<compile_context>
chip_gen: v5e
topology: v5e:2x2
jax: 0.10.0
libtpu: 0.0.40
codegen_flags: <defaults>
</compile_context>

<pallas_src>
import jax
import jax.numpy as jnp
from jax.experimental import pallas as pl
from jax.experimental.pallas import tpu as pltpu

H0 = 2 ** 9            # 512
H2 = 2 ** 9            # 512
SENS_SIZE = 75
SENS_PAD = 128         # sens K padded 75 -> 128 (aligned contraction)
OUT_PAD = 128          # actor fc_3 N padded 3 -> 128 (lane-dense stores)
IMG = 84               # 84 -> 20 -> 9 -> 7
FLAT = 64 * 7 * 7      # 3136
WEIGHT_DTYPE = jnp.bfloat16   # streamed matmul-weight dtype (set to jnp.float32 to disable)


def _round_up(x, m):
    return (x + m - 1) // m * m


def _pick_tile_m(M, max_tile=1024, min_split=256):
    """Row-tile for the conv matmuls: big (>=85% HBM roofline needs 512-1024 rows),
    and balanced so the M-grid splits evenly across v7x's two TensorCores."""
    if M < 2 * min_split:
        return M                                   # single block for tiny M
    n_blocks = max(2, -(-M // max_tile))           # at least 2, each <= ~max_tile
    return _round_up(-(-M // n_blocks), 8)


# ----------------------------------------------------------------------------
# Pallas kernel #1: conv-as-matmul, fused bias + tanh, gridded over M rows.
# Weights arrive in bf16; activations are cast to bf16 at the dot input only.
# ----------------------------------------------------------------------------
def _mm_bias_tanh_kernel(x_ref, w_ref, b_ref, o_ref):
    x_lo = x_ref[...].astype(w_ref.dtype)
    o_ref[...] = jnp.tanh(
        jnp.dot(x_lo, w_ref[...], preferred_element_type=jnp.float32)
        + b_ref[...])


def matmul_bias_tanh(x, w, b):
    """tanh(x @ w + b).  x:[M,K] f32, w:[K,N] bf16, b:[1,N] f32."""
    M, K = x.shape
    K2, N = w.shape
    assert K == K2 and b.shape == (1, N)
    tm = _pick_tile_m(M)
    grid_m = pl.cdiv(M, tm)
    return pl.pallas_call(
        _mm_bias_tanh_kernel,
        out_shape=jax.ShapeDtypeStruct((M, N), jnp.float32),
        grid=(grid_m,),
        in_specs=[
            pl.BlockSpec((tm, K), lambda i: (i, 0)),
            pl.BlockSpec((K, N), lambda i: (0, 0)),   # weight resident across M steps
            pl.BlockSpec((1, N), lambda i: (0, 0)),
        ],
        out_specs=pl.BlockSpec((tm, N), lambda i: (i, 0)),
        compiler_params=pltpu.CompilerParams(
            dimension_semantics=("parallel",)),
    )(x, w, b)


# ----------------------------------------------------------------------------
# Pallas kernel #2: fused FC tail (gridded over batch rows).
#   h1 = tanh(xflat @ W_fc1 + b_fc1)
#   h2 = tanh(h1 @ W_a1[:512] + sens_pad @ W_a1[512:](padded) + b_a1)   (no concat)
#   o  = tanh(h2 @ W_a3(padded to 128 cols) + b_a3(padded))
# Intermediates never leave VMEM/registers; weights (~4.1 MB bf16) live in VMEM.
# ----------------------------------------------------------------------------
def _fc_tail_kernel(x_ref, s_ref, w1_ref, b1_ref,
                    w2x_ref, w2s_ref, b2_ref, w3_ref, b3_ref, o_ref):
    wdt = w1_ref.dtype
    h1 = jnp.tanh(
        jnp.dot(x_ref[...].astype(wdt), w1_ref[...],
                preferred_element_type=jnp.float32)
        + b1_ref[...])
    h2 = jnp.tanh(
        jnp.dot(h1.astype(wdt), w2x_ref[...], preferred_element_type=jnp.float32)
        + jnp.dot(s_ref[...].astype(wdt), w2s_ref[...],
                  preferred_element_type=jnp.float32)
        + b2_ref[...])
    o_ref[...] = jnp.tanh(
        jnp.dot(h2.astype(wdt), w3_ref[...], preferred_element_type=jnp.float32)
        + b3_ref[...])


def fc_tail(xflat, sens_padded, kp):
    B = xflat.shape[0]
    bb = B if B <= 128 else 128            # single block at tiny batch (no dup weight DMA)
    grid_b = pl.cdiv(B, bb)
    args = (xflat, sens_padded,
            kp["fc1_w"], kp["fc1_b"],
            kp["afc1_wx"], kp["afc1_ws"], kp["afc1_b"],
            kp["afc3_w"], kp["afc3_b"])
    in_specs = [
        pl.BlockSpec((bb, FLAT), lambda i: (i, 0)),
        pl.BlockSpec((bb, SENS_PAD), lambda i: (i, 0)),
        pl.BlockSpec((FLAT, H0), lambda i: (0, 0)),        # weights resident across B steps
        pl.BlockSpec((1, H0), lambda i: (0, 0)),
        pl.BlockSpec((H0, H2), lambda i: (0, 0)),
        pl.BlockSpec((SENS_PAD, H2), lambda i: (0, 0)),
        pl.BlockSpec((1, H2), lambda i: (0, 0)),
        pl.BlockSpec((H2, OUT_PAD), lambda i: (0, 0)),
        pl.BlockSpec((1, OUT_PAD), lambda i: (0, 0)),
    ]
    return pl.pallas_call(
        _fc_tail_kernel,
        out_shape=jax.ShapeDtypeStruct((B, OUT_PAD), jnp.float32),
        grid=(grid_b,),
        in_specs=in_specs,
        out_specs=pl.BlockSpec((bb, OUT_PAD), lambda i: (i, 0)),
        compiler_params=pltpu.CompilerParams(
            dimension_semantics=("parallel",),
            vmem_limit_bytes=32 * 1024 * 1024),   # safe on v5e/v6e and v7x's 64 MiB VMEM
    )(*args)


# ----------------------------------------------------------------------------
# im2col glue (XLA) + conv wrapper.  Patch flatten order is (kh, kw, c), which
# matches the (2, 3, 1, 0) weight transpose done in prepare_params.
# ----------------------------------------------------------------------------
def _im2col(x_nhwc, kh, kw, stride):
    B, H, W, C = x_nhwc.shape
    oh = (H - kh) // stride + 1
    ow = (W - kw) // stride + 1
    patches = []
    for i in range(kh):
        for j in range(kw):
            patches.append(
                x_nhwc[:, i:i + stride * oh:stride, j:j + stride * ow:stride, :])
    p = jnp.stack(patches, axis=3)                      # [B, oh, ow, kh*kw, C]
    return p.reshape(B * oh * ow, kh * kw * C), oh, ow


def conv2d_tanh(x_nhwc, w_mat, b_row, kh, kw, stride):
    patches, oh, ow = _im2col(x_nhwc, kh, kw, stride)
    y = matmul_bias_tanh(patches, w_mat, b_row)         # [B*oh*ow, co]
    B = x_nhwc.shape[0]
    return y.reshape(B, oh, ow, w_mat.shape[1])


# ----------------------------------------------------------------------------
# Parameters: init in PyTorch layout, then one-time transform to kernel layout.
# ----------------------------------------------------------------------------
def init_params(key):
    ks = jax.random.split(key, 12)

    def w(k, shape, fan_in):
        return jax.random.normal(k, shape, jnp.float32) / jnp.sqrt(fan_in)

    return {
        "conv1_w": w(ks[0], (32, 3, 8, 8), 3 * 8 * 8),
        "conv1_b": w(ks[1], (32,), 3 * 8 * 8),
        "conv2_w": w(ks[2], (64, 32, 4, 4), 32 * 4 * 4),
        "conv2_b": w(ks[3], (64,), 32 * 4 * 4),
        "conv3_w": w(ks[4], (64, 64, 3, 3), 64 * 3 * 3),
        "conv3_b": w(ks[5], (64,), 64 * 3 * 3),
        "fc1_w":   w(ks[6], (H0, FLAT), FLAT),                       # torch [out, in]
        "fc1_b":   w(ks[7], (H0,), FLAT),
        "afc1_w":  w(ks[8], (H2, H0 + SENS_SIZE), H0 + SENS_SIZE),
        "afc1_b":  w(ks[9], (H2,), H0 + SENS_SIZE),
        "afc3_w":  w(ks[10], (3, H2), H2),
        "afc3_b":  w(ks[11], (3,), H2),
    }


def prepare_params(p, weight_dtype=WEIGHT_DTYPE):
    """One-time transform: PyTorch-layout f32 params -> kernel-ready (bf16-weight) params."""
    def conv_mat(w):  # [co, ci, kh, kw] -> [kh*kw*ci, co]  (matches im2col order)
        co, ci, kh, kw = w.shape
        return jnp.transpose(w, (2, 3, 1, 0)).reshape(kh * kw * ci, co).astype(weight_dtype)

    # fc1 rows permuted from torch's NCHW flatten order (c,h,w) to NHWC order
    # (h,w,c) so the forward pass needs no per-step activation transpose.
    fc1_w = p["fc1_w"].T                                              # [3136, 512]
    fc1_w = fc1_w.reshape(64, 7, 7, H0).transpose(1, 2, 0, 3).reshape(FLAT, H0)

    afc1_w = p["afc1_w"].T                                            # [587, 512]
    afc1_wx = afc1_w[:H0]                                             # [512, 512]
    afc1_ws = jnp.zeros((SENS_PAD, H2), jnp.float32).at[:SENS_SIZE].set(afc1_w[H0:])

    afc3_w = jnp.zeros((H2, OUT_PAD), jnp.float32).at[:, :3].set(p["afc3_w"].T)
    afc3_b = jnp.zeros((1, OUT_PAD), jnp.float32).at[0, :3].set(p["afc3_b"])

    return {
        "conv1_w": conv_mat(p["conv1_w"]), "conv1_b": p["conv1_b"].reshape(1, -1),
        "conv2_w": conv_mat(p["conv2_w"]), "conv2_b": p["conv2_b"].reshape(1, -1),
        "conv3_w": conv_mat(p["conv3_w"]), "conv3_b": p["conv3_b"].reshape(1, -1),
        "fc1_w": fc1_w.astype(weight_dtype), "fc1_b": p["fc1_b"].reshape(1, -1),
        "afc1_wx": afc1_wx.astype(weight_dtype),
        "afc1_ws": afc1_ws.astype(weight_dtype),
        "afc1_b": p["afc1_b"].reshape(1, -1),
        "afc3_w": afc3_w.astype(weight_dtype), "afc3_b": afc3_b,
    }


# ----------------------------------------------------------------------------
# actor_nn.forward  (== ActorCritic.forward)
# ----------------------------------------------------------------------------
def actor_forward(kp, image_nchw, sens):
    B = image_nchw.shape[0]
    x = jnp.transpose(image_nchw, (0, 2, 3, 1))                       # NCHW -> NHWC
    x = conv2d_tanh(x, kp["conv1_w"], kp["conv1_b"], 8, 8, 4)         # [B,20,20,32]
    x = conv2d_tanh(x, kp["conv2_w"], kp["conv2_b"], 4, 4, 2)         # [B, 9, 9,64]
    x = conv2d_tanh(x, kp["conv3_w"], kp["conv3_b"], 3, 3, 1)         # [B, 7, 7,64]
    xflat = x.reshape(B, FLAT)                                        # NHWC flatten (fc1_w permuted to match)
    sens_p = jnp.pad(sens, ((0, 0), (0, SENS_PAD - SENS_SIZE)))       # [B, 128]
    out = fc_tail(xflat, sens_p, kp)                                  # [B, 128], fused tail
    return out[:, :3]


# ----------------------------------------------------------------------------
# Pure-JAX f32 reference (torch layout/semantics) for numerics validation.
# ----------------------------------------------------------------------------
def reference_forward(p, image_nchw, sens):
    def conv(x, w, b, stride):
        y = jax.lax.conv_general_dilated(
            x, w, (stride, stride), "VALID",
            dimension_numbers=("NCHW", "OIHW", "NCHW"))
        return jnp.tanh(y + b[None, :, None, None])

    x = conv(image_nchw, p["conv1_w"], p["conv1_b"], 4)
    x = conv(x, p["conv2_w"], p["conv2_b"], 2)
    x = conv(x, p["conv3_w"], p["conv3_b"], 1)
    x = x.reshape(x.shape[0], -1)                                     # torch NCHW flatten
    x = jnp.tanh(x @ p["fc1_w"].T + p["fc1_b"])
    x = jnp.concatenate([x, sens], axis=1)
    x = jnp.tanh(x @ p["afc1_w"].T + p["afc1_b"])
    return jnp.tanh(x @ p["afc3_w"].T + p["afc3_b"])


if __name__ == "__main__":
    key = jax.random.PRNGKey(0)
    k_img, k_sens, k_par = jax.random.split(key, 3)

    batch = 2
    image = jax.random.normal(k_img, (batch, 3, IMG, IMG), jnp.float32)
    sens = jax.random.normal(k_sens, (batch, SENS_SIZE), jnp.float32)
    torch_params = init_params(k_par)
    params = prepare_params(torch_params)

    out = jax.jit(actor_forward)(params, image, sens)
    out = jax.block_until_ready(out)

    assert out.shape == (batch, 3), out.shape
    assert out.dtype == jnp.float32
    assert bool(jnp.all(jnp.isfinite(out)))
    assert bool(jnp.all(jnp.abs(out) <= 1.0))   # tanh output range

    # bf16-weight numerics check against the f32 reference.
    ref = jax.block_until_ready(jax.jit(reference_forward)(torch_params, image, sens))
    max_err = float(jnp.max(jnp.abs(out - ref)))
    assert max_err < 5e-2, max_err

    print("KERNEL_OK")
</pallas_src>

<mosaic_0001>
module attributes {stable_mosaic.version = 11 : i64} {
  func.func @_mm_bias_tanh_kernel(%arg0: i32, %arg1: memref<400x192xf32, #tpu.memory_space<vmem>>, %arg2: memref<192x32xbf16, #tpu.memory_space<vmem>>, %arg3: memref<1x32xf32, #tpu.memory_space<vmem>>, %arg4: memref<400x32xf32, #tpu.memory_space<vmem>>) attributes {dimension_semantics = [#tpu.dimension_semantics<parallel>], iteration_bounds = array<i64: 2>, scalar_prefetch = 0 : i64, scratch_operands = 0 : i64, tpu.core_type = #tpu.core_type<tc>, window_params = [{transform_indices = @transform_0, window_bounds = array<i64: 400, 192>}, {pipeline_mode = #tpu.pipeline_mode<synchronous>, transform_indices = @transform_1, window_bounds = array<i64: 192, 32>}, {pipeline_mode = #tpu.pipeline_mode<synchronous>, transform_indices = @transform_2, window_bounds = array<i64: 1, 32>}, {transform_indices = @transform_3, window_bounds = array<i64: 400, 32>}]} {
    %c0 = arith.constant 0 : index
    %c0_0 = arith.constant 0 : index
    %0 = vector.load %arg1[%c0, %c0_0] : memref<400x192xf32, #tpu.memory_space<vmem>>, vector<400x192xf32>
    %1 = arith.truncf %0 : vector<400x192xf32> to vector<400x192xbf16>
    %c0_1 = arith.constant 0 : index
    %c0_2 = arith.constant 0 : index
    %2 = vector.load %arg2[%c0_1, %c0_2] : memref<192x32xbf16, #tpu.memory_space<vmem>>, vector<192x32xbf16>
    %cst = arith.constant dense<0.000000e+00> : vector<400x32xf32>
    %3 = tpu.matmul %1, %2, %cst {dimension_numbers = #tpu.dot_dimension_numbers<[1], [0], [0], [1], [0, 0, 1, 1], [], []>} : vector<400x192xbf16>, vector<192x32xbf16>, vector<400x32xf32> -> vector<400x32xf32>
    %c0_3 = arith.constant 0 : index
    %c0_4 = arith.constant 0 : index
    %4 = vector.load %arg3[%c0_3, %c0_4] : memref<1x32xf32, #tpu.memory_space<vmem>>, vector<1x32xf32>
    %5 = vector.broadcast %4 : vector<1x32xf32> to vector<400x32xf32>
    %6 = arith.addf %3, %5 : vector<400x32xf32>
    %7 = math.tanh %6 : vector<400x32xf32>
    %c0_5 = arith.constant 0 : index
    %c0_6 = arith.constant 0 : index
    %8 = vector.load %arg4[%c0_5, %c0_6] : memref<400x32xf32, #tpu.memory_space<vmem>>, vector<400x32xf32>
    tpu.vector_store %arg4[%c0_5, %c0_6], %7 {strides = array<i32>} : memref<400x32xf32, #tpu.memory_space<vmem>>, vector<400x32xf32>,
    return
  }
  func.func @transform_0(%arg0: i32) -> (i32, i32) {
    %c0_i32 = arith.constant 0 : i32
    %c0_i32_0 = arith.constant 0 : i32
    return %arg0, %c0_i32 : i32, i32
  }
  func.func @transform_1(%arg0: i32) -> (i32, i32) {
    %c0_i32 = arith.constant 0 : i32
    %c0_i32_0 = arith.constant 0 : i32
    %c0_i32_1 = arith.constant 0 : i32
    return %c0_i32, %c0_i32_0 : i32, i32
  }
  func.func @transform_2(%arg0: i32) -> (i32, i32) {
    %c0_i32 = arith.constant 0 : i32
    %c0_i32_0 = arith.constant 0 : i32
    %c0_i32_1 = arith.constant 0 : i32
    return %c0_i32, %c0_i32_0 : i32, i32
  }
  func.func @transform_3(%arg0: i32) -> (i32, i32) {
    %c0_i32 = arith.constant 0 : i32
    %c0_i32_0 = arith.constant 0 : i32
    return %arg0, %c0_i32 : i32, i32
  }
}

module attributes {stable_mosaic.version = 11 : i64} {
  func.func @_mm_bias_tanh_kernel(%arg0: i32, %arg1: memref<162x512xf32, #tpu.memory_space<vmem>>, %arg2: memref<512x64xbf16, #tpu.memory_space<vmem>>, %arg3: memref<1x64xf32, #tpu.memory_space<vmem>>, %arg4: memref<162x64xf32, #tpu.memory_space<vmem>>) attributes {dimension_semantics = [#tpu.dimension_semantics<parallel>], iteration_bounds = array<i64: 1>, scalar_prefetch = 0 : i64, scratch_operands = 0 : i64, tpu.core_type = #tpu.core_type<tc>, window_params = [{transform_indices = @transform_0, window_bounds = array<i64: 162, 512>}, {pipeline_mode = #tpu.pipeline_mode<synchronous>, transform_indices = @transform_1, window_bounds = array<i64: 512, 64>}, {pipeline_mode = #tpu.pipeline_mode<synchronous>, transform_indices = @transform_2, window_bounds = array<i64: 1, 64>}, {transform_indices = @transform_3, window_bounds = array<i64: 162, 64>}]} {
    %c0 = arith.constant 0 : index
    %c0_0 = arith.constant 0 : index
    %0 = vector.load %arg1[%c0, %c0_0] : memref<162x512xf32, #tpu.memory_space<vmem>>, vector<162x512xf32>
    %1 = arith.truncf %0 : vector<162x512xf32> to vector<162x512xbf16>
    %c0_1 = arith.constant 0 : index
    %c0_2 = arith.constant 0 : index
    %2 = vector.load %arg2[%c0_1, %c0_2] : memref<512x64xbf16, #tpu.memory_space<vmem>>, vector<512x64xbf16>
    %cst = arith.constant dense<0.000000e+00> : vector<162x64xf32>
    %3 = tpu.matmul %1, %2, %cst {dimension_numbers = #tpu.dot_dimension_numbers<[1], [0], [0], [1], [0, 0, 1, 1], [], []>} : vector<162x512xbf16>, vector<512x64xbf16>, vector<162x64xf32> -> vector<162x64xf32>
    %c0_3 = arith.constant 0 : index
    %c0_4 = arith.constant 0 : index
    %4 = vector.load %arg3[%c0_3, %c0_4] : memref<1x64xf32, #tpu.memory_space<vmem>>, vector<1x64xf32>
    %5 = vector.broadcast %4 : vector<1x64xf32> to vector<162x64xf32>
    %6 = arith.addf %3, %5 : vector<162x64xf32>
    %7 = math.tanh %6 : vector<162x64xf32>
    %c0_5 = arith.constant 0 : index
    %c0_6 = arith.constant 0 : index
    %8 = vector.load %arg4[%c0_5, %c0_6] : memref<162x64xf32, #tpu.memory_space<vmem>>, vector<162x64xf32>
    tpu.vector_store %arg4[%c0_5, %c0_6], %7 {strides = array<i32>} : memref<162x64xf32, #tpu.memory_space<vmem>>, vector<162x64xf32>,
    return
  }
  func.func @transform_0(%arg0: i32) -> (i32, i32) {
    %c0_i32 = arith.constant 0 : i32
    %c0_i32_0 = arith.constant 0 : i32
    return %arg0, %c0_i32 : i32, i32
  }
  func.func @transform_1(%arg0: i32) -> (i32, i32) {
    %c0_i32 = arith.constant 0 : i32
    %c0_i32_0 = arith.constant 0 : i32
    %c0_i32_1 = arith.constant 0 : i32
    return %c0_i32, %c0_i32_0 : i32, i32
  }
  func.func @transform_2(%arg0: i32) -> (i32, i32) {
    %c0_i32 = arith.constant 0 : i32
    %c0_i32_0 = arith.constant 0 : i32
    %c0_i32_1 = arith.constant 0 : i32
    return %c0_i32, %c0_i32_0 : i32, i32
  }
  func.func @transform_3(%arg0: i32) -> (i32, i32) {
    %c0_i32 = arith.constant 0 : i32
    %c0_i32_0 = arith.constant 0 : i32
    return %arg0, %c0_i32 : i32, i32
  }
}

module attributes {stable_mosaic.version = 11 : i64} {
  func.func @_mm_bias_tanh_kernel(%arg0: i32, %arg1: memref<98x576xf32, #tpu.memory_space<vmem>>, %arg2: memref<576x64xbf16, #tpu.memory_space<vmem>>, %arg3: memref<1x64xf32, #tpu.memory_space<vmem>>, %arg4: memref<98x64xf32, #tpu.memory_space<vmem>>) attributes {dimension_semantics = [#tpu.dimension_semantics<parallel>], iteration_bounds = array<i64: 1>, scalar_prefetch = 0 : i64, scratch_operands = 0 : i64, tpu.core_type = #tpu.core_type<tc>, window_params = [{transform_indices = @transform_0, window_bounds = array<i64: 98, 576>}, {pipeline_mode = #tpu.pipeline_mode<synchronous>, transform_indices = @transform_1, window_bounds = array<i64: 576, 64>}, {pipeline_mode = #tpu.pipeline_mode<synchronous>, transform_indices = @transform_2, window_bounds = array<i64: 1, 64>}, {transform_indices = @transform_3, window_bounds = array<i64: 98, 64>}]} {
    %c0 = arith.constant 0 : index
    %c0_0 = arith.constant 0 : index
    %0 = vector.load %arg1[%c0, %c0_0] : memref<98x576xf32, #tpu.memory_space<vmem>>, vector<98x576xf32>
    %1 = arith.truncf %0 : vector<98x576xf32> to vector<98x576xbf16>
    %c0_1 = arith.constant 0 : index
    %c0_2 = arith.constant 0 : index
    %2 = vector.load %arg2[%c0_1, %c0_2] : memref<576x64xbf16, #tpu.memory_space<vmem>>, vector<576x64xbf16>
    %cst = arith.constant dense<0.000000e+00> : vector<98x64xf32>
    %3 = tpu.matmul %1, %2, %cst {dimension_numbers = #tpu.dot_dimension_numbers<[1], [0], [0], [1], [0, 0, 1, 1], [], []>} : vector<98x576xbf16>, vector<576x64xbf16>, vector<98x64xf32> -> vector<98x64xf32>
    %c0_3 = arith.constant 0 : index
    %c0_4 = arith.constant 0 : index
    %4 = vector.load %arg3[%c0_3, %c0_4] : memref<1x64xf32, #tpu.memory_space<vmem>>, vector<1x64xf32>
    %5 = vector.broadcast %4 : vector<1x64xf32> to vector<98x64xf32>
    %6 = arith.addf %3, %5 : vector<98x64xf32>
    %7 = math.tanh %6 : vector<98x64xf32>
    %c0_5 = arith.constant 0 : index
    %c0_6 = arith.constant 0 : index
    %8 = vector.load %arg4[%c0_5, %c0_6] : memref<98x64xf32, #tpu.memory_space<vmem>>, vector<98x64xf32>
    tpu.vector_store %arg4[%c0_5, %c0_6], %7 {strides = array<i32>} : memref<98x64xf32, #tpu.memory_space<vmem>>, vector<98x64xf32>,
    return
  }
  func.func @transform_0(%arg0: i32) -> (i32, i32) {
    %c0_i32 = arith.constant 0 : i32
    %c0_i32_0 = arith.constant 0 : i32
    return %arg0, %c0_i32 : i32, i32
  }
  func.func @transform_1(%arg0: i32) -> (i32, i32) {
    %c0_i32 = arith.constant 0 : i32
    %c0_i32_0 = arith.constant 0 : i32
    %c0_i32_1 = arith.constant 0 : i32
    return %c0_i32, %c0_i32_0 : i32, i32
  }
  func.func @transform_2(%arg0: i32) -> (i32, i32) {
    %c0_i32 = arith.constant 0 : i32
    %c0_i32_0 = arith.constant 0 : i32
    %c0_i32_1 = arith.constant 0 : i32
    return %c0_i32, %c0_i32_0 : i32, i32
  }
  func.func @transform_3(%arg0: i32) -> (i32, i32) {
    %c0_i32 = arith.constant 0 : i32
    %c0_i32_0 = arith.constant 0 : i32
    return %arg0, %c0_i32 : i32, i32
  }
}

module attributes {stable_mosaic.version = 11 : i64} {
  func.func @_fc_tail_kernel(%arg0: i32, %arg1: memref<2x3136xf32, #tpu.memory_space<vmem>>, %arg2: memref<2x128xf32, #tpu.memory_space<vmem>>, %arg3: memref<3136x512xbf16, #tpu.memory_space<vmem>>, %arg4: memref<1x512xf32, #tpu.memory_space<vmem>>, %arg5: memref<512x512xbf16, #tpu.memory_space<vmem>>, %arg6: memref<128x512xbf16, #tpu.memory_space<vmem>>, %arg7: memref<1x512xf32, #tpu.memory_space<vmem>>, %arg8: memref<512x128xbf16, #tpu.memory_space<vmem>>, %arg9: memref<1x128xf32, #tpu.memory_space<vmem>>, %arg10: memref<2x128xf32, #tpu.memory_space<vmem>>) attributes {dimension_semantics = [#tpu.dimension_semantics<parallel>], iteration_bounds = array<i64: 1>, scalar_prefetch = 0 : i64, scratch_operands = 0 : i64, tpu.core_type = #tpu.core_type<tc>, window_params = [{transform_indices = @transform_0, window_bounds = array<i64: 2, 3136>}, {transform_indices = @transform_1, window_bounds = array<i64: 2, 128>}, {pipeline_mode = #tpu.pipeline_mode<synchronous>, transform_indices = @transform_2, window_bounds = array<i64: 3136, 512>}, {pipeline_mode = #tpu.pipeline_mode<synchronous>, transform_indices = @transform_3, window_bounds = array<i64: 1, 512>}, {pipeline_mode = #tpu.pipeline_mode<synchronous>, transform_indices = @transform_4, window_bounds = array<i64: 512, 512>}, {pipeline_mode = #tpu.pipeline_mode<synchronous>, transform_indices = @transform_5, window_bounds = array<i64: 128, 512>}, {pipeline_mode = #tpu.pipeline_mode<synchronous>, transform_indices = @transform_6, window_bounds = array<i64: 1, 512>}, {pipeline_mode = #tpu.pipeline_mode<synchronous>, transform_indices = @transform_7, window_bounds = array<i64: 512, 128>}, {pipeline_mode = #tpu.pipeline_mode<synchronous>, transform_indices = @transform_8, window_bounds = array<i64: 1, 128>}, {transform_indices = @transform_9, window_bounds = array<i64: 2, 128>}]} {
    %c0 = arith.constant 0 : index
    %c0_0 = arith.constant 0 : index
    %0 = vector.load %arg1[%c0, %c0_0] : memref<2x3136xf32, #tpu.memory_space<vmem>>, vector<2x3136xf32>
    %1 = arith.truncf %0 : vector<2x3136xf32> to vector<2x3136xbf16>
    %c0_1 = arith.constant 0 : index
    %c0_2 = arith.constant 0 : index
    %2 = vector.load %arg3[%c0_1, %c0_2] : memref<3136x512xbf16, #tpu.memory_space<vmem>>, vector<3136x512xbf16>
    %cst = arith.constant dense<0.000000e+00> : vector<2x512xf32>
    %3 = tpu.matmul %1, %2, %cst {dimension_numbers = #tpu.dot_dimension_numbers<[1], [0], [0], [1], [0, 0, 1, 1], [], []>} : vector<2x3136xbf16>, vector<3136x512xbf16>, vector<2x512xf32> -> vector<2x512xf32>
    %c0_3 = arith.constant 0 : index
    %c0_4 = arith.constant 0 : index
    %4 = vector.load %arg4[%c0_3, %c0_4] : memref<1x512xf32, #tpu.memory_space<vmem>>, vector<1x512xf32>
    %5 = vector.broadcast %4 : vector<1x512xf32> to vector<2x512xf32>
    %6 = arith.addf %3, %5 : vector<2x512xf32>
    %7 = math.tanh %6 : vector<2x512xf32>
    %8 = arith.truncf %7 : vector<2x512xf32> to vector<2x512xbf16>
    %c0_5 = arith.constant 0 : index
    %c0_6 = arith.constant 0 : index
    %9 = vector.load %arg5[%c0_5, %c0_6] : memref<512x512xbf16, #tpu.memory_space<vmem>>, vector<512x512xbf16>
    %cst_7 = arith.constant dense<0.000000e+00> : vector<2x512xf32>
    %10 = tpu.matmul %8, %9, %cst_7 {dimension_numbers = #tpu.dot_dimension_numbers<[1], [0], [0], [1], [0, 0, 1, 1], [], []>} : vector<2x512xbf16>, vector<512x512xbf16>, vector<2x512xf32> -> vector<2x512xf32>
    %c0_8 = arith.constant 0 : index
    %c0_9 = arith.constant 0 : index
    %11 = vector.load %arg2[%c0_8, %c0_9] : memref<2x128xf32, #tpu.memory_space<vmem>>, vector<2x128xf32>
    %12 = arith.truncf %11 : vector<2x128xf32> to vector<2x128xbf16>
    %c0_10 = arith.constant 0 : index
    %c0_11 = arith.constant 0 : index
    %13 = vector.load %arg6[%c0_10, %c0_11] : memref<128x512xbf16, #tpu.memory_space<vmem>>, vector<128x512xbf16>
    %cst_12 = arith.constant dense<0.000000e+00> : vector<2x512xf32>
    %14 = tpu.matmul %12, %13, %cst_12 {dimension_numbers = #tpu.dot_dimension_numbers<[1], [0], [0], [1], [0, 0, 1, 1], [], []>} : vector<2x128xbf16>, vector<128x512xbf16>, vector<2x512xf32> -> vector<2x512xf32>
    %15 = arith.addf %10, %14 : vector<2x512xf32>
    %c0_13 = arith.constant 0 : index
    %c0_14 = arith.constant 0 : index
    %16 = vector.load %arg7[%c0_13, %c0_14] : memref<1x512xf32, #tpu.memory_space<vmem>>, vector<1x512xf32>
    %17 = vector.broadcast %16 : vector<1x512xf32> to vector<2x512xf32>
    %18 = arith.addf %15, %17 : vector<2x512xf32>
    %19 = math.tanh %18 : vector<2x512xf32>
    %20 = arith.truncf %19 : vector<2x512xf32> to vector<2x512xbf16>
    %c0_15 = arith.constant 0 : index
    %c0_16 = arith.constant 0 : index
    %21 = vector.load %arg8[%c0_15, %c0_16] : memref<512x128xbf16, #tpu.memory_space<vmem>>, vector<512x128xbf16>
    %cst_17 = arith.constant dense<0.000000e+00> : vector<2x128xf32>
    %22 = tpu.matmul %20, %21, %cst_17 {dimension_numbers = #tpu.dot_dimension_numbers<[1], [0], [0], [1], [0, 0, 1, 1], [], []>} : vector<2x512xbf16>, vector<512x128xbf16>, vector<2x128xf32> -> vector<2x128xf32>
    %c0_18 = arith.constant 0 : index
    %c0_19 = arith.constant 0 : index
    %23 = vector.load %arg9[%c0_18, %c0_19] : memref<1x128xf32, #tpu.memory_space<vmem>>, vector<1x128xf32>
    %24 = vector.broadcast %23 : vector<1x128xf32> to vector<2x128xf32>
    %25 = arith.addf %22, %24 : vector<2x128xf32>
    %26 = math.tanh %25 : vector<2x128xf32>
    %c0_20 = arith.constant 0 : index
    %c0_21 = arith.constant 0 : index
    %27 = vector.load %arg10[%c0_20, %c0_21] : memref<2x128xf32, #tpu.memory_space<vmem>>, vector<2x128xf32>
    tpu.vector_store %arg10[%c0_20, %c0_21], %26 {strides = array<i32>} : memref<2x128xf32, #tpu.memory_space<vmem>>, vector<2x128xf32>,
    return
  }
  func.func @transform_0(%arg0: i32) -> (i32, i32) {
    %c0_i32 = arith.constant 0 : i32
    %c0_i32_0 = arith.constant 0 : i32
    return %arg0, %c0_i32 : i32, i32
  }
  func.func @transform_1(%arg0: i32) -> (i32, i32) {
    %c0_i32 = arith.constant 0 : i32
    %c0_i32_0 = arith.constant 0 : i32
    return %arg0, %c0_i32 : i32, i32
  }
  func.func @transform_2(%arg0: i32) -> (i32, i32) {
    %c0_i32 = arith.constant 0 : i32
    %c0_i32_0 = arith.constant 0 : i32
    %c0_i32_1 = arith.constant 0 : i32
    return %c0_i32, %c0_i32_0 : i32, i32
  }
  func.func @transform_3(%arg0: i32) -> (i32, i32) {
    %c0_i32 = arith.constant 0 : i32
    %c0_i32_0 = arith.constant 0 : i32
    %c0_i32_1 = arith.constant 0 : i32
    return %c0_i32, %c0_i32_0 : i32, i32
  }
  func.func @transform_4(%arg0: i32) -> (i32, i32) {
    %c0_i32 = arith.constant 0 : i32
    %c0_i32_0 = arith.constant 0 : i32
    %c0_i32_1 = arith.constant 0 : i32
    return %c0_i32, %c0_i32_0 : i32, i32
  }
  func.func @transform_5(%arg0: i32) -> (i32, i32) {
    %c0_i32 = arith.constant 0 : i32
    %c0_i32_0 = arith.constant 0 : i32
    %c0_i32_1 = arith.constant 0 : i32
    return %c0_i32, %c0_i32_0 : i32, i32
  }
  func.func @transform_6(%arg0: i32) -> (i32, i32) {
    %c0_i32 = arith.constant 0 : i32
    %c0_i32_0 = arith.constant 0 : i32
    %c0_i32_1 = arith.constant 0 : i32
    return %c0_i32, %c0_i32_0 : i32, i32
  }
  func.func @transform_7(%arg0: i32) -> (i32, i32) {
    %c0_i32 = arith.constant 0 : i32
    %c0_i32_0 = arith.constant 0 : i32
    %c0_i32_1 = arith.constant 0 : i32
    return %c0_i32, %c0_i32_0 : i32, i32
  }
  func.func @transform_8(%arg0: i32) -> (i32, i32) {
    %c0_i32 = arith.constant 0 : i32
    %c0_i32_0 = arith.constant 0 : i32
    %c0_i32_1 = arith.constant 0 : i32
    return %c0_i32, %c0_i32_0 : i32, i32
  }
  func.func @transform_9(%arg0: i32) -> (i32, i32) {
    %c0_i32 = arith.constant 0 : i32
    %c0_i32_0 = arith.constant 0 : i32
    return %arg0, %c0_i32 : i32, i32
  }
}

</mosaic_0001>

<bundles_post_ra>
// kernel: actor_forward.4
= control target key start
LH: loop header
LB: loop body
LE: loop exit
PB: predicated region body
PF: predicated region fallthrough
CT: control target
= control target key end

     0   :  { %s1174_s12 = smov 0   ;;  %s1545_s0 = inlined_call_operand.vmem [shape: f32[800,192], index: 0, kind: input, shape index: {}]   ;;  %s1546_s1 = inlined_call_operand.vmem [shape: bf16[192,32], index: 1, kind: input, shape index: {}]   ;;  %s1547_s2 = inlined_call_operand.vmem [shape: f32[1,32], index: 2, kind: input, shape index: {}]   ;;  %s1548_s3 = inlined_call_operand.vmem [shape: f32[800,32], index: 3, kind: output, shape index: {}]  }
   0x1 LB: > { %s929_s13 = sadd.s32 4294967295, %s1152_s12   ;;  %p933_p0 = scmp.ge.s32.totalorder %s1152_s12, 1  ;;  %s1152_s12 = sphi %s1174_s12, %s13_s12  }
   0x2   : > { %p139_p1 = scmp.lt.s32.totalorder %s1152_s12, 3 }
   0x4   : > { %p140_p2 = pnand %p933_p0, %p139_p1 }
   0x5   : > { %s164_s18 = smul.u32 (!%p140_p2), 50, %s929_s13 }
   0x6   : > { %143 = sbr.rel (%p140_p2) target bundleno = 388 (0x184), region = 32 }
   0x7   : > { %p165_p3 = scmp.lt.s32.totalorder (!%p140_p2), %s164_s18, 99 }
   0xb   : > { %v1020_v0 = vld [vmem:[%s1546_s1 + $0x38] sm:$0xff]  ;;  %v1019_v2 = vld [vmem:[%s1546_s1 + $0x30] sm:$0xff]  ;;  %s1550_s18 = smov (!%p165_p3, %s164_s18), 99  ;;  %v1018_v4 = vld [vmem:[%s1546_s1 + $0x28] sm:$0xff]  ;;  %vm428_vm0 = vcmask 523264   ;;  %vm822_vm1 = vcmask 261120  }
   0xc   : > { %v1024_v1 = vld [vmem:[%s1546_s1 + $0x58] sm:$0xff]  ;;  %504 = vmatpush.bf16.msra.mxu0 %v1020_v0  ;;  %1025 = vmatpush.bf16.msra.mxu2 %v1020_v0  ;;  %v1023_v3 = vld [vmem:[%s1546_s1 + $0x50] sm:$0xff]  ;;  %s1012_s25 = sshll.u32 %s1550_s18, 4  ;;  %v1022_v5 = vld [vmem:[%s1546_s1 + $0x48] sm:$0xff]  ;;  %s936_s20 = sshll.u32 %s1550_s18, 3 }
   0xd   : > { %642 = vmatpush.bf16.msra.mxu1 %v1024_v1  ;;  %1033 = vmatpush.bf16.msra.mxu3 %v1024_v1  ;;  %s1206_s30 = scalar_lea.vmem %s1545_s0, %s1012_s25  ;;  %v1017_v6 = vld [vmem:[%s1546_s1 + $0x20] sm:$0xff]  ;;  %v1016_v13 = vld [vmem:[%s1546_s1 + $0x18] sm:$0xff]  ;;  %v1015_v15 = vld [vmem:[%s1546_s1 + $0x10] sm:$0xff]  ;;  %s1340_s23 = scalar_lea.vmem %s1548_s3, %s936_s20 }
   0xe   : > { %v1021_v7 = vld [vmem:[%s1546_s1 + $0x40] sm:$0xff]  ;;  %v179_v8 = vld [vmem:[%s1206_s30 + $0x8] sm:$0xff]  ;;  %v181_v9 = vld [vmem:[%s1206_s30 + $0x18] sm:$0xff] }
   0xf   : > { %v231_v10 = vld [vmem:[%s1206_s30 + $0x1a8] sm:$0xff]  ;;  %v233_v11 = vld [vmem:[%s1206_s30 + $0x1b8] sm:$0xff]  ;;  %v279_v12 = vpack.c.bf16 %v181_v9, %v179_v8  ;;  %v1013_v17 = vld [vmem:[%s1546_s1] sm:$0xff] }
  0x10   : > { %505 = vmatpush.bf16.msra.mxu0 %v1019_v2  ;;  %1026 = vmatpush.bf16.msra.mxu2 %v1019_v2  ;;  %v305_v14 = vpack.c.bf16 %v233_v11, %v231_v10  ;;  %v1014_v16 = vld [vmem:[%s1546_s1 + $0x8] sm:$0xff]  ;;  %v178_v18 = vld [vmem:[%s1206_s30] sm:$0xff]  ;;  %v180_v19 = vld [vmem:[%s1206_s30 + $0x10] sm:$0xff] }
  0x11   : > { %643 = vmatpush.bf16.msra.mxu1 %v1023_v3  ;;  %1034 = vmatpush.bf16.msra.mxu3 %v1023_v3  ;;  %v226_v20 = vld [vmem:[%s1206_s30 + $0x180] sm:$0xff]  ;;  %v228_v21 = vld [vmem:[%s1206_s30 + $0x190] sm:$0xff]  ;;  %v183_v22 = vld [vmem:[%s1206_s30 + $0x28] sm:$0xff]  ;;  %v278_v26 = vpack.c.bf16 %v180_v19, %v178_v18 }
  0x12   : > { %v185_v23 = vld [vmem:[%s1206_s30 + $0x38] sm:$0xff]  ;;  %v235_v24 = vld [vmem:[%s1206_s30 + $0x1c8] sm:$0xff]  ;;  %v302_v27 = vpack.c.bf16 %v228_v21, %v226_v20  ;;  %v182_v30 = vld [vmem:[%s1206_s30 + $0x20] sm:$0xff] }
  0x13   : > { %v237_v25 = vld [vmem:[%s1206_s30 + $0x1d8] sm:$0xff]  ;;  %v281_v28 = vpack.c.bf16 %v185_v23, %v183_v22  ;;  %v184_v31 = vld [vmem:[%s1206_s30 + $0x30] sm:$0xff]  ;;  %v230_v32 = vld [vmem:[%s1206_s30 + $0x1a0] sm:$0xff] }
  0x14   : > { %506 = vmatpush.bf16.msra.mxu0 %v1018_v4  ;;  %1027 = vmatpush.bf16.msra.mxu2 %v1018_v4  ;;  %v307_v29 = vpack.c.bf16 %v237_v25, %v235_v24  ;;  %v232_v33 = vld [vmem:[%s1206_s30 + $0x1b0] sm:$0xff]  ;;  %v187_v34 = vld [vmem:[%s1206_s30 + $0x48] sm:$0xff]  ;;  %v189_v35 = vld [vmem:[%s1206_s30 + $0x58] sm:$0xff]  ;;  %v280_v38 = vpack.c.bf16 %v184_v31, %v182_v30 }
  0x15   : > { %644 = vmatpush.bf16.msra.mxu1 %v1022_v5  ;;  %1035 = vmatpush.bf16.msra.mxu3 %v1022_v5  ;;  %v239_v36 = vld [vmem:[%s1206_s30 + $0x1e8] sm:$0xff]  ;;  %v241_v37 = vld [vmem:[%s1206_s30 + $0x1f8] sm:$0xff]  ;;  %v304_v39 = vpack.c.bf16 %v232_v33, %v230_v32  ;;  %v283_v40 = vpack.c.bf16 %v189_v35, %v187_v34  ;;  %v186_v42 = vld [vmem:[%s1206_s30 + $0x40] sm:$0xff] }
  0x16   : > { %v309_v41 = vpack.c.bf16 %v241_v37, %v239_v36  ;;  %v188_v43 = vld [vmem:[%s1206_s30 + $0x50] sm:$0xff]  ;;  %v234_v44 = vld [vmem:[%s1206_s30 + $0x1c0] sm:$0xff]  ;;  %v191_v46 = vld [vmem:[%s1206_s30 + $0x68] sm:$0xff] }
  0x17   : > { %v236_v45 = vld [vmem:[%s1206_s30 + $0x1d0] sm:$0xff]  ;;  %v193_v47 = vld [vmem:[%s1206_s30 + $0x78] sm:$0xff]  ;;  %v243_v48 = vld [vmem:[%s1206_s30 + $0x208] sm:$0xff]  ;;  %v282_v50 = vpack.c.bf16 %v188_v43, %v186_v42 }
  0x18   : > { %507 = vmatpush.bf16.msra.mxu0 %v1017_v6  ;;  %1028 = vmatpush.bf16.msra.mxu2 %v1017_v6  ;;  %v245_v49 = vld [vmem:[%s1206_s30 + $0x218] sm:$0xff]  ;;  %v306_v51 = vpack.c.bf16 %v236_v45, %v234_v44  ;;  %v285_v52 = vpack.c.bf16 %v193_v47, %v191_v46  ;;  %v190_v54 = vld [vmem:[%s1206_s30 + $0x60] sm:$0xff]  ;;  %v192_v55 = vld [vmem:[%s1206_s30 + $0x70] sm:$0xff] }
  0x19   : > { %645 = vmatpush.bf16.msra.mxu1 %v1021_v7  ;;  %1036 = vmatpush.bf16.msra.mxu3 %v1021_v7  ;;  %v311_v53 = vpack.c.bf16 %v245_v49, %v243_v48  ;;  %v238_v56 = vld [vmem:[%s1206_s30 + $0x1e0] sm:$0xff]  ;;  %v240_v57 = vld [vmem:[%s1206_s30 + $0x1f0] sm:$0xff]  ;;  %v195_v58 = vld [vmem:[%s1206_s30 + $0x88] sm:$0xff]  ;;  %v284_v62 = vpack.c.bf16 %v192_v55, %v190_v54 }
  0x1a   : > { %v197_v59 = vld [vmem:[%s1206_s30 + $0x98] sm:$0xff]  ;;  %v247_v60 = vld [vmem:[%s1206_s30 + $0x228] sm:$0xff]  ;;  %v308_v63 = vpack.c.bf16 %v240_v57, %v238_v56  ;;  %v194_v2 = vld [vmem:[%s1206_s30 + $0x80] sm:$0xff] }
  0x1b   : > { %v249_v61 = vld [vmem:[%s1206_s30 + $0x238] sm:$0xff]  ;;  %v287_v0 = vpack.c.bf16 %v197_v59, %v195_v58  ;;  %v196_v3 = vld [vmem:[%s1206_s30 + $0x90] sm:$0xff]  ;;  %v242_v4 = vld [vmem:[%s1206_s30 + $0x200] sm:$0xff] }
  0x1c   : > { %985 = vmatmul.msk.bf16.vlgmr.msra.gmra.mxu1 %vm428_vm0, %v279_v12  ;;  %508 = vmatpush.bf16.msra.mxu0 %v1016_v13  ;;  %v313_v1 = vpack.c.bf16 %v249_v61, %v247_v60  ;;  %v244_v5 = vld [vmem:[%s1206_s30 + $0x210] sm:$0xff]  ;;  %v199_v6 = vld [vmem:[%s1206_s30 + $0xa8] sm:$0xff]  ;;  %v201_v7 = vld [vmem:[%s1206_s30 + $0xb8] sm:$0xff]  ;;  %v286_v10 = vpack.c.bf16 %v196_v3, %v194_v2 }
  0x1d   : > { %1029 = vmatpush.bf16.msra.mxu2 %v1016_v13  ;;  %998 = vmatmul.msk.bf16.vlgmr.msra.gmra.mxu3 %vm428_vm0, %v305_v14  ;;  %v251_v8 = vld [vmem:[%s1206_s30 + $0x248] sm:$0xff]  ;;  %v253_v9 = vld [vmem:[%s1206_s30 + $0x258] sm:$0xff]  ;;  %v310_v11 = vpack.c.bf16 %v244_v5, %v242_v4  ;;  %v289_v12 = vpack.c.bf16 %v201_v7, %v199_v6  ;;  %v198_v14 = vld [vmem:[%s1206_s30 + $0xa0] sm:$0xff] }
  0x1e   : > { %v315_v13 = vpack.c.bf16 %v253_v9, %v251_v8  ;;  %v203_v18 = vld [vmem:[%s1206_s30 + $0xc8] sm:$0xff]  ;;  %v205_v19 = vld [vmem:[%s1206_s30 + $0xd8] sm:$0xff]  ;;  %v210_v54 = vld [vmem:[%s1206_s30 + $0x100] sm:$0xff] }
  0x1f   : > { %v255_v20 = vld [vmem:[%s1206_s30 + $0x268] sm:$0xff]  ;;  %v257_v21 = vld [vmem:[%s1206_s30 + $0x278] sm:$0xff]  ;;  %v291_v24 = vpack.c.bf16 %v205_v19, %v203_v18  ;;  %v212_v55 = vld [vmem:[%s1206_s30 + $0x110] sm:$0xff] }
  0x20   : > { %509 = vmatpush.bf16.msra.mxu0 %v1015_v15  ;;  %v317_v25 = vpack.c.bf16 %v257_v21, %v255_v20  ;;  %v207_v30 = vld [vmem:[%s1206_s30 + $0xe8] sm:$0xff]  ;;  %v209_v31 = vld [vmem:[%s1206_s30 + $0xf8] sm:$0xff]  ;;  %v258_v56 = vld [vmem:[%s1206_s30 + $0x280] sm:$0xff] }
  0x21   : > { %1030 = vmatpush.bf16.msra.mxu2 %v1015_v15  ;;  %v200_v15 = vld [vmem:[%s1206_s30 + $0xb0] sm:$0xff]  ;;  %v259_v32 = vld [vmem:[%s1206_s30 + $0x288] sm:$0xff]  ;;  %v261_v33 = vld [vmem:[%s1206_s30 + $0x298] sm:$0xff]  ;;  %v293_v36 = vpack.c.bf16 %v209_v31, %v207_v30 }
  0x22   : > { %v288_v22 = vpack.c.bf16 %v200_v15, %v198_v14  ;;  %v319_v37 = vpack.c.bf16 %v261_v33, %v259_v32  ;;  %v211_v42 = vld [vmem:[%s1206_s30 + $0x108] sm:$0xff]  ;;  %v213_v43 = vld [vmem:[%s1206_s30 + $0x118] sm:$0xff]  ;;  %v260_v57 = vld [vmem:[%s1206_s30 + $0x290] sm:$0xff] }
  0x23   : > { %v263_v44 = vld [vmem:[%s1206_s30 + $0x2a8] sm:$0xff]  ;;  %v265_v45 = vld [vmem:[%s1206_s30 + $0x2b8] sm:$0xff]  ;;  %v295_v48 = vpack.c.bf16 %v213_v43, %v211_v42  ;;  %v214_v14 = vld [vmem:[%s1206_s30 + $0x120] sm:$0xff] }
  0x24   : > { %510 = vmatpush.bf16.msra.mxu0 %v1014_v16  ;;  %v215_v58 = vld [vmem:[%s1206_s30 + $0x128] sm:$0xff]  ;;  %v217_v59 = vld [vmem:[%s1206_s30 + $0x138] sm:$0xff]  ;;  %v216_v15 = vld [vmem:[%s1206_s30 + $0x130] sm:$0xff] }
  0x25   : > { %1031 = vmatpush.bf16.msra.mxu2 %v1014_v16  ;;  %v246_v16 = vld [vmem:[%s1206_s30 + $0x220] sm:$0xff]  ;;  %v267_v60 = vld [vmem:[%s1206_s30 + $0x2c8] sm:$0xff]  ;;  %v269_v61 = vld [vmem:[%s1206_s30 + $0x2d8] sm:$0xff] }
  0x26   : > { %v323_v5 = vpack.c.bf16 %v269_v61, %v267_v60  ;;  %v219_v18 = vld [vmem:[%s1206_s30 + $0x148] sm:$0xff]  ;;  %v221_v19 = vld [vmem:[%s1206_s30 + $0x158] sm:$0xff]  ;;  %v218_v42 = vld [vmem:[%s1206_s30 + $0x140] sm:$0xff] }
  0x27   : > { %v271_v20 = vld [vmem:[%s1206_s30 + $0x2e8] sm:$0xff]  ;;  %v273_v21 = vld [vmem:[%s1206_s30 + $0x2f8] sm:$0xff]  ;;  %v220_v43 = vld [vmem:[%s1206_s30 + $0x150] sm:$0xff] }
  0x28   : > { %511 = vmatpush.bf16.msra.mxu0 %v1013_v17  ;;  %v325_v30 = vpack.c.bf16 %v273_v21, %v271_v20 }
  0x29   : > { %1032 = vmatpush.bf16.msra.mxu2 %v1013_v17  ;;  %v248_v17 = vld [vmem:[%s1206_s30 + $0x230] sm:$0xff] }
  0x2a   : > { %v312_v23 = vpack.c.bf16 %v248_v17, %v246_v16  ;;  %v262_v16 = vld [vmem:[%s1206_s30 + $0x2a0] sm:$0xff]  ;;  %v264_v17 = vld [vmem:[%s1206_s30 + $0x2b0] sm:$0xff] }
  0x2b   : > { %512 = vmatmul.bf16.vlgmr.msra.gmra.mxu0 %v278_v26  ;;  %v202_v26 = vld [vmem:[%s1206_s30 + $0xc0] sm:$0xff] }
  0x2c   : > { %572 = vmatmul.bf16.vlgmr.msra.gmra.mxu2 %v302_v27  ;;  %986 = vmatmul.msk.bf16.gmra.mxu1 %vm428_vm0, %v281_v28  ;;  %v204_v27 = vld [vmem:[%s1206_s30 + $0xd0] sm:$0xff]  ;;  %v250_v28 = vld [vmem:[%s1206_s30 + $0x240] sm:$0xff] }
  0x2d   : > { %999 = vmatmul.msk.bf16.gmra.mxu3 %vm428_vm0, %v307_v29  ;;  %v252_v29 = vld [vmem:[%s1206_s30 + $0x250] sm:$0xff]  ;;  %v290_v34 = vpack.c.bf16 %v204_v27, %v202_v26  ;;  %v299_v26 = vpack.c.bf16 %v221_v19, %v219_v18  ;;  %v229_v18 = vld [vmem:[%s1206_s30 + $0x198] sm:$0xff] }
  0x2e   : > { %v314_v35 = vpack.c.bf16 %v252_v29, %v250_v28 }
  0x3b   : > { %517 = vmatmul.bf16.gmra.mxu0 %v280_v38  ;;  %v206_v38 = vld [vmem:[%s1206_s30 + $0xe0] sm:$0xff] }
  0x3c   : > { %577 = vmatmul.bf16.gmra.mxu2 %v304_v39  ;;  %987 = vmatmul.msk.bf16.gmra.mxu1 %vm428_vm0, %v283_v40  ;;  %v208_v39 = vld [vmem:[%s1206_s30 + $0xf0] sm:$0xff]  ;;  %v254_v40 = vld [vmem:[%s1206_s30 + $0x260] sm:$0xff] }
  0x3d   : > { %1000 = vmatmul.msk.bf16.gmra.mxu3 %vm428_vm0, %v309_v41  ;;  %v256_v41 = vld [vmem:[%s1206_s30 + $0x270] sm:$0xff]  ;;  %v292_v46 = vpack.c.bf16 %v208_v39, %v206_v38 }
  0x3e   : > { %v316_v47 = vpack.c.bf16 %v256_v41, %v254_v40 }
  0x4b   : > { %522 = vmatmul.bf16.gmra.mxu0 %v282_v50  ;;  %v321_v50 = vpack.c.bf16 %v265_v45, %v263_v44  ;;  %v266_v44 = vld [vmem:[%s1206_s30 + $0x2c0] sm:$0xff]  ;;  %v268_v45 = vld [vmem:[%s1206_s30 + $0x2d0] sm:$0xff] }
  0x4c   : > { %582 = vmatmul.bf16.gmra.mxu2 %v306_v51  ;;  %988 = vmatmul.msk.bf16.gmra.mxu1 %vm428_vm0, %v285_v52 }
  0x4d   : > { %1001 = vmatmul.msk.bf16.gmra.mxu3 %vm428_vm0, %v311_v53  ;;  %v1317_v53 = vld [vmem:[%s1547_s2] ss:$0 sm:$0xff] }
  0x5b   : > { %527 = vmatmul.bf16.gmra.mxu0 %v284_v62  ;;  %v294_v62 = vpack.c.bf16 %v212_v55, %v210_v54  ;;  %v322_v55 = vpack.c.bf16 %v268_v45, %v266_v44  ;;  %v276_v44 = vld [vmem:[%s1206_s30 + $0x310] sm:$0xff] }
  0x5c   : > { %587 = vmatmul.bf16.gmra.mxu2 %v308_v63  ;;  %989 = vmatmul.msk.bf16.gmra.mxu1 %vm428_vm0, %v287_v0  ;;  %v318_v0 = vpack.c.bf16 %v260_v57, %v258_v56 }
  0x5d   : > { %1002 = vmatmul.msk.bf16.gmra.mxu3 %vm428_vm0, %v313_v1  ;;  %v297_v1 = vpack.c.bf16 %v217_v59, %v215_v58 }
  0x6b   : > { %532 = vmatmul.bf16.gmra.mxu0 %v286_v10 }
  0x6c   : > { %592 = vmatmul.bf16.gmra.mxu2 %v310_v11  ;;  %990 = vmatmul.msk.bf16.gmra.mxu1 %vm428_vm0, %v289_v12 }
  0x6d   : > { %1003 = vmatmul.msk.bf16.gmra.mxu3 %vm428_vm0, %v315_v13 }
  0x7b   : > { %537 = vmatmul.bf16.gmra.mxu0 %v288_v22 }
  0x7c   : > { %597 = vmatmul.bf16.gmra.mxu2 %v312_v23  ;;  %991 = vmatmul.msk.bf16.gmra.mxu1 %vm428_vm0, %v291_v24  ;;  %v296_v23 = vpack.c.bf16 %v216_v15, %v214_v14  ;;  %v224_v14 = vld [vmem:[%s1206_s30 + $0x170] sm:$0xff]  ;;  %v270_v15 = vld [vmem:[%s1206_s30 + $0x2e0] sm:$0xff] }
  0x7d   : > { %1004 = vmatmul.msk.bf16.gmra.mxu3 %vm428_vm0, %v317_v25  ;;  %v320_v25 = vpack.c.bf16 %v264_v17, %v262_v16  ;;  %v272_v16 = vld [vmem:[%s1206_s30 + $0x2f0] sm:$0xff]  ;;  %v227_v17 = vld [vmem:[%s1206_s30 + $0x188] sm:$0xff] }
  0x8b   : > { %542 = vmatmul.bf16.gmra.mxu0 %v290_v34 }
  0x8c   : > { %602 = vmatmul.bf16.gmra.mxu2 %v314_v35  ;;  %992 = vmatmul.msk.bf16.gmra.mxu1 %vm428_vm0, %v293_v36 }
  0x8d   : > { %1005 = vmatmul.msk.bf16.gmra.mxu3 %vm428_vm0, %v319_v37 }
  0x99   : > { %v647_v49 = vpop.f32.mrf.mxu1 }
  0x9b   : > { %547 = vmatmul.bf16.gmra.mxu0 %v292_v46  ;;  %v223_v46 = vld [vmem:[%s1206_s30 + $0x168] sm:$0xff] }
  0x9c   : > { %607 = vmatmul.bf16.gmra.mxu2 %v316_v47  ;;  %993 = vmatmul.msk.bf16.gmra.mxu1 %vm428_vm0, %v295_v48  ;;  %v225_v47 = vld [vmem:[%s1206_s30 + $0x178] sm:$0xff]  ;;  %v275_v48 = vld [vmem:[%s1206_s30 + $0x308] sm:$0xff] }
  0x9d   : > { %1006 = vmatmul.msk.bf16.gmra.mxu3 %vm428_vm0, %v321_v50  ;;  %v301_v56 = vpack.c.bf16 %v225_v47, %v223_v46 }
  0xa0   : > { %v1312_v51 = vpop.f32.mrf.mxu3 }
  0xa1   : > { %v649_v52 = vpop.f32.mrf.mxu1 }
  0xa8   : > { %v513_v63 = vpop.f32.mrf.mxu0  ;;  %v1327_v2 = vpop.f32.mrf.mxu3 }
  0xa9   : > { %v514_v3 = vadd.f32 %v1317_v53, %v513_v63  ;;  %v652_v4 = vpop.f32.mrf.mxu1 }
  0xab   : > { %v648_v6 = vadd.f32 %v647_v49, %v514_v3  ;;  %552 = vmatmul.bf16.gmra.mxu0 %v294_v62  ;;  %v277_v49 = vld [vmem:[%s1206_s30 + $0x318] sm:$0xff] }
  0xac   : > { %612 = vmatmul.bf16.gmra.mxu2 %v318_v0  ;;  %994 = vmatmul.msk.bf16.gmra.mxu1 %vm428_vm0, %v297_v1  ;;  %v327_v60 = vpack.c.bf16 %v277_v49, %v275_v48 }
  0xad   : > { %1046 = vtanh.f32 %v648_v6  ;;  %1007 = vmatmul.msk.bf16.gmra.mxu3 %vm428_vm0, %v323_v5 }
  0xaf   : > { %v1333_v7 = vpop.f32.mrf.mxu2 }
  0xb0   : > { %v515_v8 = vpop.f32.mrf.mxu0  ;;  %v1335_v9 = vpop.f32.mrf.mxu3 }
  0xb1   : > { %v516_v10 = vadd.f32 %v1317_v53, %v515_v8  ;;  %v654_v11 = vpop.f32.mrf.mxu1 }
  0xb3   : > { %v1047_v12 = vpop.eup %1046  ;;  %v650_v13 = vadd.f32 %v649_v52, %v516_v10  ;;  %v298_v52 = vpack.c.bf16 %v220_v43, %v218_v42  ;;  %v274_v43 = vld [vmem:[%s1206_s30 + $0x300] sm:$0xff] }
  0xb4   : > { %823 = vst.msk [vmem:[%s1340_s23] sm:$0xff] %vm822_vm1, %v1047_v12  ;;  %v326_v48 = vpack.c.bf16 %v276_v44, %v274_v43 }
  0xb5   : > { %1048 = vtanh.f32 %v650_v13  ;;  %v222_v13 = vld [vmem:[%s1206_s30 + $0x160] sm:$0xff] }
  0xb6   : > { %v300_v20 = vpack.c.bf16 %v224_v14, %v222_v13 }
  0xb7   : > { %v1353_v22 = vpop.f32.mrf.mxu2 }
  0xb8   : > { %v518_v24 = vpop.f32.mrf.mxu0  ;;  %v1355_v27 = vpop.f32.mrf.mxu3 }
  0xb9   : > { %v519_v28 = vadd.f32 %v1317_v53, %v518_v24  ;;  %v657_v29 = vpop.f32.mrf.mxu1  ;;  %v303_v24 = vpack.c.bf16 %v229_v18, %v227_v17 }
  0xbb   : > { %v1049_v31 = vpop.eup %1048  ;;  %v653_v32 = vadd.f32 %v652_v4, %v519_v28  ;;  %557 = vmatmul.bf16.gmra.mxu0 %v296_v23  ;;  %v324_v23 = vpack.c.bf16 %v272_v16, %v270_v15 }
  0xbc   : > { %824 = vst.msk [vmem:[%s1340_s23 + $0x8] sm:$0xff] %vm822_vm1, %v1049_v31  ;;  %617 = vmatmul.bf16.gmra.mxu2 %v320_v25  ;;  %995 = vmatmul.msk.bf16.gmra.mxu1 %vm428_vm0, %v299_v26 }
  0xbd   : > { %1050 = vtanh.f32 %v653_v32  ;;  %1008 = vmatmul.msk.bf16.gmra.mxu3 %vm428_vm0, %v325_v30 }
  0xbf   : > { %v578_v33 = vpop.f32.mrf.mxu2 }
  0xc0   : > { %v579_v34 = vadd.f32 %v1317_v53, %v578_v33  ;;  %v520_v35 = vpop.f32.mrf.mxu0  ;;  %v1363_v36 = vpop.f32.mrf.mxu3 }
  0xc1   : > { %v521_v37 = vadd.f32 %v1317_v53, %v520_v35  ;;  %v659_v38 = vpop.f32.mrf.mxu1 }
  0xc2   : > { %v713_v39 = vadd.f32 %v1312_v51, %v579_v34 }
  0xc3   : > { %v1051_v40 = vpop.eup %1050  ;;  %v655_v41 = vadd.f32 %v654_v11, %v521_v37 }
  0xc4   : > { %825 = vst.msk [vmem:[%s1340_s23 + $0x10] sm:$0xff] %vm822_vm1, %v1051_v40  ;;  %1052 = vtanh.f32 %v713_v39 }
  0xc5   : > { %1054 = vtanh.f32 %v655_v41 }
  0xc7   : > { %v580_v50 = vpop.f32.mrf.mxu2 }
  0xc8   : > { %v581_v51 = vadd.f32 %v1317_v53, %v580_v50  ;;  %v523_v54 = vpop.f32.mrf.mxu0  ;;  %v1378_v57 = vpop.f32.mrf.mxu3 }
  0xc9   : > { %v524_v58 = vadd.f32 %v1317_v53, %v523_v54  ;;  %v662_v59 = vpop.f32.mrf.mxu1 }
  0xca   : > { %v1053_v61 = vpop.eup %1052  ;;  %v715_v62 = vadd.f32 %v1327_v2, %v581_v51 }
  0xcb   : > { %v1055_v63 = vpop.eup %1054  ;;  %849 = vst.msk [vmem:[%s1340_s23 + $0xd0] sm:$0xff] %vm822_vm1, %v1053_v61  ;;  %v658_v0 = vadd.f32 %v657_v29, %v524_v58  ;;  %562 = vmatmul.bf16.gmra.mxu0 %v298_v52 }
  0xcc   : > { %826 = vst.msk [vmem:[%s1340_s23 + $0x18] sm:$0xff] %vm822_vm1, %v1055_v63  ;;  %1056 = vtanh.f32 %v715_v62  ;;  %622 = vmatmul.bf16.gmra.mxu2 %v322_v55  ;;  %996 = vmatmul.msk.bf16.gmra.mxu1 %vm428_vm0, %v301_v56 }
  0xcd   : > { %1058 = vtanh.f32 %v658_v0  ;;  %1009 = vmatmul.msk.bf16.gmra.mxu3 %vm428_vm0, %v327_v60 }
  0xcf   : > { %v583_v1 = vpop.f32.mrf.mxu2 }
  0xd0   : > { %v584_v2 = vadd.f32 %v1317_v53, %v583_v1  ;;  %v525_v3 = vpop.f32.mrf.mxu0  ;;  %v1389_v4 = vpop.f32.mrf.mxu3 }
  0xd1   : > { %v526_v5 = vadd.f32 %v1317_v53, %v525_v3  ;;  %v664_v6 = vpop.f32.mrf.mxu1 }
  0xd2   : > { %v1057_v8 = vpop.eup %1056  ;;  %v718_v10 = vadd.f32 %v1335_v9, %v584_v2 }
  0xd3   : > { %v1059_v11 = vpop.eup %1058  ;;  %850 = vst.msk [vmem:[%s1340_s23 + $0xd8] sm:$0xff] %vm822_vm1, %v1057_v8  ;;  %v660_v12 = vadd.f32 %v659_v38, %v526_v5 }
  0xd4   : > { %827 = vst.msk [vmem:[%s1340_s23 + $0x20] sm:$0xff] %vm822_vm1, %v1059_v11  ;;  %1060 = vtanh.f32 %v718_v10 }
  0xd5   : > { %1062 = vtanh.f32 %v660_v12 }
  0xd7   : > { %v585_v19 = vpop.f32.mrf.mxu2 }
  0xd8   : > { %v586_v9 = vadd.f32 %v1317_v53, %v585_v19  ;;  %v528_v21 = vpop.f32.mrf.mxu0  ;;  %v1405_v28 = vpop.f32.mrf.mxu3 }
  0xd9   : > { %v529_v25 = vadd.f32 %v1317_v53, %v528_v21  ;;  %v667_v26 = vpop.f32.mrf.mxu1 }
  0xda   : > { %v1061_v29 = vpop.eup %1060  ;;  %v720_v30 = vadd.f32 %v1355_v27, %v586_v9 }
  0xdb   : > { %v1063_v31 = vpop.eup %1062  ;;  %851 = vst.msk [vmem:[%s1340_s23 + $0xe0] sm:$0xff] %vm822_vm1, %v1061_v29  ;;  %v663_v32 = vadd.f32 %v662_v59, %v529_v25  ;;  %567 = vmatmul.bf16.gmra.mxu0 %v300_v20 }
  0xdc   : > { %828 = vst.msk [vmem:[%s1340_s23 + $0x28] sm:$0xff] %vm822_vm1, %v1063_v31  ;;  %1064 = vtanh.f32 %v720_v30  ;;  %627 = vmatmul.bf16.gmra.mxu2 %v324_v23  ;;  %997 = vmatmul.msk.bf16.gmra.mxu1 %vm428_vm0, %v303_v24 }
  0xdd   : > { %1066 = vtanh.f32 %v663_v32 }
  0xdf   : > { %v588_v33 = vpop.f32.mrf.mxu2 }
  0xe0   : > { %v589_v34 = vadd.f32 %v1317_v53, %v588_v33  ;;  %v530_v27 = vpop.f32.mrf.mxu0  ;;  %v732_v42 = vpop.f32.mrf.mxu3 }
  0xe1   : > { %v531_v35 = vadd.f32 %v1317_v53, %v530_v27  ;;  %v669_v37 = vpop.f32.mrf.mxu1 }
  0xe2   : > { %v1065_v38 = vpop.eup %1064  ;;  %v723_v39 = vadd.f32 %v1363_v36, %v589_v34 }
  0xe3   : > { %v1067_v40 = vpop.eup %1066  ;;  %852 = vst.msk [vmem:[%s1340_s23 + $0xe8] sm:$0xff] %vm822_vm1, %v1065_v38  ;;  %v665_v41 = vadd.f32 %v664_v6, %v531_v35 }
  0xe4   : > { %829 = vst.msk [vmem:[%s1340_s23 + $0x30] sm:$0xff] %vm822_vm1, %v1067_v40  ;;  %1068 = vtanh.f32 %v723_v39 }
  0xe5   : > { %1070 = vtanh.f32 %v665_v41 }
  0xe7   : > { %v590_v45 = vpop.f32.mrf.mxu2 }
  0xe8   : > { %v591_v46 = vadd.f32 %v1317_v53, %v590_v45  ;;  %v533_v47 = vpop.f32.mrf.mxu0  ;;  %v734_v55 = vpop.f32.mrf.mxu3 }
  0xe9   : > { %v534_v36 = vadd.f32 %v1317_v53, %v533_v47  ;;  %v672_v49 = vpop.f32.mrf.mxu1 }
  0xea   : > { %v1069_v50 = vpop.eup %1068  ;;  %v725_v52 = vadd.f32 %v1378_v57, %v591_v46 }
  0xeb   : > { %v1071_v51 = vpop.eup %1070  ;;  %853 = vst.msk [vmem:[%s1340_s23 + $0xf0] sm:$0xff] %vm822_vm1, %v1069_v50  ;;  %v668_v54 = vadd.f32 %v667_v26, %v534_v36 }
  0xec   : > { %830 = vst.msk [vmem:[%s1340_s23 + $0x38] sm:$0xff] %vm822_vm1, %v1071_v51  ;;  %1072 = vtanh.f32 %v725_v52  ;;  %632 = vmatmul.bf16.gmra.mxu2 %v326_v48 }
  0xed   : > { %1074 = vtanh.f32 %v668_v54 }
  0xef   : > { %v593_v56 = vpop.f32.mrf.mxu2 }
  0xf0   : > { %v594_v58 = vadd.f32 %v1317_v53, %v593_v56  ;;  %v535_v59 = vpop.f32.mrf.mxu0  ;;  %v737_v2 = vpop.f32.mrf.mxu3 }
  0xf1   : > { %v536_v60 = vadd.f32 %v1317_v53, %v535_v59  ;;  %v674_v61 = vpop.f32.mrf.mxu1 }
  0xf2   : > { %v1073_v57 = vpop.eup %1072  ;;  %v728_v62 = vadd.f32 %v1389_v4, %v594_v58 }
  0xf3   : > { %v1075_v63 = vpop.eup %1074  ;;  %854 = vst.msk [vmem:[%s1340_s23 + $0xf8] sm:$0xff] %vm822_vm1, %v1073_v57  ;;  %v670_v0 = vadd.f32 %v669_v37, %v536_v60 }
  0xf4   : > { %831 = vst.msk [vmem:[%s1340_s23 + $0x40] sm:$0xff] %vm822_vm1, %v1075_v63  ;;  %1076 = vtanh.f32 %v728_v62 }
  0xf5   : > { %1078 = vtanh.f32 %v670_v0 }
  0xf7   : > { %v595_v1 = vpop.f32.mrf.mxu2 }
  0xf8   : > { %v596_v3 = vadd.f32 %v1317_v53, %v595_v1  ;;  %v538_v5 = vpop.f32.mrf.mxu0  ;;  %v739_v18 = vpop.f32.mrf.mxu3 }
  0xf9   : > { %v539_v6 = vadd.f32 %v1317_v53, %v538_v5  ;;  %v677_v8 = vpop.f32.mrf.mxu1 }
  0xfa   : > { %v1077_v10 = vpop.eup %1076  ;;  %v730_v4 = vadd.f32 %v1405_v28, %v596_v3 }
  0xfb   : > { %v1079_v11 = vpop.eup %1078  ;;  %855 = vst.msk [vmem:[%s1340_s23 + $0x100] sm:$0xff] %vm822_vm1, %v1077_v10  ;;  %v673_v12 = vadd.f32 %v672_v49, %v539_v6 }
  0xfc   : > { %832 = vst.msk [vmem:[%s1340_s23 + $0x48] sm:$0xff] %vm822_vm1, %v1079_v11  ;;  %1080 = vtanh.f32 %v730_v4 }
  0xfd   : > { %1082 = vtanh.f32 %v673_v12 }
  0xff   : > { %v598_v13 = vpop.f32.mrf.mxu2 }
 0x100   : > { %v599_v14 = vadd.f32 %v1317_v53, %v598_v13  ;;  %v540_v15 = vpop.f32.mrf.mxu0  ;;  %v742_v33 = vpop.f32.mrf.mxu3 }
 0x101   : > { %v541_v16 = vadd.f32 %v1317_v53, %v540_v15  ;;  %v679_v17 = vpop.f32.mrf.mxu1 }
 0x102   : > { %v1081_v19 = vpop.eup %1080  ;;  %v733_v20 = vadd.f32 %v732_v42, %v599_v14 }
 0x103   : > { %v1083_v9 = vpop.eup %1082  ;;  %856 = vst.msk [vmem:[%s1340_s23 + $0x108] sm:$0xff] %vm822_vm1, %v1081_v19  ;;  %v675_v21 = vadd.f32 %v674_v61, %v541_v16 }
 0x104   : > { %833 = vst.msk [vmem:[%s1340_s23 + $0x50] sm:$0xff] %vm822_vm1, %v1083_v9  ;;  %1084 = vtanh.f32 %v733_v20 }
 0x105   : > { %1086 = vtanh.f32 %v675_v21 }
 0x107   : > { %v600_v23 = vpop.f32.mrf.mxu2 }
 0x108   : > { %v601_v24 = vadd.f32 %v1317_v53, %v600_v23  ;;  %v543_v25 = vpop.f32.mrf.mxu0  ;;  %v744_v43 = vpop.f32.mrf.mxu3 }
 0x109   : > { %v544_v26 = vadd.f32 %v1317_v53, %v543_v25  ;;  %v682_v28 = vpop.f32.mrf.mxu1 }
 0x10a   : > { %v1085_v29 = vpop.eup %1084  ;;  %v735_v30 = vadd.f32 %v734_v55, %v601_v24 }
 0x10b   : > { %v1087_v31 = vpop.eup %1086  ;;  %857 = vst.msk [vmem:[%s1340_s23 + $0x110] sm:$0xff] %vm822_vm1, %v1085_v29  ;;  %v678_v32 = vadd.f32 %v677_v8, %v544_v26 }
 0x10c   : > { %834 = vst.msk [vmem:[%s1340_s23 + $0x58] sm:$0xff] %vm822_vm1, %v1087_v31  ;;  %1088 = vtanh.f32 %v735_v30 }
 0x10d   : > { %1090 = vtanh.f32 %v678_v32 }
 0x10f   : > { %v603_v34 = vpop.f32.mrf.mxu2 }
 0x110   : > { %v604_v27 = vadd.f32 %v1317_v53, %v603_v34  ;;  %v545_v35 = vpop.f32.mrf.mxu0  ;;  %v747_v54 = vpop.f32.mrf.mxu3 }
 0x111   : > { %v546_v37 = vadd.f32 %v1317_v53, %v545_v35  ;;  %v684_v38 = vpop.f32.mrf.mxu1 }
 0x112   : > { %v1089_v39 = vpop.eup %1088  ;;  %v738_v40 = vadd.f32 %v737_v2, %v604_v27 }
 0x113   : > { %v1091_v41 = vpop.eup %1090  ;;  %858 = vst.msk [vmem:[%s1340_s23 + $0x118] sm:$0xff] %vm822_vm1, %v1089_v39  ;;  %v680_v42 = vadd.f32 %v679_v17, %v546_v37 }
 0x114   : > { %835 = vst.msk [vmem:[%s1340_s23 + $0x60] sm:$0xff] %vm822_vm1, %v1091_v41  ;;  %1092 = vtanh.f32 %v738_v40 }
 0x115   : > { %1094 = vtanh.f32 %v680_v42 }
 0x117   : > { %v605_v44 = vpop.f32.mrf.mxu2 }
 0x118   : > { %v606_v45 = vadd.f32 %v1317_v53, %v605_v44  ;;  %v548_v46 = vpop.f32.mrf.mxu0  ;;  %v749_v5 = vpop.f32.mrf.mxu3 }
 0x119   : > { %v549_v47 = vadd.f32 %v1317_v53, %v548_v46  ;;  %v687_v48 = vpop.f32.mrf.mxu1 }
 0x11a   : > { %v1093_v36 = vpop.eup %1092  ;;  %v740_v49 = vadd.f32 %v739_v18, %v606_v45 }
 0x11b   : > { %v1095_v50 = vpop.eup %1094  ;;  %859 = vst.msk [vmem:[%s1340_s23 + $0x120] sm:$0xff] %vm822_vm1, %v1093_v36  ;;  %v683_v52 = vadd.f32 %v682_v28, %v549_v47 }
 0x11c   : > { %836 = vst.msk [vmem:[%s1340_s23 + $0x68] sm:$0xff] %vm822_vm1, %v1095_v50  ;;  %1096 = vtanh.f32 %v740_v49 }
 0x11d   : > { %1098 = vtanh.f32 %v683_v52 }
 0x11f   : > { %v608_v51 = vpop.f32.mrf.mxu2 }
 0x120   : > { %v609_v55 = vadd.f32 %v1317_v53, %v608_v51  ;;  %v550_v56 = vpop.f32.mrf.mxu0  ;;  %v752_v20 = vpop.f32.mrf.mxu3 }
 0x121   : > { %v551_v58 = vadd.f32 %v1317_v53, %v550_v56  ;;  %v689_v59 = vpop.f32.mrf.mxu1 }
 0x122   : > { %v1097_v60 = vpop.eup %1096  ;;  %v743_v61 = vadd.f32 %v742_v33, %v609_v55 }
 0x123   : > { %v1099_v57 = vpop.eup %1098  ;;  %860 = vst.msk [vmem:[%s1340_s23 + $0x128] sm:$0xff] %vm822_vm1, %v1097_v60  ;;  %v685_v62 = vadd.f32 %v684_v38, %v551_v58 }
 0x124   : > { %837 = vst.msk [vmem:[%s1340_s23 + $0x70] sm:$0xff] %vm822_vm1, %v1099_v57  ;;  %1100 = vtanh.f32 %v743_v61 }
 0x125   : > { %1102 = vtanh.f32 %v685_v62  ;;  %v574_v62 = vadd.f32 %v1317_v53, %v1333_v7 }
 0x127   : > { %v610_v63 = vpop.f32.mrf.mxu2 }
 0x128   : > { %v611_v0 = vadd.f32 %v1317_v53, %v610_v63  ;;  %v553_v1 = vpop.f32.mrf.mxu0  ;;  %v754_v31 = vpop.f32.mrf.mxu3 }
 0x129   : > { %v554_v2 = vadd.f32 %v1317_v53, %v553_v1  ;;  %v692_v3 = vpop.f32.mrf.mxu1 }
 0x12a   : > { %v1101_v6 = vpop.eup %1100  ;;  %v745_v8 = vadd.f32 %v744_v43, %v611_v0 }
 0x12b   : > { %v1103_v10 = vpop.eup %1102  ;;  %861 = vst.msk [vmem:[%s1340_s23 + $0x130] sm:$0xff] %vm822_vm1, %v1101_v6  ;;  %v688_v4 = vadd.f32 %v687_v48, %v554_v2 }
 0x12c   : > { %838 = vst.msk [vmem:[%s1340_s23 + $0x78] sm:$0xff] %vm822_vm1, %v1103_v10  ;;  %1104 = vtanh.f32 %v745_v8 }
 0x12d   : > { %1106 = vtanh.f32 %v688_v4 }
 0x12f   : > { %v613_v11 = vpop.f32.mrf.mxu2 }
 0x130   : > { %v614_v12 = vadd.f32 %v1317_v53, %v613_v11  ;;  %v555_v13 = vpop.f32.mrf.mxu0  ;;  %v757_v42 = vpop.f32.mrf.mxu3  ;;  %v576_v11 = vadd.f32 %v1317_v53, %v1353_v22 }
 0x131   : > { %v556_v14 = vadd.f32 %v1317_v53, %v555_v13  ;;  %v694_v15 = vpop.f32.mrf.mxu1 }
 0x132   : > { %v1105_v16 = vpop.eup %1104  ;;  %v748_v17 = vadd.f32 %v747_v54, %v614_v12 }
 0x133   : > { %v1107_v18 = vpop.eup %1106  ;;  %862 = vst.msk [vmem:[%s1340_s23 + $0x138] sm:$0xff] %vm822_vm1, %v1105_v16  ;;  %v690_v19 = vadd.f32 %v689_v59, %v556_v14 }
 0x134   : > { %839 = vst.msk [vmem:[%s1340_s23 + $0x80] sm:$0xff] %vm822_vm1, %v1107_v18  ;;  %1108 = vtanh.f32 %v748_v17 }
 0x135   : > { %1110 = vtanh.f32 %v690_v19 }
 0x137   : > { %v615_v9 = vpop.f32.mrf.mxu2 }
 0x138   : > { %v616_v21 = vadd.f32 %v1317_v53, %v615_v9  ;;  %v558_v23 = vpop.f32.mrf.mxu0  ;;  %v759_v56 = vpop.f32.mrf.mxu3 }
 0x139   : > { %v559_v24 = vadd.f32 %v1317_v53, %v558_v23  ;;  %v697_v25 = vpop.f32.mrf.mxu1 }
 0x13a   : > { %v1109_v26 = vpop.eup %1108  ;;  %v750_v28 = vadd.f32 %v749_v5, %v616_v21 }
 0x13b   : > { %v1111_v29 = vpop.eup %1110  ;;  %863 = vst.msk [vmem:[%s1340_s23 + $0x140] sm:$0xff] %vm822_vm1, %v1109_v26  ;;  %v693_v30 = vadd.f32 %v692_v3, %v559_v24 }
 0x13c   : > { %840 = vst.msk [vmem:[%s1340_s23 + $0x88] sm:$0xff] %vm822_vm1, %v1111_v29  ;;  %1112 = vtanh.f32 %v750_v28 }
 0x13d   : > { %1114 = vtanh.f32 %v693_v30 }
 0x13f   : > { %v618_v32 = vpop.f32.mrf.mxu2 }
 0x140   : > { %v619_v33 = vadd.f32 %v1317_v53, %v618_v32  ;;  %v560_v34 = vpop.f32.mrf.mxu0  ;;  %v762_v4 = vpop.f32.mrf.mxu3 }
 0x141   : > { %v561_v27 = vadd.f32 %v1317_v53, %v560_v34  ;;  %v699_v35 = vpop.f32.mrf.mxu1 }
 0x142   : > { %v1113_v37 = vpop.eup %1112  ;;  %v753_v38 = vadd.f32 %v752_v20, %v619_v33 }
 0x143   : > { %v1115_v39 = vpop.eup %1114  ;;  %864 = vst.msk [vmem:[%s1340_s23 + $0x148] sm:$0xff] %vm822_vm1, %v1113_v37  ;;  %v695_v40 = vadd.f32 %v694_v15, %v561_v27 }
 0x144   : > { %841 = vst.msk [vmem:[%s1340_s23 + $0x90] sm:$0xff] %vm822_vm1, %v1115_v39  ;;  %1116 = vtanh.f32 %v753_v38 }
 0x145   : > { %1118 = vtanh.f32 %v695_v40 }
 0x147   : > { %v620_v41 = vpop.f32.mrf.mxu2 }
 0x148   : > { %v621_v43 = vadd.f32 %v1317_v53, %v620_v41  ;;  %v563_v44 = vpop.f32.mrf.mxu0  ;;  %v764_v22 = vpop.f32.mrf.mxu3 }
 0x149   : > { %v564_v45 = vadd.f32 %v1317_v53, %v563_v44  ;;  %v702_v46 = vpop.f32.mrf.mxu1 }
 0x14a   : > { %v1117_v47 = vpop.eup %1116  ;;  %v755_v48 = vadd.f32 %v754_v31, %v621_v43 }
 0x14b   : > { %v1119_v36 = vpop.eup %1118  ;;  %865 = vst.msk [vmem:[%s1340_s23 + $0x150] sm:$0xff] %vm822_vm1, %v1117_v47  ;;  %v698_v49 = vadd.f32 %v697_v25, %v564_v45 }
 0x14c   : > { %842 = vst.msk [vmem:[%s1340_s23 + $0x98] sm:$0xff] %vm822_vm1, %v1119_v36  ;;  %1120 = vtanh.f32 %v755_v48 }
 0x14d   : > { %1122 = vtanh.f32 %v698_v49 }
 0x14f   : > { %v623_v50 = vpop.f32.mrf.mxu2 }
 0x150   : > { %v624_v52 = vadd.f32 %v1317_v53, %v623_v50  ;;  %v565_v51 = vpop.f32.mrf.mxu0  ;;  %v767_v29 = vpop.f32.mrf.mxu3 }
 0x151   : > { %v566_v54 = vadd.f32 %v1317_v53, %v565_v51  ;;  %v704_v55 = vpop.f32.mrf.mxu1 }
 0x152   : > { %v1121_v58 = vpop.eup %1120  ;;  %v758_v59 = vadd.f32 %v757_v42, %v624_v52 }
 0x153   : > { %v1123_v60 = vpop.eup %1122  ;;  %866 = vst.msk [vmem:[%s1340_s23 + $0x158] sm:$0xff] %vm822_vm1, %v1121_v58  ;;  %v700_v61 = vadd.f32 %v699_v35, %v566_v54 }
 0x154   : > { %843 = vst.msk [vmem:[%s1340_s23 + $0xa0] sm:$0xff] %vm822_vm1, %v1123_v60  ;;  %1124 = vtanh.f32 %v758_v59 }
 0x155   : > { %1126 = vtanh.f32 %v700_v61 }
 0x157   : > { %v625_v57 = vpop.f32.mrf.mxu2 }
 0x158   : > { %v626_v63 = vadd.f32 %v1317_v53, %v625_v57  ;;  %v568_v0 = vpop.f32.mrf.mxu0  ;;  %v769_v35 = vpop.f32.mrf.mxu3 }
 0x159   : > { %v569_v1 = vadd.f32 %v1317_v53, %v568_v0  ;;  %v707_v2 = vpop.f32.mrf.mxu1 }
 0x15a   : > { %v1125_v3 = vpop.eup %1124  ;;  %v760_v5 = vadd.f32 %v759_v56, %v626_v63  ;;  %v708_v6 = vadd.f32 %v707_v2, %v574_v62 }
 0x15b   : > { %v1127_v8 = vpop.eup %1126  ;;  %867 = vst.msk [vmem:[%s1340_s23 + $0x160] sm:$0xff] %vm822_vm1, %v1125_v3  ;;  %v703_v10 = vadd.f32 %v702_v46, %v569_v1 }
 0x15c   : > { %844 = vst.msk [vmem:[%s1340_s23 + $0xa8] sm:$0xff] %vm822_vm1, %v1127_v8  ;;  %1128 = vtanh.f32 %v760_v5 }
 0x15d   : > { %1130 = vtanh.f32 %v703_v10 }
 0x15e   : > { %1132 = vtanh.f32 %v708_v6 }
 0x15f   : > { %v628_v7 = vpop.f32.mrf.mxu2 }
 0x160   : > { %v629_v12 = vadd.f32 %v1317_v53, %v628_v7  ;;  %v570_v13 = vpop.f32.mrf.mxu0 }
 0x161   : > { %v571_v14 = vadd.f32 %v1317_v53, %v570_v13  ;;  %v709_v15 = vpop.f32.mrf.mxu1 }
 0x162   : > { %v1129_v16 = vpop.eup %1128  ;;  %v763_v17 = vadd.f32 %v762_v4, %v629_v12  ;;  %v710_v18 = vadd.f32 %v709_v15, %v576_v11 }
 0x163   : > { %v1131_v19 = vpop.eup %1130  ;;  %868 = vst.msk [vmem:[%s1340_s23 + $0x168] sm:$0xff] %vm822_vm1, %v1129_v16  ;;  %v705_v20 = vadd.f32 %v704_v55, %v571_v14 }
 0x164   : > { %v1133_v9 = vpop.eup %1132  ;;  %845 = vst.msk [vmem:[%s1340_s23 + $0xb0] sm:$0xff] %vm822_vm1, %v1131_v19  ;;  %1134 = vtanh.f32 %v763_v17 }
 0x165   : > { %847 = vst.msk [vmem:[%s1340_s23 + $0xc0] sm:$0xff] %vm822_vm1, %v1133_v9  ;;  %1136 = vtanh.f32 %v705_v20 }
 0x166   : > { %1138 = vtanh.f32 %v710_v18 }
 0x167   : > { %v630_v21 = vpop.f32.mrf.mxu2 }
 0x168   : > { %v631_v23 = vadd.f32 %v1317_v53, %v630_v21 }
 0x16a   : > { %v1135_v24 = vpop.eup %1134  ;;  %v765_v25 = vadd.f32 %v764_v22, %v631_v23 }
 0x16b   : > { %v1137_v26 = vpop.eup %1136  ;;  %869 = vst.msk [vmem:[%s1340_s23 + $0x170] sm:$0xff] %vm822_vm1, %v1135_v24 }
 0x16c   : > { %v1139_v28 = vpop.eup %1138  ;;  %846 = vst.msk [vmem:[%s1340_s23 + $0xb8] sm:$0xff] %vm822_vm1, %v1137_v26  ;;  %1140 = vtanh.f32 %v765_v25 }
 0x16d   : > { %848 = vst.msk [vmem:[%s1340_s23 + $0xc8] sm:$0xff] %vm822_vm1, %v1139_v28 }
 0x16f   : > { %v633_v30 = vpop.f32.mrf.mxu2 }
 0x170   : > { %v634_v31 = vadd.f32 %v1317_v53, %v633_v30 }
 0x172   : > { %v1141_v32 = vpop.eup %1140  ;;  %v768_v33 = vadd.f32 %v767_v29, %v634_v31 }
 0x173   : > { %870 = vst.msk [vmem:[%s1340_s23 + $0x178] sm:$0xff] %vm822_vm1, %v1141_v32 }
 0x174   : > { %1142 = vtanh.f32 %v768_v33 }
 0x177   : > { %v635_v34 = vpop.f32.mrf.mxu2 }
 0x178   : > { %v636_v27 = vadd.f32 %v1317_v53, %v635_v34 }
 0x17a   : > { %v1143_v37 = vpop.eup %1142  ;;  %v770_v38 = vadd.f32 %v769_v35, %v636_v27 }
 0x17b   : > { %871 = vst.msk [vmem:[%s1340_s23 + $0x180] sm:$0xff] %vm822_vm1, %v1143_v37 }
 0x17c   : > { %1144 = vtanh.f32 %v770_v38 }
 0x182   : > { %v1145_v39 = vpop.eup %1144 }
 0x183   : > { %872 = vst.msk [vmem:[%s1340_s23 + $0x188] sm:$0xff] %vm822_vm1, %v1145_v39 }
 0x184 PF: > { %s13_s12 = sadd.s32 1, %s1152_s12  }
 0x185   : > { %p10_p4 = scmp.ge.s32.totalorder %s13_s12, 4  }
 0x187   :  { %12 = sbr.rel (!%p10_p4) target bundleno = 1 (0x1), region = 62 }

// kernel: actor_forward.5
= control target key start
LH: loop header
LB: loop body
LE: loop exit
PB: predicated region body
PF: predicated region fallthrough
CT: control target
= control target key end

     0   :  { %vm675_vm0 = vcmask 523264   ;;  %vm696_vm1 = vcmask 517120   ;;  %s1382_s1 = inlined_call_operand.vmem [shape: bf16[512,64], index: 1, kind: input, shape index: {}]   ;;  %s1383_s2 = inlined_call_operand.vmem [shape: f32[1,64], index: 2, kind: input, shape index: {}]   ;;  %s1384_s0 = inlined_call_operand.vmem [shape: f32[162,512], index: 0, kind: input, shape index: {}]   ;;  %s1385_s3 = inlined_call_operand.vmem [shape: f32[162,64], index: 3, kind: output, shape index: {}]  }
   0x1   :  { %v837_v0 = vld [vmem:[%s1382_s1 + $0x38] sm:$0xff]  ;;  %v836_v4 = vld [vmem:[%s1382_s1 + $0x30] sm:$0xff]  ;;  %v835_v8 = vld [vmem:[%s1382_s1 + $0x28] sm:$0xff] }
   0x2   :  { %v845_v1 = vld [vmem:[%s1382_s1 + $0x78] sm:$0xff]  ;;  %402 = vmatpush.bf16.msra.mxu0 %v837_v0  ;;  %v844_v5 = vld [vmem:[%s1382_s1 + $0x70] sm:$0xff]  ;;  %v843_v9 = vld [vmem:[%s1382_s1 + $0x68] sm:$0xff] }
   0x3   :  { %v853_v2 = vld [vmem:[%s1382_s1 + $0xb8] sm:$0xff]  ;;  %465 = vmatpush.bf16.msra.mxu1 %v845_v1  ;;  %v852_v6 = vld [vmem:[%s1382_s1 + $0xb0] sm:$0xff]  ;;  %v851_v10 = vld [vmem:[%s1382_s1 + $0xa8] sm:$0xff] }
   0x4   :  { %v861_v3 = vld [vmem:[%s1382_s1 + $0xf8] sm:$0xff]  ;;  %528 = vmatpush.bf16.msra.mxu2 %v853_v2  ;;  %v860_v7 = vld [vmem:[%s1382_s1 + $0xf0] sm:$0xff]  ;;  %v859_v11 = vld [vmem:[%s1382_s1 + $0xe8] sm:$0xff] }
   0x5   :  { %591 = vmatpush.bf16.msra.mxu3 %v861_v3  ;;  %v834_v12 = vld [vmem:[%s1382_s1 + $0x20] sm:$0xff]  ;;  %v833_v16 = vld [vmem:[%s1382_s1 + $0x18] sm:$0xff]  ;;  %v832_v20 = vld [vmem:[%s1382_s1 + $0x10] sm:$0xff] }
   0x6   :  { %403 = vmatpush.bf16.msra.mxu0 %v836_v4  ;;  %v842_v13 = vld [vmem:[%s1382_s1 + $0x60] sm:$0xff]  ;;  %v841_v17 = vld [vmem:[%s1382_s1 + $0x58] sm:$0xff]  ;;  %v840_v21 = vld [vmem:[%s1382_s1 + $0x50] sm:$0xff] }
   0x7   :  { %466 = vmatpush.bf16.msra.mxu1 %v844_v5  ;;  %v850_v14 = vld [vmem:[%s1382_s1 + $0xa0] sm:$0xff]  ;;  %v849_v18 = vld [vmem:[%s1382_s1 + $0x98] sm:$0xff]  ;;  %v848_v22 = vld [vmem:[%s1382_s1 + $0x90] sm:$0xff] }
   0x8   :  { %529 = vmatpush.bf16.msra.mxu2 %v852_v6  ;;  %v858_v15 = vld [vmem:[%s1382_s1 + $0xe0] sm:$0xff]  ;;  %v857_v19 = vld [vmem:[%s1382_s1 + $0xd8] sm:$0xff]  ;;  %v856_v23 = vld [vmem:[%s1382_s1 + $0xd0] sm:$0xff] }
   0x9   :  { %592 = vmatpush.bf16.msra.mxu3 %v860_v7  ;;  %v831_v24 = vld [vmem:[%s1382_s1 + $0x8] sm:$0xff]  ;;  %v830_v28 = vld [vmem:[%s1382_s1] sm:$0xff]  ;;  %v16_v36 = vld [vmem:[%s1384_s0 + $0x10] sm:$0xff] }
   0xa   :  { %404 = vmatpush.bf16.msra.mxu0 %v835_v8  ;;  %v839_v25 = vld [vmem:[%s1382_s1 + $0x48] sm:$0xff]  ;;  %v838_v29 = vld [vmem:[%s1382_s1 + $0x40] sm:$0xff]  ;;  %v20_v37 = vld [vmem:[%s1384_s0 + $0x30] sm:$0xff] }
   0xb   :  { %467 = vmatpush.bf16.msra.mxu1 %v843_v9  ;;  %v847_v26 = vld [vmem:[%s1382_s1 + $0x88] sm:$0xff]  ;;  %v846_v30 = vld [vmem:[%s1382_s1 + $0x80] sm:$0xff]  ;;  %v17_v38 = vld [vmem:[%s1384_s0 + $0x18] sm:$0xff]  ;;  %v100_v42 = vpack.c.bf16 %v20_v37, %v16_v36 }
   0xc   :  { %530 = vmatpush.bf16.msra.mxu2 %v851_v10  ;;  %v855_v27 = vld [vmem:[%s1382_s1 + $0xc8] sm:$0xff]  ;;  %v854_v31 = vld [vmem:[%s1382_s1 + $0xc0] sm:$0xff]  ;;  %v21_v39 = vld [vmem:[%s1384_s0 + $0x38] sm:$0xff] }
   0xd   :  { %593 = vmatpush.bf16.msra.mxu3 %v859_v11  ;;  %v14_v32 = vld [vmem:[%s1384_s0] sm:$0xff]  ;;  %v15_v34 = vld [vmem:[%s1384_s0 + $0x8] sm:$0xff]  ;;  %v101_v43 = vpack.c.bf16 %v21_v39, %v17_v38  ;;  %v24_v48 = vld [vmem:[%s1384_s0 + $0x50] sm:$0xff] }
   0xe   :  { %405 = vmatpush.bf16.msra.mxu0 %v834_v12  ;;  %v18_v33 = vld [vmem:[%s1384_s0 + $0x20] sm:$0xff]  ;;  %v19_v35 = vld [vmem:[%s1384_s0 + $0x28] sm:$0xff]  ;;  %v28_v49 = vld [vmem:[%s1384_s0 + $0x70] sm:$0xff] }
   0xf   :  { %468 = vmatpush.bf16.msra.mxu1 %v842_v13  ;;  %v98_v40 = vpack.c.bf16 %v18_v33, %v14_v32  ;;  %v99_v41 = vpack.c.bf16 %v19_v35, %v15_v34  ;;  %v22_v44 = vld [vmem:[%s1384_s0 + $0x40] sm:$0xff]  ;;  %v23_v46 = vld [vmem:[%s1384_s0 + $0x48] sm:$0xff]  ;;  %v25_v50 = vld [vmem:[%s1384_s0 + $0x58] sm:$0xff]  ;;  %v104_v54 = vpack.c.bf16 %v28_v49, %v24_v48 }
  0x10   :  { %531 = vmatpush.bf16.msra.mxu2 %v850_v14  ;;  %v26_v45 = vld [vmem:[%s1384_s0 + $0x60] sm:$0xff]  ;;  %v27_v47 = vld [vmem:[%s1384_s0 + $0x68] sm:$0xff]  ;;  %v29_v51 = vld [vmem:[%s1384_s0 + $0x78] sm:$0xff] }
  0x11   :  { %594 = vmatpush.bf16.msra.mxu3 %v858_v15  ;;  %v102_v52 = vpack.c.bf16 %v26_v45, %v22_v44  ;;  %v103_v53 = vpack.c.bf16 %v27_v47, %v23_v46  ;;  %v105_v55 = vpack.c.bf16 %v29_v51, %v25_v50  ;;  %v30_v56 = vld [vmem:[%s1384_s0 + $0x80] sm:$0xff]  ;;  %v31_v58 = vld [vmem:[%s1384_s0 + $0x88] sm:$0xff]  ;;  %v32_v60 = vld [vmem:[%s1384_s0 + $0x90] sm:$0xff] }
  0x12   :  { %406 = vmatpush.bf16.msra.mxu0 %v833_v16  ;;  %v34_v57 = vld [vmem:[%s1384_s0 + $0xa0] sm:$0xff]  ;;  %v35_v59 = vld [vmem:[%s1384_s0 + $0xa8] sm:$0xff]  ;;  %v36_v61 = vld [vmem:[%s1384_s0 + $0xb0] sm:$0xff] }
  0x13   :  { %469 = vmatpush.bf16.msra.mxu1 %v841_v17  ;;  %v33_v62 = vld [vmem:[%s1384_s0 + $0x98] sm:$0xff]  ;;  %v106_v0 = vpack.c.bf16 %v34_v57, %v30_v56  ;;  %v107_v1 = vpack.c.bf16 %v35_v59, %v31_v58  ;;  %v108_v2 = vpack.c.bf16 %v36_v61, %v32_v60  ;;  %v38_v4 = vld [vmem:[%s1384_s0 + $0xc0] sm:$0xff]  ;;  %v39_v6 = vld [vmem:[%s1384_s0 + $0xc8] sm:$0xff] }
  0x14   :  { %532 = vmatpush.bf16.msra.mxu2 %v849_v18  ;;  %v37_v63 = vld [vmem:[%s1384_s0 + $0xb8] sm:$0xff]  ;;  %v42_v5 = vld [vmem:[%s1384_s0 + $0xe0] sm:$0xff]  ;;  %v43_v7 = vld [vmem:[%s1384_s0 + $0xe8] sm:$0xff] }
  0x15   :  { %595 = vmatpush.bf16.msra.mxu3 %v857_v19  ;;  %v109_v3 = vpack.c.bf16 %v37_v63, %v33_v62  ;;  %v40_v8 = vld [vmem:[%s1384_s0 + $0xd0] sm:$0xff]  ;;  %v41_v10 = vld [vmem:[%s1384_s0 + $0xd8] sm:$0xff]  ;;  %v110_v12 = vpack.c.bf16 %v42_v5, %v38_v4  ;;  %v111_v13 = vpack.c.bf16 %v43_v7, %v39_v6  ;;  %v46_v16 = vld [vmem:[%s1384_s0 + $0x100] sm:$0xff] }
  0x16   :  { %407 = vmatpush.bf16.msra.mxu0 %v832_v20  ;;  %v44_v9 = vld [vmem:[%s1384_s0 + $0xf0] sm:$0xff]  ;;  %v45_v11 = vld [vmem:[%s1384_s0 + $0xf8] sm:$0xff]  ;;  %v50_v17 = vld [vmem:[%s1384_s0 + $0x120] sm:$0xff] }
  0x17   :  { %470 = vmatpush.bf16.msra.mxu1 %v840_v21  ;;  %v112_v14 = vpack.c.bf16 %v44_v9, %v40_v8  ;;  %v113_v15 = vpack.c.bf16 %v45_v11, %v41_v10  ;;  %v47_v18 = vld [vmem:[%s1384_s0 + $0x108] sm:$0xff]  ;;  %v48_v20 = vld [vmem:[%s1384_s0 + $0x110] sm:$0xff]  ;;  %v57_v34 = vld [vmem:[%s1384_s0 + $0x158] sm:$0xff] }
  0x18   :  { %533 = vmatpush.bf16.msra.mxu2 %v848_v22  ;;  %v51_v19 = vld [vmem:[%s1384_s0 + $0x128] sm:$0xff]  ;;  %v52_v21 = vld [vmem:[%s1384_s0 + $0x130] sm:$0xff]  ;;  %v49_v22 = vld [vmem:[%s1384_s0 + $0x118] sm:$0xff] }
  0x19   :  { %596 = vmatpush.bf16.msra.mxu3 %v856_v23  ;;  %v53_v23 = vld [vmem:[%s1384_s0 + $0x138] sm:$0xff]  ;;  %v56_v32 = vld [vmem:[%s1384_s0 + $0x150] sm:$0xff]  ;;  %v83_v4 = vld [vmem:[%s1384_s0 + $0x228] sm:$0xff] }
  0x1a   :  { %408 = vmatpush.bf16.msra.mxu0 %v831_v24  ;;  %v114_v24 = vpack.c.bf16 %v50_v17, %v46_v16  ;;  %v60_v33 = vld [vmem:[%s1384_s0 + $0x170] sm:$0xff]  ;;  %v61_v35 = vld [vmem:[%s1384_s0 + $0x178] sm:$0xff] }
  0x1b   :  { %471 = vmatpush.bf16.msra.mxu1 %v839_v25  ;;  %v115_v25 = vpack.c.bf16 %v51_v19, %v47_v18  ;;  %v120_v38 = vpack.c.bf16 %v60_v33, %v56_v32  ;;  %v121_v39 = vpack.c.bf16 %v61_v35, %v57_v34  ;;  %v64_v44 = vld [vmem:[%s1384_s0 + $0x190] sm:$0xff]  ;;  %v65_v46 = vld [vmem:[%s1384_s0 + $0x198] sm:$0xff] }
  0x1c   :  { %534 = vmatpush.bf16.msra.mxu2 %v847_v26  ;;  %v116_v26 = vpack.c.bf16 %v52_v21, %v48_v20  ;;  %v68_v45 = vld [vmem:[%s1384_s0 + $0x1b0] sm:$0xff]  ;;  %v69_v47 = vld [vmem:[%s1384_s0 + $0x1b8] sm:$0xff] }
  0x1d   :  { %597 = vmatpush.bf16.msra.mxu3 %v855_v27  ;;  %v117_v27 = vpack.c.bf16 %v53_v23, %v49_v22  ;;  %v124_v50 = vpack.c.bf16 %v68_v45, %v64_v44  ;;  %v125_v51 = vpack.c.bf16 %v69_v47, %v65_v46  ;;  %v72_v56 = vld [vmem:[%s1384_s0 + $0x1d0] sm:$0xff]  ;;  %v73_v58 = vld [vmem:[%s1384_s0 + $0x1d8] sm:$0xff] }
  0x1e   :  { %409 = vmatpush.bf16.msra.mxu0 %v830_v28  ;;  %v54_v28 = vld [vmem:[%s1384_s0 + $0x140] sm:$0xff]  ;;  %v76_v57 = vld [vmem:[%s1384_s0 + $0x1f0] sm:$0xff]  ;;  %v77_v59 = vld [vmem:[%s1384_s0 + $0x1f8] sm:$0xff] }
  0x1f   :  { %472 = vmatpush.bf16.msra.mxu1 %v838_v29  ;;  %v58_v29 = vld [vmem:[%s1384_s0 + $0x160] sm:$0xff]  ;;  %v128_v62 = vpack.c.bf16 %v76_v57, %v72_v56  ;;  %v129_v63 = vpack.c.bf16 %v77_v59, %v73_v58  ;;  %v80_v5 = vld [vmem:[%s1384_s0 + $0x210] sm:$0xff]  ;;  %v81_v7 = vld [vmem:[%s1384_s0 + $0x218] sm:$0xff] }
  0x20   :  { %535 = vmatpush.bf16.msra.mxu2 %v846_v30  ;;  %v55_v30 = vld [vmem:[%s1384_s0 + $0x148] sm:$0xff]  ;;  %v118_v36 = vpack.c.bf16 %v58_v29, %v54_v28  ;;  %v84_v6 = vld [vmem:[%s1384_s0 + $0x230] sm:$0xff]  ;;  %v85_v8 = vld [vmem:[%s1384_s0 + $0x238] sm:$0xff] }
  0x21   :  { %598 = vmatpush.bf16.msra.mxu3 %v854_v31  ;;  %410 = vmatmul.bf16.vlgmr.msra.gmra.mxu0 %v98_v40  ;;  %v59_v31 = vld [vmem:[%s1384_s0 + $0x168] sm:$0xff]  ;;  %v62_v40 = vld [vmem:[%s1384_s0 + $0x180] sm:$0xff]  ;;  %v88_v28 = vld [vmem:[%s1384_s0 + $0x250] sm:$0xff] }
  0x22   :  { %473 = vmatmul.bf16.vlgmr.msra.gmra.mxu1 %v99_v41  ;;  %v119_v37 = vpack.c.bf16 %v59_v31, %v55_v30  ;;  %v66_v41 = vld [vmem:[%s1384_s0 + $0x1a0] sm:$0xff]  ;;  %v92_v29 = vld [vmem:[%s1384_s0 + $0x270] sm:$0xff]  ;;  %v89_v30 = vld [vmem:[%s1384_s0 + $0x258] sm:$0xff] }
  0x23   :  { %536 = vmatmul.bf16.vlgmr.msra.gmra.mxu2 %v100_v42  ;;  %v63_v42 = vld [vmem:[%s1384_s0 + $0x188] sm:$0xff]  ;;  %v122_v48 = vpack.c.bf16 %v66_v41, %v62_v40  ;;  %v93_v31 = vld [vmem:[%s1384_s0 + $0x278] sm:$0xff]  ;;  %v136_v40 = vpack.c.bf16 %v92_v29, %v88_v28  ;;  %v96_v56 = vld [vmem:[%s1384_s0 + $0x290] sm:$0x3] }
  0x24   :  { %599 = vmatmul.bf16.vlgmr.msra.gmra.mxu3 %v101_v43  ;;  %v67_v43 = vld [vmem:[%s1384_s0 + $0x1a8] sm:$0xff]  ;;  %v137_v41 = vpack.c.bf16 %v93_v31, %v89_v30  ;;  %v97_v57 = vld [vmem:[%s1384_s0 + $0x298] sm:$0x3] }
  0x25   :  { %v123_v49 = vpack.c.bf16 %v67_v43, %v63_v42 }
  0x31   :  { %415 = vmatmul.bf16.gmra.mxu0 %v102_v52  ;;  %v70_v52 = vld [vmem:[%s1384_s0 + $0x1c0] sm:$0xff] }
  0x32   :  { %478 = vmatmul.bf16.gmra.mxu1 %v103_v53  ;;  %v74_v53 = vld [vmem:[%s1384_s0 + $0x1e0] sm:$0xff] }
  0x33   :  { %541 = vmatmul.bf16.gmra.mxu2 %v104_v54  ;;  %v71_v54 = vld [vmem:[%s1384_s0 + $0x1c8] sm:$0xff]  ;;  %v126_v60 = vpack.c.bf16 %v74_v53, %v70_v52 }
  0x34   :  { %604 = vmatmul.bf16.gmra.mxu3 %v105_v55  ;;  %v75_v55 = vld [vmem:[%s1384_s0 + $0x1e8] sm:$0xff] }
  0x35   :  { %v127_v61 = vpack.c.bf16 %v75_v55, %v71_v54  ;;  %v94_v54 = vld [vmem:[%s1384_s0 + $0x280] sm:$0x3]  ;;  %v95_v55 = vld [vmem:[%s1384_s0 + $0x288] sm:$0x3] }
  0x41   :  { %420 = vmatmul.bf16.gmra.mxu0 %v106_v0  ;;  %v1216_v0 = vld [vmem:[%s1383_s2] ss:$0 sm:$0xff] }
  0x42   :  { %483 = vmatmul.bf16.gmra.mxu1 %v107_v1  ;;  %v78_v1 = vld [vmem:[%s1384_s0 + $0x200] sm:$0xff] }
  0x43   :  { %546 = vmatmul.bf16.gmra.mxu2 %v108_v2  ;;  %v82_v2 = vld [vmem:[%s1384_s0 + $0x220] sm:$0xff] }
  0x44   :  { %609 = vmatmul.bf16.gmra.mxu3 %v109_v3  ;;  %v79_v3 = vld [vmem:[%s1384_s0 + $0x208] sm:$0xff]  ;;  %v130_v9 = vpack.c.bf16 %v82_v2, %v78_v1 }
  0x45   :  { %v131_v10 = vpack.c.bf16 %v83_v4, %v79_v3  ;;  %v140_v3 = vpack.c.bf16 %v96_v56, %v96_v56  ;;  %v141_v4 = vpack.c.bf16 %v97_v57, %v97_v57 }
  0x51   :  { %425 = vmatmul.bf16.gmra.mxu0 %v110_v12 }
  0x52   :  { %488 = vmatmul.bf16.gmra.mxu1 %v111_v13  ;;  %v132_v13 = vpack.c.bf16 %v84_v6, %v80_v5 }
  0x53   :  { %551 = vmatmul.bf16.gmra.mxu2 %v112_v14  ;;  %v133_v14 = vpack.c.bf16 %v85_v8, %v81_v7 }
  0x54   :  { %614 = vmatmul.bf16.gmra.mxu3 %v113_v15 }
  0x61   :  { %430 = vmatmul.bf16.gmra.mxu0 %v114_v24  ;;  %v86_v24 = vld [vmem:[%s1384_s0 + $0x240] sm:$0xff] }
  0x62   :  { %493 = vmatmul.bf16.gmra.mxu1 %v115_v25  ;;  %v90_v25 = vld [vmem:[%s1384_s0 + $0x260] sm:$0xff] }
  0x63   :  { %556 = vmatmul.bf16.gmra.mxu2 %v116_v26  ;;  %v87_v26 = vld [vmem:[%s1384_s0 + $0x248] sm:$0xff]  ;;  %v134_v35 = vpack.c.bf16 %v90_v25, %v86_v24 }
  0x64   :  { %619 = vmatmul.bf16.gmra.mxu3 %v117_v27  ;;  %v91_v27 = vld [vmem:[%s1384_s0 + $0x268] sm:$0xff] }
  0x71   :  { %435 = vmatmul.bf16.gmra.mxu0 %v118_v36  ;;  %v135_v36 = vpack.c.bf16 %v91_v27, %v87_v26 }
  0x72   :  { %498 = vmatmul.bf16.gmra.mxu1 %v119_v37 }
  0x73   :  { %561 = vmatmul.bf16.gmra.mxu2 %v120_v38 }
  0x74   :  { %624 = vmatmul.bf16.gmra.mxu3 %v121_v39 }
  0x81   :  { %440 = vmatmul.bf16.gmra.mxu0 %v122_v48 }
  0x82   :  { %503 = vmatmul.bf16.gmra.mxu1 %v123_v49 }
  0x83   :  { %566 = vmatmul.bf16.gmra.mxu2 %v124_v50 }
  0x84   :  { %629 = vmatmul.bf16.gmra.mxu3 %v125_v51 }
  0x91   :  { %445 = vmatmul.bf16.gmra.mxu0 %v126_v60 }
  0x92   :  { %508 = vmatmul.bf16.gmra.mxu1 %v127_v61  ;;  %v138_v61 = vpack.c.bf16 %v94_v54, %v94_v54 }
  0x93   :  { %571 = vmatmul.bf16.gmra.mxu2 %v128_v62  ;;  %v139_v62 = vpack.c.bf16 %v95_v55, %v95_v55 }
  0x94   :  { %634 = vmatmul.bf16.gmra.mxu3 %v129_v63 }
  0x9e   :  { %v411_v11 = vpop.f32.mrf.mxu0 }
  0x9f   :  { %v474_v12 = vpop.f32.mrf.mxu1  ;;  %v412_v15 = vadd.f32 %v1216_v0, %v411_v11 }
  0xa1   :  { %450 = vmatmul.bf16.gmra.mxu0 %v130_v9  ;;  %v475_v16 = vadd.f32 %v474_v12, %v412_v15 }
  0xa2   :  { %513 = vmatmul.bf16.gmra.mxu1 %v131_v10 }
  0xa3   :  { %576 = vmatmul.bf16.gmra.mxu2 %v132_v13 }
  0xa4   :  { %639 = vmatmul.bf16.gmra.mxu3 %v133_v14 }
  0xa6   :  { %v537_v17 = vpop.f32.mrf.mxu2  ;;  %v413_v20 = vpop.f32.mrf.mxu0 }
  0xa7   :  { %v600_v18 = vpop.f32.mrf.mxu3  ;;  %v538_v19 = vadd.f32 %v537_v17, %v475_v16  ;;  %v476_v21 = vpop.f32.mrf.mxu1  ;;  %v414_v23 = vadd.f32 %v1216_v0, %v413_v20 }
  0xa9   :  { %v601_v22 = vadd.f32 %v600_v18, %v538_v19  ;;  %v477_v32 = vadd.f32 %v476_v21, %v414_v23 }
  0xab   :  { %863 = vtanh.f32 %v601_v22 }
  0xae   :  { %v539_v33 = vpop.f32.mrf.mxu2  ;;  %v416_v38 = vpop.f32.mrf.mxu0 }
  0xaf   :  { %v602_v34 = vpop.f32.mrf.mxu3  ;;  %v540_v37 = vadd.f32 %v539_v33, %v477_v32  ;;  %v479_v39 = vpop.f32.mrf.mxu1  ;;  %v417_v42 = vadd.f32 %v1216_v0, %v416_v38 }
  0xb1   :  { %v864_v43 = vpop.eup %863  ;;  %v603_v44 = vadd.f32 %v602_v34, %v540_v37  ;;  %455 = vmatmul.bf16.gmra.mxu0 %v134_v35  ;;  %v480_v45 = vadd.f32 %v479_v39, %v417_v42 }
  0xb2   :  { %676 = vst.msk [vmem:[%s1385_s3] sm:$0xff] %vm675_vm0, %v864_v43  ;;  %518 = vmatmul.bf16.gmra.mxu1 %v135_v36 }
  0xb3   :  { %865 = vtanh.f32 %v603_v44  ;;  %581 = vmatmul.bf16.gmra.mxu2 %v136_v40 }
  0xb4   :  { %644 = vmatmul.bf16.gmra.mxu3 %v137_v41 }
  0xb6   :  { %v542_v46 = vpop.f32.mrf.mxu2  ;;  %v418_v49 = vpop.f32.mrf.mxu0 }
  0xb7   :  { %v605_v47 = vpop.f32.mrf.mxu3  ;;  %v543_v48 = vadd.f32 %v542_v46, %v480_v45  ;;  %v481_v50 = vpop.f32.mrf.mxu1  ;;  %v419_v53 = vadd.f32 %v1216_v0, %v418_v49 }
  0xb9   :  { %v866_v51 = vpop.eup %865  ;;  %v606_v52 = vadd.f32 %v605_v47, %v543_v48  ;;  %v482_v58 = vadd.f32 %v481_v50, %v419_v53 }
  0xba   :  { %677 = vst.msk [vmem:[%s1385_s3 + $0x8] sm:$0xff] %vm675_vm0, %v866_v51 }
  0xbb   :  { %867 = vtanh.f32 %v606_v52 }
  0xbe   :  { %v544_v59 = vpop.f32.mrf.mxu2  ;;  %v421_v1 = vpop.f32.mrf.mxu0 }
  0xbf   :  { %v607_v60 = vpop.f32.mrf.mxu3  ;;  %v545_v63 = vadd.f32 %v544_v59, %v482_v58  ;;  %v484_v2 = vpop.f32.mrf.mxu1  ;;  %v422_v5 = vadd.f32 %v1216_v0, %v421_v1 }
  0xc1   :  { %v868_v6 = vpop.eup %867  ;;  %v608_v7 = vadd.f32 %v607_v60, %v545_v63  ;;  %460 = vmatmul.bf16.gmra.mxu0 %v138_v61  ;;  %v485_v8 = vadd.f32 %v484_v2, %v422_v5 }
  0xc2   :  { %678 = vst.msk [vmem:[%s1385_s3 + $0x10] sm:$0xff] %vm675_vm0, %v868_v6  ;;  %523 = vmatmul.bf16.gmra.mxu1 %v139_v62 }
  0xc3   :  { %869 = vtanh.f32 %v608_v7  ;;  %586 = vmatmul.bf16.gmra.mxu2 %v140_v3 }
  0xc4   :  { %649 = vmatmul.bf16.gmra.mxu3 %v141_v4 }
  0xc6   :  { %v547_v9 = vpop.f32.mrf.mxu2  ;;  %v423_v12 = vpop.f32.mrf.mxu0 }
  0xc7   :  { %v610_v10 = vpop.f32.mrf.mxu3  ;;  %v548_v11 = vadd.f32 %v547_v9, %v485_v8  ;;  %v486_v13 = vpop.f32.mrf.mxu1  ;;  %v424_v16 = vadd.f32 %v1216_v0, %v423_v12 }
  0xc9   :  { %v870_v14 = vpop.eup %869  ;;  %v611_v15 = vadd.f32 %v610_v10, %v548_v11  ;;  %v487_v17 = vadd.f32 %v486_v13, %v424_v16 }
  0xca   :  { %679 = vst.msk [vmem:[%s1385_s3 + $0x18] sm:$0xff] %vm675_vm0, %v870_v14 }
  0xcb   :  { %871 = vtanh.f32 %v611_v15 }
  0xce   :  { %v549_v18 = vpop.f32.mrf.mxu2  ;;  %v426_v21 = vpop.f32.mrf.mxu0 }
  0xcf   :  { %v612_v19 = vpop.f32.mrf.mxu3  ;;  %v550_v20 = vadd.f32 %v549_v18, %v487_v17  ;;  %v489_v22 = vpop.f32.mrf.mxu1  ;;  %v427_v23 = vadd.f32 %v1216_v0, %v426_v21 }
  0xd1   :  { %v872_v24 = vpop.eup %871  ;;  %v613_v25 = vadd.f32 %v612_v19, %v550_v20  ;;  %v490_v26 = vadd.f32 %v489_v22, %v427_v23 }
  0xd2   :  { %680 = vst.msk [vmem:[%s1385_s3 + $0x20] sm:$0xff] %vm675_vm0, %v872_v24 }
  0xd3   :  { %873 = vtanh.f32 %v613_v25 }
  0xd6   :  { %v552_v27 = vpop.f32.mrf.mxu2  ;;  %v428_v30 = vpop.f32.mrf.mxu0 }
  0xd7   :  { %v615_v28 = vpop.f32.mrf.mxu3  ;;  %v553_v29 = vadd.f32 %v552_v27, %v490_v26  ;;  %v491_v31 = vpop.f32.mrf.mxu1  ;;  %v429_v34 = vadd.f32 %v1216_v0, %v428_v30 }
  0xd9   :  { %v874_v32 = vpop.eup %873  ;;  %v616_v33 = vadd.f32 %v615_v28, %v553_v29  ;;  %v492_v35 = vadd.f32 %v491_v31, %v429_v34 }
  0xda   :  { %681 = vst.msk [vmem:[%s1385_s3 + $0x28] sm:$0xff] %vm675_vm0, %v874_v32 }
  0xdb   :  { %875 = vtanh.f32 %v616_v33 }
  0xde   :  { %v554_v36 = vpop.f32.mrf.mxu2  ;;  %v431_v39 = vpop.f32.mrf.mxu0 }
  0xdf   :  { %v617_v37 = vpop.f32.mrf.mxu3  ;;  %v555_v38 = vadd.f32 %v554_v36, %v492_v35  ;;  %v494_v40 = vpop.f32.mrf.mxu1  ;;  %v432_v41 = vadd.f32 %v1216_v0, %v431_v39 }
  0xe1   :  { %v876_v42 = vpop.eup %875  ;;  %v618_v43 = vadd.f32 %v617_v37, %v555_v38  ;;  %v495_v44 = vadd.f32 %v494_v40, %v432_v41 }
  0xe2   :  { %682 = vst.msk [vmem:[%s1385_s3 + $0x30] sm:$0xff] %vm675_vm0, %v876_v42 }
  0xe3   :  { %877 = vtanh.f32 %v618_v43 }
  0xe6   :  { %v557_v45 = vpop.f32.mrf.mxu2  ;;  %v433_v48 = vpop.f32.mrf.mxu0 }
  0xe7   :  { %v620_v46 = vpop.f32.mrf.mxu3  ;;  %v558_v47 = vadd.f32 %v557_v45, %v495_v44  ;;  %v496_v49 = vpop.f32.mrf.mxu1  ;;  %v434_v52 = vadd.f32 %v1216_v0, %v433_v48 }
  0xe9   :  { %v878_v50 = vpop.eup %877  ;;  %v621_v51 = vadd.f32 %v620_v46, %v558_v47  ;;  %v497_v53 = vadd.f32 %v496_v49, %v434_v52 }
  0xea   :  { %683 = vst.msk [vmem:[%s1385_s3 + $0x38] sm:$0xff] %vm675_vm0, %v878_v50 }
  0xeb   :  { %879 = vtanh.f32 %v621_v51 }
  0xee   :  { %v559_v54 = vpop.f32.mrf.mxu2  ;;  %v436_v57 = vpop.f32.mrf.mxu0 }
  0xef   :  { %v622_v55 = vpop.f32.mrf.mxu3  ;;  %v560_v56 = vadd.f32 %v559_v54, %v497_v53  ;;  %v499_v58 = vpop.f32.mrf.mxu1  ;;  %v437_v59 = vadd.f32 %v1216_v0, %v436_v57 }
  0xf1   :  { %v880_v60 = vpop.eup %879  ;;  %v623_v61 = vadd.f32 %v622_v55, %v560_v56  ;;  %v500_v62 = vadd.f32 %v499_v58, %v437_v59 }
  0xf2   :  { %684 = vst.msk [vmem:[%s1385_s3 + $0x40] sm:$0xff] %vm675_vm0, %v880_v60 }
  0xf3   :  { %881 = vtanh.f32 %v623_v61 }
  0xf6   :  { %v562_v63 = vpop.f32.mrf.mxu2  ;;  %v438_v3 = vpop.f32.mrf.mxu0 }
  0xf7   :  { %v625_v1 = vpop.f32.mrf.mxu3  ;;  %v563_v2 = vadd.f32 %v562_v63, %v500_v62  ;;  %v501_v4 = vpop.f32.mrf.mxu1  ;;  %v439_v7 = vadd.f32 %v1216_v0, %v438_v3 }
  0xf9   :  { %v882_v5 = vpop.eup %881  ;;  %v626_v6 = vadd.f32 %v625_v1, %v563_v2  ;;  %v502_v8 = vadd.f32 %v501_v4, %v439_v7 }
  0xfa   :  { %685 = vst.msk [vmem:[%s1385_s3 + $0x48] sm:$0xff] %vm675_vm0, %v882_v5 }
  0xfb   :  { %883 = vtanh.f32 %v626_v6 }
  0xfe   :  { %v564_v9 = vpop.f32.mrf.mxu2  ;;  %v441_v12 = vpop.f32.mrf.mxu0 }
  0xff   :  { %v627_v10 = vpop.f32.mrf.mxu3  ;;  %v565_v11 = vadd.f32 %v564_v9, %v502_v8  ;;  %v504_v13 = vpop.f32.mrf.mxu1  ;;  %v442_v14 = vadd.f32 %v1216_v0, %v441_v12 }
 0x101   :  { %v884_v15 = vpop.eup %883  ;;  %v628_v16 = vadd.f32 %v627_v10, %v565_v11  ;;  %v505_v17 = vadd.f32 %v504_v13, %v442_v14 }
 0x102   :  { %686 = vst.msk [vmem:[%s1385_s3 + $0x50] sm:$0xff] %vm675_vm0, %v884_v15 }
 0x103   :  { %885 = vtanh.f32 %v628_v16 }
 0x106   :  { %v567_v18 = vpop.f32.mrf.mxu2  ;;  %v443_v21 = vpop.f32.mrf.mxu0 }
 0x107   :  { %v630_v19 = vpop.f32.mrf.mxu3  ;;  %v568_v20 = vadd.f32 %v567_v18, %v505_v17  ;;  %v506_v22 = vpop.f32.mrf.mxu1  ;;  %v444_v25 = vadd.f32 %v1216_v0, %v443_v21 }
 0x109   :  { %v886_v23 = vpop.eup %885  ;;  %v631_v24 = vadd.f32 %v630_v19, %v568_v20  ;;  %v507_v26 = vadd.f32 %v506_v22, %v444_v25 }
 0x10a   :  { %687 = vst.msk [vmem:[%s1385_s3 + $0x58] sm:$0xff] %vm675_vm0, %v886_v23 }
 0x10b   :  { %887 = vtanh.f32 %v631_v24 }
 0x10e   :  { %v569_v27 = vpop.f32.mrf.mxu2  ;;  %v446_v30 = vpop.f32.mrf.mxu0 }
 0x10f   :  { %v632_v28 = vpop.f32.mrf.mxu3  ;;  %v570_v29 = vadd.f32 %v569_v27, %v507_v26  ;;  %v509_v31 = vpop.f32.mrf.mxu1  ;;  %v447_v32 = vadd.f32 %v1216_v0, %v446_v30 }
 0x111   :  { %v888_v33 = vpop.eup %887  ;;  %v633_v34 = vadd.f32 %v632_v28, %v570_v29  ;;  %v510_v35 = vadd.f32 %v509_v31, %v447_v32 }
 0x112   :  { %688 = vst.msk [vmem:[%s1385_s3 + $0x60] sm:$0xff] %vm675_vm0, %v888_v33 }
 0x113   :  { %889 = vtanh.f32 %v633_v34 }
 0x116   :  { %v572_v36 = vpop.f32.mrf.mxu2  ;;  %v448_v39 = vpop.f32.mrf.mxu0 }
 0x117   :  { %v635_v37 = vpop.f32.mrf.mxu3  ;;  %v573_v38 = vadd.f32 %v572_v36, %v510_v35  ;;  %v511_v40 = vpop.f32.mrf.mxu1  ;;  %v449_v43 = vadd.f32 %v1216_v0, %v448_v39 }
 0x119   :  { %v890_v41 = vpop.eup %889  ;;  %v636_v42 = vadd.f32 %v635_v37, %v573_v38  ;;  %v512_v44 = vadd.f32 %v511_v40, %v449_v43 }
 0x11a   :  { %689 = vst.msk [vmem:[%s1385_s3 + $0x68] sm:$0xff] %vm675_vm0, %v890_v41 }
 0x11b   :  { %891 = vtanh.f32 %v636_v42 }
 0x11e   :  { %v574_v45 = vpop.f32.mrf.mxu2  ;;  %v451_v48 = vpop.f32.mrf.mxu0 }
 0x11f   :  { %v637_v46 = vpop.f32.mrf.mxu3  ;;  %v575_v47 = vadd.f32 %v574_v45, %v512_v44  ;;  %v514_v49 = vpop.f32.mrf.mxu1  ;;  %v452_v50 = vadd.f32 %v1216_v0, %v451_v48 }
 0x121   :  { %v892_v51 = vpop.eup %891  ;;  %v638_v52 = vadd.f32 %v637_v46, %v575_v47  ;;  %v515_v53 = vadd.f32 %v514_v49, %v452_v50 }
 0x122   :  { %690 = vst.msk [vmem:[%s1385_s3 + $0x70] sm:$0xff] %vm675_vm0, %v892_v51 }
 0x123   :  { %893 = vtanh.f32 %v638_v52 }
 0x126   :  { %v577_v54 = vpop.f32.mrf.mxu2  ;;  %v453_v57 = vpop.f32.mrf.mxu0 }
 0x127   :  { %v640_v55 = vpop.f32.mrf.mxu3  ;;  %v578_v56 = vadd.f32 %v577_v54, %v515_v53  ;;  %v516_v58 = vpop.f32.mrf.mxu1  ;;  %v454_v61 = vadd.f32 %v1216_v0, %v453_v57 }
 0x129   :  { %v894_v59 = vpop.eup %893  ;;  %v641_v60 = vadd.f32 %v640_v55, %v578_v56  ;;  %v517_v62 = vadd.f32 %v516_v58, %v454_v61 }
 0x12a   :  { %691 = vst.msk [vmem:[%s1385_s3 + $0x78] sm:$0xff] %vm675_vm0, %v894_v59 }
 0x12b   :  { %895 = vtanh.f32 %v641_v60 }
 0x12e   :  { %v579_v63 = vpop.f32.mrf.mxu2  ;;  %v456_v3 = vpop.f32.mrf.mxu0 }
 0x12f   :  { %v642_v1 = vpop.f32.mrf.mxu3  ;;  %v580_v2 = vadd.f32 %v579_v63, %v517_v62  ;;  %v519_v4 = vpop.f32.mrf.mxu1  ;;  %v457_v5 = vadd.f32 %v1216_v0, %v456_v3 }
 0x131   :  { %v896_v6 = vpop.eup %895  ;;  %v643_v7 = vadd.f32 %v642_v1, %v580_v2  ;;  %v520_v8 = vadd.f32 %v519_v4, %v457_v5 }
 0x132   :  { %692 = vst.msk [vmem:[%s1385_s3 + $0x80] sm:$0xff] %vm675_vm0, %v896_v6 }
 0x133   :  { %897 = vtanh.f32 %v643_v7 }
 0x136   :  { %v582_v9 = vpop.f32.mrf.mxu2  ;;  %v458_v12 = vpop.f32.mrf.mxu0 }
 0x137   :  { %v645_v10 = vpop.f32.mrf.mxu3  ;;  %v583_v11 = vadd.f32 %v582_v9, %v520_v8  ;;  %v521_v13 = vpop.f32.mrf.mxu1  ;;  %v459_v16 = vadd.f32 %v1216_v0, %v458_v12 }
 0x139   :  { %v898_v14 = vpop.eup %897  ;;  %v646_v15 = vadd.f32 %v645_v10, %v583_v11  ;;  %v522_v17 = vadd.f32 %v521_v13, %v459_v16 }
 0x13a   :  { %693 = vst.msk [vmem:[%s1385_s3 + $0x88] sm:$0xff] %vm675_vm0, %v898_v14 }
 0x13b   :  { %899 = vtanh.f32 %v646_v15 }
 0x13e   :  { %v584_v18 = vpop.f32.mrf.mxu2  ;;  %v461_v21 = vpop.f32.mrf.mxu0 }
 0x13f   :  { %v647_v19 = vpop.f32.mrf.mxu3  ;;  %v585_v20 = vadd.f32 %v584_v18, %v522_v17  ;;  %v524_v22 = vpop.f32.mrf.mxu1  ;;  %v462_v23 = vadd.f32 %v1216_v0, %v461_v21 }
 0x141   :  { %v900_v24 = vpop.eup %899  ;;  %v648_v25 = vadd.f32 %v647_v19, %v585_v20  ;;  %v525_v26 = vadd.f32 %v524_v22, %v462_v23 }
 0x142   :  { %694 = vst.msk [vmem:[%s1385_s3 + $0x90] sm:$0xff] %vm675_vm0, %v900_v24 }
 0x143   :  { %901 = vtanh.f32 %v648_v25 }
 0x146   :  { %v587_v27 = vpop.f32.mrf.mxu2  ;;  %v463_v30 = vpop.f32.mrf.mxu0 }
 0x147   :  { %v650_v28 = vpop.f32.mrf.mxu3  ;;  %v588_v29 = vadd.f32 %v587_v27, %v525_v26  ;;  %v526_v31 = vpop.f32.mrf.mxu1 }
 0x149   :  { %v902_v32 = vpop.eup %901  ;;  %v651_v33 = vadd.f32 %v650_v28, %v588_v29 }
 0x14a   :  { %695 = vst.msk [vmem:[%s1385_s3 + $0x98] sm:$0xff] %vm675_vm0, %v902_v32 }
 0x14b   :  { %903 = vtanh.f32 %v651_v33 }
 0x14e   :  { %v589_v0 = vpop.f32.mrf.mxu2 }
 0x14f   :  { %v652_v34 = vpop.f32.mrf.mxu3 }
 0x151   :  { %v904_v35 = vpop.eup %903 }
 0x152   :  { %697 = vst.msk [vmem:[%s1385_s3 + $0xa0] sm:$0x3] %vm696_vm1, %v904_v35 }

// kernel: actor_forward.6
= control target key start
LH: loop header
LB: loop body
LE: loop exit
PB: predicated region body
PF: predicated region fallthrough
CT: control target
= control target key end

     0   :  { %vm407_vm0 = vcmask 523264   ;;  %vm669_vm1 = vcmask 517120   ;;  %s1339_s1 = inlined_call_operand.vmem [shape: bf16[576,64], index: 1, kind: input, shape index: {}]   ;;  %s1340_s2 = inlined_call_operand.vmem [shape: f32[1,64], index: 2, kind: input, shape index: {}]   ;;  %s1341_s0 = inlined_call_operand.vmem [shape: f32[98,576], index: 0, kind: input, shape index: {}]   ;;  %s1342_s3 = inlined_call_operand.vmem [shape: f32[98,64], index: 3, kind: output, shape index: {}]  }
   0x1   :  { %v833_v0 = vld [vmem:[%s1339_s1 + $0x38] sm:$0xff]  ;;  %v832_v1 = vld [vmem:[%s1339_s1 + $0x30] sm:$0xff]  ;;  %v831_v2 = vld [vmem:[%s1339_s1 + $0x28] sm:$0xff] }
   0x2   :  { %862 = vmatpush.bf16.msra.mxu1 %v833_v0  ;;  %863 = vmatpush.bf16.msra.mxu2 %v833_v0  ;;  %v830_v3 = vld [vmem:[%s1339_s1 + $0x20] sm:$0xff]  ;;  %v829_v4 = vld [vmem:[%s1339_s1 + $0x18] sm:$0xff]  ;;  %v828_v5 = vld [vmem:[%s1339_s1 + $0x10] sm:$0xff] }
   0x3   :  { %864 = vmatpush.bf16.msra.mxu3 %v833_v0  ;;  %429 = vmatpush.bf16.msra.mxu0 %v833_v0  ;;  %v827_v6 = vld [vmem:[%s1339_s1 + $0x8] sm:$0xff]  ;;  %v826_v7 = vld [vmem:[%s1339_s1] sm:$0xff]  ;;  %v857_v14 = vld [vmem:[%s1339_s1 + $0xf8] sm:$0xff] }
   0x4   :  { %v35_v8 = vld [vmem:[%s1341_s0 + $0xa0] sm:$0xff]  ;;  %v40_v9 = vld [vmem:[%s1341_s0 + $0xc8] sm:$0xff]  ;;  %v849_v15 = vld [vmem:[%s1339_s1 + $0xb8] sm:$0xff] }
   0x5   :  { %v55_v10 = vld [vmem:[%s1341_s0 + $0x140] sm:$0xff]  ;;  %v60_v11 = vld [vmem:[%s1341_s0 + $0x168] sm:$0xff]  ;;  %v90_v17 = vpack.c.bf16 %v40_v9, %v35_v8  ;;  %v841_v19 = vld [vmem:[%s1339_s1 + $0x78] sm:$0xff] }
   0x6   :  { %865 = vmatpush.bf16.msra.mxu1 %v832_v1  ;;  %866 = vmatpush.bf16.msra.mxu2 %v832_v1  ;;  %v15_v12 = vld [vmem:[%s1341_s0] sm:$0xff]  ;;  %v20_v13 = vld [vmem:[%s1341_s0 + $0x28] sm:$0xff]  ;;  %v100_v18 = vpack.c.bf16 %v60_v11, %v55_v10  ;;  %v861_v22 = vld [vmem:[%s1339_s1 + $0x118] sm:$0xff] }
   0x7   :  { %867 = vmatpush.bf16.msra.mxu3 %v832_v1  ;;  %430 = vmatpush.bf16.msra.mxu0 %v832_v1  ;;  %v75_v16 = vld [vmem:[%s1341_s0 + $0x1e0] sm:$0x3]  ;;  %v80_v20 = vpack.c.bf16 %v20_v13, %v15_v12  ;;  %v856_v23 = vld [vmem:[%s1339_s1 + $0xf0] sm:$0xff]  ;;  %v855_v27 = vld [vmem:[%s1339_s1 + $0xe8] sm:$0xff] }
   0x8   :  { %v110_v21 = vpack.c.bf16 %v75_v16, %v75_v16  ;;  %v848_v24 = vld [vmem:[%s1339_s1 + $0xb0] sm:$0xff]  ;;  %v847_v28 = vld [vmem:[%s1339_s1 + $0xa8] sm:$0xff]  ;;  %v854_v31 = vld [vmem:[%s1339_s1 + $0xe0] sm:$0xff] }
   0x9   :  { %v840_v25 = vld [vmem:[%s1339_s1 + $0x70] sm:$0xff]  ;;  %v839_v29 = vld [vmem:[%s1339_s1 + $0x68] sm:$0xff]  ;;  %v846_v32 = vld [vmem:[%s1339_s1 + $0xa0] sm:$0xff] }
   0xa   :  { %868 = vmatpush.bf16.msra.mxu1 %v831_v2  ;;  %869 = vmatpush.bf16.msra.mxu2 %v831_v2  ;;  %v860_v26 = vld [vmem:[%s1339_s1 + $0x110] sm:$0xff]  ;;  %v859_v30 = vld [vmem:[%s1339_s1 + $0x108] sm:$0xff]  ;;  %v838_v33 = vld [vmem:[%s1339_s1 + $0x60] sm:$0xff] }
   0xb   :  { %870 = vmatpush.bf16.msra.mxu3 %v831_v2  ;;  %431 = vmatpush.bf16.msra.mxu0 %v831_v2  ;;  %v45_v34 = vld [vmem:[%s1341_s0 + $0xf0] sm:$0xff]  ;;  %v50_v35 = vld [vmem:[%s1341_s0 + $0x118] sm:$0xff]  ;;  %v858_v40 = vld [vmem:[%s1339_s1 + $0x100] sm:$0xff] }
   0xc   :  { %v65_v36 = vld [vmem:[%s1341_s0 + $0x190] sm:$0xff]  ;;  %v70_v37 = vld [vmem:[%s1341_s0 + $0x1b8] sm:$0xff]  ;;  %v95_v43 = vpack.c.bf16 %v50_v35, %v45_v34  ;;  %v851_v50 = vld [vmem:[%s1339_s1 + $0xc8] sm:$0xff] }
   0xd   :  { %v25_v38 = vld [vmem:[%s1341_s0 + $0x50] sm:$0xff]  ;;  %v30_v39 = vld [vmem:[%s1341_s0 + $0x78] sm:$0xff]  ;;  %v105_v44 = vpack.c.bf16 %v70_v37, %v65_v36  ;;  %v843_v51 = vld [vmem:[%s1339_s1 + $0x88] sm:$0xff] }
   0xe   :  { %871 = vmatpush.bf16.msra.mxu1 %v830_v3  ;;  %872 = vmatpush.bf16.msra.mxu2 %v830_v3  ;;  %v853_v41 = vld [vmem:[%s1339_s1 + $0xd8] sm:$0xff]  ;;  %v85_v46 = vpack.c.bf16 %v30_v39, %v25_v38  ;;  %v852_v47 = vld [vmem:[%s1339_s1 + $0xd0] sm:$0xff]  ;;  %v835_v52 = vld [vmem:[%s1339_s1 + $0x48] sm:$0xff] }
   0xf   :  { %873 = vmatpush.bf16.msra.mxu3 %v830_v3  ;;  %432 = vmatpush.bf16.msra.mxu0 %v830_v3  ;;  %v845_v42 = vld [vmem:[%s1339_s1 + $0x98] sm:$0xff]  ;;  %v844_v48 = vld [vmem:[%s1339_s1 + $0x90] sm:$0xff]  ;;  %v850_v53 = vld [vmem:[%s1339_s1 + $0xc0] sm:$0xff] }
  0x10   :  { %v837_v45 = vld [vmem:[%s1339_s1 + $0x58] sm:$0xff]  ;;  %v836_v49 = vld [vmem:[%s1339_s1 + $0x50] sm:$0xff]  ;;  %v842_v54 = vld [vmem:[%s1339_s1 + $0x80] sm:$0xff] }
  0x11   :  { %v18_v55 = vld [vmem:[%s1341_s0 + $0x18] sm:$0xff]  ;;  %v23_v56 = vld [vmem:[%s1341_s0 + $0x40] sm:$0xff]  ;;  %v16_v58 = vld [vmem:[%s1341_s0 + $0x8] sm:$0xff] }
  0x12   :  { %874 = vmatpush.bf16.msra.mxu1 %v829_v4  ;;  %875 = vmatpush.bf16.msra.mxu2 %v829_v4  ;;  %v834_v57 = vld [vmem:[%s1339_s1 + $0x40] sm:$0xff]  ;;  %v21_v59 = vld [vmem:[%s1341_s0 + $0x30] sm:$0xff]  ;;  %v22_v61 = vld [vmem:[%s1341_s0 + $0x38] sm:$0xff]  ;;  %v83_v62 = vpack.c.bf16 %v23_v56, %v18_v55 }
  0x13   :  { %876 = vmatpush.bf16.msra.mxu3 %v829_v4  ;;  %433 = vmatpush.bf16.msra.mxu0 %v829_v4  ;;  %v17_v60 = vld [vmem:[%s1341_s0 + $0x10] sm:$0xff]  ;;  %v19_v63 = vld [vmem:[%s1341_s0 + $0x20] sm:$0xff]  ;;  %v24_v0 = vld [vmem:[%s1341_s0 + $0x48] sm:$0xff]  ;;  %v81_v1 = vpack.c.bf16 %v21_v59, %v16_v58 }
  0x14   :  { %v82_v2 = vpack.c.bf16 %v22_v61, %v17_v60  ;;  %v84_v3 = vpack.c.bf16 %v24_v0, %v19_v63  ;;  %v28_v4 = vld [vmem:[%s1341_s0 + $0x68] sm:$0xff]  ;;  %v27_v8 = vld [vmem:[%s1341_s0 + $0x60] sm:$0xff]  ;;  %v29_v11 = vld [vmem:[%s1341_s0 + $0x70] sm:$0xff] }
  0x15   :  { %v32_v9 = vld [vmem:[%s1341_s0 + $0x88] sm:$0xff]  ;;  %v34_v12 = vld [vmem:[%s1341_s0 + $0x98] sm:$0xff]  ;;  %v49_v35 = vld [vmem:[%s1341_s0 + $0x110] sm:$0xff] }
  0x16   :  { %877 = vmatpush.bf16.msra.mxu1 %v828_v5  ;;  %878 = vmatpush.bf16.msra.mxu2 %v828_v5  ;;  %v38_v16 = vld [vmem:[%s1341_s0 + $0xb8] sm:$0xff]  ;;  %v71_v55 = vld [vmem:[%s1341_s0 + $0x1c0] sm:$0xff]  ;;  %v69_v59 = vld [vmem:[%s1341_s0 + $0x1b0] sm:$0xff] }
  0x17   :  { %879 = vmatpush.bf16.msra.mxu3 %v828_v5  ;;  %434 = vmatpush.bf16.msra.mxu0 %v828_v5  ;;  %v33_v5 = vld [vmem:[%s1341_s0 + $0x90] sm:$0xff]  ;;  %v54_v36 = vld [vmem:[%s1341_s0 + $0x138] sm:$0xff]  ;;  %v67_v56 = vld [vmem:[%s1341_s0 + $0x1a0] sm:$0xff] }
  0x18   :  { %v88_v10 = vpack.c.bf16 %v33_v5, %v28_v4  ;;  %v99_v39 = vpack.c.bf16 %v54_v36, %v49_v35  ;;  %v74_v60 = vld [vmem:[%s1341_s0 + $0x1d8] sm:$0xff]  ;;  %v79_v4 = vld [vmem:[%s1341_s0 + $0x200] sm:$0x3] }
  0x19   :  { %v109_v63 = vpack.c.bf16 %v74_v60, %v69_v59  ;;  %v78_v0 = vld [vmem:[%s1341_s0 + $0x1f8] sm:$0x3] }
  0x1a   :  { %880 = vmatpush.bf16.msra.mxu1 %v827_v6  ;;  %881 = vmatpush.bf16.msra.mxu2 %v827_v6 }
  0x1b   :  { %882 = vmatpush.bf16.msra.mxu3 %v827_v6  ;;  %435 = vmatpush.bf16.msra.mxu0 %v827_v6  ;;  %v26_v6 = vld [vmem:[%s1341_s0 + $0x58] sm:$0xff] }
  0x1e   :  { %883 = vmatpush.bf16.msra.mxu1 %v826_v7  ;;  %884 = vmatpush.bf16.msra.mxu2 %v826_v7 }
  0x1f   :  { %885 = vmatpush.bf16.msra.mxu3 %v826_v7  ;;  %436 = vmatpush.bf16.msra.mxu0 %v826_v7  ;;  %v31_v7 = vld [vmem:[%s1341_s0 + $0x80] sm:$0xff] }
  0x20   :  { %v86_v13 = vpack.c.bf16 %v31_v7, %v26_v6 }
  0x21   :  { %447 = vmatmul.bf16.vlgmr.msra.gmra.mxu1 %v90_v17  ;;  %457 = vmatmul.bf16.vlgmr.msra.gmra.mxu2 %v100_v18  ;;  %v43_v17 = vld [vmem:[%s1341_s0 + $0xe0] sm:$0xff]  ;;  %v36_v18 = vld [vmem:[%s1341_s0 + $0xa8] sm:$0xff] }
  0x22   :  { %515 = vmatpush.bf16.msrb.mxu2 %v849_v15  ;;  %472 = vmatpush.bf16.msrb.mxu1 %v841_v19  ;;  %v89_v15 = vpack.c.bf16 %v34_v12, %v29_v11  ;;  %v41_v19 = vld [vmem:[%s1341_s0 + $0xd0] sm:$0xff] }
  0x23   :  { %558 = vmatpush.bf16.msrb.mxu3 %v857_v14  ;;  %437 = vmatmul.bf16.vlgmr.msra.gmra.mxu0 %v80_v20  ;;  %v87_v14 = vpack.c.bf16 %v32_v9, %v27_v8  ;;  %v37_v20 = vld [vmem:[%s1341_s0 + $0xb0] sm:$0xff]  ;;  %v114_v8 = vpack.c.bf16 %v79_v4, %v79_v4 }
  0x24   :  { %467 = vmatmul.bf16.vlgmr.msra.gmra.mxu3 %v110_v21  ;;  %605 = vmatpush.bf16.msrb.mxu0 %v861_v22  ;;  %v42_v21 = vld [vmem:[%s1341_s0 + $0xd8] sm:$0xff]  ;;  %v93_v22 = vpack.c.bf16 %v43_v17, %v38_v16 }
  0x26   :  { %516 = vmatpush.bf16.msrb.mxu2 %v848_v24  ;;  %473 = vmatpush.bf16.msrb.mxu1 %v840_v25  ;;  %v44_v24 = vld [vmem:[%s1341_s0 + $0xe8] sm:$0xff]  ;;  %v91_v25 = vpack.c.bf16 %v41_v19, %v36_v18 }
  0x27   :  { %559 = vmatpush.bf16.msrb.mxu3 %v856_v23  ;;  %v39_v23 = vld [vmem:[%s1341_s0 + $0xc0] sm:$0xff] }
  0x28   :  { %606 = vmatpush.bf16.msrb.mxu0 %v860_v26  ;;  %v92_v26 = vpack.c.bf16 %v42_v21, %v37_v20 }
  0x2a   :  { %517 = vmatpush.bf16.msrb.mxu2 %v847_v28  ;;  %474 = vmatpush.bf16.msrb.mxu1 %v839_v29  ;;  %v48_v28 = vld [vmem:[%s1341_s0 + $0x108] sm:$0xff]  ;;  %v53_v29 = vld [vmem:[%s1341_s0 + $0x130] sm:$0xff] }
  0x2b   :  { %560 = vmatpush.bf16.msrb.mxu3 %v855_v27  ;;  %v94_v27 = vpack.c.bf16 %v44_v24, %v39_v23  ;;  %v98_v34 = vpack.c.bf16 %v53_v29, %v48_v28 }
  0x2c   :  { %607 = vmatpush.bf16.msrb.mxu0 %v859_v30  ;;  %v46_v30 = vld [vmem:[%s1341_s0 + $0xf8] sm:$0xff] }
  0x2e   :  { %518 = vmatpush.bf16.msrb.mxu2 %v846_v32  ;;  %475 = vmatpush.bf16.msrb.mxu1 %v838_v33  ;;  %v47_v32 = vld [vmem:[%s1341_s0 + $0x100] sm:$0xff]  ;;  %v52_v33 = vld [vmem:[%s1341_s0 + $0x128] sm:$0xff] }
  0x2f   :  { %561 = vmatpush.bf16.msrb.mxu3 %v854_v31  ;;  %v51_v31 = vld [vmem:[%s1341_s0 + $0x120] sm:$0xff]  ;;  %v97_v38 = vpack.c.bf16 %v52_v33, %v47_v32 }
  0x30   :  { %608 = vmatpush.bf16.msrb.mxu0 %v858_v40  ;;  %v96_v37 = vpack.c.bf16 %v51_v31, %v46_v30  ;;  %v58_v40 = vld [vmem:[%s1341_s0 + $0x158] sm:$0xff] }
  0x31   :  { %452 = vmatmul.bf16.gmra.mxu1 %v95_v43  ;;  %462 = vmatmul.bf16.gmra.mxu2 %v105_v44  ;;  %v61_v43 = vld [vmem:[%s1341_s0 + $0x170] sm:$0xff] }
  0x32   :  { %519 = vmatpush.bf16.msrb.mxu2 %v845_v42  ;;  %476 = vmatpush.bf16.msrb.mxu1 %v837_v45  ;;  %v56_v42 = vld [vmem:[%s1341_s0 + $0x148] sm:$0xff]  ;;  %v57_v44 = vld [vmem:[%s1341_s0 + $0x150] sm:$0xff]  ;;  %v62_v45 = vld [vmem:[%s1341_s0 + $0x178] sm:$0xff] }
  0x33   :  { %562 = vmatpush.bf16.msrb.mxu3 %v853_v41  ;;  %442 = vmatmul.bf16.gmra.mxu0 %v85_v46  ;;  %v63_v41 = vld [vmem:[%s1341_s0 + $0x180] sm:$0xff] }
  0x34   :  { %v103_v46 = vpack.c.bf16 %v63_v41, %v58_v40 }
  0x36   :  { %520 = vmatpush.bf16.msrb.mxu2 %v844_v48  ;;  %477 = vmatpush.bf16.msrb.mxu1 %v836_v49  ;;  %v64_v48 = vld [vmem:[%s1341_s0 + $0x188] sm:$0xff]  ;;  %v101_v49 = vpack.c.bf16 %v61_v43, %v56_v42 }
  0x37   :  { %563 = vmatpush.bf16.msrb.mxu3 %v852_v47  ;;  %v59_v47 = vld [vmem:[%s1341_s0 + $0x160] sm:$0xff] }
  0x3a   :  { %521 = vmatpush.bf16.msrb.mxu2 %v843_v51  ;;  %478 = vmatpush.bf16.msrb.mxu1 %v835_v52  ;;  %v104_v51 = vpack.c.bf16 %v64_v48, %v59_v47  ;;  %v68_v52 = vld [vmem:[%s1341_s0 + $0x1a8] sm:$0xff] }
  0x3b   :  { %564 = vmatpush.bf16.msrb.mxu3 %v851_v50  ;;  %v102_v50 = vpack.c.bf16 %v62_v45, %v57_v44 }
  0x3e   :  { %522 = vmatpush.bf16.msrb.mxu2 %v842_v54  ;;  %479 = vmatpush.bf16.msrb.mxu1 %v834_v57  ;;  %v66_v54 = vld [vmem:[%s1341_s0 + $0x198] sm:$0xff]  ;;  %v72_v57 = vld [vmem:[%s1341_s0 + $0x1c8] sm:$0xff] }
  0x3f   :  { %565 = vmatpush.bf16.msrb.mxu3 %v850_v53  ;;  %v73_v53 = vld [vmem:[%s1341_s0 + $0x1d0] sm:$0xff]  ;;  %v106_v61 = vpack.c.bf16 %v71_v55, %v66_v54 }
  0x40   :  { %v108_v58 = vpack.c.bf16 %v73_v53, %v68_v52 }
  0x41   :  { %480 = vmatmul.bf16.vlgmr.msrb.gmra.mxu1 %v81_v1  ;;  %523 = vmatmul.bf16.vlgmr.msrb.gmra.mxu2 %v82_v2  ;;  %v76_v1 = vld [vmem:[%s1341_s0 + $0x1e8] sm:$0x3]  ;;  %v77_v2 = vld [vmem:[%s1341_s0 + $0x1f0] sm:$0x3] }
  0x42   :  { %566 = vmatmul.bf16.vlgmr.msrb.gmra.mxu3 %v83_v62  ;;  %v107_v62 = vpack.c.bf16 %v72_v57, %v67_v56  ;;  %v111_v5 = vpack.c.bf16 %v76_v1, %v76_v1  ;;  %v112_v6 = vpack.c.bf16 %v77_v2, %v77_v2 }
  0x43   :  { %819 = vmatmul.msk.bf16.vlgmr.msrb.gmra.mxu0 %vm407_vm0, %v84_v3  ;;  %v113_v3 = vpack.c.bf16 %v78_v0, %v78_v0 }
  0x51   :  { %485 = vmatmul.bf16.gmra.mxu1 %v86_v13  ;;  %528 = vmatmul.bf16.gmra.mxu2 %v87_v14 }
  0x52   :  { %571 = vmatmul.bf16.gmra.mxu3 %v88_v10  ;;  %v1248_v10 = vld [vmem:[%s1340_s2] ss:$0 sm:$0xff] }
  0x53   :  { %820 = vmatmul.msk.bf16.gmra.mxu0 %vm407_vm0, %v89_v15 }
  0x61   :  { %490 = vmatmul.bf16.gmra.mxu1 %v91_v25  ;;  %533 = vmatmul.bf16.gmra.mxu2 %v92_v26 }
  0x62   :  { %576 = vmatmul.bf16.gmra.mxu3 %v93_v22 }
  0x63   :  { %821 = vmatmul.msk.bf16.gmra.mxu0 %vm407_vm0, %v94_v27 }
  0x71   :  { %495 = vmatmul.bf16.gmra.mxu1 %v96_v37  ;;  %538 = vmatmul.bf16.gmra.mxu2 %v97_v38 }
  0x72   :  { %581 = vmatmul.bf16.gmra.mxu3 %v98_v34 }
  0x73   :  { %822 = vmatmul.msk.bf16.gmra.mxu0 %vm407_vm0, %v99_v39 }
  0x81   :  { %500 = vmatmul.bf16.gmra.mxu1 %v101_v49  ;;  %543 = vmatmul.bf16.gmra.mxu2 %v102_v50 }
  0x82   :  { %586 = vmatmul.bf16.gmra.mxu3 %v103_v46 }
  0x83   :  { %823 = vmatmul.msk.bf16.gmra.mxu0 %vm407_vm0, %v104_v51 }
  0x91   :  { %505 = vmatmul.bf16.gmra.mxu1 %v106_v61  ;;  %548 = vmatmul.bf16.gmra.mxu2 %v107_v62 }
  0x92   :  { %591 = vmatmul.bf16.gmra.mxu3 %v108_v58 }
  0x93   :  { %824 = vmatmul.msk.bf16.gmra.mxu0 %vm407_vm0, %v109_v63 }
  0x9e   :  { %v1242_v7 = vpop.f32.mrf.mxu1 }
  0x9f   :  { %v449_v4 = vadd.f32 %v1248_v10, %v1242_v7 }
  0xa0   :  { %v438_v9 = vpop.f32.mrf.mxu0 }
  0xa1   :  { %510 = vmatmul.bf16.gmra.mxu1 %v111_v5  ;;  %553 = vmatmul.bf16.gmra.mxu2 %v112_v6  ;;  %v439_v30 = vadd.f32 %v1248_v10, %v438_v9 }
  0xa2   :  { %596 = vmatmul.bf16.gmra.mxu3 %v113_v3 }
  0xa3   :  { %825 = vmatmul.msk.bf16.gmra.mxu0 %vm407_vm0, %v114_v8 }
  0xa4   :  { %v458_v11 = vpop.f32.mrf.mxu2 }
  0xa5   :  { %v1251_v12 = vadd.f32 %v1248_v10, %v458_v11 }
  0xa6   :  { %v1253_v13 = vpop.f32.mrf.mxu1 }
  0xa7   :  { %v468_v14 = vpop.f32.mrf.mxu3 }
  0xa8   :  { %v440_v15 = vpop.f32.mrf.mxu0  ;;  %v1256_v16 = vadd.f32 %v1248_v10, %v468_v14 }
  0xa9   :  { %v441_v38 = vadd.f32 %v1248_v10, %v440_v15 }
  0xac   :  { %v460_v17 = vpop.f32.mrf.mxu2 }
  0xad   :  { %v1259_v18 = vadd.f32 %v1248_v10, %v460_v17 }
  0xae   :  { %v1261_v19 = vpop.f32.mrf.mxu1 }
  0xaf   :  { %v470_v20 = vpop.f32.mrf.mxu3 }
  0xb0   :  { %v443_v21 = vpop.f32.mrf.mxu0 }
  0xb1   :  { %v444_v48 = vadd.f32 %v1248_v10, %v443_v21  ;;  %v451_v21 = vadd.f32 %v1248_v10, %v1253_v13 }
  0xb4   :  { %v463_v22 = vpop.f32.mrf.mxu2 }
  0xb5   :  { %v1264_v23 = vadd.f32 %v1248_v10, %v463_v22 }
  0xb6   :  { %v1266_v24 = vpop.f32.mrf.mxu1 }
  0xb8   :  { %v445_v25 = vpop.f32.mrf.mxu0 }
  0xb9   :  { %v446_v58 = vadd.f32 %v1248_v10, %v445_v25 }
  0xbc   :  { %v465_v26 = vpop.f32.mrf.mxu2 }
  0xbd   :  { %v1269_v27 = vadd.f32 %v1248_v10, %v465_v26 }
  0xbe   :  { %v481_v28 = vpop.f32.mrf.mxu1 }
  0xbf   :  { %v482_v32 = vadd.f32 %v481_v28, %v439_v30 }
  0xc0   :  { %v610_v29 = vpop.f32.mrf.mxu0 }
  0xc4   :  { %v524_v33 = vpop.f32.mrf.mxu2 }
  0xc5   :  { %v567_v31 = vpop.f32.mrf.mxu3  ;;  %v525_v34 = vadd.f32 %v524_v33, %v482_v32  ;;  %v454_v33 = vadd.f32 %v1248_v10, %v1261_v19 }
  0xc6   :  { %v483_v35 = vpop.f32.mrf.mxu1 }
  0xc7   :  { %v568_v36 = vadd.f32 %v567_v31, %v525_v34  ;;  %v484_v41 = vadd.f32 %v483_v35, %v441_v38 }
  0xc8   :  { %v612_v37 = vpop.f32.mrf.mxu0 }
  0xc9   :  { %v611_v39 = vadd.f32 %v610_v29, %v568_v36 }
  0xcb   :  { %887 = vtanh.f32 %v611_v39 }
  0xcc   :  { %v526_v42 = vpop.f32.mrf.mxu2 }
  0xcd   :  { %v569_v40 = vpop.f32.mrf.mxu3  ;;  %v527_v43 = vadd.f32 %v526_v42, %v484_v41  ;;  %v456_v42 = vadd.f32 %v1248_v10, %v1266_v24 }
  0xce   :  { %v486_v44 = vpop.f32.mrf.mxu1 }
  0xcf   :  { %v570_v45 = vadd.f32 %v569_v40, %v527_v43  ;;  %v487_v51 = vadd.f32 %v486_v44, %v444_v48 }
  0xd0   :  { %v615_v46 = vpop.f32.mrf.mxu0 }
  0xd1   :  { %v888_v47 = vpop.eup %887  ;;  %v613_v49 = vadd.f32 %v612_v37, %v570_v45 }
  0xd2   :  { %657 = vst.msk [vmem:[%s1342_s3] sm:$0xff] %vm407_vm0, %v888_v47 }
  0xd3   :  { %889 = vtanh.f32 %v613_v49 }
  0xd4   :  { %v529_v52 = vpop.f32.mrf.mxu2 }
  0xd5   :  { %v572_v50 = vpop.f32.mrf.mxu3  ;;  %v530_v53 = vadd.f32 %v529_v52, %v487_v51 }
  0xd6   :  { %v488_v54 = vpop.f32.mrf.mxu1 }
  0xd7   :  { %v573_v55 = vadd.f32 %v572_v50, %v530_v53  ;;  %v489_v61 = vadd.f32 %v488_v54, %v446_v58 }
  0xd8   :  { %v617_v56 = vpop.f32.mrf.mxu0 }
  0xd9   :  { %v890_v57 = vpop.eup %889  ;;  %v616_v59 = vadd.f32 %v615_v46, %v573_v55 }
  0xda   :  { %658 = vst.msk [vmem:[%s1342_s3 + $0x8] sm:$0xff] %vm407_vm0, %v890_v57 }
  0xdb   :  { %891 = vtanh.f32 %v616_v59 }
  0xdc   :  { %v531_v62 = vpop.f32.mrf.mxu2 }
  0xdd   :  { %v574_v60 = vpop.f32.mrf.mxu3  ;;  %v532_v63 = vadd.f32 %v531_v62, %v489_v61 }
  0xde   :  { %v491_v0 = vpop.f32.mrf.mxu1 }
  0xdf   :  { %v575_v1 = vadd.f32 %v574_v60, %v532_v63  ;;  %v492_v8 = vadd.f32 %v491_v0, %v449_v4 }
  0xe0   :  { %v620_v2 = vpop.f32.mrf.mxu0 }
  0xe1   :  { %v892_v3 = vpop.eup %891  ;;  %v618_v5 = vadd.f32 %v617_v56, %v575_v1 }
  0xe2   :  { %659 = vst.msk [vmem:[%s1342_s3 + $0x10] sm:$0xff] %vm407_vm0, %v892_v3 }
  0xe3   :  { %893 = vtanh.f32 %v618_v5 }
  0xe4   :  { %v534_v9 = vpop.f32.mrf.mxu2 }
  0xe5   :  { %v577_v6 = vpop.f32.mrf.mxu3  ;;  %v535_v11 = vadd.f32 %v534_v9, %v492_v8 }
  0xe6   :  { %v493_v14 = vpop.f32.mrf.mxu1 }
  0xe7   :  { %v578_v15 = vadd.f32 %v577_v6, %v535_v11  ;;  %v494_v25 = vadd.f32 %v493_v14, %v451_v21 }
  0xe8   :  { %v622_v17 = vpop.f32.mrf.mxu0 }
  0xe9   :  { %v894_v20 = vpop.eup %893  ;;  %v621_v22 = vadd.f32 %v620_v2, %v578_v15 }
  0xea   :  { %660 = vst.msk [vmem:[%s1342_s3 + $0x18] sm:$0xff] %vm407_vm0, %v894_v20 }
  0xeb   :  { %895 = vtanh.f32 %v621_v22 }
  0xec   :  { %v536_v26 = vpop.f32.mrf.mxu2 }
  0xed   :  { %v579_v7 = vpop.f32.mrf.mxu3  ;;  %v537_v28 = vadd.f32 %v536_v26, %v494_v25 }
  0xee   :  { %v496_v29 = vpop.f32.mrf.mxu1 }
  0xef   :  { %v580_v30 = vadd.f32 %v579_v7, %v537_v28  ;;  %v497_v35 = vadd.f32 %v496_v29, %v454_v33 }
  0xf0   :  { %v625_v31 = vpop.f32.mrf.mxu0 }
  0xf1   :  { %v896_v32 = vpop.eup %895  ;;  %v623_v34 = vadd.f32 %v622_v17, %v580_v30 }
  0xf2   :  { %661 = vst.msk [vmem:[%s1342_s3 + $0x20] sm:$0xff] %vm407_vm0, %v896_v32 }
  0xf3   :  { %897 = vtanh.f32 %v623_v34 }
  0xf4   :  { %v539_v36 = vpop.f32.mrf.mxu2 }
  0xf5   :  { %v582_v13 = vpop.f32.mrf.mxu3  ;;  %v540_v37 = vadd.f32 %v539_v36, %v497_v35 }
  0xf6   :  { %v498_v38 = vpop.f32.mrf.mxu1 }
  0xf7   :  { %v583_v39 = vadd.f32 %v582_v13, %v540_v37  ;;  %v499_v44 = vadd.f32 %v498_v38, %v456_v42 }
  0xf8   :  { %v627_v40 = vpop.f32.mrf.mxu0 }
  0xf9   :  { %v898_v41 = vpop.eup %897  ;;  %v626_v43 = vadd.f32 %v625_v31, %v583_v39 }
  0xfa   :  { %662 = vst.msk [vmem:[%s1342_s3 + $0x28] sm:$0xff] %vm407_vm0, %v898_v41 }
  0xfb   :  { %899 = vtanh.f32 %v626_v43 }
  0xfc   :  { %v541_v45 = vpop.f32.mrf.mxu2 }
  0xfd   :  { %v584_v19 = vpop.f32.mrf.mxu3  ;;  %v542_v46 = vadd.f32 %v541_v45, %v499_v44 }
  0xfe   :  { %v501_v47 = vpop.f32.mrf.mxu1 }
  0xff   :  { %v585_v48 = vadd.f32 %v584_v19, %v542_v46  ;;  %v502_v24 = vadd.f32 %v501_v47, %v1251_v12 }
 0x100   :  { %v630_v49 = vpop.f32.mrf.mxu0 }
 0x101   :  { %v900_v50 = vpop.eup %899  ;;  %v628_v51 = vadd.f32 %v627_v40, %v585_v48 }
 0x102   :  { %663 = vst.msk [vmem:[%s1342_s3 + $0x30] sm:$0xff] %vm407_vm0, %v900_v50 }
 0x103   :  { %901 = vtanh.f32 %v628_v51 }
 0x104   :  { %v544_v52 = vpop.f32.mrf.mxu2 }
 0x105   :  { %v587_v10 = vpop.f32.mrf.mxu3  ;;  %v545_v53 = vadd.f32 %v544_v52, %v502_v24 }
 0x106   :  { %v503_v54 = vpop.f32.mrf.mxu1 }
 0x107   :  { %v588_v55 = vadd.f32 %v587_v10, %v545_v53  ;;  %v504_v60 = vadd.f32 %v503_v54, %v1259_v18 }
 0x108   :  { %v632_v56 = vpop.f32.mrf.mxu0 }
 0x109   :  { %v902_v57 = vpop.eup %901  ;;  %v631_v58 = vadd.f32 %v630_v49, %v588_v55 }
 0x10a   :  { %664 = vst.msk [vmem:[%s1342_s3 + $0x38] sm:$0xff] %vm407_vm0, %v902_v57 }
 0x10b   :  { %903 = vtanh.f32 %v631_v58 }
 0x10c   :  { %v546_v61 = vpop.f32.mrf.mxu2 }
 0x10d   :  { %v589_v59 = vpop.f32.mrf.mxu3  ;;  %v547_v62 = vadd.f32 %v546_v61, %v504_v60 }
 0x10e   :  { %v506_v63 = vpop.f32.mrf.mxu1 }
 0x10f   :  { %v590_v12 = vadd.f32 %v589_v59, %v547_v62  ;;  %v507_v4 = vadd.f32 %v506_v63, %v1264_v23 }
 0x110   :  { %v635_v0 = vpop.f32.mrf.mxu0 }
 0x111   :  { %v904_v1 = vpop.eup %903  ;;  %v633_v2 = vadd.f32 %v632_v56, %v590_v12 }
 0x112   :  { %665 = vst.msk [vmem:[%s1342_s3 + $0x40] sm:$0xff] %vm407_vm0, %v904_v1 }
 0x113   :  { %905 = vtanh.f32 %v633_v2 }
 0x114   :  { %v549_v5 = vpop.f32.mrf.mxu2 }
 0x115   :  { %v592_v3 = vpop.f32.mrf.mxu3  ;;  %v550_v6 = vadd.f32 %v549_v5, %v507_v4 }
 0x116   :  { %v508_v8 = vpop.f32.mrf.mxu1 }
 0x117   :  { %v593_v18 = vadd.f32 %v592_v3, %v550_v6  ;;  %v509_v17 = vadd.f32 %v508_v8, %v1269_v27 }
 0x118   :  { %v637_v9 = vpop.f32.mrf.mxu0 }
 0x119   :  { %v906_v11 = vpop.eup %905  ;;  %v636_v14 = vadd.f32 %v635_v0, %v593_v18 }
 0x11a   :  { %666 = vst.msk [vmem:[%s1342_s3 + $0x48] sm:$0xff] %vm407_vm0, %v906_v11 }
 0x11b   :  { %907 = vtanh.f32 %v636_v14 }
 0x11c   :  { %v551_v20 = vpop.f32.mrf.mxu2 }
 0x11d   :  { %v594_v15 = vpop.f32.mrf.mxu3  ;;  %v552_v21 = vadd.f32 %v551_v20, %v509_v17 }
 0x11e   :  { %v511_v22 = vpop.f32.mrf.mxu1 }
 0x11f   :  { %v595_v23 = vadd.f32 %v594_v15, %v552_v21  ;;  %v512_v29 = vadd.f32 %v511_v22, %v1256_v16 }
 0x120   :  { %v640_v7 = vpop.f32.mrf.mxu0 }
 0x121   :  { %v908_v25 = vpop.eup %907  ;;  %v638_v26 = vadd.f32 %v637_v9, %v595_v23 }
 0x122   :  { %667 = vst.msk [vmem:[%s1342_s3 + $0x50] sm:$0xff] %vm407_vm0, %v908_v25 }
 0x123   :  { %909 = vtanh.f32 %v638_v26 }
 0x124   :  { %v554_v30 = vpop.f32.mrf.mxu2 }
 0x125   :  { %v597_v28 = vpop.f32.mrf.mxu3  ;;  %v555_v31 = vadd.f32 %v554_v30, %v512_v29 }
 0x126   :  { %v513_v32 = vpop.f32.mrf.mxu1 }
 0x127   :  { %v598_v27 = vadd.f32 %v597_v28, %v555_v31 }
 0x128   :  { %v642_v33 = vpop.f32.mrf.mxu0 }
 0x129   :  { %v910_v34 = vpop.eup %909  ;;  %v641_v13 = vadd.f32 %v640_v7, %v598_v27 }
 0x12a   :  { %668 = vst.msk [vmem:[%s1342_s3 + $0x58] sm:$0xff] %vm407_vm0, %v910_v34 }
 0x12b   :  { %911 = vtanh.f32 %v641_v13 }
 0x12c   :  { %v556_v36 = vpop.f32.mrf.mxu2 }
 0x12d   :  { %v599_v35 = vpop.f32.mrf.mxu3 }
 0x131   :  { %v912_v37 = vpop.eup %911 }
 0x132   :  { %670 = vst.msk [vmem:[%s1342_s3 + $0x60] sm:$0x3] %vm669_vm1, %v912_v37 }

// kernel: actor_forward.7
= control target key start
LH: loop header
LB: loop body
LE: loop exit
PB: predicated region body
PF: predicated region fallthrough
CT: control target
= control target key end

     0   :  { %s18859_s0 = inlined_call_operand.vmem [shape: f32[2,3136], index: 0, kind: input, shape index: {}]   ;;  %s18860_s1 = inlined_call_operand.vmem [shape: f32[2,128], index: 1, kind: input, shape index: {}]   ;;  %s18861_s2 = inlined_call_operand.vmem [shape: bf16[3136,512], index: 2, kind: input, shape index: {}]   ;;  %s18862_s3 = inlined_call_operand.vmem [shape: f32[1,512], index: 3, kind: input, shape index: {}]   ;;  %s18863_s4 = inlined_call_operand.vmem [shape: bf16[512,512], index: 4, kind: input, shape index: {}]   ;;  %s18864_s5 = inlined_call_operand.vmem [shape: bf16[128,512], index: 5, kind: input, shape index: {}]   ;;  %s18865_s6 = inlined_call_operand.vmem [shape: f32[1,512], index: 6, kind: input, shape index: {}]   ;;  %s18866_s7 = inlined_call_operand.vmem [shape: bf16[512,128], index: 7, kind: input, shape index: {}]   ;;  %s18867_s8 = inlined_call_operand.vmem [shape: f32[1,128], index: 8, kind: input, shape index: {}]   ;;  %s18868_s9 = inlined_call_operand.hbm [shape: f32[2,128], index: 9, kind: output, shape index: {}]  }
   0x1   :  { %v7845_v0 = vld [vmem:[%s18861_s2 + $0xe0] sm:$0xf]  ;;  %v11669_v1 = vld [vmem:[%s18861_s2 + $0xec] sm:$0xf0] }
   0x2   :  { %v7973_v2 = vld [vmem:[%s18861_s2 + $0x1e0] sm:$0xf]  ;;  %v7846_v3 = vor.u32 %v11669_v1, %v7845_v0  ;;  %v11701_v4 = vld [vmem:[%s18861_s2 + $0x1ec] sm:$0xf0] }
   0x3   :  { %v8101_v5 = vld [vmem:[%s18861_s2 + $0x2e0] sm:$0xf]  ;;  %v11733_v6 = vld [vmem:[%s18861_s2 + $0x2ec] sm:$0xf0]  ;;  %v7974_v7 = vor.u32 %v11701_v4, %v7973_v2 }
   0x4   :  { %v8102_v8 = vor.u32 %v11733_v6, %v8101_v5  ;;  %v8229_v9 = vld [vmem:[%s18861_s2 + $0x3e0] sm:$0xf]  ;;  %v11765_v10 = vld [vmem:[%s18861_s2 + $0x3ec] sm:$0xf0]  ;;  %4849 = vmatpush.bf16.msra.mxu0 %v7846_v3 }
   0x5   :  { %v7829_v11 = vld [vmem:[%s18861_s2 + $0xc0] sm:$0xf]  ;;  %v8230_v12 = vor.u32 %v11765_v10, %v8229_v9  ;;  %v11665_v13 = vld [vmem:[%s18861_s2 + $0xcc] sm:$0xf0]  ;;  %4862 = vmatpush.bf16.msra.mxu1 %v7974_v7 }
   0x6   :  { %v7957_v14 = vld [vmem:[%s18861_s2 + $0x1c0] sm:$0xf]  ;;  %v11697_v15 = vld [vmem:[%s18861_s2 + $0x1cc] sm:$0xf0]  ;;  %4875 = vmatpush.bf16.msra.mxu2 %v8102_v8  ;;  %v7830_v16 = vor.u32 %v11665_v13, %v7829_v11 }
   0x7   :  { %v7958_v17 = vor.u32 %v11697_v15, %v7957_v14  ;;  %v8085_v18 = vld [vmem:[%s18861_s2 + $0x2c0] sm:$0xf]  ;;  %v11729_v19 = vld [vmem:[%s18861_s2 + $0x2cc] sm:$0xf0]  ;;  %4888 = vmatpush.bf16.msra.mxu3 %v8230_v12 }
   0x8   :  { %v8213_v20 = vld [vmem:[%s18861_s2 + $0x3c0] sm:$0xf]  ;;  %v8086_v21 = vor.u32 %v11729_v19, %v8085_v18  ;;  %v11761_v22 = vld [vmem:[%s18861_s2 + $0x3cc] sm:$0xf0]  ;;  %4850 = vmatpush.bf16.msra.mxu0 %v7830_v16 }
   0x9   :  { %v7813_v23 = vld [vmem:[%s18861_s2 + $0xa0] sm:$0xf]  ;;  %v11661_v24 = vld [vmem:[%s18861_s2 + $0xac] sm:$0xf0]  ;;  %v8214_v25 = vor.u32 %v11761_v22, %v8213_v20  ;;  %4863 = vmatpush.bf16.msra.mxu1 %v7958_v17 }
   0xa   :  { %v7941_v26 = vld [vmem:[%s18861_s2 + $0x1a0] sm:$0xf]  ;;  %v11693_v27 = vld [vmem:[%s18861_s2 + $0x1ac] sm:$0xf0]  ;;  %v7814_v29 = vor.u32 %v11661_v24, %v7813_v23  ;;  %4876 = vmatpush.bf16.msra.mxu2 %v8086_v21 }
   0xb   :  { %v8069_v28 = vld [vmem:[%s18861_s2 + $0x2a0] sm:$0xf]  ;;  %v11725_v30 = vld [vmem:[%s18861_s2 + $0x2ac] sm:$0xf0]  ;;  %v7942_v33 = vor.u32 %v11693_v27, %v7941_v26  ;;  %4889 = vmatpush.bf16.msra.mxu3 %v8214_v25 }
   0xc   :  { %v8197_v31 = vld [vmem:[%s18861_s2 + $0x3a0] sm:$0xf]  ;;  %v11757_v32 = vld [vmem:[%s18861_s2 + $0x3ac] sm:$0xf0]  ;;  %v8070_v34 = vor.u32 %v11725_v30, %v8069_v28  ;;  %4851 = vmatpush.bf16.msra.mxu0 %v7814_v29 }
   0xd   :  { %v7797_v35 = vld [vmem:[%s18861_s2 + $0x80] sm:$0xf]  ;;  %v11657_v36 = vld [vmem:[%s18861_s2 + $0x8c] sm:$0xf0]  ;;  %v8198_v38 = vor.u32 %v11757_v32, %v8197_v31  ;;  %4864 = vmatpush.bf16.msra.mxu1 %v7942_v33 }
   0xe   :  { %v7925_v37 = vld [vmem:[%s18861_s2 + $0x180] sm:$0xf]  ;;  %v11689_v39 = vld [vmem:[%s18861_s2 + $0x18c] sm:$0xf0]  ;;  %v7798_v44 = vor.u32 %v11657_v36, %v7797_v35  ;;  %4877 = vmatpush.bf16.msra.mxu2 %v8070_v34 }
   0xf   :  { %v8053_v40 = vld [vmem:[%s18861_s2 + $0x280] sm:$0xf]  ;;  %v11721_v41 = vld [vmem:[%s18861_s2 + $0x28c] sm:$0xf0]  ;;  %v7926_v45 = vor.u32 %v11689_v39, %v7925_v37  ;;  %4890 = vmatpush.bf16.msra.mxu3 %v8198_v38 }
  0x10   :  { %v8181_v42 = vld [vmem:[%s18861_s2 + $0x380] sm:$0xf]  ;;  %v11753_v43 = vld [vmem:[%s18861_s2 + $0x38c] sm:$0xf0]  ;;  %v8054_v46 = vor.u32 %v11721_v41, %v8053_v40  ;;  %4852 = vmatpush.bf16.msra.mxu0 %v7798_v44 }
  0x11   :  { %v7781_v47 = vld [vmem:[%s18861_s2 + $0x60] sm:$0xf]  ;;  %v11653_v48 = vld [vmem:[%s18861_s2 + $0x6c] sm:$0xf0]  ;;  %v8182_v50 = vor.u32 %v11753_v43, %v8181_v42  ;;  %4865 = vmatpush.bf16.msra.mxu1 %v7926_v45 }
  0x12   :  { %v7909_v49 = vld [vmem:[%s18861_s2 + $0x160] sm:$0xf]  ;;  %v11685_v51 = vld [vmem:[%s18861_s2 + $0x16c] sm:$0xf0]  ;;  %v7782_v56 = vor.u32 %v11653_v48, %v7781_v47  ;;  %4878 = vmatpush.bf16.msra.mxu2 %v8054_v46 }
  0x13   :  { %v8037_v52 = vld [vmem:[%s18861_s2 + $0x260] sm:$0xf]  ;;  %v11717_v53 = vld [vmem:[%s18861_s2 + $0x26c] sm:$0xf0]  ;;  %v7910_v57 = vor.u32 %v11685_v51, %v7909_v49  ;;  %4891 = vmatpush.bf16.msra.mxu3 %v8182_v50 }
  0x14   :  { %v8165_v54 = vld [vmem:[%s18861_s2 + $0x360] sm:$0xf]  ;;  %v11749_v55 = vld [vmem:[%s18861_s2 + $0x36c] sm:$0xf0]  ;;  %v8038_v58 = vor.u32 %v11717_v53, %v8037_v52  ;;  %4853 = vmatpush.bf16.msra.mxu0 %v7782_v56 }
  0x15   :  { %v7765_v59 = vld [vmem:[%s18861_s2 + $0x40] sm:$0xf]  ;;  %v11649_v60 = vld [vmem:[%s18861_s2 + $0x4c] sm:$0xf0]  ;;  %v8166_v62 = vor.u32 %v11749_v55, %v8165_v54  ;;  %4866 = vmatpush.bf16.msra.mxu1 %v7910_v57 }
  0x16   :  { %v7893_v61 = vld [vmem:[%s18861_s2 + $0x140] sm:$0xf]  ;;  %v11681_v63 = vld [vmem:[%s18861_s2 + $0x14c] sm:$0xf0]  ;;  %v7766_v4 = vor.u32 %v11649_v60, %v7765_v59  ;;  %4879 = vmatpush.bf16.msra.mxu2 %v8038_v58 }
  0x17   :  { %v8021_v0 = vld [vmem:[%s18861_s2 + $0x240] sm:$0xf]  ;;  %v11713_v1 = vld [vmem:[%s18861_s2 + $0x24c] sm:$0xf0]  ;;  %v7894_v5 = vor.u32 %v11681_v63, %v7893_v61  ;;  %4892 = vmatpush.bf16.msra.mxu3 %v8166_v62 }
  0x18   :  { %v8149_v2 = vld [vmem:[%s18861_s2 + $0x340] sm:$0xf]  ;;  %v11745_v3 = vld [vmem:[%s18861_s2 + $0x34c] sm:$0xf0]  ;;  %v8022_v6 = vor.u32 %v11713_v1, %v8021_v0  ;;  %4854 = vmatpush.bf16.msra.mxu0 %v7766_v4 }
  0x19   :  { %v7749_v7 = vld [vmem:[%s18861_s2 + $0x20] sm:$0xf]  ;;  %v11645_v8 = vld [vmem:[%s18861_s2 + $0x2c] sm:$0xf0]  ;;  %v8150_v10 = vor.u32 %v11745_v3, %v8149_v2  ;;  %4867 = vmatpush.bf16.msra.mxu1 %v7894_v5 }
  0x1a   :  { %v7877_v9 = vld [vmem:[%s18861_s2 + $0x120] sm:$0xf]  ;;  %v11677_v11 = vld [vmem:[%s18861_s2 + $0x12c] sm:$0xf0]  ;;  %v7750_v16 = vor.u32 %v11645_v8, %v7749_v7  ;;  %4880 = vmatpush.bf16.msra.mxu2 %v8022_v6 }
  0x1b   :  { %v8005_v12 = vld [vmem:[%s18861_s2 + $0x220] sm:$0xf]  ;;  %v11709_v13 = vld [vmem:[%s18861_s2 + $0x22c] sm:$0xf0]  ;;  %v7878_v19 = vor.u32 %v11677_v11, %v7877_v9  ;;  %4893 = vmatpush.bf16.msra.mxu3 %v8150_v10 }
  0x1c   :  { %v8133_v14 = vld [vmem:[%s18861_s2 + $0x320] sm:$0xf]  ;;  %v11741_v15 = vld [vmem:[%s18861_s2 + $0x32c] sm:$0xf0]  ;;  %v8006_v20 = vor.u32 %v11709_v13, %v8005_v12  ;;  %4855 = vmatpush.bf16.msra.mxu0 %v7750_v16 }
  0x1d   :  { %v7733_v17 = vld [vmem:[%s18861_s2] sm:$0xf]  ;;  %v11641_v18 = vld [vmem:[%s18861_s2 + $0xc] sm:$0xf0]  ;;  %v8134_v24 = vor.u32 %v11741_v15, %v8133_v14  ;;  %4868 = vmatpush.bf16.msra.mxu1 %v7878_v19 }
  0x1e   :  { %v7861_v21 = vld [vmem:[%s18861_s2 + $0x100] sm:$0xf]  ;;  %v11673_v22 = vld [vmem:[%s18861_s2 + $0x10c] sm:$0xf0]  ;;  %v7734_v31 = vor.u32 %v11641_v18, %v7733_v17  ;;  %4881 = vmatpush.bf16.msra.mxu2 %v8006_v20 }
  0x1f   :  { %v7989_v23 = vld [vmem:[%s18861_s2 + $0x200] sm:$0xf]  ;;  %v11705_v25 = vld [vmem:[%s18861_s2 + $0x20c] sm:$0xf0]  ;;  %v7862_v35 = vor.u32 %v11673_v22, %v7861_v21  ;;  %4894 = vmatpush.bf16.msra.mxu3 %v8134_v24 }
  0x20   :  { %v8117_v26 = vld [vmem:[%s18861_s2 + $0x300] sm:$0xf]  ;;  %v11737_v27 = vld [vmem:[%s18861_s2 + $0x30c] sm:$0xf0]  ;;  %v7990_v36 = vor.u32 %v11705_v25, %v7989_v23  ;;  %4856 = vmatpush.bf16.msra.mxu0 %v7734_v31 }
  0x21   :  { %v8357_v28 = vld [vmem:[%s18861_s2 + $0x4e0] sm:$0xf]  ;;  %v11797_v29 = vld [vmem:[%s18861_s2 + $0x4ec] sm:$0xf0]  ;;  %v8118_v39 = vor.u32 %v11737_v27, %v8117_v26  ;;  %4869 = vmatpush.bf16.msra.mxu1 %v7862_v35 }
  0x22   :  { %v8485_v30 = vld [vmem:[%s18861_s2 + $0x5e0] sm:$0xf]  ;;  %v11829_v32 = vld [vmem:[%s18861_s2 + $0x5ec] sm:$0xf0]  ;;  %v8358_v40 = vor.u32 %v11797_v29, %v8357_v28  ;;  %4882 = vmatpush.bf16.msra.mxu2 %v7990_v36 }
  0x23   :  { %v8613_v33 = vld [vmem:[%s18861_s2 + $0x6e0] sm:$0xf]  ;;  %v11861_v34 = vld [vmem:[%s18861_s2 + $0x6ec] sm:$0xf0]  ;;  %v8486_v41 = vor.u32 %v11829_v32, %v8485_v30  ;;  %4895 = vmatpush.bf16.msra.mxu3 %v8118_v39 }
  0x24   :  { %v8741_v37 = vld [vmem:[%s18861_s2 + $0x7e0] sm:$0xf]  ;;  %v11893_v38 = vld [vmem:[%s18861_s2 + $0x7ec] sm:$0xf0]  ;;  %v8614_v42 = vor.u32 %v11861_v34, %v8613_v33  ;;  %4901 = vmatpush.bf16.msrb.mxu0 %v8358_v40 }
  0x25   :  { %v8341_v43 = vld [vmem:[%s18861_s2 + $0x4c0] sm:$0xf]  ;;  %v11793_v44 = vld [vmem:[%s18861_s2 + $0x4cc] sm:$0xf0]  ;;  %v8742_v46 = vor.u32 %v11893_v38, %v8741_v37  ;;  %4914 = vmatpush.bf16.msrb.mxu1 %v8486_v41 }
  0x26   :  { %v8469_v45 = vld [vmem:[%s18861_s2 + $0x5c0] sm:$0xf]  ;;  %v11825_v47 = vld [vmem:[%s18861_s2 + $0x5cc] sm:$0xf0]  ;;  %v8342_v52 = vor.u32 %v11793_v44, %v8341_v43  ;;  %4927 = vmatpush.bf16.msrb.mxu2 %v8614_v42 }
  0x27   :  { %v8597_v48 = vld [vmem:[%s18861_s2 + $0x6c0] sm:$0xf]  ;;  %v11857_v49 = vld [vmem:[%s18861_s2 + $0x6cc] sm:$0xf0]  ;;  %v8470_v55 = vor.u32 %v11825_v47, %v8469_v45  ;;  %4940 = vmatpush.bf16.msrb.mxu3 %v8742_v46 }
  0x28   :  { %v8725_v50 = vld [vmem:[%s18861_s2 + $0x7c0] sm:$0xf]  ;;  %v11889_v51 = vld [vmem:[%s18861_s2 + $0x7cc] sm:$0xf0]  ;;  %v8598_v56 = vor.u32 %v11857_v49, %v8597_v48  ;;  %4902 = vmatpush.bf16.msrb.mxu0 %v8342_v52 }
  0x29   :  { %v8325_v53 = vld [vmem:[%s18861_s2 + $0x4a0] sm:$0xf]  ;;  %v11789_v54 = vld [vmem:[%s18861_s2 + $0x4ac] sm:$0xf0]  ;;  %v8726_v60 = vor.u32 %v11889_v51, %v8725_v50  ;;  %4915 = vmatpush.bf16.msrb.mxu1 %v8470_v55 }
  0x2a   :  { %v8453_v57 = vld [vmem:[%s18861_s2 + $0x5a0] sm:$0xf]  ;;  %v11821_v58 = vld [vmem:[%s18861_s2 + $0x5ac] sm:$0xf0]  ;;  %v8326_v1 = vor.u32 %v11789_v54, %v8325_v53  ;;  %4928 = vmatpush.bf16.msrb.mxu2 %v8598_v56 }
  0x2b   :  { %v34_v59 = vld [vmem:[%s18859_s0] sm:$0xff]  ;;  %v11853_v62 = vld [vmem:[%s18861_s2 + $0x6ac] sm:$0xf0]  ;;  %v8454_v3 = vor.u32 %v11821_v58, %v8453_v57  ;;  %4941 = vmatpush.bf16.msrb.mxu3 %v8726_v60  ;;  %v35_v57 = vld [vmem:[%s18859_s0 + $0x8] sm:$0xff] }
  0x2c   :  { %v8581_v61 = vld [vmem:[%s18861_s2 + $0x6a0] sm:$0xf]  ;;  %48 = vst [vmem:[#allocation1] ss:$4 sm:$0xff] %v34_v59  ;;  %v11885_v0 = vld [vmem:[%s18861_s2 + $0x7ac] sm:$0xf0]  ;;  %4903 = vmatpush.bf16.msrb.mxu0 %v8326_v1 }
  0x2d   :  { %v8709_v63 = vld [vmem:[%s18861_s2 + $0x7a0] sm:$0xf]  ;;  %v8582_v4 = vor.u32 %v11853_v62, %v8581_v61  ;;  %v11785_v5 = vld [vmem:[%s18861_s2 + $0x48c] sm:$0xf0]  ;;  %4916 = vmatpush.bf16.msrb.mxu1 %v8454_v3  ;;  %50 = vst [vmem:[#allocation1 + $0x20] ss:$4 sm:$0xff] %v35_v57 }
  0x2e   :  { %v8309_v2 = vld [vmem:[%s18861_s2 + $0x480] sm:$0xf]  ;;  %v11817_v7 = vld [vmem:[%s18861_s2 + $0x58c] sm:$0xf0]  ;;  %v8710_v8 = vor.u32 %v11885_v0, %v8709_v63 }
  0x2f   :  { %v8437_v6 = vld [vmem:[%s18861_s2 + $0x580] sm:$0xf]  ;;  %v11849_v10 = vld [vmem:[%s18861_s2 + $0x68c] sm:$0xf0]  ;;  %v8310_v15 = vor.u32 %v11785_v5, %v8309_v2  ;;  %4929 = vmatpush.bf16.msrb.mxu2 %v8582_v4 }
  0x30   :  { %v8565_v9 = vld [vmem:[%s18861_s2 + $0x680] sm:$0xf]  ;;  %v11881_v12 = vld [vmem:[%s18861_s2 + $0x78c] sm:$0xf0]  ;;  %v8438_v21 = vor.u32 %v11817_v7, %v8437_v6  ;;  %4942 = vmatpush.bf16.msrb.mxu3 %v8710_v8 }
  0x31   :  { %v8693_v11 = vld [vmem:[%s18861_s2 + $0x780] sm:$0xf]  ;;  %v11781_v14 = vld [vmem:[%s18861_s2 + $0x46c] sm:$0xf0]  ;;  %v8566_v22 = vor.u32 %v11849_v10, %v8565_v9  ;;  %4904 = vmatpush.bf16.msrb.mxu0 %v8310_v15 }
  0x32   :  { %v8293_v13 = vld [vmem:[%s18861_s2 + $0x460] sm:$0xf]  ;;  %v11813_v17 = vld [vmem:[%s18861_s2 + $0x56c] sm:$0xf0]  ;;  %v8694_v25 = vor.u32 %v11881_v12, %v8693_v11  ;;  %4917 = vmatpush.bf16.msrb.mxu1 %v8438_v21 }
  0x33   :  { %v8421_v16 = vld [vmem:[%s18861_s2 + $0x560] sm:$0xf]  ;;  %v11845_v19 = vld [vmem:[%s18861_s2 + $0x66c] sm:$0xf0]  ;;  %v8294_v34 = vor.u32 %v11781_v14, %v8293_v13  ;;  %4930 = vmatpush.bf16.msrb.mxu2 %v8566_v22 }
  0x34   :  { %v8549_v18 = vld [vmem:[%s18861_s2 + $0x660] sm:$0xf]  ;;  %v36_v20 = vld [vmem:[%s18859_s0 + $0x10] sm:$0xff]  ;;  %v54_v28 = vld.sshfl [vmem:[#allocation1 + $0x18] sm:$0xff pattern:$0x73625140]  ;;  %v8422_v35 = vor.u32 %v11813_v17, %v8421_v16  ;;  %4943 = vmatpush.bf16.msrb.mxu3 %v8694_v25 }
  0x35   :  { %v53_v23 = vld.sshfl [vmem:[#allocation1 + $0x10] sm:$0xff pattern:$0x73625140]  ;;  %v51_v24 = vld.sshfl [vmem:[#allocation1] sm:$0xff pattern:$0x73625140]  ;;  %v13037_v32 = vpack.c.bf16 %v54_v28, %v54_v28  ;;  %v8550_v36 = vor.u32 %v11845_v19, %v8549_v18  ;;  %4905 = vmatpush.bf16.msrb.mxu0 %v8294_v34 }
  0x36   :  { %v13027_v26 = vpack.c.bf16 %v53_v23, %v53_v23  ;;  %v13029_v27 = vpack.c.bf16 %v51_v24, %v51_v24  ;;  %v52_v29 = vld.sshfl [vmem:[#allocation1 + $0x8] sm:$0xff pattern:$0x73625140]  ;;  %v8677_v30 = vld [vmem:[%s18861_s2 + $0x760] sm:$0xf]  ;;  %4918 = vmatpush.bf16.msrb.mxu1 %v8422_v35 }
  0x37   :  { %v11877_v31 = vld [vmem:[%s18861_s2 + $0x76c] sm:$0xf0]  ;;  %59 = vst [vmem:[#allocation1] ss:$4 sm:$0xff] %v36_v20  ;;  %v13039_v33 = vpack.c.bf16 %v52_v29, %v52_v29  ;;  %v8277_v37 = vld [vmem:[%s18861_s2 + $0x440] sm:$0xf]  ;;  %4896 = vmatmul.bf16.vlgmr.msra.gmra.mxu3 %v13037_v32  ;;  %4931 = vmatpush.bf16.msrb.mxu2 %v8550_v36 }
  0x38   :  { %4883 = vmatmul.bf16.vlgmr.msra.gmra.mxu2 %v13027_v26  ;;  %v11777_v38 = vld [vmem:[%s18861_s2 + $0x44c] sm:$0xf0]  ;;  %v8405_v39 = vld [vmem:[%s18861_s2 + $0x540] sm:$0xf]  ;;  %v8678_v40 = vor.u32 %v11877_v31, %v8677_v30  ;;  %4857 = vmatmul.bf16.vlgmr.msra.gmra.mxu0 %v13029_v27  ;;  %v37_v20 = vld [vmem:[%s18859_s0 + $0x18] sm:$0xff] }
  0x39   :  { %v11809_v41 = vld [vmem:[%s18861_s2 + $0x54c] sm:$0xf0]  ;;  %v8533_v42 = vld [vmem:[%s18861_s2 + $0x640] sm:$0xf]  ;;  %4870 = vmatmul.bf16.vlgmr.msra.gmra.mxu1 %v13039_v33  ;;  %v8278_v46 = vor.u32 %v11777_v38, %v8277_v37 }
  0x3a   :  { %v11841_v43 = vld [vmem:[%s18861_s2 + $0x64c] sm:$0xf0]  ;;  %v8661_v44 = vld [vmem:[%s18861_s2 + $0x740] sm:$0xf]  ;;  %v8406_v49 = vor.u32 %v11809_v41, %v8405_v39  ;;  %4944 = vmatpush.bf16.msrb.mxu3 %v8678_v40 }
  0x3b   :  { %v11873_v45 = vld [vmem:[%s18861_s2 + $0x74c] sm:$0xf0]  ;;  %v8261_v47 = vld [vmem:[%s18861_s2 + $0x420] sm:$0xf]  ;;  %v8534_v50 = vor.u32 %v11841_v43, %v8533_v42  ;;  %4906 = vmatpush.bf16.msrb.mxu0 %v8278_v46 }
  0x3c   :  { %v11773_v48 = vld [vmem:[%s18861_s2 + $0x42c] sm:$0xf0]  ;;  %v8389_v51 = vld [vmem:[%s18861_s2 + $0x520] sm:$0xf]  ;;  %v8662_v54 = vor.u32 %v11873_v45, %v8661_v44  ;;  %4919 = vmatpush.bf16.msrb.mxu1 %v8406_v49 }
  0x3d   :  { %v11805_v52 = vld [vmem:[%s18861_s2 + $0x52c] sm:$0xf0]  ;;  %v8517_v53 = vld [vmem:[%s18861_s2 + $0x620] sm:$0xf]  ;;  %v8262_v60 = vor.u32 %v11773_v48, %v8261_v47  ;;  %4932 = vmatpush.bf16.msrb.mxu2 %v8534_v50 }
  0x3e   :  { %v11837_v55 = vld [vmem:[%s18861_s2 + $0x62c] sm:$0xf0]  ;;  %v8645_v56 = vld [vmem:[%s18861_s2 + $0x720] sm:$0xf]  ;;  %v8390_v0 = vor.u32 %v11805_v52, %v8389_v51  ;;  %4945 = vmatpush.bf16.msrb.mxu3 %v8662_v54 }
  0x3f   :  { %v11869_v58 = vld [vmem:[%s18861_s2 + $0x72c] sm:$0xf0]  ;;  %v8245_v59 = vld [vmem:[%s18861_s2 + $0x400] sm:$0xf]  ;;  %v8518_v1 = vor.u32 %v11837_v55, %v8517_v53  ;;  %4907 = vmatpush.bf16.msrb.mxu0 %v8262_v60 }
  0x40   :  { %v11769_v61 = vld [vmem:[%s18861_s2 + $0x40c] sm:$0xf0]  ;;  %v8373_v62 = vld [vmem:[%s18861_s2 + $0x500] sm:$0xf]  ;;  %v8646_v5 = vor.u32 %v11869_v58, %v8645_v56  ;;  %4920 = vmatpush.bf16.msrb.mxu1 %v8390_v0 }
  0x41   :  { %v11801_v63 = vld [vmem:[%s18861_s2 + $0x50c] sm:$0xf0]  ;;  %v8501_v2 = vld [vmem:[%s18861_s2 + $0x600] sm:$0xf]  ;;  %v8246_v12 = vor.u32 %v11769_v61, %v8245_v59  ;;  %4933 = vmatpush.bf16.msrb.mxu2 %v8518_v1 }
  0x42   :  { %v11833_v3 = vld [vmem:[%s18861_s2 + $0x60c] sm:$0xf0]  ;;  %v8629_v4 = vld [vmem:[%s18861_s2 + $0x700] sm:$0xf]  ;;  %v8374_v16 = vor.u32 %v11801_v63, %v8373_v62  ;;  %4946 = vmatpush.bf16.msrb.mxu3 %v8646_v5 }
  0x43   :  { %v11865_v6 = vld [vmem:[%s18861_s2 + $0x70c] sm:$0xf0]  ;;  %v8869_v7 = vld [vmem:[%s18861_s2 + $0x8e0] sm:$0xf]  ;;  %v8502_v17 = vor.u32 %v11833_v3, %v8501_v2  ;;  %4908 = vmatpush.bf16.msrb.mxu0 %v8246_v12 }
  0x44   :  { %v11925_v8 = vld [vmem:[%s18861_s2 + $0x8ec] sm:$0xf0]  ;;  %v8997_v9 = vld [vmem:[%s18861_s2 + $0x9e0] sm:$0xf]  ;;  %v8630_v21 = vor.u32 %v11865_v6, %v8629_v4  ;;  %4921 = vmatpush.bf16.msrb.mxu1 %v8374_v16 }
  0x45   :  { %v11957_v10 = vld [vmem:[%s18861_s2 + $0x9ec] sm:$0xf0]  ;;  %v9125_v11 = vld [vmem:[%s18861_s2 + $0xae0] sm:$0xf]  ;;  %v8870_v22 = vor.u32 %v11925_v8, %v8869_v7  ;;  %4934 = vmatpush.bf16.msrb.mxu2 %v8502_v17 }
  0x46   :  { %v11989_v13 = vld [vmem:[%s18861_s2 + $0xaec] sm:$0xf0]  ;;  %v9253_v14 = vld [vmem:[%s18861_s2 + $0xbe0] sm:$0xf]  ;;  %v8998_v29 = vor.u32 %v11957_v10, %v8997_v9  ;;  %4947 = vmatpush.bf16.msrb.mxu3 %v8630_v21 }
  0x47   :  { %v12021_v15 = vld [vmem:[%s18861_s2 + $0xbec] sm:$0xf0]  ;;  %v8853_v18 = vld [vmem:[%s18861_s2 + $0x8c0] sm:$0xf]  ;;  %v9126_v30 = vor.u32 %v11989_v13, %v9125_v11  ;;  %4953 = vmatpush.bf16.msra.mxu0 %v8870_v22 }
  0x48   :  { %v11921_v19 = vld [vmem:[%s18861_s2 + $0x8cc] sm:$0xf0]  ;;  %v8981_v23 = vld [vmem:[%s18861_s2 + $0x9c0] sm:$0xf]  ;;  %v9254_v35 = vor.u32 %v12021_v15, %v9253_v14  ;;  %4966 = vmatpush.bf16.msra.mxu1 %v8998_v29 }
  0x49   :  { %v11953_v24 = vld [vmem:[%s18861_s2 + $0x9cc] sm:$0xf0]  ;;  %v55_v28 = vld.sshfl [vmem:[#allocation1 + $0x20] sm:$0xff pattern:$0x73625140]  ;;  %v8854_v43 = vor.u32 %v11921_v19, %v8853_v18  ;;  %4979 = vmatpush.bf16.msra.mxu2 %v9126_v30 }
  0x4a   :  { %v57_v25 = vld.sshfl [vmem:[#allocation1 + $0x30] sm:$0xff pattern:$0x73625140]  ;;  %v58_v31 = vld.sshfl [vmem:[#allocation1 + $0x38] sm:$0xff pattern:$0x73625140]  ;;  %v13173_v41 = vpack.c.bf16 %v55_v28, %v55_v28  ;;  %v8982_v45 = vor.u32 %v11953_v24, %v8981_v23  ;;  %4992 = vmatpush.bf16.msra.mxu3 %v9254_v35 }
  0x4b   :  { %v56_v34 = vld.sshfl [vmem:[#allocation1 + $0x28] sm:$0xff pattern:$0x73625140]  ;;  %v9109_v36 = vld [vmem:[%s18861_s2 + $0xac0] sm:$0xf]  ;;  %v13165_v38 = vpack.c.bf16 %v57_v25, %v57_v25  ;;  %v13175_v42 = vpack.c.bf16 %v58_v31, %v58_v31  ;;  %4954 = vmatpush.bf16.msra.mxu0 %v8854_v43 }
  0x4c   :  { %v11985_v37 = vld [vmem:[%s18861_s2 + $0xacc] sm:$0xf0]  ;;  %60 = vst [vmem:[#allocation1 + $0x20] ss:$4 sm:$0xff] %v37_v20  ;;  %v9237_v39 = vld [vmem:[%s18861_s2 + $0xbc0] sm:$0xf]  ;;  %v13177_v44 = vpack.c.bf16 %v56_v34, %v56_v34  ;;  %4909 = vmatmul.bf16.vlgmr.msrb.gmra.mxu0 %v13173_v41  ;;  %4967 = vmatpush.bf16.msra.mxu1 %v8982_v45 }
  0x4d   :  { %v12017_v40 = vld [vmem:[%s18861_s2 + $0xbcc] sm:$0xf0]  ;;  %v9110_v46 = vor.u32 %v11985_v37, %v9109_v36  ;;  %v8837_v47 = vld [vmem:[%s18861_s2 + $0x8a0] sm:$0xf]  ;;  %4935 = vmatmul.bf16.vlgmr.msrb.gmra.mxu2 %v13165_v38  ;;  %4948 = vmatmul.bf16.vlgmr.msrb.gmra.mxu3 %v13175_v42 }
  0x4e   :  { %v11917_v48 = vld [vmem:[%s18861_s2 + $0x8ac] sm:$0xf0]  ;;  %v8965_v49 = vld [vmem:[%s18861_s2 + $0x9a0] sm:$0xf]  ;;  %v9238_v50 = vor.u32 %v12017_v40, %v9237_v39  ;;  %4922 = vmatmul.bf16.vlgmr.msrb.gmra.mxu1 %v13177_v44 }
  0x4f   :  { %v11949_v51 = vld [vmem:[%s18861_s2 + $0x9ac] sm:$0xf0]  ;;  %v9093_v52 = vld [vmem:[%s18861_s2 + $0xaa0] sm:$0xf]  ;;  %v8838_v56 = vor.u32 %v11917_v48, %v8837_v47  ;;  %4980 = vmatpush.bf16.msra.mxu2 %v9110_v46 }
  0x50   :  { %v11981_v53 = vld [vmem:[%s18861_s2 + $0xaac] sm:$0xf0]  ;;  %v9221_v54 = vld [vmem:[%s18861_s2 + $0xba0] sm:$0xf]  ;;  %v8966_v57 = vor.u32 %v11949_v51, %v8965_v49  ;;  %4993 = vmatpush.bf16.msra.mxu3 %v9238_v50 }
  0x51   :  { %v12013_v55 = vld [vmem:[%s18861_s2 + $0xbac] sm:$0xf0]  ;;  %v9094_v58 = vor.u32 %v11981_v53, %v9093_v52  ;;  %v8821_v59 = vld [vmem:[%s18861_s2 + $0x880] sm:$0xf]  ;;  %4955 = vmatpush.bf16.msra.mxu0 %v8838_v56 }
  0x52   :  { %v11913_v60 = vld [vmem:[%s18861_s2 + $0x88c] sm:$0xf0]  ;;  %v8949_v61 = vld [vmem:[%s18861_s2 + $0x980] sm:$0xf]  ;;  %v9222_v62 = vor.u32 %v12013_v55, %v9221_v54  ;;  %4968 = vmatpush.bf16.msra.mxu1 %v8966_v57 }
  0x53   :  { %v11945_v63 = vld [vmem:[%s18861_s2 + $0x98c] sm:$0xf0]  ;;  %v9077_v0 = vld [vmem:[%s18861_s2 + $0xa80] sm:$0xf]  ;;  %v8822_v4 = vor.u32 %v11913_v60, %v8821_v59  ;;  %4981 = vmatpush.bf16.msra.mxu2 %v9094_v58 }
  0x54   :  { %v11977_v1 = vld [vmem:[%s18861_s2 + $0xa8c] sm:$0xf0]  ;;  %v9205_v2 = vld [vmem:[%s18861_s2 + $0xb80] sm:$0xf]  ;;  %v8950_v8 = vor.u32 %v11945_v63, %v8949_v61  ;;  %4994 = vmatpush.bf16.msra.mxu3 %v9222_v62 }
  0x55   :  { %v12009_v3 = vld [vmem:[%s18861_s2 + $0xb8c] sm:$0xf0]  ;;  %v8805_v5 = vld [vmem:[%s18861_s2 + $0x860] sm:$0xf]  ;;  %v9078_v9 = vor.u32 %v11977_v1, %v9077_v0  ;;  %4956 = vmatpush.bf16.msra.mxu0 %v8822_v4 }
  0x56   :  { %v11909_v6 = vld [vmem:[%s18861_s2 + $0x86c] sm:$0xf0]  ;;  %v8933_v7 = vld [vmem:[%s18861_s2 + $0x960] sm:$0xf]  ;;  %v9206_v13 = vor.u32 %v12009_v3, %v9205_v2  ;;  %4969 = vmatpush.bf16.msra.mxu1 %v8950_v8 }
  0x57   :  { %v11941_v10 = vld [vmem:[%s18861_s2 + $0x96c] sm:$0xf0]  ;;  %v9061_v11 = vld [vmem:[%s18861_s2 + $0xa60] sm:$0xf]  ;;  %v8806_v20 = vor.u32 %v11909_v6, %v8805_v5  ;;  %4982 = vmatpush.bf16.msra.mxu2 %v9078_v9 }
  0x58   :  { %v11973_v12 = vld [vmem:[%s18861_s2 + $0xa6c] sm:$0xf0]  ;;  %v9189_v14 = vld [vmem:[%s18861_s2 + $0xb60] sm:$0xf]  ;;  %v8934_v23 = vor.u32 %v11941_v10, %v8933_v7  ;;  %4995 = vmatpush.bf16.msra.mxu3 %v9206_v13 }
  0x59   :  { %v12005_v15 = vld [vmem:[%s18861_s2 + $0xb6c] sm:$0xf0]  ;;  %v38_v16 = vld [vmem:[%s18859_s0 + $0x20] sm:$0xff]  ;;  %v13265_v21 = vld.sshfl [vmem:[#allocation1 + $0x8] sm:$0xff pattern:$0x73625140]  ;;  %v9062_v24 = vor.u32 %v11973_v12, %v9061_v11  ;;  %4957 = vmatpush.bf16.msra.mxu0 %v8806_v20 }
  0x5a   :  { %v8789_v17 = vld [vmem:[%s18861_s2 + $0x840] sm:$0xf]  ;;  %v13263_v19 = vld.sshfl [vmem:[#allocation1 + $0x10] sm:$0xff pattern:$0x73625140]  ;;  %v9190_v29 = vor.u32 %v12005_v15, %v9189_v14  ;;  %4970 = vmatpush.bf16.msra.mxu1 %v8934_v23 }
  0x5b   :  { %v13261_v18 = vld.sshfl [vmem:[#allocation1] sm:$0xff pattern:$0x73625140]  ;;  %v13267_v22 = vld.sshfl [vmem:[#allocation1 + $0x18] sm:$0xff pattern:$0x73625140]  ;;  %4983 = vmatpush.bf16.msra.mxu2 %v9062_v24 }
  0x5c   :  { %v11905_v25 = vld [vmem:[%s18861_s2 + $0x84c] sm:$0xf0]  ;;  %v8917_v28 = vld [vmem:[%s18861_s2 + $0x940] sm:$0xf]  ;;  %69 = vst [vmem:[#allocation1] ss:$4 sm:$0xff] %v38_v16  ;;  %4996 = vmatpush.bf16.msra.mxu3 %v9190_v29  ;;  %v13373_v24 = vpack.c.bf16 %v13261_v18, %v13261_v18  ;;  %v13390_v18 = vpack.c.bf16 %v13265_v21, %v13265_v21 }
  0x5d   :  { %v11937_v30 = vld [vmem:[%s18861_s2 + $0x94c] sm:$0xf0]  ;;  %v9045_v31 = vld [vmem:[%s18861_s2 + $0xa40] sm:$0xf]  ;;  %v8790_v37 = vor.u32 %v11905_v25, %v8789_v17 }
  0x5e   :  { %v11969_v34 = vld [vmem:[%s18861_s2 + $0xa4c] sm:$0xf0]  ;;  %v9173_v35 = vld [vmem:[%s18861_s2 + $0xb40] sm:$0xf]  ;;  %v8918_v39 = vor.u32 %v11937_v30, %v8917_v28  ;;  %v13386_v30 = vpack.c.bf16 %v13263_v19, %v13263_v19 }
  0x5f   :  { %v12001_v36 = vld [vmem:[%s18861_s2 + $0xb4c] sm:$0xf0]  ;;  %v9046_v40 = vor.u32 %v11969_v34, %v9045_v31  ;;  %v8773_v43 = vld [vmem:[%s18861_s2 + $0x820] sm:$0xf]  ;;  %4958 = vmatpush.bf16.msra.mxu0 %v8790_v37 }
  0x60   :  { %v11901_v45 = vld [vmem:[%s18861_s2 + $0x82c] sm:$0xf0]  ;;  %v8901_v46 = vld [vmem:[%s18861_s2 + $0x920] sm:$0xf]  ;;  %v9174_v47 = vor.u32 %v12001_v36, %v9173_v35  ;;  %4971 = vmatpush.bf16.msra.mxu1 %v8918_v39  ;;  %v13400_v35 = vpack.c.bf16 %v13267_v22, %v13267_v22 }
  0x61   :  { %v11933_v48 = vld [vmem:[%s18861_s2 + $0x92c] sm:$0xf0]  ;;  %v9029_v49 = vld [vmem:[%s18861_s2 + $0xa20] sm:$0xf]  ;;  %v8774_v53 = vor.u32 %v11901_v45, %v8773_v43  ;;  %4984 = vmatpush.bf16.msra.mxu2 %v9046_v40 }
  0x62   :  { %v11965_v50 = vld [vmem:[%s18861_s2 + $0xa2c] sm:$0xf0]  ;;  %v9157_v51 = vld [vmem:[%s18861_s2 + $0xb20] sm:$0xf]  ;;  %v8902_v56 = vor.u32 %v11933_v48, %v8901_v46  ;;  %4997 = vmatpush.bf16.msra.mxu3 %v9174_v47 }
  0x63   :  { %v11997_v52 = vld [vmem:[%s18861_s2 + $0xb2c] sm:$0xf0]  ;;  %v8757_v54 = vld [vmem:[%s18861_s2 + $0x800] sm:$0xf]  ;;  %v9030_v57 = vor.u32 %v11965_v50, %v9029_v49  ;;  %4959 = vmatpush.bf16.msra.mxu0 %v8774_v53 }
  0x64   :  { %v11897_v55 = vld [vmem:[%s18861_s2 + $0x80c] sm:$0xf0]  ;;  %v8885_v58 = vld [vmem:[%s18861_s2 + $0x900] sm:$0xf]  ;;  %v9158_v61 = vor.u32 %v11997_v52, %v9157_v51  ;;  %4972 = vmatpush.bf16.msra.mxu1 %v8902_v56  ;;  %v39_v56 = vld [vmem:[%s18859_s0 + $0x28] sm:$0xff] }
  0x65   :  { %v11929_v59 = vld [vmem:[%s18861_s2 + $0x90c] sm:$0xf0]  ;;  %v9013_v60 = vld [vmem:[%s18861_s2 + $0xa00] sm:$0xf]  ;;  %v8758_v4 = vor.u32 %v11897_v55, %v8757_v54  ;;  %4985 = vmatpush.bf16.msra.mxu2 %v9030_v57 }
  0x66   :  { %v11961_v62 = vld [vmem:[%s18861_s2 + $0xa0c] sm:$0xf0]  ;;  %v9141_v63 = vld [vmem:[%s18861_s2 + $0xb00] sm:$0xf]  ;;  %v8886_v8 = vor.u32 %v11929_v59, %v8885_v58  ;;  %4998 = vmatpush.bf16.msra.mxu3 %v9158_v61 }
  0x67   :  { %v11993_v0 = vld [vmem:[%s18861_s2 + $0xb0c] sm:$0xf0]  ;;  %v9381_v1 = vld [vmem:[%s18861_s2 + $0xce0] sm:$0xf]  ;;  %v9014_v9 = vor.u32 %v11961_v62, %v9013_v60  ;;  %4960 = vmatpush.bf16.msra.mxu0 %v8758_v4 }
  0x68   :  { %v12053_v2 = vld [vmem:[%s18861_s2 + $0xcec] sm:$0xf0]  ;;  %v9509_v3 = vld [vmem:[%s18861_s2 + $0xde0] sm:$0xf]  ;;  %v9142_v12 = vor.u32 %v11993_v0, %v9141_v63  ;;  %4973 = vmatpush.bf16.msra.mxu1 %v8886_v8 }
  0x69   :  { %v12085_v5 = vld [vmem:[%s18861_s2 + $0xdec] sm:$0xf0]  ;;  %v9637_v6 = vld [vmem:[%s18861_s2 + $0xee0] sm:$0xf]  ;;  %v9382_v13 = vor.u32 %v12053_v2, %v9381_v1  ;;  %4986 = vmatpush.bf16.msra.mxu2 %v9014_v9 }
  0x6a   :  { %v12117_v7 = vld [vmem:[%s18861_s2 + $0xeec] sm:$0xf0]  ;;  %v9765_v10 = vld [vmem:[%s18861_s2 + $0xfe0] sm:$0xf]  ;;  %v9510_v14 = vor.u32 %v12085_v5, %v9509_v3  ;;  %4999 = vmatpush.bf16.msra.mxu3 %v9142_v12  ;;  %4961 = vmatmul.bf16.vlgmr.msra.gmra.mxu0 %v13373_v24 }
  0x6b   :  { %v12149_v11 = vld [vmem:[%s18861_s2 + $0xfec] sm:$0xf0]  ;;  %v9638_v15 = vor.u32 %v12117_v7, %v9637_v6  ;;  %v9365_v16 = vld [vmem:[%s18861_s2 + $0xcc0] sm:$0xf]  ;;  %5005 = vmatpush.bf16.msrb.mxu0 %v9382_v13  ;;  %4974 = vmatmul.bf16.vlgmr.msra.gmra.mxu1 %v13390_v18 }
  0x6c   :  { %v12049_v17 = vld [vmem:[%s18861_s2 + $0xccc] sm:$0xf0]  ;;  %v9493_v20 = vld [vmem:[%s18861_s2 + $0xdc0] sm:$0xf]  ;;  %v9766_v23 = vor.u32 %v12149_v11, %v9765_v10  ;;  %5018 = vmatpush.bf16.msrb.mxu1 %v9510_v14  ;;  %4987 = vmatmul.bf16.vlgmr.msra.gmra.mxu2 %v13386_v30 }
  0x6d   :  { %v12081_v25 = vld [vmem:[%s18861_s2 + $0xdcc] sm:$0xf0]  ;;  %v9621_v28 = vld [vmem:[%s18861_s2 + $0xec0] sm:$0xf]  ;;  %v9366_v19 = vor.u32 %v12049_v17, %v9365_v16  ;;  %5031 = vmatpush.bf16.msrb.mxu2 %v9638_v15  ;;  %5000 = vmatmul.bf16.vlgmr.msra.gmra.mxu3 %v13400_v35 }
  0x6e   :  { %v12113_v29 = vld [vmem:[%s18861_s2 + $0xecc] sm:$0xf0]  ;;  %v9749_v31 = vld [vmem:[%s18861_s2 + $0xfc0] sm:$0xf]  ;;  %v9494_v36 = vor.u32 %v12081_v25, %v9493_v20  ;;  %5044 = vmatpush.bf16.msrb.mxu3 %v9766_v23 }
  0x6f   :  { %v12145_v34 = vld [vmem:[%s18861_s2 + $0xfcc] sm:$0xf0]  ;;  %v9349_v21 = vld [vmem:[%s18861_s2 + $0xca0] sm:$0xf]  ;;  %v9622_v37 = vor.u32 %v12113_v29, %v9621_v28  ;;  %5006 = vmatpush.bf16.msrb.mxu0 %v9366_v19 }
  0x70   :  { %v12045_v39 = vld [vmem:[%s18861_s2 + $0xcac] sm:$0xf0]  ;;  %v9477_v40 = vld [vmem:[%s18861_s2 + $0xda0] sm:$0xf]  ;;  %v9750_v43 = vor.u32 %v12145_v34, %v9749_v31  ;;  %5019 = vmatpush.bf16.msrb.mxu1 %v9494_v36 }
  0x71   :  { %v12077_v22 = vld [vmem:[%s18861_s2 + $0xdac] sm:$0xf0]  ;;  %v9605_v45 = vld [vmem:[%s18861_s2 + $0xea0] sm:$0xf]  ;;  %v9350_v51 = vor.u32 %v12045_v39, %v9349_v21  ;;  %5032 = vmatpush.bf16.msrb.mxu2 %v9622_v37 }
  0x72   :  { %v12109_v46 = vld [vmem:[%s18861_s2 + $0xeac] sm:$0xf0]  ;;  %v9733_v47 = vld [vmem:[%s18861_s2 + $0xfa0] sm:$0xf]  ;;  %v9478_v57 = vor.u32 %v12077_v22, %v9477_v40  ;;  %5045 = vmatpush.bf16.msrb.mxu3 %v9750_v43 }
  0x73   :  { %v12141_v48 = vld [vmem:[%s18861_s2 + $0xfac] sm:$0xf0]  ;;  %v9333_v49 = vld [vmem:[%s18861_s2 + $0xc80] sm:$0xf]  ;;  %v9606_v58 = vor.u32 %v12109_v46, %v9605_v45  ;;  %5007 = vmatpush.bf16.msrb.mxu0 %v9350_v51 }
  0x74   :  { %v12041_v50 = vld [vmem:[%s18861_s2 + $0xc8c] sm:$0xf0]  ;;  %v9461_v52 = vld [vmem:[%s18861_s2 + $0xd80] sm:$0xf]  ;;  %v9734_v61 = vor.u32 %v12141_v48, %v9733_v47  ;;  %5020 = vmatpush.bf16.msrb.mxu1 %v9478_v57 }
  0x75   :  { %v12073_v53 = vld [vmem:[%s18861_s2 + $0xd8c] sm:$0xf0]  ;;  %v9589_v54 = vld [vmem:[%s18861_s2 + $0xe80] sm:$0xf]  ;;  %v9334_v2 = vor.u32 %v12041_v50, %v9333_v49  ;;  %5033 = vmatpush.bf16.msrb.mxu2 %v9606_v58 }
  0x76   :  { %v12105_v55 = vld [vmem:[%s18861_s2 + $0xe8c] sm:$0xf0]  ;;  %v13451_v59 = vld.sshfl [vmem:[#allocation1 + $0x20] sm:$0xff pattern:$0x73625140]  ;;  %v9462_v3 = vor.u32 %v12073_v53, %v9461_v52  ;;  %5046 = vmatpush.bf16.msrb.mxu3 %v9734_v61 }
  0x77   :  { %v13453_v60 = vld.sshfl [vmem:[#allocation1 + $0x30] sm:$0xff pattern:$0x73625140]  ;;  %v13455_v62 = vld.sshfl [vmem:[#allocation1 + $0x28] sm:$0xff pattern:$0x73625140]  ;;  %v9590_v4 = vor.u32 %v12105_v55, %v9589_v54  ;;  %5008 = vmatpush.bf16.msrb.mxu0 %v9334_v2 }
  0x78   :  { %v13457_v63 = vld.sshfl [vmem:[#allocation1 + $0x38] sm:$0xff pattern:$0x73625140]  ;;  %v9717_v0 = vld [vmem:[%s18861_s2 + $0xf80] sm:$0xf]  ;;  %5021 = vmatpush.bf16.msrb.mxu1 %v9462_v3 }
  0x79   :  { %v12137_v1 = vld [vmem:[%s18861_s2 + $0xf8c] sm:$0xf0]  ;;  %70 = vst [vmem:[#allocation1 + $0x20] ss:$4 sm:$0xff] %v39_v56  ;;  %v9317_v5 = vld [vmem:[%s18861_s2 + $0xc60] sm:$0xf]  ;;  %5034 = vmatpush.bf16.msrb.mxu2 %v9590_v4 }
  0x7a   :  { %v12037_v6 = vld [vmem:[%s18861_s2 + $0xc6c] sm:$0xf0]  ;;  %v9445_v7 = vld [vmem:[%s18861_s2 + $0xd60] sm:$0xf]  ;;  %v9718_v8 = vor.u32 %v12137_v1, %v9717_v0 }
  0x7b   :  { %v12069_v9 = vld [vmem:[%s18861_s2 + $0xd6c] sm:$0xf0]  ;;  %v9573_v10 = vld [vmem:[%s18861_s2 + $0xe60] sm:$0xf]  ;;  %v9318_v14 = vor.u32 %v12037_v6, %v9317_v5 }
  0x7c   :  { %v12101_v11 = vld [vmem:[%s18861_s2 + $0xe6c] sm:$0xf0]  ;;  %v9701_v12 = vld [vmem:[%s18861_s2 + $0xf60] sm:$0xf]  ;;  %v9446_v15 = vor.u32 %v12069_v9, %v9445_v7  ;;  %5047 = vmatpush.bf16.msrb.mxu3 %v9718_v8 }
  0x7d   :  { %v12133_v13 = vld [vmem:[%s18861_s2 + $0xf6c] sm:$0xf0]  ;;  %v9574_v16 = vor.u32 %v12101_v11, %v9573_v10  ;;  %v9301_v17 = vld [vmem:[%s18861_s2 + $0xc40] sm:$0xf]  ;;  %5009 = vmatpush.bf16.msrb.mxu0 %v9318_v14 }
  0x7e   :  { %v12033_v20 = vld [vmem:[%s18861_s2 + $0xc4c] sm:$0xf0]  ;;  %v9429_v23 = vld [vmem:[%s18861_s2 + $0xd40] sm:$0xf]  ;;  %v9702_v25 = vor.u32 %v12133_v13, %v9701_v12  ;;  %5022 = vmatpush.bf16.msrb.mxu1 %v9446_v15 }
  0x7f   :  { %v12065_v28 = vld [vmem:[%s18861_s2 + $0xd4c] sm:$0xf0]  ;;  %v9557_v29 = vld [vmem:[%s18861_s2 + $0xe40] sm:$0xf]  ;;  %v9302_v21 = vor.u32 %v12033_v20, %v9301_v17  ;;  %5035 = vmatpush.bf16.msrb.mxu2 %v9574_v16 }
  0x80   :  { %v12097_v31 = vld [vmem:[%s18861_s2 + $0xe4c] sm:$0xf0]  ;;  %v9685_v34 = vld [vmem:[%s18861_s2 + $0xf40] sm:$0xf]  ;;  %v9430_v36 = vor.u32 %v12065_v28, %v9429_v23  ;;  %5048 = vmatpush.bf16.msrb.mxu3 %v9702_v25 }
  0x81   :  { %v12129_v19 = vld [vmem:[%s18861_s2 + $0xf4c] sm:$0xf0]  ;;  %v9558_v37 = vor.u32 %v12097_v31, %v9557_v29  ;;  %v9285_v39 = vld [vmem:[%s18861_s2 + $0xc20] sm:$0xf]  ;;  %5010 = vmatpush.bf16.msrb.mxu0 %v9302_v21 }
  0x82   :  { %v12029_v40 = vld [vmem:[%s18861_s2 + $0xc2c] sm:$0xf0]  ;;  %v9413_v22 = vld [vmem:[%s18861_s2 + $0xd20] sm:$0xf]  ;;  %v9686_v43 = vor.u32 %v12129_v19, %v9685_v34  ;;  %5023 = vmatpush.bf16.msrb.mxu1 %v9430_v36 }
  0x83   :  { %v12061_v45 = vld [vmem:[%s18861_s2 + $0xd2c] sm:$0xf0]  ;;  %v9541_v46 = vld [vmem:[%s18861_s2 + $0xe20] sm:$0xf]  ;;  %v9286_v51 = vor.u32 %v12029_v40, %v9285_v39  ;;  %5036 = vmatpush.bf16.msrb.mxu2 %v9558_v37 }
  0x84   :  { %v12093_v47 = vld [vmem:[%s18861_s2 + $0xe2c] sm:$0xf0]  ;;  %v9669_v48 = vld [vmem:[%s18861_s2 + $0xf20] sm:$0xf]  ;;  %v9414_v55 = vor.u32 %v12061_v45, %v9413_v22  ;;  %5049 = vmatpush.bf16.msrb.mxu3 %v9686_v43 }
  0x85   :  { %v12125_v49 = vld [vmem:[%s18861_s2 + $0xf2c] sm:$0xf0]  ;;  %v9269_v50 = vld [vmem:[%s18861_s2 + $0xc00] sm:$0xf]  ;;  %v9542_v56 = vor.u32 %v12093_v47, %v9541_v46 }
  0x86   :  { %v12025_v52 = vld [vmem:[%s18861_s2 + $0xc0c] sm:$0xf0]  ;;  %v9397_v53 = vld [vmem:[%s18861_s2 + $0xd00] sm:$0xf]  ;;  %v9670_v0 = vor.u32 %v12125_v49, %v9669_v48 }
  0x87   :  { %v12057_v54 = vld [vmem:[%s18861_s2 + $0xd0c] sm:$0xf0]  ;;  %v9525_v57 = vld [vmem:[%s18861_s2 + $0xe00] sm:$0xf] }
  0x88   :  { %v12089_v58 = vld [vmem:[%s18861_s2 + $0xe0c] sm:$0xf0]  ;;  %v9653_v61 = vld [vmem:[%s18861_s2 + $0xf00] sm:$0xf] }
  0x89   :  { %v12121_v1 = vld [vmem:[%s18861_s2 + $0xf0c] sm:$0xf0]  ;;  %v9893_v2 = vld [vmem:[%s18861_s2 + $0x10e0] sm:$0xf] }
  0x8a   :  { %v12181_v3 = vld [vmem:[%s18861_s2 + $0x10ec] sm:$0xf0]  ;;  %v10021_v4 = vld [vmem:[%s18861_s2 + $0x11e0] sm:$0xf] }
  0x8b   :  { %14 = vsyncpa [#allocation3], 0  ;;  %5011 = vmatpush.bf16.msrb.mxu0 %v9286_v51  ;;  %v9270_v5 = vor.u32 %v12025_v52, %v9269_v50  ;;  %v12213_v6 = vld [vmem:[%s18861_s2 + $0x11ec] sm:$0xf0]  ;;  %v10149_v7 = vld [vmem:[%s18861_s2 + $0x12e0] sm:$0xf]  ;;  %5024 = vmatpush.bf16.msrb.mxu1 %v9414_v55  ;;  %v9398_v9 = vor.u32 %v12057_v54, %v9397_v53  ;;  %v9526_v10 = vor.u32 %v12089_v58, %v9525_v57 }
  0x8c   :  { %v12245_v8 = vld [vmem:[%s18861_s2 + $0x12ec] sm:$0xf0]  ;;  %5037 = vmatpush.bf16.msrb.mxu2 %v9542_v56  ;;  %v10277_v11 = vld [vmem:[%s18861_s2 + $0x13e0] sm:$0xf]  ;;  %5050 = vmatpush.bf16.msrb.mxu3 %v9670_v0  ;;  %v9654_v13 = vor.u32 %v12121_v1, %v9653_v61  ;;  %v9894_v14 = vor.u32 %v12181_v3, %v9893_v2  ;;  %v10022_v15 = vor.u32 %v12213_v6, %v10021_v4  ;;  %vm4845_vm0 = vcmask 523264   ;;  %s12664_s21 = smov [#allocation2]  }
  0x8d   :  { %v12277_v12 = vld [vmem:[%s18861_s2 + $0x13ec] sm:$0xf0]  ;;  %v10150_v16 = vor.u32 %v12245_v8, %v10149_v7  ;;  %v9877_v17 = vld [vmem:[%s18861_s2 + $0x10c0] sm:$0xf]  ;;  %v13596_v28 = vpack.c.bf16 %v13451_v59, %v13451_v59  ;;  %v13609_v19 = vpack.c.bf16 %v13453_v60, %v13453_v60  ;;  %v13613_v59 = vpack.c.bf16 %v13455_v62, %v13455_v62  ;;  %s7720_s22 = sshll.u32 %s12664_s21, 4  ;;  %s7722_s25 = sshll.u32 %s18868_s9, 4  ;;  %s7721_s22 = int_to_ptr.vmem [resolvable:$true] %s7720_s22  ;;  %s7723_s25 = int_to_ptr.hbm [resolvable:$true] %s7722_s25 }
  0x8e   :  { %v12177_v20 = vld [vmem:[%s18861_s2 + $0x10cc] sm:$0xf0]  ;;  %v10005_v23 = vld [vmem:[%s18861_s2 + $0x11c0] sm:$0xf]  ;;  %v10278_v25 = vor.u32 %v12277_v12, %v10277_v11  ;;  %v13623_v37 = vpack.c.bf16 %v13457_v63, %v13457_v63 }
  0x8f   :  { %5012 = vmatpush.bf16.msrb.mxu0 %v9270_v5  ;;  %v12209_v29 = vld [vmem:[%s18861_s2 + $0x11cc] sm:$0xf0]  ;;  %v10133_v31 = vld [vmem:[%s18861_s2 + $0x12c0] sm:$0xf]  ;;  %5025 = vmatpush.bf16.msrb.mxu1 %v9398_v9  ;;  %v9878_v60 = vor.u32 %v12177_v20, %v9877_v17 }
  0x90   :  { %v12241_v34 = vld [vmem:[%s18861_s2 + $0x12cc] sm:$0xf0]  ;;  %5038 = vmatpush.bf16.msrb.mxu2 %v9526_v10  ;;  %v10261_v21 = vld [vmem:[%s18861_s2 + $0x13c0] sm:$0xf]  ;;  %5051 = vmatpush.bf16.msrb.mxu3 %v9654_v13  ;;  %v10006_v39 = vor.u32 %v12209_v29, %v10005_v23 }
  0x91   :  { %v12273_v36 = vld [vmem:[%s18861_s2 + $0x13cc] sm:$0xf0]  ;;  %v10134_v62 = vor.u32 %v12241_v34, %v10133_v31  ;;  %v9861_v40 = vld [vmem:[%s18861_s2 + $0x10a0] sm:$0xf] }
  0x92   :  { %v12173_v22 = vld [vmem:[%s18861_s2 + $0x10ac] sm:$0xf0]  ;;  %v9989_v43 = vld [vmem:[%s18861_s2 + $0x11a0] sm:$0xf]  ;;  %5013 = vmatmul.bf16.vlgmr.msrb.gmra.mxu0 %v13596_v28  ;;  %v10262_v63 = vor.u32 %v12273_v36, %v10261_v21  ;;  %5026 = vmatmul.bf16.vlgmr.msrb.gmra.mxu1 %v13613_v59 }
  0x93   :  { %5057 = vmatpush.bf16.msra.mxu0 %v9894_v14  ;;  %5070 = vmatpush.bf16.msra.mxu1 %v10022_v15  ;;  %v12205_v45 = vld [vmem:[%s18861_s2 + $0x11ac] sm:$0xf0]  ;;  %v10117_v46 = vld [vmem:[%s18861_s2 + $0x12a0] sm:$0xf]  ;;  %v9862_v50 = vor.u32 %v12173_v22, %v9861_v40 }
  0x94   :  { %5083 = vmatpush.bf16.msra.mxu2 %v10150_v16  ;;  %5096 = vmatpush.bf16.msra.mxu3 %v10278_v25  ;;  %v12237_v47 = vld [vmem:[%s18861_s2 + $0x12ac] sm:$0xf0]  ;;  %v10245_v48 = vld [vmem:[%s18861_s2 + $0x13a0] sm:$0xf]  ;;  %v9990_v51 = vor.u32 %v12205_v45, %v9989_v43 }
  0x95   :  { %5039 = vmatmul.bf16.vlgmr.msrb.gmra.mxu2 %v13609_v19  ;;  %v12269_v49 = vld [vmem:[%s18861_s2 + $0x13ac] sm:$0xf0]  ;;  %5052 = vmatmul.bf16.vlgmr.msrb.gmra.mxu3 %v13623_v37  ;;  %v10118_v52 = vor.u32 %v12237_v47, %v10117_v46  ;;  %v9845_v53 = vld [vmem:[%s18861_s2 + $0x1080] sm:$0xf] }
  0x96   :  { %v12169_v54 = vld [vmem:[%s18861_s2 + $0x108c] sm:$0xf0]  ;;  %v9973_v55 = vld [vmem:[%s18861_s2 + $0x1180] sm:$0xf]  ;;  %v10246_v56 = vor.u32 %v12269_v49, %v10245_v48 }
  0x97   :  { %5058 = vmatpush.bf16.msra.mxu0 %v9878_v60  ;;  %5071 = vmatpush.bf16.msra.mxu1 %v10006_v39  ;;  %v12201_v57 = vld [vmem:[%s18861_s2 + $0x118c] sm:$0xf0]  ;;  %v10101_v58 = vld [vmem:[%s18861_s2 + $0x1280] sm:$0xf]  ;;  %v9846_v2 = vor.u32 %v12169_v54, %v9845_v53 }
  0x98   :  { %5084 = vmatpush.bf16.msra.mxu2 %v10134_v62  ;;  %5097 = vmatpush.bf16.msra.mxu3 %v10262_v63  ;;  %v12233_v61 = vld [vmem:[%s18861_s2 + $0x128c] sm:$0xf0]  ;;  %v10229_v0 = vld [vmem:[%s18861_s2 + $0x1380] sm:$0xf]  ;;  %v9974_v3 = vor.u32 %v12201_v57, %v9973_v55 }
  0x99   :  { %v12265_v1 = vld [vmem:[%s18861_s2 + $0x138c] sm:$0xf0]  ;;  %v10102_v4 = vor.u32 %v12233_v61, %v10101_v58  ;;  %v9829_v5 = vld [vmem:[%s18861_s2 + $0x1060] sm:$0xf] }
  0x9a   :  { %v12165_v6 = vld [vmem:[%s18861_s2 + $0x106c] sm:$0xf0]  ;;  %v9957_v7 = vld [vmem:[%s18861_s2 + $0x1160] sm:$0xf]  ;;  %v10230_v8 = vor.u32 %v12265_v1, %v10229_v0 }
  0x9b   :  { %5059 = vmatpush.bf16.msra.mxu0 %v9862_v50  ;;  %5072 = vmatpush.bf16.msra.mxu1 %v9990_v51  ;;  %v12197_v9 = vld [vmem:[%s18861_s2 + $0x116c] sm:$0xf0]  ;;  %v10085_v10 = vld [vmem:[%s18861_s2 + $0x1260] sm:$0xf]  ;;  %v9830_v14 = vor.u32 %v12165_v6, %v9829_v5 }
  0x9c   :  { %5085 = vmatpush.bf16.msra.mxu2 %v10118_v52  ;;  %5098 = vmatpush.bf16.msra.mxu3 %v10246_v56  ;;  %v12229_v11 = vld [vmem:[%s18861_s2 + $0x126c] sm:$0xf0]  ;;  %v10213_v12 = vld [vmem:[%s18861_s2 + $0x1360] sm:$0xf]  ;;  %v9958_v15 = vor.u32 %v12197_v9, %v9957_v7 }
  0x9d   :  { %v12261_v13 = vld [vmem:[%s18861_s2 + $0x136c] sm:$0xf0]  ;;  %v10086_v16 = vor.u32 %v12229_v11, %v10085_v10  ;;  %v9813_v17 = vld [vmem:[%s18861_s2 + $0x1040] sm:$0xf] }
  0x9e   :  { %v12161_v20 = vld [vmem:[%s18861_s2 + $0x104c] sm:$0xf0]  ;;  %v9941_v23 = vld [vmem:[%s18861_s2 + $0x1140] sm:$0xf]  ;;  %v10214_v25 = vor.u32 %v12261_v13, %v10213_v12 }
  0x9f   :  { %5060 = vmatpush.bf16.msra.mxu0 %v9846_v2  ;;  %5073 = vmatpush.bf16.msra.mxu1 %v9974_v3  ;;  %v12193_v29 = vld [vmem:[%s18861_s2 + $0x114c] sm:$0xf0]  ;;  %v10069_v31 = vld [vmem:[%s18861_s2 + $0x1240] sm:$0xf]  ;;  %v9814_v60 = vor.u32 %v12161_v20, %v9813_v17 }
  0xa0   :  { %5086 = vmatpush.bf16.msra.mxu2 %v10102_v4  ;;  %5099 = vmatpush.bf16.msra.mxu3 %v10230_v8  ;;  %v12225_v34 = vld [vmem:[%s18861_s2 + $0x124c] sm:$0xf0]  ;;  %v10197_v21 = vld [vmem:[%s18861_s2 + $0x1340] sm:$0xf]  ;;  %v9942_v39 = vor.u32 %v12193_v29, %v9941_v23 }
  0xa1   :  { %v12257_v36 = vld [vmem:[%s18861_s2 + $0x134c] sm:$0xf0]  ;;  %v10070_v62 = vor.u32 %v12225_v34, %v10069_v31  ;;  %v9797_v40 = vld [vmem:[%s18861_s2 + $0x1020] sm:$0xf] }
  0xa2   :  { %v12157_v22 = vld [vmem:[%s18861_s2 + $0x102c] sm:$0xf0]  ;;  %v9925_v43 = vld [vmem:[%s18861_s2 + $0x1120] sm:$0xf]  ;;  %v10198_v63 = vor.u32 %v12257_v36, %v10197_v21 }
  0xa3   :  { %5061 = vmatpush.bf16.msra.mxu0 %v9830_v14  ;;  %5074 = vmatpush.bf16.msra.mxu1 %v9958_v15  ;;  %v12189_v45 = vld [vmem:[%s18861_s2 + $0x112c] sm:$0xf0]  ;;  %v10053_v46 = vld [vmem:[%s18861_s2 + $0x1220] sm:$0xf]  ;;  %v9798_v51 = vor.u32 %v12157_v22, %v9797_v40 }
  0xa4   :  { %5087 = vmatpush.bf16.msra.mxu2 %v10086_v16  ;;  %5100 = vmatpush.bf16.msra.mxu3 %v10214_v25  ;;  %v12221_v47 = vld [vmem:[%s18861_s2 + $0x122c] sm:$0xf0]  ;;  %v10181_v48 = vld [vmem:[%s18861_s2 + $0x1320] sm:$0xf]  ;;  %v9926_v55 = vor.u32 %v12189_v45, %v9925_v43 }
  0xa5   :  { %v12253_v49 = vld [vmem:[%s18861_s2 + $0x132c] sm:$0xf0]  ;;  %v9781_v50 = vld [vmem:[%s18861_s2 + $0x1000] sm:$0xf]  ;;  %v10054_v56 = vor.u32 %v12221_v47, %v10053_v46 }
  0xa6   :  { %v12153_v52 = vld [vmem:[%s18861_s2 + $0x100c] sm:$0xf0]  ;;  %v9909_v53 = vld [vmem:[%s18861_s2 + $0x1100] sm:$0xf]  ;;  %v10182_v0 = vor.u32 %v12253_v49, %v10181_v48 }
  0xa7   :  { %5062 = vmatpush.bf16.msra.mxu0 %v9814_v60  ;;  %v12185_v54 = vld [vmem:[%s18861_s2 + $0x110c] sm:$0xf0]  ;;  %5075 = vmatpush.bf16.msra.mxu1 %v9942_v39  ;;  %v10037_v57 = vld [vmem:[%s18861_s2 + $0x1200] sm:$0xf]  ;;  %v9782_v7 = vor.u32 %v12153_v52, %v9781_v50 }
  0xa8   :  { %5088 = vmatpush.bf16.msra.mxu2 %v10070_v62  ;;  %v12217_v58 = vld [vmem:[%s18861_s2 + $0x120c] sm:$0xf0]  ;;  %v10165_v61 = vld [vmem:[%s18861_s2 + $0x1300] sm:$0xf]  ;;  %5101 = vmatpush.bf16.msra.mxu3 %v10198_v63  ;;  %v9910_v11 = vor.u32 %v12185_v54, %v9909_v53 }
  0xa9   :  { %v12249_v1 = vld [vmem:[%s18861_s2 + $0x130c] sm:$0xf0]  ;;  %v10405_v2 = vld [vmem:[%s18861_s2 + $0x14e0] sm:$0xf]  ;;  %v10038_v12 = vor.u32 %v12217_v58, %v10037_v57 }
  0xaa   :  { %v12309_v3 = vld [vmem:[%s18861_s2 + $0x14ec] sm:$0xf0]  ;;  %v10533_v4 = vld [vmem:[%s18861_s2 + $0x15e0] sm:$0xf]  ;;  %v10166_v15 = vor.u32 %v12249_v1, %v10165_v61 }
  0xab   :  { %v12341_v5 = vld [vmem:[%s18861_s2 + $0x15ec] sm:$0xf0]  ;;  %v10661_v6 = vld [vmem:[%s18861_s2 + $0x16e0] sm:$0xf]  ;;  %5063 = vmatpush.bf16.msra.mxu0 %v9798_v51  ;;  %5076 = vmatpush.bf16.msra.mxu1 %v9926_v55  ;;  %v10406_v16 = vor.u32 %v12309_v3, %v10405_v2 }
  0xac   :  { %v12373_v8 = vld [vmem:[%s18861_s2 + $0x16ec] sm:$0xf0]  ;;  %v10789_v9 = vld [vmem:[%s18861_s2 + $0x17e0] sm:$0xf]  ;;  %5089 = vmatpush.bf16.msra.mxu2 %v10054_v56  ;;  %5102 = vmatpush.bf16.msra.mxu3 %v10182_v0  ;;  %v10534_v23 = vor.u32 %v12341_v5, %v10533_v4 }
  0xad   :  { %v12405_v10 = vld [vmem:[%s18861_s2 + $0x17ec] sm:$0xf0]  ;;  %v71_v13 = vld.sshfl [vmem:[#allocation1] sm:$0xff pattern:$0x73625140]  ;;  %v10662_v25 = vor.u32 %v12373_v8, %v10661_v6 }
  0xae   :  { %v73_v14 = vld.sshfl [vmem:[#allocation1 + $0x10] sm:$0xff pattern:$0x73625140]  ;;  %v72_v17 = vld.sshfl [vmem:[#allocation1 + $0x8] sm:$0xff pattern:$0x73625140]  ;;  %v10790_v21 = vor.u32 %v12405_v10, %v10789_v9  ;;  %v13806_v36 = vpack.c.bf16 %v71_v13, %v71_v13 }
  0xaf   :  { %v74_v20 = vld.sshfl [vmem:[#allocation1 + $0x18] sm:$0xff pattern:$0x73625140]  ;;  %v10389_v29 = vld [vmem:[%s18861_s2 + $0x14c0] sm:$0xf]  ;;  %5064 = vmatpush.bf16.msra.mxu0 %v9782_v7  ;;  %5077 = vmatpush.bf16.msra.mxu1 %v9910_v11  ;;  %v13817_v40 = vpack.c.bf16 %v73_v14, %v73_v14  ;;  %v13819_v22 = vpack.c.bf16 %v72_v17, %v72_v17 }
  0xb0   :  { %v12305_v31 = vld [vmem:[%s18861_s2 + $0x14cc] sm:$0xf0]  ;;  %v10517_v34 = vld [vmem:[%s18861_s2 + $0x15c0] sm:$0xf]  ;;  %5090 = vmatpush.bf16.msra.mxu2 %v10038_v12  ;;  %5103 = vmatpush.bf16.msra.mxu3 %v10166_v15  ;;  %v13827_v45 = vpack.c.bf16 %v74_v20, %v74_v20 }
  0xb1   :  { %v12337_v60 = vld [vmem:[%s18861_s2 + $0x15cc] sm:$0xf0]  ;;  %v10645_v39 = vld [vmem:[%s18861_s2 + $0x16c0] sm:$0xf]  ;;  %v10390_v46 = vor.u32 %v12305_v31, %v10389_v29 }
  0xb2   :  { %v12369_v62 = vld [vmem:[%s18861_s2 + $0x16cc] sm:$0xf0]  ;;  %v10773_v43 = vld [vmem:[%s18861_s2 + $0x17c0] sm:$0xf]  ;;  %v10518_v47 = vor.u32 %v12337_v60, %v10517_v34  ;;  %5065 = vmatmul.bf16.vlgmr.msra.gmra.mxu0 %v13806_v36  ;;  %5078 = vmatmul.bf16.vlgmr.msra.gmra.mxu1 %v13819_v22 }
  0xb3   :  { %v12401_v63 = vld [vmem:[%s18861_s2 + $0x17cc] sm:$0xf0]  ;;  %5109 = vmatpush.bf16.msrb.mxu0 %v10406_v16  ;;  %5122 = vmatpush.bf16.msrb.mxu1 %v10534_v23  ;;  %v10646_v48 = vor.u32 %v12369_v62, %v10645_v39  ;;  %v10373_v49 = vld [vmem:[%s18861_s2 + $0x14a0] sm:$0xf] }
  0xb4   :  { %5135 = vmatpush.bf16.msrb.mxu2 %v10662_v25  ;;  %v12301_v50 = vld [vmem:[%s18861_s2 + $0x14ac] sm:$0xf0]  ;;  %v10501_v51 = vld [vmem:[%s18861_s2 + $0x15a0] sm:$0xf]  ;;  %5148 = vmatpush.bf16.msrb.mxu3 %v10790_v21  ;;  %v10774_v52 = vor.u32 %v12401_v63, %v10773_v43 }
  0xb5   :  { %v12333_v53 = vld [vmem:[%s18861_s2 + $0x15ac] sm:$0xf0]  ;;  %v10629_v54 = vld [vmem:[%s18861_s2 + $0x16a0] sm:$0xf]  ;;  %5091 = vmatmul.bf16.vlgmr.msra.gmra.mxu2 %v13817_v40  ;;  %5104 = vmatmul.bf16.vlgmr.msra.gmra.mxu3 %v13827_v45  ;;  %v10374_v58 = vor.u32 %v12301_v50, %v10373_v49 }
  0xb6   :  { %v12365_v55 = vld [vmem:[%s18861_s2 + $0x16ac] sm:$0xf0]  ;;  %v10757_v56 = vld [vmem:[%s18861_s2 + $0x17a0] sm:$0xf]  ;;  %v10502_v61 = vor.u32 %v12333_v53, %v10501_v51 }
  0xb7   :  { %v12397_v57 = vld [vmem:[%s18861_s2 + $0x17ac] sm:$0xf0]  ;;  %5110 = vmatpush.bf16.msrb.mxu0 %v10390_v46  ;;  %5123 = vmatpush.bf16.msrb.mxu1 %v10518_v47  ;;  %v10630_v0 = vor.u32 %v12365_v55, %v10629_v54  ;;  %v10357_v1 = vld [vmem:[%s18861_s2 + $0x1480] sm:$0xf] }
  0xb8   :  { %5136 = vmatpush.bf16.msrb.mxu2 %v10646_v48  ;;  %v12297_v2 = vld [vmem:[%s18861_s2 + $0x148c] sm:$0xf0]  ;;  %v10485_v3 = vld [vmem:[%s18861_s2 + $0x1580] sm:$0xf]  ;;  %5149 = vmatpush.bf16.msrb.mxu3 %v10774_v52  ;;  %v10758_v4 = vor.u32 %v12397_v57, %v10757_v56 }
  0xb9   :  { %v12329_v5 = vld [vmem:[%s18861_s2 + $0x158c] sm:$0xf0]  ;;  %v10613_v6 = vld [vmem:[%s18861_s2 + $0x1680] sm:$0xf]  ;;  %v10358_v10 = vor.u32 %v12297_v2, %v10357_v1 }
  0xba   :  { %v12361_v7 = vld [vmem:[%s18861_s2 + $0x168c] sm:$0xf0]  ;;  %v10741_v8 = vld [vmem:[%s18861_s2 + $0x1780] sm:$0xf]  ;;  %v10486_v12 = vor.u32 %v12329_v5, %v10485_v3 }
  0xbb   :  { %v12393_v9 = vld [vmem:[%s18861_s2 + $0x178c] sm:$0xf0]  ;;  %5111 = vmatpush.bf16.msrb.mxu0 %v10374_v58  ;;  %5124 = vmatpush.bf16.msrb.mxu1 %v10502_v61  ;;  %v10614_v13 = vor.u32 %v12361_v7, %v10613_v6  ;;  %v10341_v14 = vld [vmem:[%s18861_s2 + $0x1460] sm:$0xf]  ;;  %v4858_v6 = vpop.f32.mrf.mxu0 }
  0xbc   :  { %v40_v11 = vld [vmem:[%s18859_s0 + $0x30] sm:$0x3]  ;;  %5137 = vmatpush.bf16.msrb.mxu2 %v10630_v0  ;;  %v10469_v16 = vld [vmem:[%s18861_s2 + $0x1560] sm:$0xf]  ;;  %5150 = vmatpush.bf16.msrb.mxu3 %v10758_v4  ;;  %v10742_v17 = vor.u32 %v12393_v9, %v10741_v8 }
  0xbd   :  { %v12293_v15 = vld [vmem:[%s18861_s2 + $0x146c] sm:$0xf0]  ;;  %v10597_v23 = vld [vmem:[%s18861_s2 + $0x1660] sm:$0xf]  ;;  %79 = vst [vmem:[#allocation1] ss:$4 sm:$0xff] %v40_v11 }
  0xbe   :  { %v12325_v20 = vld [vmem:[%s18861_s2 + $0x156c] sm:$0xf0]  ;;  %v10725_v29 = vld [vmem:[%s18861_s2 + $0x1760] sm:$0xf]  ;;  %v10342_v34 = vor.u32 %v12293_v15, %v10341_v14 }
  0xbf   :  { %v12357_v25 = vld [vmem:[%s18861_s2 + $0x166c] sm:$0xf0]  ;;  %5112 = vmatpush.bf16.msrb.mxu0 %v10358_v10  ;;  %v10325_v21 = vld [vmem:[%s18861_s2 + $0x1440] sm:$0xf]  ;;  %5125 = vmatpush.bf16.msrb.mxu1 %v10486_v12  ;;  %v10470_v60 = vor.u32 %v12325_v20, %v10469_v16  ;;  %v4871_v12 = vpop.f32.mrf.mxu1 }
  0xc0   :  { %v12389_v31 = vld [vmem:[%s18861_s2 + $0x176c] sm:$0xf0]  ;;  %5138 = vmatpush.bf16.msrb.mxu2 %v10614_v13  ;;  %v10598_v39 = vor.u32 %v12357_v25, %v10597_v23  ;;  %v10453_v43 = vld [vmem:[%s18861_s2 + $0x1540] sm:$0xf]  ;;  %5151 = vmatpush.bf16.msrb.mxu3 %v10742_v17 }
  0xc1   :  { %v12289_v62 = vld [vmem:[%s18861_s2 + $0x144c] sm:$0xf0]  ;;  %v915_v63 = vld [vmem:[%s18862_s3] sm:$0xf]  ;;  %v10726_v46 = vor.u32 %v12389_v31, %v10725_v29 }
  0xc2   :  { %v12321_v47 = vld [vmem:[%s18861_s2 + $0x154c] sm:$0xf0]  ;;  %v10581_v48 = vld [vmem:[%s18861_s2 + $0x1640] sm:$0xf]  ;;  %v10326_v52 = vor.u32 %v12289_v62, %v10325_v21  ;;  %v917_v53 = vperm.slane %v915_v63, 0 }
  0xc3   :  { %v12353_v49 = vld [vmem:[%s18861_s2 + $0x164c] sm:$0xf0]  ;;  %v10709_v50 = vld [vmem:[%s18861_s2 + $0x1740] sm:$0xf]  ;;  %5113 = vmatpush.bf16.msrb.mxu0 %v10342_v34  ;;  %5126 = vmatpush.bf16.msrb.mxu1 %v10470_v60  ;;  %v10454_v54 = vor.u32 %v12321_v47, %v10453_v43  ;;  %v11667_v34 = vld [vmem:[%s18861_s2 + $0xe4] sm:$0xf] }
  0xc4   :  { %v12385_v51 = vld [vmem:[%s18861_s2 + $0x174c] sm:$0xf0]  ;;  %5139 = vmatpush.bf16.msrb.mxu2 %v10598_v39  ;;  %v10582_v55 = vor.u32 %v12353_v49, %v10581_v48  ;;  %v10309_v56 = vld [vmem:[%s18861_s2 + $0x1420] sm:$0xf]  ;;  %5152 = vmatpush.bf16.msrb.mxu3 %v10726_v46  ;;  %v4859_v11 = vadd.f32 %v4858_v6, %v917_v53  ;;  %v7847_v21 = vld [vmem:[%s18861_s2 + $0xf0] sm:$0xf0]  ;;  %v4884_v39 = vpop.f32.mrf.mxu2 }
  0xc5   :  { %v12285_v57 = vld [vmem:[%s18861_s2 + $0x142c] sm:$0xf0]  ;;  %v10437_v58 = vld [vmem:[%s18861_s2 + $0x1520] sm:$0xf]  ;;  %v10710_v61 = vor.u32 %v12385_v51, %v10709_v50  ;;  %v11699_v60 = vld [vmem:[%s18861_s2 + $0x1e4] sm:$0xf] }
  0xc6   :  { %v12317_v0 = vld [vmem:[%s18861_s2 + $0x152c] sm:$0xf0]  ;;  %v10565_v1 = vld [vmem:[%s18861_s2 + $0x1620] sm:$0xf]  ;;  %v10310_v7 = vor.u32 %v12285_v57, %v10309_v56  ;;  %v4872_v31 = vadd.f32 %v4871_v12, %v4859_v11  ;;  %v7975_v43 = vld [vmem:[%s18861_s2 + $0x1f0] sm:$0xf0]  ;;  %v4897_v56 = vpop.f32.mrf.mxu3  ;;  %v7850_v57 = vor.u32 %v11667_v34, %v7847_v21 }
  0xc7   :  { %v12349_v2 = vld [vmem:[%s18861_s2 + $0x162c] sm:$0xf0]  ;;  %v10693_v3 = vld [vmem:[%s18861_s2 + $0x1720] sm:$0xf]  ;;  %5114 = vmatpush.bf16.msrb.mxu0 %v10326_v52  ;;  %5127 = vmatpush.bf16.msrb.mxu1 %v10454_v54  ;;  %v10438_v13 = vor.u32 %v12317_v0, %v10437_v58  ;;  %v11731_v63 = vld [vmem:[%s18861_s2 + $0x2e4] sm:$0xf]  ;;  %v7978_v58 = vor.u32 %v11699_v60, %v7975_v43 }
  0xc8   :  { %v12381_v4 = vld [vmem:[%s18861_s2 + $0x172c] sm:$0xf0]  ;;  %v10293_v5 = vld [vmem:[%s18861_s2 + $0x1400] sm:$0xf]  ;;  %5140 = vmatpush.bf16.msrb.mxu2 %v10582_v55  ;;  %v10566_v14 = vor.u32 %v12349_v2, %v10565_v1  ;;  %5153 = vmatpush.bf16.msrb.mxu3 %v10710_v61  ;;  %v8103_v46 = vld [vmem:[%s18861_s2 + $0x2f0] sm:$0xf0]  ;;  %v4885_v47 = vadd.f32 %v4884_v39, %v4872_v31 }
  0xc9   :  { %v12281_v8 = vld [vmem:[%s18861_s2 + $0x140c] sm:$0xf0]  ;;  %v10421_v9 = vld [vmem:[%s18861_s2 + $0x1500] sm:$0xf]  ;;  %v10694_v20 = vor.u32 %v12381_v4, %v10693_v3  ;;  %v11663_v1 = vld [vmem:[%s18861_s2 + $0xc4] sm:$0xf]  ;;  %v4860_v3 = vpop.f32.mrf.mxu0  ;;  %v8106_v4 = vor.u32 %v11731_v63, %v8103_v46 }
  0xca   :  { %v12313_v10 = vld [vmem:[%s18861_s2 + $0x150c] sm:$0xf0]  ;;  %v10549_v15 = vld [vmem:[%s18861_s2 + $0x1600] sm:$0xf]  ;;  %v10294_v62 = vor.u32 %v12281_v8, %v10293_v5  ;;  %v14016_v2 = vadd.f32 %v4897_v56, %v4885_v47  ;;  %v7831_v6 = vld [vmem:[%s18861_s2 + $0xd0] sm:$0xf0] }
  0xcb   :  { %v12345_v16 = vld [vmem:[%s18861_s2 + $0x160c] sm:$0xf0]  ;;  %v10677_v17 = vld [vmem:[%s18861_s2 + $0x1700] sm:$0xf]  ;;  %5115 = vmatpush.bf16.msrb.mxu0 %v10310_v7  ;;  %5128 = vmatpush.bf16.msrb.mxu1 %v10438_v13  ;;  %v10422_v48 = vor.u32 %v12313_v10, %v10421_v9  ;;  %v11695_v7 = vld [vmem:[%s18861_s2 + $0x1c4] sm:$0xf]  ;;  %v4873_v9 = vpop.f32.mrf.mxu1 }
  0xcc   :  { %v12377_v23 = vld [vmem:[%s18861_s2 + $0x170c] sm:$0xf0]  ;;  %v10853_v25 = vld [vmem:[%s18861_s2 + $0x1860] sm:$0xf]  ;;  %5141 = vmatpush.bf16.msrb.mxu2 %v10566_v14  ;;  %v10550_v49 = vor.u32 %v12345_v16, %v10549_v15  ;;  %5154 = vmatpush.bf16.msrb.mxu3 %v10694_v20  ;;  %v7959_v8 = vld [vmem:[%s18861_s2 + $0x1d0] sm:$0xf0]  ;;  %v7834_v16 = vor.u32 %v11663_v1, %v7831_v6 }
  0xcd   :  { %v12421_v29 = vld [vmem:[%s18861_s2 + $0x186c] sm:$0xf0]  ;;  %v75_v50 = vld.sshfl [vmem:[#allocation1 + $0x20] sm:$0xff pattern:$0x73625140]  ;;  %v10678_v52 = vor.u32 %v12377_v23, %v10677_v17  ;;  %v7962_v17 = vor.u32 %v11695_v7, %v7959_v8 }
  0xce   :  { %v77_v51 = vld.sshfl [vmem:[#allocation1 + $0x30] sm:$0xff pattern:$0x73625140]  ;;  %v10854_v53 = vor.u32 %v12421_v29, %v10853_v25  ;;  %v76_v54 = vld.sshfl [vmem:[#allocation1 + $0x28] sm:$0xff pattern:$0x73625140]  ;;  %v14018_v5 = vpack.c.bf16 %v75_v50, %v75_v50  ;;  %v4886_v29 = vpop.f32.mrf.mxu2  ;;  %v4899_v46 = vpop.f32.mrf.mxu3 }
  0xcf   :  { %v78_v55 = vld.sshfl [vmem:[#allocation1 + $0x38] sm:$0xff pattern:$0x73625140]  ;;  %v10837_v61 = vld [vmem:[%s18861_s2 + $0x1840] sm:$0xf]  ;;  %5116 = vmatpush.bf16.msrb.mxu0 %v10294_v62  ;;  %5129 = vmatpush.bf16.msrb.mxu1 %v10422_v48  ;;  %v14029_v10 = vpack.c.bf16 %v77_v51, %v77_v51  ;;  %v14031_v11 = vpack.c.bf16 %v76_v54, %v76_v54 }
  0xd0   :  { %v12417_v0 = vld [vmem:[%s18861_s2 + $0x184c] sm:$0xf0]  ;;  %5142 = vmatpush.bf16.msrb.mxu2 %v10550_v49  ;;  %v11727_v12 = vld [vmem:[%s18861_s2 + $0x2c4] sm:$0xf]  ;;  %v8087_v13 = vld [vmem:[%s18861_s2 + $0x2d0] sm:$0xf0]  ;;  %5155 = vmatpush.bf16.msrb.mxu3 %v10678_v52  ;;  %v14039_v14 = vpack.c.bf16 %v78_v55, %v78_v55 }
  0xd1   :  { %v10838_v15 = vor.u32 %v12417_v0, %v10837_v61  ;;  %v10821_v20 = vld [vmem:[%s18861_s2 + $0x1820] sm:$0xf]  ;;  %v12413_v23 = vld [vmem:[%s18861_s2 + $0x182c] sm:$0xf0]  ;;  %v11659_v25 = vld [vmem:[%s18861_s2 + $0xa4] sm:$0xf]  ;;  %v8090_v31 = vor.u32 %v11727_v12, %v8087_v13  ;;  %v4910_v0 = vpop.f32.mrf.mxu0 }
  0xd2   :  { %5117 = vmatmul.bf16.vlgmr.msrb.gmra.mxu0 %v14018_v5  ;;  %v7815_v34 = vld [vmem:[%s18861_s2 + $0xb0] sm:$0xf0]  ;;  %v11691_v21 = vld [vmem:[%s18861_s2 + $0x1a4] sm:$0xf]  ;;  %5130 = vmatmul.bf16.vlgmr.msrb.gmra.mxu1 %v14031_v11  ;;  %v10822_v43 = vor.u32 %v12413_v23, %v10821_v20  ;;  %v10805_v63 = vld [vmem:[%s18861_s2 + $0x1800] sm:$0xf]  ;;  %v4911_v7 = vadd.f32 %v4910_v0, %v14016_v2 }
  0xd3   :  { %5165 = vmatpush.bf16.msra.mxu0 %v10854_v53  ;;  %5174 = vmatpush.bf16.msra.mxu1 %v7850_v57  ;;  %v7943_v60 = vld [vmem:[%s18861_s2 + $0x1b0] sm:$0xf0]  ;;  %v11723_v39 = vld [vmem:[%s18861_s2 + $0x2a4] sm:$0xf]  ;;  %v7818_v47 = vor.u32 %v11659_v25, %v7815_v34  ;;  %v12409_v49 = vld [vmem:[%s18861_s2 + $0x180c] sm:$0xf0]  ;;  %v4923_v8 = vpop.f32.mrf.mxu1 }
  0xd4   :  { %5187 = vmatpush.bf16.msra.mxu2 %v7978_v58  ;;  %5200 = vmatpush.bf16.msra.mxu3 %v8106_v4  ;;  %v8071_v62 = vld [vmem:[%s18861_s2 + $0x2b0] sm:$0xf0]  ;;  %v7946_v48 = vor.u32 %v11691_v21, %v7943_v60  ;;  %v11655_v50 = vld [vmem:[%s18861_s2 + $0x84] sm:$0xf]  ;;  %v10806_v61 = vor.u32 %v12409_v49, %v10805_v63  ;;  %v4924_v23 = vadd.f32 %v4923_v8, %v4911_v7 }
  0xd5   :  { %5143 = vmatmul.bf16.vlgmr.msrb.gmra.mxu2 %v14029_v10  ;;  %5156 = vmatmul.bf16.vlgmr.msrb.gmra.mxu3 %v14039_v14  ;;  %v7799_v51 = vld [vmem:[%s18861_s2 + $0x90] sm:$0xf0]  ;;  %v8074_v52 = vor.u32 %v11723_v39, %v8071_v62  ;;  %v11687_v53 = vld [vmem:[%s18861_s2 + $0x184] sm:$0xf] }
  0xd6   :  { %v7927_v54 = vld [vmem:[%s18861_s2 + $0x190] sm:$0xf0]  ;;  %v11719_v55 = vld [vmem:[%s18861_s2 + $0x284] sm:$0xf]  ;;  %v7802_v1 = vor.u32 %v11655_v50, %v7799_v51  ;;  %v4936_v60 = vpop.f32.mrf.mxu2 }
  0xd7   :  { %5166 = vmatpush.bf16.msra.mxu0 %v10838_v15  ;;  %5175 = vmatpush.bf16.msra.mxu1 %v7834_v16  ;;  %v8055_v56 = vld [vmem:[%s18861_s2 + $0x290] sm:$0xf0]  ;;  %v11763_v57 = vld [vmem:[%s18861_s2 + $0x3e4] sm:$0xf]  ;;  %v7930_v3 = vor.u32 %v11687_v53, %v7927_v54 }
  0xd8   :  { %5188 = vmatpush.bf16.msra.mxu2 %v7962_v17  ;;  %5201 = vmatpush.bf16.msra.mxu3 %v8090_v31  ;;  %v8231_v58 = vld [vmem:[%s18861_s2 + $0x3f0] sm:$0xf0]  ;;  %v11651_v4 = vld [vmem:[%s18861_s2 + $0x64] sm:$0xf]  ;;  %v8058_v9 = vor.u32 %v11719_v55, %v8055_v56 }
  0xd9   :  { %v7783_v6 = vld [vmem:[%s18861_s2 + $0x70] sm:$0xf0]  ;;  %v8234_v12 = vor.u32 %v11763_v57, %v8231_v58  ;;  %v11683_v13 = vld [vmem:[%s18861_s2 + $0x164] sm:$0xf]  ;;  %v4912_v54 = vpop.f32.mrf.mxu0 }
  0xda   :  { %v7911_v15 = vld [vmem:[%s18861_s2 + $0x170] sm:$0xf0]  ;;  %v11715_v16 = vld [vmem:[%s18861_s2 + $0x264] sm:$0xf]  ;;  %v7786_v29 = vor.u32 %v11651_v4, %v7783_v6 }
  0xdb   :  { %5167 = vmatpush.bf16.msra.mxu0 %v10822_v43  ;;  %5176 = vmatpush.bf16.msra.mxu1 %v7818_v47  ;;  %v8039_v2 = vld [vmem:[%s18861_s2 + $0x270] sm:$0xf0]  ;;  %v11759_v17 = vld [vmem:[%s18861_s2 + $0x3c4] sm:$0xf]  ;;  %v7914_v31 = vor.u32 %v11683_v13, %v7911_v15  ;;  %v4937_v47 = vadd.f32 %v4936_v60, %v4924_v23 }
  0xdc   :  { %5189 = vmatpush.bf16.msra.mxu2 %v7946_v48  ;;  %5202 = vmatpush.bf16.msra.mxu3 %v8074_v52  ;;  %v8215_v20 = vld [vmem:[%s18861_s2 + $0x3d0] sm:$0xf0]  ;;  %v80_v25 = vld.sshfl [vmem:[#allocation1] sm:$0xff pattern:$0x73625140]  ;;  %v8042_v39 = vor.u32 %v11715_v16, %v8039_v2  ;;  %v4949_v48 = vpop.f32.mrf.mxu3 }
  0xdd   :  { %v11647_v34 = vld [vmem:[%s18861_s2 + $0x44] sm:$0xf]  ;;  %v7767_v21 = vld [vmem:[%s18861_s2 + $0x50] sm:$0xf0]  ;;  %v8218_v62 = vor.u32 %v11759_v17, %v8215_v20  ;;  %v14139_v49 = vpack.c.bf16 %v80_v25, %v80_v25  ;;  %v14150_v53 = vadd.f32 %v4949_v48, %v4937_v47 }
  0xde   :  { %v11679_v43 = vld [vmem:[%s18861_s2 + $0x144] sm:$0xf]  ;;  %v7895_v63 = vld [vmem:[%s18861_s2 + $0x150] sm:$0xf0]  ;;  %v7770_v55 = vor.u32 %v11647_v34, %v7767_v21  ;;  %v4938_v17 = vpop.f32.mrf.mxu2 }
  0xdf   :  { %5168 = vmatpush.bf16.msra.mxu0 %v10806_v61  ;;  %5177 = vmatpush.bf16.msra.mxu1 %v7802_v1  ;;  %v11711_v46 = vld [vmem:[%s18861_s2 + $0x244] sm:$0xf]  ;;  %v8023_v50 = vld [vmem:[%s18861_s2 + $0x250] sm:$0xf0]  ;;  %v7898_v56 = vor.u32 %v11679_v43, %v7895_v63  ;;  %v4925_v61 = vpop.f32.mrf.mxu1 }
  0xe0   :  { %5190 = vmatpush.bf16.msra.mxu2 %v7930_v3  ;;  %5203 = vmatpush.bf16.msra.mxu3 %v8058_v9  ;;  %v11755_v51 = vld [vmem:[%s18861_s2 + $0x3a4] sm:$0xf]  ;;  %v8199_v52 = vld [vmem:[%s18861_s2 + $0x3b0] sm:$0xf0]  ;;  %v8026_v0 = vor.u32 %v11711_v46, %v8023_v50 }
  0xe1   :  { %v11643_v57 = vld [vmem:[%s18861_s2 + $0x24] sm:$0xf]  ;;  %v7751_v58 = vld [vmem:[%s18861_s2 + $0x30] sm:$0xf0]  ;;  %v8202_v1 = vor.u32 %v11755_v51, %v8199_v52 }
  0xe2   :  { %v11675_v3 = vld [vmem:[%s18861_s2 + $0x124] sm:$0xf]  ;;  %v7879_v4 = vld [vmem:[%s18861_s2 + $0x130] sm:$0xf0]  ;;  %10867 = vmatmul.msk.bf16.vlgmr.msra.gmra.mxu0 %vm4845_vm0, %v14139_v49 }
  0xe3   :  { %5213 = vmatpush.bf16.msrb.mxu0 %v8234_v12  ;;  %5178 = vmatpush.bf16.msra.mxu1 %v7786_v29  ;;  %v11707_v6 = vld [vmem:[%s18861_s2 + $0x224] sm:$0xf]  ;;  %v8007_v7 = vld [vmem:[%s18861_s2 + $0x230] sm:$0xf0]  ;;  %v7754_v12 = vor.u32 %v11643_v57, %v7751_v58  ;;  %v7882_v13 = vor.u32 %v11675_v3, %v7879_v4 }
  0xe4   :  { %5191 = vmatpush.bf16.msra.mxu2 %v7914_v31  ;;  %5204 = vmatpush.bf16.msra.mxu3 %v8042_v39  ;;  %v11751_v8 = vld [vmem:[%s18861_s2 + $0x384] sm:$0xf]  ;;  %v8183_v9 = vld [vmem:[%s18861_s2 + $0x390] sm:$0xf0]  ;;  %v8010_v20 = vor.u32 %v11707_v6, %v8007_v7  ;;  %v4951_v34 = vpop.f32.mrf.mxu3 }
  0xe5   :  { %v11639_v15 = vld [vmem:[%s18861_s2 + $0x4] sm:$0xf]  ;;  %v7735_v16 = vld [vmem:[%s18861_s2 + $0x10] sm:$0xf0]  ;;  %v8186_v23 = vor.u32 %v11751_v8, %v8183_v9 }
  0xe6   :  { %v11671_v2 = vld [vmem:[%s18861_s2 + $0x104] sm:$0xf]  ;;  %v7863_v25 = vld [vmem:[%s18861_s2 + $0x110] sm:$0xf0]  ;;  %v7738_v46 = vor.u32 %v11639_v15, %v7735_v16 }
  0xe7   :  { %5214 = vmatpush.bf16.msrb.mxu0 %v8218_v62  ;;  %5179 = vmatpush.bf16.msra.mxu1 %v7770_v55  ;;  %v11703_v29 = vld [vmem:[%s18861_s2 + $0x204] sm:$0xf]  ;;  %v7991_v31 = vld [vmem:[%s18861_s2 + $0x210] sm:$0xf0]  ;;  %v7866_v47 = vor.u32 %v11671_v2, %v7863_v25 }
  0xe8   :  { %5192 = vmatpush.bf16.msra.mxu2 %v7898_v56  ;;  %5205 = vmatpush.bf16.msra.mxu3 %v8026_v0  ;;  %v11747_v21 = vld [vmem:[%s18861_s2 + $0x364] sm:$0xf]  ;;  %v8167_v60 = vld [vmem:[%s18861_s2 + $0x370] sm:$0xf0]  ;;  %v7994_v51 = vor.u32 %v11703_v29, %v7991_v31 }
  0xe9   :  { %v11795_v39 = vld [vmem:[%s18861_s2 + $0x4e4] sm:$0xf]  ;;  %v8359_v62 = vld [vmem:[%s18861_s2 + $0x4f0] sm:$0xf0]  ;;  %v8170_v52 = vor.u32 %v11747_v21, %v8167_v60 }
  0xea   :  { %v11827_v43 = vld [vmem:[%s18861_s2 + $0x5e4] sm:$0xf]  ;;  %v8487_v63 = vld [vmem:[%s18861_s2 + $0x5f0] sm:$0xf0]  ;;  %v8362_v54 = vor.u32 %v11795_v39, %v8359_v62 }
  0xeb   :  { %5215 = vmatpush.bf16.msrb.mxu0 %v8202_v1  ;;  %5180 = vmatpush.bf16.msra.mxu1 %v7754_v12  ;;  %v11859_v48 = vld [vmem:[%s18861_s2 + $0x6e4] sm:$0xf]  ;;  %v8615_v50 = vld [vmem:[%s18861_s2 + $0x6f0] sm:$0xf0]  ;;  %v8490_v55 = vor.u32 %v11827_v43, %v8487_v63 }
  0xec   :  { %5193 = vmatpush.bf16.msra.mxu2 %v7882_v13  ;;  %5206 = vmatpush.bf16.msra.mxu3 %v8010_v20  ;;  %v11743_v56 = vld [vmem:[%s18861_s2 + $0x344] sm:$0xf]  ;;  %v8151_v57 = vld [vmem:[%s18861_s2 + $0x350] sm:$0xf0]  ;;  %v8618_v61 = vor.u32 %v11859_v48, %v8615_v50  ;;  %v4962_v48 = vpop.f32.mrf.mxu0 }
  0xed   :  { %v11791_v58 = vld [vmem:[%s18861_s2 + $0x4c4] sm:$0xf]  ;;  %v8343_v0 = vld [vmem:[%s18861_s2 + $0x4d0] sm:$0xf0]  ;;  %v8154_v7 = vor.u32 %v11743_v56, %v8151_v57  ;;  %v4975_v56 = vpop.f32.mrf.mxu1 }
  0xee   :  { %v11823_v1 = vld [vmem:[%s18861_s2 + $0x5c4] sm:$0xf]  ;;  %v8471_v3 = vld [vmem:[%s18861_s2 + $0x5d0] sm:$0xf0]  ;;  %v8346_v8 = vor.u32 %v11791_v58, %v8343_v0 }
  0xef   :  { %5216 = vmatpush.bf16.msrb.mxu0 %v8186_v23  ;;  %5181 = vmatpush.bf16.msra.mxu1 %v7738_v46  ;;  %v11855_v4 = vld [vmem:[%s18861_s2 + $0x6c4] sm:$0xf]  ;;  %v8599_v6 = vld [vmem:[%s18861_s2 + $0x6d0] sm:$0xf0]  ;;  %v8474_v9 = vor.u32 %v11823_v1, %v8471_v3 }
  0xf0   :  { %5194 = vmatpush.bf16.msra.mxu2 %v7866_v47  ;;  %5207 = vmatpush.bf16.msra.mxu3 %v7994_v51  ;;  %v11739_v12 = vld [vmem:[%s18861_s2 + $0x324] sm:$0xf]  ;;  %v8135_v13 = vld [vmem:[%s18861_s2 + $0x330] sm:$0xf0]  ;;  %v8602_v16 = vor.u32 %v11855_v4, %v8599_v6 }
  0xf1   :  { %v11787_v15 = vld [vmem:[%s18861_s2 + $0x4a4] sm:$0xf]  ;;  %v8327_v2 = vld [vmem:[%s18861_s2 + $0x4b0] sm:$0xf0]  ;;  %v8138_v29 = vor.u32 %v11739_v12, %v8135_v13 }
  0xf2   :  { %v11819_v17 = vld [vmem:[%s18861_s2 + $0x5a4] sm:$0xf]  ;;  %v8455_v20 = vld [vmem:[%s18861_s2 + $0x5b0] sm:$0xf0]  ;;  %5182 = vmatmul.bf16.vlgmr.msra.gmra.mxu1 %v13029_v27  ;;  %v8330_v34 = vor.u32 %v11787_v15, %v8327_v2 }
  0xf3   :  { %5217 = vmatpush.bf16.msrb.mxu0 %v8170_v52  ;;  %5226 = vmatpush.bf16.msrb.mxu1 %v8362_v54  ;;  %v11851_v23 = vld [vmem:[%s18861_s2 + $0x6a4] sm:$0xf]  ;;  %v8583_v25 = vld [vmem:[%s18861_s2 + $0x6b0] sm:$0xf0]  ;;  %v8458_v21 = vor.u32 %v11819_v17, %v8455_v20  ;;  %v4963_v54 = vadd.f32 %v4962_v48, %v14150_v53  ;;  %v4988_v20 = vpop.f32.mrf.mxu2 }
  0xf4   :  { %5239 = vmatpush.bf16.msrb.mxu2 %v8490_v55  ;;  %5252 = vmatpush.bf16.msrb.mxu3 %v8618_v61  ;;  %v11735_v31 = vld [vmem:[%s18861_s2 + $0x304] sm:$0xf]  ;;  %v8119_v60 = vld [vmem:[%s18861_s2 + $0x310] sm:$0xf0]  ;;  %v8586_v43 = vor.u32 %v11851_v23, %v8583_v25 }
  0xf5   :  { %5195 = vmatmul.bf16.vlgmr.msra.gmra.mxu2 %v13039_v33  ;;  %5208 = vmatmul.bf16.vlgmr.msra.gmra.mxu3 %v13027_v26  ;;  %v11783_v39 = vld [vmem:[%s18861_s2 + $0x484] sm:$0xf]  ;;  %v8311_v62 = vld [vmem:[%s18861_s2 + $0x490] sm:$0xf0]  ;;  %v8122_v55 = vor.u32 %v11735_v31, %v8119_v60  ;;  %v4976_v3 = vadd.f32 %v4975_v56, %v4963_v54 }
  0xf6   :  { %v11815_v63 = vld [vmem:[%s18861_s2 + $0x584] sm:$0xf]  ;;  %v8439_v46 = vld [vmem:[%s18861_s2 + $0x590] sm:$0xf0]  ;;  %v8314_v57 = vor.u32 %v11783_v39, %v8311_v62 }
  0xf7   :  { %5218 = vmatpush.bf16.msrb.mxu0 %v8154_v7  ;;  %5227 = vmatpush.bf16.msrb.mxu1 %v8346_v8  ;;  %v11847_v47 = vld [vmem:[%s18861_s2 + $0x684] sm:$0xf]  ;;  %v8567_v50 = vld [vmem:[%s18861_s2 + $0x690] sm:$0xf0]  ;;  %v8442_v58 = vor.u32 %v11815_v63, %v8439_v46  ;;  %v4977_v63 = vpop.f32.mrf.mxu1 }
  0xf8   :  { %5240 = vmatpush.bf16.msrb.mxu2 %v8474_v9  ;;  %5253 = vmatpush.bf16.msrb.mxu3 %v8602_v16  ;;  %v11891_v51 = vld [vmem:[%s18861_s2 + $0x7e4] sm:$0xf]  ;;  %v8743_v52 = vld [vmem:[%s18861_s2 + $0x7f0] sm:$0xf0]  ;;  %v8570_v1 = vor.u32 %v11847_v47, %v8567_v50 }
  0xf9   :  { %v11779_v61 = vld [vmem:[%s18861_s2 + $0x464] sm:$0xf]  ;;  %v8295_v0 = vld [vmem:[%s18861_s2 + $0x470] sm:$0xf0]  ;;  %v8746_v4 = vor.u32 %v11891_v51, %v8743_v52 }
  0xfa   :  { %v11811_v53 = vld [vmem:[%s18861_s2 + $0x564] sm:$0xf]  ;;  %v8423_v6 = vld [vmem:[%s18861_s2 + $0x570] sm:$0xf0]  ;;  %v8298_v13 = vor.u32 %v11779_v61, %v8295_v0 }
  0xfb   :  { %5219 = vmatpush.bf16.msrb.mxu0 %v8138_v29  ;;  %5228 = vmatpush.bf16.msrb.mxu1 %v8330_v34  ;;  %v11843_v7 = vld [vmem:[%s18861_s2 + $0x664] sm:$0xf]  ;;  %v8551_v8 = vld [vmem:[%s18861_s2 + $0x670] sm:$0xf0]  ;;  %v8426_v15 = vor.u32 %v11811_v53, %v8423_v6  ;;  %v4989_v34 = vadd.f32 %v4988_v20, %v4976_v3 }
  0xfc   :  { %5241 = vmatpush.bf16.msrb.mxu2 %v8458_v21  ;;  %5254 = vmatpush.bf16.msrb.mxu3 %v8586_v43  ;;  %v11887_v9 = vld [vmem:[%s18861_s2 + $0x7c4] sm:$0xf]  ;;  %v8727_v12 = vld [vmem:[%s18861_s2 + $0x7d0] sm:$0xf0]  ;;  %v8554_v17 = vor.u32 %v11843_v7, %v8551_v8  ;;  %v5001_v21 = vpop.f32.mrf.mxu3  ;;  %v4964_v43 = vpop.f32.mrf.mxu0 }
  0xfd   :  { %v11775_v16 = vld [vmem:[%s18861_s2 + $0x444] sm:$0xf]  ;;  %v8279_v2 = vld [vmem:[%s18861_s2 + $0x450] sm:$0xf0]  ;;  %v8730_v23 = vor.u32 %v11887_v9, %v8727_v12  ;;  %v14351_v46 = vadd.f32 %v5001_v21, %v4989_v34 }
  0xfe   :  { %v11807_v25 = vld [vmem:[%s18861_s2 + $0x544] sm:$0xf]  ;;  %v8407_v29 = vld [vmem:[%s18861_s2 + $0x550] sm:$0xf0]  ;;  %v8282_v47 = vor.u32 %v11775_v16, %v8279_v2 }
  0xff   :  { %5220 = vmatpush.bf16.msrb.mxu0 %v8122_v55  ;;  %5229 = vmatpush.bf16.msrb.mxu1 %v8314_v57  ;;  %v11839_v31 = vld [vmem:[%s18861_s2 + $0x644] sm:$0xf]  ;;  %v8535_v60 = vld [vmem:[%s18861_s2 + $0x650] sm:$0xf0]  ;;  %v8410_v48 = vor.u32 %v11807_v25, %v8407_v29 }
 0x100   :  { %5242 = vmatpush.bf16.msrb.mxu2 %v8442_v58  ;;  %5255 = vmatpush.bf16.msrb.mxu3 %v8570_v1  ;;  %v11883_v39 = vld [vmem:[%s18861_s2 + $0x7a4] sm:$0xf]  ;;  %v8711_v62 = vld [vmem:[%s18861_s2 + $0x7b0] sm:$0xf0]  ;;  %v8538_v52 = vor.u32 %v11839_v31, %v8535_v60 }
 0x101   :  { %v11771_v50 = vld [vmem:[%s18861_s2 + $0x424] sm:$0xf]  ;;  %v8263_v51 = vld [vmem:[%s18861_s2 + $0x430] sm:$0xf0]  ;;  %v8714_v54 = vor.u32 %v11883_v39, %v8711_v62 }
 0x102   :  { %5221 = vmatmul.bf16.vlgmr.msrb.gmra.mxu0 %v13037_v32  ;;  %v11803_v55 = vld [vmem:[%s18861_s2 + $0x524] sm:$0xf]  ;;  %v8391_v56 = vld [vmem:[%s18861_s2 + $0x530] sm:$0xf0]  ;;  %v8266_v1 = vor.u32 %v11771_v50, %v8263_v51 }
 0x103   :  { %5265 = vmatpush.bf16.msra.mxu0 %v8746_v4  ;;  %5230 = vmatpush.bf16.msrb.mxu1 %v8298_v13  ;;  %v11835_v57 = vld [vmem:[%s18861_s2 + $0x624] sm:$0xf]  ;;  %v8519_v58 = vld [vmem:[%s18861_s2 + $0x630] sm:$0xf0]  ;;  %v8394_v3 = vor.u32 %v11803_v55, %v8391_v56 }
 0x104   :  { %5243 = vmatpush.bf16.msrb.mxu2 %v8426_v15  ;;  %5256 = vmatpush.bf16.msrb.mxu3 %v8554_v17  ;;  %v11879_v61 = vld [vmem:[%s18861_s2 + $0x784] sm:$0xf]  ;;  %v8695_v0 = vld [vmem:[%s18861_s2 + $0x790] sm:$0xf0]  ;;  %v8522_v7 = vor.u32 %v11835_v57, %v8519_v58  ;;  %v4990_v15 = vpop.f32.mrf.mxu2  ;;  %v5003_v20 = vpop.f32.mrf.mxu3 }
 0x105   :  { %v11767_v4 = vld [vmem:[%s18861_s2 + $0x404] sm:$0xf]  ;;  %v8247_v53 = vld [vmem:[%s18861_s2 + $0x410] sm:$0xf0]  ;;  %v8698_v8 = vor.u32 %v11879_v61, %v8695_v0 }
 0x106   :  { %v11799_v6 = vld [vmem:[%s18861_s2 + $0x504] sm:$0xf]  ;;  %v8375_v9 = vld [vmem:[%s18861_s2 + $0x510] sm:$0xf0]  ;;  %v8250_v31 = vor.u32 %v11767_v4, %v8247_v53 }
 0x107   :  { %5266 = vmatpush.bf16.msra.mxu0 %v8730_v23  ;;  %5231 = vmatpush.bf16.msrb.mxu1 %v8282_v47  ;;  %v11831_v12 = vld [vmem:[%s18861_s2 + $0x604] sm:$0xf]  ;;  %v8503_v13 = vld [vmem:[%s18861_s2 + $0x610] sm:$0xf0]  ;;  %v8378_v34 = vor.u32 %v11799_v6, %v8375_v9 }
 0x108   :  { %5244 = vmatpush.bf16.msrb.mxu2 %v8410_v48  ;;  %5257 = vmatpush.bf16.msrb.mxu3 %v8538_v52  ;;  %v11875_v16 = vld [vmem:[%s18861_s2 + $0x764] sm:$0xf]  ;;  %v8679_v2 = vld [vmem:[%s18861_s2 + $0x770] sm:$0xf0]  ;;  %v8506_v39 = vor.u32 %v11831_v12, %v8503_v13 }
 0x109   :  { %v11923_v17 = vld [vmem:[%s18861_s2 + $0x8e4] sm:$0xf]  ;;  %v8871_v23 = vld [vmem:[%s18861_s2 + $0x8f0] sm:$0xf0]  ;;  %v8682_v62 = vor.u32 %v11875_v16, %v8679_v2 }
 0x10a   :  { %v11955_v25 = vld [vmem:[%s18861_s2 + $0x9e4] sm:$0xf]  ;;  %v8999_v29 = vld [vmem:[%s18861_s2 + $0x9f0] sm:$0xf0]  ;;  %v8874_v43 = vor.u32 %v11923_v17, %v8871_v23 }
 0x10b   :  { %5267 = vmatpush.bf16.msra.mxu0 %v8714_v54  ;;  %5232 = vmatpush.bf16.msrb.mxu1 %v8266_v1  ;;  %v11987_v21 = vld [vmem:[%s18861_s2 + $0xae4] sm:$0xf]  ;;  %v9127_v60 = vld [vmem:[%s18861_s2 + $0xaf0] sm:$0xf0]  ;;  %v9002_v63 = vor.u32 %v11955_v25, %v8999_v29 }
 0x10c   :  { %5245 = vmatpush.bf16.msrb.mxu2 %v8394_v3  ;;  %5258 = vmatpush.bf16.msrb.mxu3 %v8522_v7  ;;  %v11871_v47 = vld [vmem:[%s18861_s2 + $0x744] sm:$0xf]  ;;  %v8663_v48 = vld [vmem:[%s18861_s2 + $0x750] sm:$0xf0]  ;;  %v9130_v51 = vor.u32 %v11987_v21, %v9127_v60 }
 0x10d   :  { %v11919_v50 = vld [vmem:[%s18861_s2 + $0x8c4] sm:$0xf]  ;;  %v8855_v52 = vld [vmem:[%s18861_s2 + $0x8d0] sm:$0xf0]  ;;  %v8666_v58 = vor.u32 %v11871_v47, %v8663_v48 }
 0x10e   :  { %v11951_v54 = vld [vmem:[%s18861_s2 + $0x9c4] sm:$0xf]  ;;  %v8983_v55 = vld [vmem:[%s18861_s2 + $0x9d0] sm:$0xf0]  ;;  %v8858_v61 = vor.u32 %v11919_v50, %v8855_v52 }
 0x10f   :  { %5268 = vmatpush.bf16.msra.mxu0 %v8698_v8  ;;  %5233 = vmatpush.bf16.msrb.mxu1 %v8250_v31  ;;  %v11983_v56 = vld [vmem:[%s18861_s2 + $0xac4] sm:$0xf]  ;;  %v9111_v57 = vld [vmem:[%s18861_s2 + $0xad0] sm:$0xf0]  ;;  %v8986_v0 = vor.u32 %v11951_v54, %v8983_v55  ;;  %v5014_v21 = vpop.f32.mrf.mxu0  ;;  %v5027_v47 = vpop.f32.mrf.mxu1 }
 0x110   :  { %5246 = vmatpush.bf16.msrb.mxu2 %v8378_v34  ;;  %5259 = vmatpush.bf16.msrb.mxu3 %v8506_v39  ;;  %v11867_v1 = vld [vmem:[%s18861_s2 + $0x724] sm:$0xf]  ;;  %v8647_v3 = vld [vmem:[%s18861_s2 + $0x730] sm:$0xf0]  ;;  %v9114_v53 = vor.u32 %v11983_v56, %v9111_v57 }
 0x111   :  { %v11915_v4 = vld [vmem:[%s18861_s2 + $0x8a4] sm:$0xf]  ;;  %v8839_v6 = vld [vmem:[%s18861_s2 + $0x8b0] sm:$0xf0]  ;;  %v8650_v13 = vor.u32 %v11867_v1, %v8647_v3 }
 0x112   :  { %v11947_v7 = vld [vmem:[%s18861_s2 + $0x9a4] sm:$0xf]  ;;  %v8967_v8 = vld [vmem:[%s18861_s2 + $0x9b0] sm:$0xf0]  ;;  %5234 = vmatmul.bf16.vlgmr.msrb.gmra.mxu1 %v13173_v41  ;;  %v8842_v16 = vor.u32 %v11915_v4, %v8839_v6 }
 0x113   :  { %5269 = vmatpush.bf16.msra.mxu0 %v8682_v62  ;;  %5278 = vmatpush.bf16.msra.mxu1 %v8874_v43  ;;  %v11979_v9 = vld [vmem:[%s18861_s2 + $0xaa4] sm:$0xf]  ;;  %v9095_v12 = vld [vmem:[%s18861_s2 + $0xab0] sm:$0xf0]  ;;  %v8970_v2 = vor.u32 %v11947_v7, %v8967_v8  ;;  %v5015_v43 = vadd.f32 %v5014_v21, %v14351_v46 }
 0x114   :  { %5291 = vmatpush.bf16.msra.mxu2 %v9002_v63  ;;  %5304 = vmatpush.bf16.msra.mxu3 %v9130_v51  ;;  %v11863_v15 = vld [vmem:[%s18861_s2 + $0x704] sm:$0xf]  ;;  %v8631_v17 = vld [vmem:[%s18861_s2 + $0x710] sm:$0xf0]  ;;  %v9098_v25 = vor.u32 %v11979_v9, %v9095_v12 }
 0x115   :  { %5247 = vmatmul.bf16.vlgmr.msrb.gmra.mxu2 %v13177_v44  ;;  %5260 = vmatmul.bf16.vlgmr.msrb.gmra.mxu3 %v13165_v38  ;;  %v11911_v20 = vld [vmem:[%s18861_s2 + $0x884] sm:$0xf]  ;;  %v8823_v23 = vld [vmem:[%s18861_s2 + $0x890] sm:$0xf0]  ;;  %v8634_v63 = vor.u32 %v11863_v15, %v8631_v17  ;;  %v5028_v55 = vadd.f32 %v5027_v47, %v5015_v43 }
 0x116   :  { %v11943_v29 = vld [vmem:[%s18861_s2 + $0x984] sm:$0xf]  ;;  %v8951_v31 = vld [vmem:[%s18861_s2 + $0x990] sm:$0xf0]  ;;  %v8826_v48 = vor.u32 %v11911_v20, %v8823_v23 }
 0x117   :  { %5270 = vmatpush.bf16.msra.mxu0 %v8666_v58  ;;  %5279 = vmatpush.bf16.msra.mxu1 %v8858_v61  ;;  %v11975_v34 = vld [vmem:[%s18861_s2 + $0xa84] sm:$0xf]  ;;  %v9079_v60 = vld [vmem:[%s18861_s2 + $0xa90] sm:$0xf0]  ;;  %v8954_v50 = vor.u32 %v11943_v29, %v8951_v31  ;;  %v5029_v29 = vpop.f32.mrf.mxu1 }
 0x118   :  { %5292 = vmatpush.bf16.msra.mxu2 %v8986_v0  ;;  %5305 = vmatpush.bf16.msra.mxu3 %v9114_v53  ;;  %v12019_v39 = vld [vmem:[%s18861_s2 + $0xbe4] sm:$0xf]  ;;  %v9255_v62 = vld [vmem:[%s18861_s2 + $0xbf0] sm:$0xf0]  ;;  %v9082_v54 = vor.u32 %v11975_v34, %v9079_v60  ;;  %v5040_v8 = vpop.f32.mrf.mxu2 }
 0x119   :  { %v11907_v51 = vld [vmem:[%s18861_s2 + $0x864] sm:$0xf]  ;;  %v8807_v52 = vld [vmem:[%s18861_s2 + $0x870] sm:$0xf0]  ;;  %v9258_v56 = vor.u32 %v12019_v39, %v9255_v62 }
 0x11a   :  { %v11939_v46 = vld [vmem:[%s18861_s2 + $0x964] sm:$0xf]  ;;  %v8935_v57 = vld [vmem:[%s18861_s2 + $0x970] sm:$0xf0]  ;;  %v8810_v3 = vor.u32 %v11907_v51, %v8807_v52 }
 0x11b   :  { %5271 = vmatpush.bf16.msra.mxu0 %v8650_v13  ;;  %5280 = vmatpush.bf16.msra.mxu1 %v8842_v16  ;;  %v11971_v58 = vld [vmem:[%s18861_s2 + $0xa64] sm:$0xf]  ;;  %v9063_v61 = vld [vmem:[%s18861_s2 + $0xa70] sm:$0xf0]  ;;  %v8938_v4 = vor.u32 %v11939_v46, %v8935_v57  ;;  %v5041_v16 = vadd.f32 %v5040_v8, %v5028_v55 }
 0x11c   :  { %5293 = vmatpush.bf16.msra.mxu2 %v8970_v2  ;;  %5306 = vmatpush.bf16.msra.mxu3 %v9098_v25  ;;  %v12015_v0 = vld [vmem:[%s18861_s2 + $0xbc4] sm:$0xf]  ;;  %v9239_v1 = vld [vmem:[%s18861_s2 + $0xbd0] sm:$0xf0]  ;;  %v9066_v7 = vor.u32 %v11971_v58, %v9063_v61  ;;  %v5053_v2 = vpop.f32.mrf.mxu3  ;;  %v5016_v25 = vpop.f32.mrf.mxu0 }
 0x11d   :  { %v11903_v53 = vld [vmem:[%s18861_s2 + $0x844] sm:$0xf]  ;;  %v8791_v6 = vld [vmem:[%s18861_s2 + $0x850] sm:$0xf0]  ;;  %v9242_v9 = vor.u32 %v12015_v0, %v9239_v1  ;;  %v14550_v31 = vadd.f32 %v5053_v2, %v5041_v16 }
 0x11e   :  { %v11935_v12 = vld [vmem:[%s18861_s2 + $0x944] sm:$0xf]  ;;  %v8919_v13 = vld [vmem:[%s18861_s2 + $0x950] sm:$0xf0]  ;;  %v8794_v34 = vor.u32 %v11903_v53, %v8791_v6 }
 0x11f   :  { %5272 = vmatpush.bf16.msra.mxu0 %v8634_v63  ;;  %5281 = vmatpush.bf16.msra.mxu1 %v8826_v48  ;;  %v11967_v15 = vld [vmem:[%s18861_s2 + $0xa44] sm:$0xf]  ;;  %v9047_v17 = vld [vmem:[%s18861_s2 + $0xa50] sm:$0xf0]  ;;  %v8922_v21 = vor.u32 %v11935_v12, %v8919_v13 }
 0x120   :  { %5294 = vmatpush.bf16.msra.mxu2 %v8954_v50  ;;  %5307 = vmatpush.bf16.msra.mxu3 %v9082_v54  ;;  %v12011_v20 = vld [vmem:[%s18861_s2 + $0xba4] sm:$0xf]  ;;  %v9223_v23 = vld [vmem:[%s18861_s2 + $0xbb0] sm:$0xf0]  ;;  %v9050_v62 = vor.u32 %v11967_v15, %v9047_v17 }
 0x121   :  { %v11899_v60 = vld [vmem:[%s18861_s2 + $0x824] sm:$0xf]  ;;  %v8775_v39 = vld [vmem:[%s18861_s2 + $0x830] sm:$0xf0]  ;;  %v9226_v43 = vor.u32 %v12011_v20, %v9223_v23 }
 0x122   :  { %5273 = vmatmul.bf16.vlgmr.msra.gmra.mxu0 %v13175_v42  ;;  %v11931_v63 = vld [vmem:[%s18861_s2 + $0x924] sm:$0xf]  ;;  %v8903_v47 = vld [vmem:[%s18861_s2 + $0x930] sm:$0xf0]  ;;  %v8778_v54 = vor.u32 %v11899_v60, %v8775_v39 }
 0x123   :  { %5317 = vmatpush.bf16.msrb.mxu0 %v9258_v56  ;;  %5282 = vmatpush.bf16.msra.mxu1 %v8810_v3  ;;  %v11963_v48 = vld [vmem:[%s18861_s2 + $0xa24] sm:$0xf]  ;;  %v9031_v50 = vld [vmem:[%s18861_s2 + $0xa30] sm:$0xf0]  ;;  %v8906_v55 = vor.u32 %v11931_v63, %v8903_v47 }
 0x124   :  { %5295 = vmatpush.bf16.msra.mxu2 %v8938_v4  ;;  %5308 = vmatpush.bf16.msra.mxu3 %v9066_v7  ;;  %v12007_v51 = vld [vmem:[%s18861_s2 + $0xb84] sm:$0xf]  ;;  %v9207_v52 = vld [vmem:[%s18861_s2 + $0xb90] sm:$0xf0]  ;;  %v9034_v58 = vor.u32 %v11963_v48, %v9031_v50  ;;  %v5042_v4 = vpop.f32.mrf.mxu2  ;;  %v5055_v8 = vpop.f32.mrf.mxu3 }
 0x125   :  { %v11895_v56 = vld [vmem:[%s18861_s2 + $0x804] sm:$0xf]  ;;  %v8759_v46 = vld [vmem:[%s18861_s2 + $0x810] sm:$0xf0]  ;;  %v9210_v61 = vor.u32 %v12007_v51, %v9207_v52 }
 0x126   :  { %v11927_v57 = vld [vmem:[%s18861_s2 + $0x904] sm:$0xf]  ;;  %v8887_v0 = vld [vmem:[%s18861_s2 + $0x910] sm:$0xf0]  ;;  %v8762_v15 = vor.u32 %v11895_v56, %v8759_v46 }
 0x127   :  { %5318 = vmatpush.bf16.msrb.mxu0 %v9242_v9  ;;  %5283 = vmatpush.bf16.msra.mxu1 %v8794_v34  ;;  %v11959_v1 = vld [vmem:[%s18861_s2 + $0xa04] sm:$0xf]  ;;  %v9015_v3 = vld [vmem:[%s18861_s2 + $0xa10] sm:$0xf0]  ;;  %v8890_v16 = vor.u32 %v11927_v57, %v8887_v0 }
 0x128   :  { %5296 = vmatpush.bf16.msra.mxu2 %v8922_v21  ;;  %5309 = vmatpush.bf16.msra.mxu3 %v9050_v62  ;;  %v12003_v53 = vld [vmem:[%s18861_s2 + $0xb64] sm:$0xf]  ;;  %v9191_v6 = vld [vmem:[%s18861_s2 + $0xb70] sm:$0xf0]  ;;  %v9018_v20 = vor.u32 %v11959_v1, %v9015_v3 }
 0x129   :  { %v12051_v7 = vld [vmem:[%s18861_s2 + $0xce4] sm:$0xf]  ;;  %v9383_v9 = vld [vmem:[%s18861_s2 + $0xcf0] sm:$0xf0]  ;;  %v9194_v23 = vor.u32 %v12003_v53, %v9191_v6 }
 0x12a   :  { %v12083_v12 = vld [vmem:[%s18861_s2 + $0xde4] sm:$0xf]  ;;  %v9511_v13 = vld [vmem:[%s18861_s2 + $0xdf0] sm:$0xf0]  ;;  %v9386_v25 = vor.u32 %v12051_v7, %v9383_v9 }
 0x12b   :  { %5319 = vmatpush.bf16.msrb.mxu0 %v9226_v43  ;;  %5284 = vmatpush.bf16.msra.mxu1 %v8778_v54  ;;  %v12115_v2 = vld [vmem:[%s18861_s2 + $0xee4] sm:$0xf]  ;;  %v9639_v17 = vld [vmem:[%s18861_s2 + $0xef0] sm:$0xf0]  ;;  %v9514_v29 = vor.u32 %v12083_v12, %v9511_v13 }
 0x12c   :  { %5297 = vmatpush.bf16.msra.mxu2 %v8906_v55  ;;  %5310 = vmatpush.bf16.msra.mxu3 %v9034_v58  ;;  %v11999_v34 = vld [vmem:[%s18861_s2 + $0xb44] sm:$0xf]  ;;  %v9175_v21 = vld [vmem:[%s18861_s2 + $0xb50] sm:$0xf0]  ;;  %v9642_v39 = vor.u32 %v12115_v2, %v9639_v17 }
 0x12d   :  { %v12047_v60 = vld [vmem:[%s18861_s2 + $0xcc4] sm:$0xf]  ;;  %v9367_v62 = vld [vmem:[%s18861_s2 + $0xcd0] sm:$0xf0]  ;;  %v9178_v50 = vor.u32 %v11999_v34, %v9175_v21 }
 0x12e   :  { %v12079_v43 = vld [vmem:[%s18861_s2 + $0xdc4] sm:$0xf]  ;;  %v9495_v63 = vld [vmem:[%s18861_s2 + $0xdd0] sm:$0xf0]  ;;  %v9370_v51 = vor.u32 %v12047_v60, %v9367_v62 }
 0x12f   :  { %5320 = vmatpush.bf16.msrb.mxu0 %v9210_v61  ;;  %5285 = vmatpush.bf16.msra.mxu1 %v8762_v15  ;;  %v12111_v47 = vld [vmem:[%s18861_s2 + $0xec4] sm:$0xf]  ;;  %v9623_v48 = vld [vmem:[%s18861_s2 + $0xed0] sm:$0xf0]  ;;  %v9498_v52 = vor.u32 %v12079_v43, %v9495_v63  ;;  %v5066_v2 = vpop.f32.mrf.mxu0  ;;  %v5079_v34 = vpop.f32.mrf.mxu1 }
 0x130   :  { %5298 = vmatpush.bf16.msra.mxu2 %v8890_v16  ;;  %5311 = vmatpush.bf16.msra.mxu3 %v9018_v20  ;;  %v11995_v54 = vld [vmem:[%s18861_s2 + $0xb24] sm:$0xf]  ;;  %v9159_v55 = vld [vmem:[%s18861_s2 + $0xb30] sm:$0xf0]  ;;  %v9626_v46 = vor.u32 %v12111_v47, %v9623_v48 }
 0x131   :  { %v12043_v56 = vld [vmem:[%s18861_s2 + $0xca4] sm:$0xf]  ;;  %v9351_v57 = vld [vmem:[%s18861_s2 + $0xcb0] sm:$0xf0]  ;;  %v9162_v3 = vor.u32 %v11995_v54, %v9159_v55 }
 0x132   :  { %5286 = vmatmul.bf16.vlgmr.msra.gmra.mxu1 %v13373_v24  ;;  %v12075_v58 = vld [vmem:[%s18861_s2 + $0xda4] sm:$0xf]  ;;  %v9479_v61 = vld [vmem:[%s18861_s2 + $0xdb0] sm:$0xf0]  ;;  %v9354_v53 = vor.u32 %v12043_v56, %v9351_v57 }
 0x133   :  { %5321 = vmatpush.bf16.msrb.mxu0 %v9194_v23  ;;  %5330 = vmatpush.bf16.msrb.mxu1 %v9386_v25  ;;  %v12107_v0 = vld [vmem:[%s18861_s2 + $0xea4] sm:$0xf]  ;;  %v9607_v1 = vld [vmem:[%s18861_s2 + $0xeb0] sm:$0xf0]  ;;  %v9482_v6 = vor.u32 %v12075_v58, %v9479_v61  ;;  %v5067_v25 = vadd.f32 %v5066_v2, %v14550_v31 }
 0x134   :  { %5343 = vmatpush.bf16.msrb.mxu2 %v9514_v29  ;;  %5356 = vmatpush.bf16.msrb.mxu3 %v9642_v39  ;;  %v11991_v4 = vld [vmem:[%s18861_s2 + $0xb04] sm:$0xf]  ;;  %v9143_v7 = vld [vmem:[%s18861_s2 + $0xb10] sm:$0xf0]  ;;  %v9610_v12 = vor.u32 %v12107_v0, %v9607_v1 }
 0x135   :  { %5299 = vmatmul.bf16.vlgmr.msra.gmra.mxu2 %v13390_v18  ;;  %5312 = vmatmul.bf16.vlgmr.msra.gmra.mxu3 %v13386_v30  ;;  %v12039_v8 = vld [vmem:[%s18861_s2 + $0xc84] sm:$0xf]  ;;  %v9335_v9 = vld [vmem:[%s18861_s2 + $0xc90] sm:$0xf0]  ;;  %v9146_v29 = vor.u32 %v11991_v4, %v9143_v7  ;;  %v5080_v63 = vadd.f32 %v5079_v34, %v5067_v25 }
 0x136   :  { %v12071_v13 = vld [vmem:[%s18861_s2 + $0xd84] sm:$0xf]  ;;  %v9463_v15 = vld [vmem:[%s18861_s2 + $0xd90] sm:$0xf0]  ;;  %v9338_v21 = vor.u32 %v12039_v8, %v9335_v9 }
 0x137   :  { %5322 = vmatpush.bf16.msrb.mxu0 %v9178_v50  ;;  %5331 = vmatpush.bf16.msrb.mxu1 %v9370_v51  ;;  %v12103_v16 = vld [vmem:[%s18861_s2 + $0xe84] sm:$0xf]  ;;  %v9591_v17 = vld [vmem:[%s18861_s2 + $0xe90] sm:$0xf0]  ;;  %v9466_v60 = vor.u32 %v12071_v13, %v9463_v15  ;;  %v5081_v13 = vpop.f32.mrf.mxu1 }
 0x138   :  { %5344 = vmatpush.bf16.msrb.mxu2 %v9498_v52  ;;  %5357 = vmatpush.bf16.msrb.mxu3 %v9626_v46  ;;  %v12147_v20 = vld [vmem:[%s18861_s2 + $0xfe4] sm:$0xf]  ;;  %v9767_v23 = vld [vmem:[%s18861_s2 + $0xff0] sm:$0xf0]  ;;  %v9594_v43 = vor.u32 %v12103_v16, %v9591_v17  ;;  %v5092_v61 = vpop.f32.mrf.mxu2 }
 0x139   :  { %v12035_v39 = vld [vmem:[%s18861_s2 + $0xc64] sm:$0xf]  ;;  %v9319_v62 = vld [vmem:[%s18861_s2 + $0xc70] sm:$0xf0]  ;;  %v9770_v47 = vor.u32 %v12147_v20, %v9767_v23 }
 0x13a   :  { %v12067_v31 = vld [vmem:[%s18861_s2 + $0xd64] sm:$0xf]  ;;  %v9447_v48 = vld [vmem:[%s18861_s2 + $0xd70] sm:$0xf0]  ;;  %v9322_v55 = vor.u32 %v12035_v39, %v9319_v62 }
 0x13b   :  { %5323 = vmatpush.bf16.msrb.mxu0 %v9162_v3  ;;  %5332 = vmatpush.bf16.msrb.mxu1 %v9354_v53  ;;  %v12099_v50 = vld [vmem:[%s18861_s2 + $0xe64] sm:$0xf]  ;;  %v9575_v51 = vld [vmem:[%s18861_s2 + $0xe70] sm:$0xf0]  ;;  %v9450_v56 = vor.u32 %v12067_v31, %v9447_v48  ;;  %v5093_v53 = vadd.f32 %v5092_v61, %v5080_v63 }
 0x13c   :  { %5345 = vmatpush.bf16.msrb.mxu2 %v9482_v6  ;;  %5358 = vmatpush.bf16.msrb.mxu3 %v9610_v12  ;;  %v12143_v52 = vld [vmem:[%s18861_s2 + $0xfc4] sm:$0xf]  ;;  %v9751_v54 = vld [vmem:[%s18861_s2 + $0xfd0] sm:$0xf0]  ;;  %v9578_v58 = vor.u32 %v12099_v50, %v9575_v51  ;;  %v5105_v6 = vpop.f32.mrf.mxu3  ;;  %v5068_v12 = vpop.f32.mrf.mxu0 }
 0x13d   :  { %v12031_v46 = vld [vmem:[%s18861_s2 + $0xc44] sm:$0xf]  ;;  %v9303_v57 = vld [vmem:[%s18861_s2 + $0xc50] sm:$0xf0]  ;;  %v9754_v0 = vor.u32 %v12143_v52, %v9751_v54  ;;  %v14749_v15 = vadd.f32 %v5105_v6, %v5093_v53 }
 0x13e   :  { %v12063_v1 = vld [vmem:[%s18861_s2 + $0xd44] sm:$0xf]  ;;  %v9431_v3 = vld [vmem:[%s18861_s2 + $0xd50] sm:$0xf0]  ;;  %v9306_v16 = vor.u32 %v12031_v46, %v9303_v57 }
 0x13f   :  { %5324 = vmatpush.bf16.msrb.mxu0 %v9146_v29  ;;  %5333 = vmatpush.bf16.msrb.mxu1 %v9338_v21  ;;  %v12095_v4 = vld [vmem:[%s18861_s2 + $0xe44] sm:$0xf]  ;;  %v9559_v7 = vld [vmem:[%s18861_s2 + $0xe50] sm:$0xf0]  ;;  %v9434_v2 = vor.u32 %v12063_v1, %v9431_v3 }
 0x140   :  { %5346 = vmatpush.bf16.msrb.mxu2 %v9466_v60  ;;  %5359 = vmatpush.bf16.msrb.mxu3 %v9594_v43  ;;  %v12139_v8 = vld [vmem:[%s18861_s2 + $0xfa4] sm:$0xf]  ;;  %v9735_v9 = vld [vmem:[%s18861_s2 + $0xfb0] sm:$0xf0]  ;;  %v9562_v23 = vor.u32 %v12095_v4, %v9559_v7 }
 0x141   :  { %v12027_v17 = vld [vmem:[%s18861_s2 + $0xc24] sm:$0xf]  ;;  %v9287_v20 = vld [vmem:[%s18861_s2 + $0xc30] sm:$0xf0]  ;;  %v9738_v25 = vor.u32 %v12139_v8, %v9735_v9 }
 0x142   :  { %5325 = vmatmul.bf16.vlgmr.msrb.gmra.mxu0 %v13400_v35  ;;  %v12059_v29 = vld [vmem:[%s18861_s2 + $0xd24] sm:$0xf]  ;;  %v9415_v34 = vld [vmem:[%s18861_s2 + $0xd30] sm:$0xf0]  ;;  %v9290_v43 = vor.u32 %v12027_v17, %v9287_v20 }
 0x143   :  { %5369 = vmatpush.bf16.msra.mxu0 %v9770_v47  ;;  %5334 = vmatpush.bf16.msrb.mxu1 %v9322_v55  ;;  %v12091_v21 = vld [vmem:[%s18861_s2 + $0xe24] sm:$0xf]  ;;  %v9543_v60 = vld [vmem:[%s18861_s2 + $0xe30] sm:$0xf0]  ;;  %v9418_v63 = vor.u32 %v12059_v29, %v9415_v34 }
 0x144   :  { %5347 = vmatpush.bf16.msrb.mxu2 %v9450_v56  ;;  %5360 = vmatpush.bf16.msrb.mxu3 %v9578_v58  ;;  %v12135_v39 = vld [vmem:[%s18861_s2 + $0xf84] sm:$0xf]  ;;  %v9719_v62 = vld [vmem:[%s18861_s2 + $0xf90] sm:$0xf0]  ;;  %v9546_v50 = vor.u32 %v12091_v21, %v9543_v60  ;;  %v5094_v56 = vpop.f32.mrf.mxu2  ;;  %v5107_v61 = vpop.f32.mrf.mxu3 }
 0x145   :  { %v12023_v47 = vld [vmem:[%s18861_s2 + $0xc04] sm:$0xf]  ;;  %v9271_v31 = vld [vmem:[%s18861_s2 + $0xc10] sm:$0xf0]  ;;  %v9722_v51 = vor.u32 %v12135_v39, %v9719_v62 }
 0x146   :  { %v12055_v48 = vld [vmem:[%s18861_s2 + $0xd04] sm:$0xf]  ;;  %v9399_v52 = vld [vmem:[%s18861_s2 + $0xd10] sm:$0xf0]  ;;  %v9274_v4 = vor.u32 %v12023_v47, %v9271_v31 }
 0x147   :  { %5370 = vmatpush.bf16.msra.mxu0 %v9754_v0  ;;  %5335 = vmatpush.bf16.msrb.mxu1 %v9306_v16  ;;  %v12087_v54 = vld [vmem:[%s18861_s2 + $0xe04] sm:$0xf]  ;;  %v9527_v55 = vld [vmem:[%s18861_s2 + $0xe10] sm:$0xf0]  ;;  %v9402_v53 = vor.u32 %v12055_v48, %v9399_v52 }
 0x148   :  { %5348 = vmatpush.bf16.msrb.mxu2 %v9434_v2  ;;  %5361 = vmatpush.bf16.msrb.mxu3 %v9562_v23  ;;  %v12131_v46 = vld [vmem:[%s18861_s2 + $0xf64] sm:$0xf]  ;;  %v9703_v57 = vld [vmem:[%s18861_s2 + $0xf70] sm:$0xf0]  ;;  %v9530_v8 = vor.u32 %v12087_v54, %v9527_v55 }
 0x149   :  { %v12179_v58 = vld [vmem:[%s18861_s2 + $0x10e4] sm:$0xf]  ;;  %v9895_v0 = vld [vmem:[%s18861_s2 + $0x10f0] sm:$0xf0]  ;;  %v9706_v9 = vor.u32 %v12131_v46, %v9703_v57 }
 0x14a   :  { %v12211_v1 = vld [vmem:[%s18861_s2 + $0x11e4] sm:$0xf]  ;;  %v10023_v3 = vld [vmem:[%s18861_s2 + $0x11f0] sm:$0xf0]  ;;  %v9898_v12 = vor.u32 %v12179_v58, %v9895_v0 }
 0x14b   :  { %5371 = vmatpush.bf16.msra.mxu0 %v9738_v25  ;;  %5336 = vmatpush.bf16.msrb.mxu1 %v9290_v43  ;;  %v12243_v6 = vld [vmem:[%s18861_s2 + $0x12e4] sm:$0xf]  ;;  %v10151_v7 = vld [vmem:[%s18861_s2 + $0x12f0] sm:$0xf0]  ;;  %v10026_v13 = vor.u32 %v12211_v1, %v10023_v3 }
 0x14c   :  { %5349 = vmatpush.bf16.msrb.mxu2 %v9418_v63  ;;  %5362 = vmatpush.bf16.msrb.mxu3 %v9546_v50  ;;  %v12127_v16 = vld [vmem:[%s18861_s2 + $0xf44] sm:$0xf]  ;;  %v9687_v2 = vld [vmem:[%s18861_s2 + $0xf50] sm:$0xf0]  ;;  %v10154_v20 = vor.u32 %v12243_v6, %v10151_v7 }
 0x14d   :  { %v12175_v17 = vld [vmem:[%s18861_s2 + $0x10c4] sm:$0xf]  ;;  %v9879_v23 = vld [vmem:[%s18861_s2 + $0x10d0] sm:$0xf0]  ;;  %v9690_v60 = vor.u32 %v12127_v16, %v9687_v2 }
 0x14e   :  { %v12207_v25 = vld [vmem:[%s18861_s2 + $0x11c4] sm:$0xf]  ;;  %v10007_v29 = vld [vmem:[%s18861_s2 + $0x11d0] sm:$0xf0]  ;;  %v9882_v39 = vor.u32 %v12175_v17, %v9879_v23 }
 0x14f   :  { %5372 = vmatpush.bf16.msra.mxu0 %v9722_v51  ;;  %5337 = vmatpush.bf16.msrb.mxu1 %v9274_v4  ;;  %v12239_v34 = vld [vmem:[%s18861_s2 + $0x12c4] sm:$0xf]  ;;  %v10135_v21 = vld [vmem:[%s18861_s2 + $0x12d0] sm:$0xf0]  ;;  %v10010_v62 = vor.u32 %v12207_v25, %v10007_v29  ;;  %v5118_v6 = vpop.f32.mrf.mxu0  ;;  %v5131_v16 = vpop.f32.mrf.mxu1 }
 0x150   :  { %5350 = vmatpush.bf16.msrb.mxu2 %v9402_v53  ;;  %5363 = vmatpush.bf16.msrb.mxu3 %v9530_v8  ;;  %v12123_v43 = vld [vmem:[%s18861_s2 + $0xf24] sm:$0xf]  ;;  %v9671_v63 = vld [vmem:[%s18861_s2 + $0xf30] sm:$0xf0]  ;;  %v10138_v31 = vor.u32 %v12239_v34, %v10135_v21 }
 0x151   :  { %v12171_v47 = vld [vmem:[%s18861_s2 + $0x10a4] sm:$0xf]  ;;  %v9863_v48 = vld [vmem:[%s18861_s2 + $0x10b0] sm:$0xf0]  ;;  %v9674_v55 = vor.u32 %v12123_v43, %v9671_v63 }
 0x152   :  { %5338 = vmatmul.bf16.vlgmr.msrb.gmra.mxu1 %v13596_v28  ;;  %v12203_v50 = vld [vmem:[%s18861_s2 + $0x11a4] sm:$0xf]  ;;  %v9991_v51 = vld [vmem:[%s18861_s2 + $0x11b0] sm:$0xf0]  ;;  %v9866_v46 = vor.u32 %v12171_v47, %v9863_v48 }
 0x153   :  { %5373 = vmatpush.bf16.msra.mxu0 %v9706_v9  ;;  %5382 = vmatpush.bf16.msra.mxu1 %v9898_v12  ;;  %v12235_v52 = vld [vmem:[%s18861_s2 + $0x12a4] sm:$0xf]  ;;  %v10119_v54 = vld [vmem:[%s18861_s2 + $0x12b0] sm:$0xf0]  ;;  %v9994_v57 = vor.u32 %v12203_v50, %v9991_v51  ;;  %v5119_v12 = vadd.f32 %v5118_v6, %v14749_v15 }
 0x154   :  { %5395 = vmatpush.bf16.msra.mxu2 %v10026_v13  ;;  %5408 = vmatpush.bf16.msra.mxu3 %v10154_v20  ;;  %v12119_v56 = vld [vmem:[%s18861_s2 + $0xf04] sm:$0xf]  ;;  %v9655_v58 = vld [vmem:[%s18861_s2 + $0xf10] sm:$0xf0]  ;;  %v10122_v1 = vor.u32 %v12235_v52, %v10119_v54 }
 0x155   :  { %5351 = vmatmul.bf16.vlgmr.msrb.gmra.mxu2 %v13613_v59  ;;  %5364 = vmatmul.bf16.vlgmr.msrb.gmra.mxu3 %v13609_v19  ;;  %v12167_v61 = vld [vmem:[%s18861_s2 + $0x1084] sm:$0xf]  ;;  %v9847_v0 = vld [vmem:[%s18861_s2 + $0x1090] sm:$0xf0]  ;;  %v9658_v13 = vor.u32 %v12119_v56, %v9655_v58  ;;  %v5132_v29 = vadd.f32 %v5131_v16, %v5119_v12 }
 0x156   :  { %v12199_v3 = vld [vmem:[%s18861_s2 + $0x1184] sm:$0xf]  ;;  %v9975_v4 = vld [vmem:[%s18861_s2 + $0x1190] sm:$0xf0]  ;;  %v9850_v2 = vor.u32 %v12167_v61, %v9847_v0 }
 0x157   :  { %5374 = vmatpush.bf16.msra.mxu0 %v9690_v60  ;;  %5383 = vmatpush.bf16.msra.mxu1 %v9882_v39  ;;  %v12231_v53 = vld [vmem:[%s18861_s2 + $0x1284] sm:$0xf]  ;;  %v10103_v7 = vld [vmem:[%s18861_s2 + $0x1290] sm:$0xf0]  ;;  %v9978_v17 = vor.u32 %v12199_v3, %v9975_v4  ;;  %v5133_v3 = vpop.f32.mrf.mxu1 }
 0x158   :  { %5396 = vmatpush.bf16.msra.mxu2 %v10010_v62  ;;  %5409 = vmatpush.bf16.msra.mxu3 %v10138_v31  ;;  %v12275_v8 = vld [vmem:[%s18861_s2 + $0x13e4] sm:$0xf]  ;;  %v10279_v9 = vld [vmem:[%s18861_s2 + $0x13f0] sm:$0xf0]  ;;  %v10106_v25 = vor.u32 %v12231_v53, %v10103_v7  ;;  %v5144_v51 = vpop.f32.mrf.mxu2  ;;  %v5157_v58 = vpop.f32.mrf.mxu3 }
 0x159   :  { %v12163_v20 = vld [vmem:[%s18861_s2 + $0x1064] sm:$0xf]  ;;  %v9831_v23 = vld [vmem:[%s18861_s2 + $0x1070] sm:$0xf0]  ;;  %v10282_v34 = vor.u32 %v12275_v8, %v10279_v9 }
 0x15a   :  { %v12195_v15 = vld [vmem:[%s18861_s2 + $0x1164] sm:$0xf]  ;;  %v9959_v21 = vld [vmem:[%s18861_s2 + $0x1170] sm:$0xf0]  ;;  %v9834_v63 = vor.u32 %v12163_v20, %v9831_v23 }
 0x15b   :  { %5375 = vmatpush.bf16.msra.mxu0 %v9674_v55  ;;  %5384 = vmatpush.bf16.msra.mxu1 %v9866_v46  ;;  %v12227_v60 = vld [vmem:[%s18861_s2 + $0x1264] sm:$0xf]  ;;  %v10087_v39 = vld [vmem:[%s18861_s2 + $0x1270] sm:$0xf0]  ;;  %v9962_v47 = vor.u32 %v12195_v15, %v9959_v21  ;;  %v5145_v46 = vadd.f32 %v5144_v51, %v5132_v29 }
 0x15c   :  { %5397 = vmatpush.bf16.msra.mxu2 %v9994_v57  ;;  %5410 = vmatpush.bf16.msra.mxu3 %v10122_v1  ;;  %v12271_v62 = vld [vmem:[%s18861_s2 + $0x13c4] sm:$0xf]  ;;  %v10263_v43 = vld [vmem:[%s18861_s2 + $0x13d0] sm:$0xf0]  ;;  %v10090_v50 = vor.u32 %v12227_v60, %v10087_v39  ;;  %v5120_v57 = vpop.f32.mrf.mxu0 }
 0x15d   :  { %v12159_v31 = vld [vmem:[%s18861_s2 + $0x1044] sm:$0xf]  ;;  %v9815_v48 = vld [vmem:[%s18861_s2 + $0x1050] sm:$0xf0]  ;;  %v10266_v52 = vor.u32 %v12271_v62, %v10263_v43  ;;  %v5158_v4 = vadd.f32 %v5157_v58, %v5145_v46 }
 0x15e   :  { %v12191_v54 = vld [vmem:[%s18861_s2 + $0x1144] sm:$0xf]  ;;  %v9943_v55 = vld [vmem:[%s18861_s2 + $0x1150] sm:$0xf0]  ;;  %v9818_v53 = vor.u32 %v12159_v31, %v9815_v48 }
 0x15f   :  { %5376 = vmatpush.bf16.msra.mxu0 %v9658_v13  ;;  %5385 = vmatpush.bf16.msra.mxu1 %v9850_v2  ;;  %v12223_v56 = vld [vmem:[%s18861_s2 + $0x1244] sm:$0xf]  ;;  %v10071_v61 = vld [vmem:[%s18861_s2 + $0x1250] sm:$0xf0]  ;;  %v9946_v6 = vor.u32 %v12191_v54, %v9943_v55 }
 0x160   :  { %5398 = vmatpush.bf16.msra.mxu2 %v9978_v17  ;;  %5411 = vmatpush.bf16.msra.mxu3 %v10106_v25  ;;  %v12267_v0 = vld [vmem:[%s18861_s2 + $0x13a4] sm:$0xf]  ;;  %v10247_v1 = vld [vmem:[%s18861_s2 + $0x13b0] sm:$0xf0]  ;;  %v10074_v9 = vor.u32 %v12223_v56, %v10071_v61  ;;  %v5159_v51 = vpop.f32.mrf.mxu3 }
 0x161   :  { %v12155_v7 = vld [vmem:[%s18861_s2 + $0x1024] sm:$0xf]  ;;  %v9799_v8 = vld [vmem:[%s18861_s2 + $0x1030] sm:$0xf0]  ;;  %v10250_v12 = vor.u32 %v12267_v0, %v10247_v1 }
 0x162   :  { %5377 = vmatmul.bf16.vlgmr.msra.gmra.mxu0 %v13623_v37  ;;  %v12187_v13 = vld [vmem:[%s18861_s2 + $0x1124] sm:$0xf]  ;;  %v9927_v16 = vld [vmem:[%s18861_s2 + $0x1130] sm:$0xf0]  ;;  %v9802_v25 = vor.u32 %v12155_v7, %v9799_v8 }
 0x163   :  { %5421 = vmatpush.bf16.msrb.mxu0 %v10282_v34  ;;  %5386 = vmatpush.bf16.msra.mxu1 %v9834_v63  ;;  %v12219_v2 = vld [vmem:[%s18861_s2 + $0x1224] sm:$0xf]  ;;  %v10055_v17 = vld [vmem:[%s18861_s2 + $0x1230] sm:$0xf0]  ;;  %v9930_v29 = vor.u32 %v12187_v13, %v9927_v16 }
 0x164   :  { %5399 = vmatpush.bf16.msra.mxu2 %v9962_v47  ;;  %5412 = vmatpush.bf16.msra.mxu3 %v10090_v50  ;;  %v12263_v20 = vld [vmem:[%s18861_s2 + $0x1384] sm:$0xf]  ;;  %v10231_v23 = vld [vmem:[%s18861_s2 + $0x1390] sm:$0xf0]  ;;  %v10058_v60 = vor.u32 %v12219_v2, %v10055_v17  ;;  %v5146_v47 = vpop.f32.mrf.mxu2 }
 0x165   :  { %v12151_v34 = vld [vmem:[%s18861_s2 + $0x1004] sm:$0xf]  ;;  %v9783_v15 = vld [vmem:[%s18861_s2 + $0x1010] sm:$0xf0]  ;;  %v10234_v39 = vor.u32 %v12263_v20, %v10231_v23 }
 0x166   :  { %v12183_v21 = vld [vmem:[%s18861_s2 + $0x1104] sm:$0xf]  ;;  %v9911_v62 = vld [vmem:[%s18861_s2 + $0x1110] sm:$0xf0]  ;;  %v9786_v57 = vor.u32 %v12151_v34, %v9783_v15 }
 0x167   :  { %5422 = vmatpush.bf16.msrb.mxu0 %v10266_v52  ;;  %5387 = vmatpush.bf16.msra.mxu1 %v9818_v53  ;;  %v12215_v43 = vld [vmem:[%s18861_s2 + $0x1204] sm:$0xf]  ;;  %v10039_v63 = vld [vmem:[%s18861_s2 + $0x1210] sm:$0xf0]  ;;  %v5170_v52 = vpop.f32.mrf.mxu0  ;;  %v9914_v58 = vor.u32 %v12183_v21, %v9911_v62 }
 0x168   :  { %5400 = vmatpush.bf16.msra.mxu2 %v9946_v6  ;;  %5413 = vmatpush.bf16.msra.mxu3 %v10074_v9  ;;  %v12259_v31 = vld [vmem:[%s18861_s2 + $0x1364] sm:$0xf]  ;;  %v10215_v48 = vld [vmem:[%s18861_s2 + $0x1370] sm:$0xf0]  ;;  %v15008_v46 = vadd.f32 %v5170_v52, %v5158_v4  ;;  %v10042_v1 = vor.u32 %v12215_v43, %v10039_v63 }
 0x169   :  { %v12307_v50 = vld [vmem:[%s18861_s2 + $0x14e4] sm:$0xf]  ;;  %v10407_v54 = vld [vmem:[%s18861_s2 + $0x14f0] sm:$0xf0]  ;;  %v10218_v3 = vor.u32 %v12259_v31, %v10215_v48 }
 0x16a   :  { %v12339_v55 = vld [vmem:[%s18861_s2 + $0x15e4] sm:$0xf]  ;;  %v10535_v56 = vld [vmem:[%s18861_s2 + $0x15f0] sm:$0xf0]  ;;  %v10410_v53 = vor.u32 %v12307_v50, %v10407_v54  ;;  %12617 = vtanh.f32 %v15008_v46  ;;  %v12425_v46 = vld [vmem:[%s18863_s4 + $0xc] sm:$0xf0] }
 0x16b   :  { %5423 = vmatpush.bf16.msrb.mxu0 %v10250_v12  ;;  %5388 = vmatpush.bf16.msra.mxu1 %v9802_v25  ;;  %v12371_v61 = vld [vmem:[%s18861_s2 + $0x16e4] sm:$0xf]  ;;  %v10663_v0 = vld [vmem:[%s18861_s2 + $0x16f0] sm:$0xf0]  ;;  %v10538_v6 = vor.u32 %v12339_v55, %v10535_v56 }
 0x16c   :  { %5401 = vmatpush.bf16.msra.mxu2 %v9930_v29  ;;  %5414 = vmatpush.bf16.msra.mxu3 %v10058_v60  ;;  %v12255_v4 = vld [vmem:[%s18861_s2 + $0x1344] sm:$0xf]  ;;  %v10199_v7 = vld [vmem:[%s18861_s2 + $0x1350] sm:$0xf0]  ;;  %v10666_v9 = vor.u32 %v12371_v61, %v10663_v0  ;;  %v12635_v0 = vld [vmem:[%s18862_s3] sm:$0xf] }
 0x16d   :  { %v12303_v8 = vld [vmem:[%s18861_s2 + $0x14c4] sm:$0xf]  ;;  %v10391_v12 = vld [vmem:[%s18861_s2 + $0x14d0] sm:$0xf0]  ;;  %v10202_v20 = vor.u32 %v12255_v4, %v10199_v7 }
 0x16e   :  { %v12335_v13 = vld [vmem:[%s18861_s2 + $0x15c4] sm:$0xf]  ;;  %v10519_v16 = vld [vmem:[%s18861_s2 + $0x15d0] sm:$0xf0]  ;;  %v10394_v23 = vor.u32 %v12303_v8, %v10391_v12 }
 0x16f   :  { %5424 = vmatpush.bf16.msrb.mxu0 %v10234_v39  ;;  %5389 = vmatpush.bf16.msra.mxu1 %v9786_v57  ;;  %v12367_v2 = vld [vmem:[%s18861_s2 + $0x16c4] sm:$0xf]  ;;  %v10647_v17 = vld [vmem:[%s18861_s2 + $0x16d0] sm:$0xf0]  ;;  %v10522_v25 = vor.u32 %v12335_v13, %v10519_v16  ;;  %v5172_v43 = vpop.f32.mrf.mxu0  ;;  %v5183_v7 = vpop.f32.mrf.mxu1 }
 0x170   :  { %5402 = vmatpush.bf16.msra.mxu2 %v9914_v58  ;;  %5415 = vmatpush.bf16.msra.mxu3 %v10042_v1  ;;  %v12251_v29 = vld [vmem:[%s18861_s2 + $0x1324] sm:$0xf]  ;;  %v10183_v34 = vld [vmem:[%s18861_s2 + $0x1330] sm:$0xf0]  ;;  %v10650_v21 = vor.u32 %v12367_v2, %v10647_v17  ;;  %v918_v1 = vperm.slane %v12635_v0, 1 }
 0x171   :  { %v12299_v15 = vld [vmem:[%s18861_s2 + $0x14a4] sm:$0xf]  ;;  %v10375_v60 = vld [vmem:[%s18861_s2 + $0x14b0] sm:$0xf0]  ;;  %v10186_v31 = vor.u32 %v12251_v29, %v10183_v34 }
 0x172   :  { %5390 = vmatmul.bf16.vlgmr.msra.gmra.mxu1 %v13806_v36  ;;  %v12331_v39 = vld [vmem:[%s18861_s2 + $0x15a4] sm:$0xf]  ;;  %v10503_v62 = vld [vmem:[%s18861_s2 + $0x15b0] sm:$0xf0]  ;;  %v10378_v51 = vor.u32 %v12299_v15, %v10375_v60 }
 0x173   :  { %5425 = vmatpush.bf16.msrb.mxu0 %v10218_v3  ;;  %5434 = vmatpush.bf16.msrb.mxu1 %v10410_v53  ;;  %v12363_v63 = vld [vmem:[%s18861_s2 + $0x16a4] sm:$0xf]  ;;  %v10631_v47 = vld [vmem:[%s18861_s2 + $0x16b0] sm:$0xf0]  ;;  %v10506_v52 = vor.u32 %v12331_v39, %v10503_v62 }
 0x174   :  { %5447 = vmatpush.bf16.msrb.mxu2 %v10538_v6  ;;  %5460 = vmatpush.bf16.msrb.mxu3 %v10666_v9  ;;  %v12247_v48 = vld [vmem:[%s18861_s2 + $0x1304] sm:$0xf]  ;;  %v10167_v50 = vld [vmem:[%s18861_s2 + $0x1310] sm:$0xf0]  ;;  %v10634_v57 = vor.u32 %v12363_v63, %v10631_v47 }
 0x175   :  { %5403 = vmatmul.bf16.vlgmr.msra.gmra.mxu2 %v13819_v22  ;;  %5416 = vmatmul.bf16.vlgmr.msra.gmra.mxu3 %v13817_v40  ;;  %v12295_v54 = vld [vmem:[%s18861_s2 + $0x1484] sm:$0xf]  ;;  %v10359_v55 = vld [vmem:[%s18861_s2 + $0x1490] sm:$0xf0]  ;;  %v10170_v4 = vor.u32 %v12247_v48, %v10167_v50 }
 0x176   :  { %v12327_v56 = vld [vmem:[%s18861_s2 + $0x1584] sm:$0xf]  ;;  %v10487_v58 = vld [vmem:[%s18861_s2 + $0x1590] sm:$0xf0]  ;;  %v10362_v8 = vor.u32 %v12295_v54, %v10359_v55 }
 0x177   :  { %5426 = vmatpush.bf16.msrb.mxu0 %v10202_v20  ;;  %5435 = vmatpush.bf16.msrb.mxu1 %v10394_v23  ;;  %v12359_v61 = vld [vmem:[%s18861_s2 + $0x1684] sm:$0xf]  ;;  %v10615_v3 = vld [vmem:[%s18861_s2 + $0x1690] sm:$0xf0]  ;;  %v10490_v9 = vor.u32 %v12327_v56, %v10487_v58  ;;  %v5185_v58 = vpop.f32.mrf.mxu1 }
 0x178   :  { %5448 = vmatpush.bf16.msrb.mxu2 %v10522_v25  ;;  %5461 = vmatpush.bf16.msrb.mxu3 %v10650_v21  ;;  %v12403_v53 = vld [vmem:[%s18861_s2 + $0x17e4] sm:$0xf]  ;;  %v10791_v6 = vld [vmem:[%s18861_s2 + $0x17f0] sm:$0xf0]  ;;  %v10618_v16 = vor.u32 %v12359_v61, %v10615_v3  ;;  %v5184_v25 = vadd.f32 %v5183_v7, %v918_v1  ;;  %v5196_v43 = vpop.f32.mrf.mxu2 }
 0x179   :  { %v12291_v12 = vld [vmem:[%s18861_s2 + $0x1464] sm:$0xf]  ;;  %v10343_v13 = vld [vmem:[%s18861_s2 + $0x1470] sm:$0xf0]  ;;  %v10794_v2 = vor.u32 %v12403_v53, %v10791_v6 }
 0x17a   :  { %v12323_v17 = vld [vmem:[%s18861_s2 + $0x1564] sm:$0xf]  ;;  %v10471_v20 = vld [vmem:[%s18861_s2 + $0x1570] sm:$0xf0]  ;;  %v10346_v21 = vor.u32 %v12291_v12, %v10343_v13 }
 0x17b   :  { %5427 = vmatpush.bf16.msrb.mxu0 %v10186_v31  ;;  %5436 = vmatpush.bf16.msrb.mxu1 %v10378_v51  ;;  %v12355_v23 = vld [vmem:[%s18861_s2 + $0x1664] sm:$0xf]  ;;  %v10599_v29 = vld [vmem:[%s18861_s2 + $0x1670] sm:$0xf0]  ;;  %v10474_v60 = vor.u32 %v12323_v17, %v10471_v20  ;;  %v5197_v51 = vadd.f32 %v5196_v43, %v5184_v25 }
 0x17c   :  { %5449 = vmatpush.bf16.msrb.mxu2 %v10506_v52  ;;  %5462 = vmatpush.bf16.msrb.mxu3 %v10634_v57  ;;  %v12399_v34 = vld [vmem:[%s18861_s2 + $0x17c4] sm:$0xf]  ;;  %v10775_v15 = vld [vmem:[%s18861_s2 + $0x17d0] sm:$0xf0]  ;;  %v10602_v63 = vor.u32 %v12355_v23, %v10599_v29  ;;  %v5209_v52 = vpop.f32.mrf.mxu3 }
 0x17d   :  { %v12287_v39 = vld [vmem:[%s18861_s2 + $0x1444] sm:$0xf]  ;;  %v10327_v62 = vld [vmem:[%s18861_s2 + $0x1450] sm:$0xf0]  ;;  %v10778_v47 = vor.u32 %v12399_v34, %v10775_v15  ;;  %v5210_v57 = vadd.f32 %v5209_v52, %v5197_v51  ;;  %v11670_v51 = vld [vmem:[%s18861_s2 + $0xf4] sm:$0xf0] }
 0x17e   :  { %v12319_v31 = vld [vmem:[%s18861_s2 + $0x1544] sm:$0xf]  ;;  %v10455_v48 = vld [vmem:[%s18861_s2 + $0x1550] sm:$0xf0]  ;;  %v10330_v61 = vor.u32 %v12287_v39, %v10327_v62 }
 0x17f   :  { %5428 = vmatpush.bf16.msrb.mxu0 %v10170_v4  ;;  %5437 = vmatpush.bf16.msrb.mxu1 %v10362_v8  ;;  %v12351_v50 = vld [vmem:[%s18861_s2 + $0x1644] sm:$0xf]  ;;  %v10583_v54 = vld [vmem:[%s18861_s2 + $0x1650] sm:$0xf0]  ;;  %v10458_v0 = vor.u32 %v12319_v31, %v10455_v48 }
 0x180   :  { %5450 = vmatpush.bf16.msrb.mxu2 %v10490_v9  ;;  %5463 = vmatpush.bf16.msrb.mxu3 %v10618_v16  ;;  %v12395_v55 = vld [vmem:[%s18861_s2 + $0x17a4] sm:$0xf]  ;;  %v10759_v56 = vld [vmem:[%s18861_s2 + $0x17b0] sm:$0xf0]  ;;  %v10586_v53 = vor.u32 %v12351_v50, %v10583_v54  ;;  %v5222_v16 = vpop.f32.mrf.mxu0  ;;  %v5198_v34 = vpop.f32.mrf.mxu2  ;;  %v7853_v50 = vld [vmem:[%s18861_s2 + $0xe8] sm:$0xf] }
 0x181   :  { %v12283_v1 = vld [vmem:[%s18861_s2 + $0x1424] sm:$0xf]  ;;  %v10311_v3 = vld [vmem:[%s18861_s2 + $0x1430] sm:$0xf0]  ;;  %v10762_v6 = vor.u32 %v12395_v55, %v10759_v56  ;;  %v15182_v29 = vadd.f32 %v5222_v16, %v5210_v57  ;;  %v7981_v55 = vld [vmem:[%s18861_s2 + $0x1e8] sm:$0xf] }
 0x182   :  { %5429 = vmatmul.bf16.vlgmr.msrb.gmra.mxu0 %v13827_v45  ;;  %v12315_v4 = vld [vmem:[%s18861_s2 + $0x1524] sm:$0xf]  ;;  %v10439_v7 = vld [vmem:[%s18861_s2 + $0x1530] sm:$0xf0]  ;;  %v11702_v56 = vld [vmem:[%s18861_s2 + $0x1f4] sm:$0xf0] }
 0x183   :  { %5473 = vmatpush.bf16.msra.mxu0 %v10794_v2  ;;  %5438 = vmatpush.bf16.msrb.mxu1 %v10346_v21  ;;  %v12347_v8 = vld [vmem:[%s18861_s2 + $0x1624] sm:$0xf]  ;;  %v10567_v9 = vld [vmem:[%s18861_s2 + $0x1630] sm:$0xf0]  ;;  %v10314_v2 = vor.u32 %v12283_v1, %v10311_v3  ;;  %v10442_v17 = vor.u32 %v12315_v4, %v10439_v7  ;;  %v7837_v7 = vld [vmem:[%s18861_s2 + $0xc8] sm:$0xf] }
 0x184   :  { %5451 = vmatpush.bf16.msrb.mxu2 %v10474_v60  ;;  %5464 = vmatpush.bf16.msrb.mxu3 %v10602_v63  ;;  %v12391_v12 = vld [vmem:[%s18861_s2 + $0x1784] sm:$0xf]  ;;  %v10743_v13 = vld [vmem:[%s18861_s2 + $0x1790] sm:$0xf0]  ;;  %v10570_v15 = vor.u32 %v12347_v8, %v10567_v9  ;;  %v5211_v43 = vpop.f32.mrf.mxu3  ;;  %v11666_v8 = vld [vmem:[%s18861_s2 + $0xd4] sm:$0xf0] }
 0x185   :  { %v12279_v20 = vld [vmem:[%s18861_s2 + $0x1404] sm:$0xf]  ;;  %v10295_v23 = vld [vmem:[%s18861_s2 + $0x1410] sm:$0xf0]  ;;  %v10746_v21 = vor.u32 %v12391_v12, %v10743_v13  ;;  %v7965_v12 = vld [vmem:[%s18861_s2 + $0x1c8] sm:$0xf] }
 0x186   :  { %v12311_v25 = vld [vmem:[%s18861_s2 + $0x1504] sm:$0xf]  ;;  %v10423_v60 = vld [vmem:[%s18861_s2 + $0x1510] sm:$0xf0]  ;;  %v10298_v52 = vor.u32 %v12279_v20, %v10295_v23  ;;  %v11698_v13 = vld [vmem:[%s18861_s2 + $0x1d4] sm:$0xf0] }
 0x187   :  { %5474 = vmatpush.bf16.msra.mxu0 %v10778_v47  ;;  %5439 = vmatpush.bf16.msrb.mxu1 %v10330_v61  ;;  %v12343_v39 = vld [vmem:[%s18861_s2 + $0x1604] sm:$0xf]  ;;  %v10551_v62 = vld [vmem:[%s18861_s2 + $0x1610] sm:$0xf0]  ;;  %v10426_v54 = vor.u32 %v12311_v25, %v10423_v60  ;;  %v7966_v34 = vor.u32 %v11698_v13, %v7965_v12  ;;  %v11662_v60 = vld [vmem:[%s18861_s2 + $0xb4] sm:$0xf0] }
 0x188   :  { %5452 = vmatpush.bf16.msrb.mxu2 %v10458_v0  ;;  %5465 = vmatpush.bf16.msrb.mxu3 %v10586_v53  ;;  %v12387_v63 = vld [vmem:[%s18861_s2 + $0x1764] sm:$0xf]  ;;  %v10727_v47 = vld [vmem:[%s18861_s2 + $0x1770] sm:$0xf0]  ;;  %v10554_v57 = vor.u32 %v12343_v39, %v10551_v62  ;;  %v7854_v0 = vor.u32 %v11670_v51, %v7853_v50  ;;  %v5224_v9 = vpop.f32.mrf.mxu0  ;;  %v7949_v39 = vld [vmem:[%s18861_s2 + $0x1a8] sm:$0xf] }
 0x189   :  { %v12419_v31 = vld [vmem:[%s18861_s2 + $0x1864] sm:$0xf]  ;;  %v10855_v48 = vld [vmem:[%s18861_s2 + $0x1870] sm:$0xf0]  ;;  %v10730_v58 = vor.u32 %v12387_v63, %v10727_v47  ;;  %v11694_v62 = vld [vmem:[%s18861_s2 + $0x1b4] sm:$0xf0] }
 0x18a   :  { %v10858_v61 = vor.u32 %v12419_v31, %v10855_v48  ;;  %v12383_v1 = vld [vmem:[%s18861_s2 + $0x1744] sm:$0xf]  ;;  %v10711_v3 = vld [vmem:[%s18861_s2 + $0x1750] sm:$0xf0]  ;;  %v7789_v12 = vld [vmem:[%s18861_s2 + $0x68] sm:$0xf] }
 0x18b   :  { %5475 = vmatpush.bf16.msra.mxu0 %v10762_v6  ;;  %5440 = vmatpush.bf16.msrb.mxu1 %v10314_v2  ;;  %v12415_v53 = vld [vmem:[%s18861_s2 + $0x1844] sm:$0xf]  ;;  %v7982_v6 = vor.u32 %v11702_v56, %v7981_v55  ;;  %v10839_v4 = vld [vmem:[%s18861_s2 + $0x1850] sm:$0xf0]  ;;  %v10714_v16 = vor.u32 %v12383_v1, %v10711_v3  ;;  %v11658_v55 = vld [vmem:[%s18861_s2 + $0x94] sm:$0xf0] }
 0x18c   :  { %5453 = vmatpush.bf16.msrb.mxu2 %v10442_v17  ;;  %5466 = vmatpush.bf16.msrb.mxu3 %v10570_v15  ;;  %v10842_v2 = vor.u32 %v12415_v53, %v10839_v4  ;;  %v7838_v17 = vor.u32 %v11666_v8, %v7837_v7  ;;  %v12379_v20 = vld [vmem:[%s18861_s2 + $0x1724] sm:$0xf]  ;;  %v10695_v23 = vld [vmem:[%s18861_s2 + $0x1730] sm:$0xf0]  ;;  %v7933_v56 = vld [vmem:[%s18861_s2 + $0x188] sm:$0xf] }
 0x18d   :  { %v12411_v25 = vld [vmem:[%s18861_s2 + $0x1824] sm:$0xf]  ;;  %v10823_v15 = vld [vmem:[%s18861_s2 + $0x1830] sm:$0xf0]  ;;  %v10698_v43 = vor.u32 %v12379_v20, %v10695_v23  ;;  %v8237_v1 = vld [vmem:[%s18861_s2 + $0x3e8] sm:$0xf] }
 0x18e   :  { %v12375_v63 = vld [vmem:[%s18861_s2 + $0x1704] sm:$0xf]  ;;  %v10826_v47 = vor.u32 %v12411_v25, %v10823_v15  ;;  %v10679_v48 = vld [vmem:[%s18861_s2 + $0x1710] sm:$0xf0]  ;;  %v11766_v3 = vld [vmem:[%s18861_s2 + $0x3f4] sm:$0xf0] }
 0x18f   :  { %5476 = vmatpush.bf16.msra.mxu0 %v10746_v21  ;;  %5441 = vmatpush.bf16.msrb.mxu1 %v10298_v52  ;;  %v7821_v21 = vld [vmem:[%s18861_s2 + $0xa8] sm:$0xf]  ;;  %v12407_v50 = vld [vmem:[%s18861_s2 + $0x1804] sm:$0xf]  ;;  %v10807_v51 = vld [vmem:[%s18861_s2 + $0x1810] sm:$0xf0]  ;;  %v7950_v52 = vor.u32 %v11694_v62, %v7949_v39  ;;  %v5235_v53 = vpop.f32.mrf.mxu1 }
 0x190   :  { %5454 = vmatpush.bf16.msrb.mxu2 %v10426_v54  ;;  %5467 = vmatpush.bf16.msrb.mxu3 %v10554_v57  ;;  %v7822_v31 = vor.u32 %v11662_v60, %v7821_v21  ;;  %v7805_v54 = vld [vmem:[%s18861_s2 + $0x88] sm:$0xf]  ;;  %v11690_v57 = vld [vmem:[%s18861_s2 + $0x194] sm:$0xf0]  ;;  %v5236_v7 = vadd.f32 %v5235_v53, %v15182_v29 }
 0x191   :  { %v7806_v4 = vor.u32 %v11658_v55, %v7805_v54  ;;  %v7934_v8 = vor.u32 %v11690_v57, %v7933_v56  ;;  %v11654_v13 = vld [vmem:[%s18861_s2 + $0x74] sm:$0xf0]  ;;  %v8221_v23 = vld [vmem:[%s18861_s2 + $0x3c8] sm:$0xf] }
 0x192   :  { %5442 = vmatmul.bf16.vlgmr.msrb.gmra.mxu1 %v14018_v5  ;;  %v11686_v29 = vld [vmem:[%s18861_s2 + $0x174] sm:$0xf0]  ;;  %v7773_v39 = vld [vmem:[%s18861_s2 + $0x48] sm:$0xf] }
 0x193   :  { %5477 = vmatpush.bf16.msra.mxu0 %v10730_v58  ;;  %5490 = vmatpush.bf16.msra.mxu1 %v10858_v61  ;;  %v8109_v58 = vld [vmem:[%s18861_s2 + $0x2e8] sm:$0xf]  ;;  %v11734_v61 = vld [vmem:[%s18861_s2 + $0x2f4] sm:$0xf0] }
 0x194   :  { %5499 = vmatpush.bf16.msra.mxu2 %v7854_v0  ;;  %5512 = vmatpush.bf16.msra.mxu3 %v7982_v6  ;;  %v10682_v0 = vor.u32 %v12375_v63, %v10679_v48  ;;  %v10810_v6 = vor.u32 %v12407_v50, %v10807_v51  ;;  %v8110_v9 = vor.u32 %v11734_v61, %v8109_v58  ;;  %v11730_v20 = vld [vmem:[%s18861_s2 + $0x2d4] sm:$0xf0]  ;;  %v8077_v50 = vld [vmem:[%s18861_s2 + $0x2a8] sm:$0xf] }
 0x195   :  { %5455 = vmatmul.bf16.vlgmr.msrb.gmra.mxu2 %v14031_v11  ;;  %5468 = vmatmul.bf16.vlgmr.msrb.gmra.mxu3 %v14029_v10  ;;  %v11762_v25 = vld [vmem:[%s18861_s2 + $0x3d4] sm:$0xf0] }
 0x196   :  { %v11650_v62 = vld [vmem:[%s18861_s2 + $0x54] sm:$0xf0] }
 0x197   :  { %5478 = vmatpush.bf16.msra.mxu0 %v10714_v16  ;;  %5491 = vmatpush.bf16.msra.mxu1 %v10842_v2  ;;  %v7917_v16 = vld [vmem:[%s18861_s2 + $0x168] sm:$0xf]  ;;  %v8238_v2 = vor.u32 %v11766_v3, %v8237_v1  ;;  %v11682_v48 = vld [vmem:[%s18861_s2 + $0x154] sm:$0xf0]  ;;  %v5237_v56 = vpop.f32.mrf.mxu1  ;;  %v7774_v57 = vor.u32 %v11650_v62, %v7773_v39 }
 0x198   :  { %5500 = vmatpush.bf16.msra.mxu2 %v7838_v17  ;;  %5513 = vmatpush.bf16.msra.mxu3 %v7966_v34  ;;  %v8093_v17 = vld [vmem:[%s18861_s2 + $0x2c8] sm:$0xf]  ;;  %v7790_v34 = vor.u32 %v11654_v13, %v7789_v12  ;;  %v5248_v15 = vpop.f32.mrf.mxu2  ;;  %v7918_v21 = vor.u32 %v11686_v29, %v7917_v16  ;;  %v11726_v51 = vld [vmem:[%s18861_s2 + $0x2b4] sm:$0xf0] }
 0x199   :  { %v8094_v60 = vor.u32 %v11730_v20, %v8093_v17  ;;  %v5249_v63 = vadd.f32 %v5248_v15, %v5236_v7  ;;  %v11758_v54 = vld [vmem:[%s18861_s2 + $0x3b4] sm:$0xf0]  ;;  %v8078_v61 = vor.u32 %v11726_v51, %v8077_v50  ;;  %v7885_v3 = vld [vmem:[%s18861_s2 + $0x128] sm:$0xf] }
 0x19a   :  { %v11646_v1 = vld [vmem:[%s18861_s2 + $0x34] sm:$0xf0]  ;;  %v8173_v62 = vld [vmem:[%s18861_s2 + $0x368] sm:$0xf] }
 0x19b   :  { %5479 = vmatpush.bf16.msra.mxu0 %v10698_v43  ;;  %5492 = vmatpush.bf16.msra.mxu1 %v10826_v47  ;;  %v7901_v43 = vld [vmem:[%s18861_s2 + $0x148] sm:$0xf]  ;;  %v5261_v47 = vpop.f32.mrf.mxu3  ;;  %v11722_v7 = vld [vmem:[%s18861_s2 + $0x294] sm:$0xf0] }
 0x19c   :  { %5501 = vmatpush.bf16.msra.mxu2 %v7822_v31  ;;  %5514 = vmatpush.bf16.msra.mxu3 %v7950_v52  ;;  %v8222_v31 = vor.u32 %v11762_v25, %v8221_v23  ;;  %v8205_v52 = vld [vmem:[%s18861_s2 + $0x3a8] sm:$0xf]  ;;  %v5262_v55 = vadd.f32 %v5261_v47, %v5249_v63  ;;  %v7902_v58 = vor.u32 %v11682_v48, %v7901_v43  ;;  %v11754_v12 = vld [vmem:[%s18861_s2 + $0x394] sm:$0xf0] }
 0x19d   :  { %v8206_v53 = vor.u32 %v11758_v54, %v8205_v52  ;;  %v11642_v23 = vld [vmem:[%s18861_s2 + $0x14] sm:$0xf0]  ;;  %v7869_v25 = vld [vmem:[%s18861_s2 + $0x108] sm:$0xf] }
 0x19e   :  { %v11718_v39 = vld [vmem:[%s18861_s2 + $0x274] sm:$0xf0]  ;;  %v8365_v63 = vld [vmem:[%s18861_s2 + $0x4e8] sm:$0xf] }
 0x19f   :  { %5480 = vmatpush.bf16.msra.mxu0 %v10682_v0  ;;  %5493 = vmatpush.bf16.msra.mxu1 %v10810_v6  ;;  %v7757_v0 = vld [vmem:[%s18861_s2 + $0x28] sm:$0xf]  ;;  %v11678_v6 = vld [vmem:[%s18861_s2 + $0x134] sm:$0xf0] }
 0x1a0   :  { %5502 = vmatpush.bf16.msra.mxu2 %v7806_v4  ;;  %5515 = vmatpush.bf16.msra.mxu3 %v7934_v8  ;;  %v8061_v4 = vld [vmem:[%s18861_s2 + $0x288] sm:$0xf]  ;;  %v5274_v8 = vpop.f32.mrf.mxu0  ;;  %v7758_v13 = vor.u32 %v11646_v1, %v7757_v0  ;;  %v5250_v29 = vpop.f32.mrf.mxu2  ;;  %v7886_v17 = vor.u32 %v11678_v6, %v7885_v3  ;;  %v11750_v43 = vld [vmem:[%s18861_s2 + $0x374] sm:$0xf0] }
 0x1a1   :  { %v15380_v16 = vadd.f32 %v5274_v8, %v5262_v55  ;;  %v8062_v20 = vor.u32 %v11722_v7, %v8061_v4  ;;  %v11798_v47 = vld [vmem:[%s18861_s2 + $0x4f4] sm:$0xf0]  ;;  %v8493_v48 = vld [vmem:[%s18861_s2 + $0x5e8] sm:$0xf]  ;;  %v8174_v54 = vor.u32 %v11750_v43, %v8173_v62 }
 0x1a2   :  { %5481 = vmatmul.bf16.vlgmr.msra.gmra.mxu0 %v14039_v14  ;;  %10868 = vmatmul.msk.bf16.vlgmr.msra.gmra.mxu1 %vm4845_vm0, %v14139_v49  ;;  %v11830_v50 = vld [vmem:[%s18861_s2 + $0x5f4] sm:$0xf0]  ;;  %v8366_v55 = vor.u32 %v11798_v47, %v8365_v63  ;;  %v8029_v56 = vld [vmem:[%s18861_s2 + $0x248] sm:$0xf] }
 0x1a3   :  { %5525 = vmatpush.bf16.msrb.mxu0 %v8110_v9  ;;  %5538 = vmatpush.bf16.msrb.mxu1 %v8238_v2  ;;  %v8189_v9 = vld [vmem:[%s18861_s2 + $0x388] sm:$0xf]  ;;  %v5263_v15 = vpop.f32.mrf.mxu3  ;;  %v11746_v0 = vld [vmem:[%s18861_s2 + $0x354] sm:$0xf0] }
 0x1a4   :  { %5503 = vmatpush.bf16.msra.mxu2 %v7790_v34  ;;  %5516 = vmatpush.bf16.msra.mxu3 %v7918_v21  ;;  %v7741_v2 = vld [vmem:[%s18861_s2 + $0x8] sm:$0xf]  ;;  %v11674_v34 = vld [vmem:[%s18861_s2 + $0x114] sm:$0xf0]  ;;  %v8190_v21 = vor.u32 %v11754_v12, %v8189_v9 }
 0x1a5   :  { %v7870_v51 = vor.u32 %v11674_v34, %v7869_v25  ;;  %v8349_v1 = vld [vmem:[%s18861_s2 + $0x4c8] sm:$0xf]  ;;  %v11794_v3 = vld [vmem:[%s18861_s2 + $0x4d4] sm:$0xf0] }
 0x1a6   :  { %v8477_v6 = vld [vmem:[%s18861_s2 + $0x5c8] sm:$0xf]  ;;  %v11826_v4 = vld [vmem:[%s18861_s2 + $0x5d4] sm:$0xf0]  ;;  %v8350_v9 = vor.u32 %v11794_v3, %v8349_v1 }
 0x1a7   :  { %5526 = vmatpush.bf16.msrb.mxu0 %v8094_v60  ;;  %5539 = vmatpush.bf16.msrb.mxu1 %v8222_v31  ;;  %v8045_v60 = vld [vmem:[%s18861_s2 + $0x268] sm:$0xf]  ;;  %v7742_v31 = vor.u32 %v11642_v23, %v7741_v2  ;;  %v8478_v29 = vor.u32 %v11826_v4, %v8477_v6  ;;  %v11790_v23 = vld [vmem:[%s18861_s2 + $0x4b4] sm:$0xf0] }
 0x1a8   :  { %5504 = vmatpush.bf16.msra.mxu2 %v7774_v57  ;;  %5517 = vmatpush.bf16.msra.mxu3 %v7902_v58  ;;  %v8046_v52 = vor.u32 %v11718_v39, %v8045_v60  ;;  %v11714_v57 = vld [vmem:[%s18861_s2 + $0x254] sm:$0xf0]  ;;  %v8157_v58 = vld [vmem:[%s18861_s2 + $0x348] sm:$0xf] }
 0x1a9   :  { %v8030_v7 = vor.u32 %v11714_v57, %v8029_v56  ;;  %v8158_v8 = vor.u32 %v11746_v0, %v8157_v58  ;;  %v8013_v12 = vld [vmem:[%s18861_s2 + $0x228] sm:$0xf]  ;;  %v11822_v34 = vld [vmem:[%s18861_s2 + $0x5b4] sm:$0xf0] }
 0x1aa   :  { %v8141_v2 = vld [vmem:[%s18861_s2 + $0x328] sm:$0xf]  ;;  %v11706_v62 = vld [vmem:[%s18861_s2 + $0x214] sm:$0xf0] }
 0x1ab   :  { %5527 = vmatpush.bf16.msrb.mxu0 %v8078_v61  ;;  %5540 = vmatpush.bf16.msrb.mxu1 %v8206_v53  ;;  %v8494_v61 = vor.u32 %v11830_v50, %v8493_v48  ;;  %v5276_v53 = vpop.f32.mrf.mxu0  ;;  %v8461_v25 = vld [vmem:[%s18861_s2 + $0x5a8] sm:$0xf]  ;;  %v11738_v63 = vld [vmem:[%s18861_s2 + $0x314] sm:$0xf0] }
 0x1ac   :  { %5505 = vmatpush.bf16.msra.mxu2 %v7758_v13  ;;  %5518 = vmatpush.bf16.msra.mxu3 %v7886_v17  ;;  %v11710_v13 = vld [vmem:[%s18861_s2 + $0x234] sm:$0xf0]  ;;  %v8125_v43 = vld [vmem:[%s18861_s2 + $0x308] sm:$0xf]  ;;  %v8462_v47 = vor.u32 %v11822_v34, %v8461_v25 }
 0x1ad   :  { %v11742_v17 = vld [vmem:[%s18861_s2 + $0x334] sm:$0xf0]  ;;  %v8014_v15 = vor.u32 %v11710_v13, %v8013_v12  ;;  %v8445_v50 = vld [vmem:[%s18861_s2 + $0x588] sm:$0xf]  ;;  %v8126_v0 = vor.u32 %v11738_v63, %v8125_v43 }
 0x1ae   :  { %v8142_v60 = vor.u32 %v11742_v17, %v8141_v2  ;;  %v11786_v48 = vld [vmem:[%s18861_s2 + $0x494] sm:$0xf0]  ;;  %v8749_v58 = vld [vmem:[%s18861_s2 + $0x7e8] sm:$0xf] }
 0x1af   :  { %5528 = vmatpush.bf16.msrb.mxu0 %v8062_v20  ;;  %5541 = vmatpush.bf16.msrb.mxu1 %v8190_v21  ;;  %v8333_v20 = vld [vmem:[%s18861_s2 + $0x4a8] sm:$0xf]  ;;  %v11782_v6 = vld [vmem:[%s18861_s2 + $0x474] sm:$0xf0] }
 0x1b0   :  { %5506 = vmatpush.bf16.msra.mxu2 %v7742_v31  ;;  %5519 = vmatpush.bf16.msra.mxu3 %v7870_v51  ;;  %v7997_v21 = vld [vmem:[%s18861_s2 + $0x208] sm:$0xf]  ;;  %v8334_v39 = vor.u32 %v11790_v23, %v8333_v20  ;;  %v5287_v51 = vpop.f32.mrf.mxu1  ;;  %v11858_v12 = vld [vmem:[%s18861_s2 + $0x6d4] sm:$0xf0] }
 0x1b1   :  { %v8317_v31 = vld [vmem:[%s18861_s2 + $0x488] sm:$0xf]  ;;  %v5288_v56 = vadd.f32 %v5287_v51, %v15380_v16  ;;  %v7998_v57 = vor.u32 %v11706_v62, %v7997_v21  ;;  %v11890_v2 = vld [vmem:[%s18861_s2 + $0x7d4] sm:$0xf0] }
 0x1b2   :  { %v8318_v1 = vor.u32 %v11786_v48, %v8317_v31  ;;  %v8301_v16 = vld [vmem:[%s18861_s2 + $0x468] sm:$0xf]  ;;  %v11810_v62 = vld [vmem:[%s18861_s2 + $0x554] sm:$0xf0] }
 0x1b3   :  { %5529 = vmatpush.bf16.msrb.mxu0 %v8046_v52  ;;  %5542 = vmatpush.bf16.msrb.mxu1 %v8174_v54  ;;  %v11818_v52 = vld [vmem:[%s18861_s2 + $0x594] sm:$0xf0]  ;;  %v8621_v54 = vld [vmem:[%s18861_s2 + $0x6e8] sm:$0xf] }
 0x1b4   :  { %5551 = vmatpush.bf16.msrb.mxu2 %v8366_v55  ;;  %5564 = vmatpush.bf16.msrb.mxu3 %v8494_v61  ;;  %v11862_v55 = vld [vmem:[%s18861_s2 + $0x6f4] sm:$0xf0]  ;;  %v8446_v3 = vor.u32 %v11818_v52, %v8445_v50  ;;  %v8429_v4 = vld [vmem:[%s18861_s2 + $0x568] sm:$0xf] }
 0x1b5   :  { %5507 = vmatmul.bf16.vlgmr.msra.gmra.mxu2 %v13029_v27  ;;  %5520 = vmatmul.bf16.vlgmr.msra.gmra.mxu3 %v13039_v33  ;;  %v11894_v61 = vld [vmem:[%s18861_s2 + $0x7f4] sm:$0xf0]  ;;  %v8622_v53 = vor.u32 %v11862_v55, %v8621_v54  ;;  %v8733_v13 = vld [vmem:[%s18861_s2 + $0x7c8] sm:$0xf] }
 0x1b6   :  { %v8285_v34 = vld [vmem:[%s18861_s2 + $0x448] sm:$0xf]  ;;  %v11854_v63 = vld [vmem:[%s18861_s2 + $0x6b4] sm:$0xf0] }
 0x1b7   :  { %5530 = vmatpush.bf16.msrb.mxu0 %v8030_v7  ;;  %5543 = vmatpush.bf16.msrb.mxu1 %v8158_v8  ;;  %v8750_v7 = vor.u32 %v11894_v61, %v8749_v58  ;;  %v11814_v8 = vld [vmem:[%s18861_s2 + $0x574] sm:$0xf0]  ;;  %v8413_v21 = vld [vmem:[%s18861_s2 + $0x548] sm:$0xf] }
 0x1b8   :  { %5552 = vmatpush.bf16.msrb.mxu2 %v8350_v9  ;;  %5565 = vmatpush.bf16.msrb.mxu3 %v8478_v29  ;;  %v8605_v9 = vld [vmem:[%s18861_s2 + $0x6c8] sm:$0xf]  ;;  %v8302_v29 = vor.u32 %v11782_v6, %v8301_v16  ;;  %v8430_v17 = vor.u32 %v11814_v8, %v8429_v4  ;;  %v5300_v20 = vpop.f32.mrf.mxu2  ;;  %v5313_v25 = vpop.f32.mrf.mxu3  ;;  %v11886_v48 = vld [vmem:[%s18861_s2 + $0x7b4] sm:$0xf0]  ;;  %v8414_v52 = vor.u32 %v11810_v62, %v8413_v21 }
 0x1b9   :  { %v8606_v23 = vor.u32 %v11858_v12, %v8605_v9  ;;  %v8589_v43 = vld [vmem:[%s18861_s2 + $0x6a8] sm:$0xf]  ;;  %v11806_v61 = vld [vmem:[%s18861_s2 + $0x534] sm:$0xf0] }
 0x1ba   :  { %v8717_v31 = vld [vmem:[%s18861_s2 + $0x7a8] sm:$0xf]  ;;  %v8590_v54 = vor.u32 %v11854_v63, %v8589_v43  ;;  %v11882_v16 = vld [vmem:[%s18861_s2 + $0x794] sm:$0xf0] }
 0x1bb   :  { %5531 = vmatpush.bf16.msrb.mxu0 %v8014_v15  ;;  %5544 = vmatpush.bf16.msrb.mxu1 %v8142_v60  ;;  %v11778_v15 = vld [vmem:[%s18861_s2 + $0x454] sm:$0xf0]  ;;  %v5301_v60 = vadd.f32 %v5300_v20, %v5288_v56  ;;  %v8269_v55 = vld [vmem:[%s18861_s2 + $0x428] sm:$0xf]  ;;  %v8718_v58 = vor.u32 %v11886_v48, %v8717_v31 }
 0x1bc   :  { %5553 = vmatpush.bf16.msrb.mxu2 %v8334_v39  ;;  %5566 = vmatpush.bf16.msrb.mxu3 %v8462_v47  ;;  %v8734_v39 = vor.u32 %v11890_v2, %v8733_v13  ;;  %v5289_v47 = vpop.f32.mrf.mxu1  ;;  %v8286_v51 = vor.u32 %v11778_v15, %v8285_v34  ;;  %v11774_v56 = vld [vmem:[%s18861_s2 + $0x434] sm:$0xf0]  ;;  %v8381_v13 = vld [vmem:[%s18861_s2 + $0x508] sm:$0xf] }
 0x1bd   :  { %v5314_v50 = vadd.f32 %v5313_v25, %v5301_v60  ;;  %v8270_v4 = vor.u32 %v11774_v56, %v8269_v55  ;;  %v11770_v12 = vld [vmem:[%s18861_s2 + $0x414] sm:$0xf0]  ;;  %v8685_v34 = vld [vmem:[%s18861_s2 + $0x768] sm:$0xf] }
 0x1be   :  { %v11802_v2 = vld [vmem:[%s18861_s2 + $0x514] sm:$0xf0]  ;;  %v8877_v21 = vld [vmem:[%s18861_s2 + $0x8e8] sm:$0xf] }
 0x1bf   :  { %5532 = vmatpush.bf16.msrb.mxu0 %v7998_v57  ;;  %5545 = vmatpush.bf16.msrb.mxu1 %v8126_v0  ;;  %v8397_v57 = vld [vmem:[%s18861_s2 + $0x528] sm:$0xf]  ;;  %v11846_v25 = vld [vmem:[%s18861_s2 + $0x674] sm:$0xf0]  ;;  %v8382_v63 = vor.u32 %v11802_v2, %v8381_v13 }
 0x1c0   :  { %5554 = vmatpush.bf16.msrb.mxu2 %v8318_v1  ;;  %5567 = vmatpush.bf16.msrb.mxu3 %v8446_v3  ;;  %v8573_v0 = vld [vmem:[%s18861_s2 + $0x688] sm:$0xf]  ;;  %v11850_v1 = vld [vmem:[%s18861_s2 + $0x694] sm:$0xf0]  ;;  %v5326_v3 = vpop.f32.mrf.mxu0  ;;  %v8398_v8 = vor.u32 %v11806_v61, %v8397_v57 }
 0x1c1   :  { %v15579_v6 = vadd.f32 %v5326_v3, %v5314_v50  ;;  %v8574_v9 = vor.u32 %v11850_v1, %v8573_v0  ;;  %v11878_v15 = vld [vmem:[%s18861_s2 + $0x774] sm:$0xf0]  ;;  %v9005_v62 = vld [vmem:[%s18861_s2 + $0x9e8] sm:$0xf] }
 0x1c2   :  { %5533 = vmatmul.bf16.vlgmr.msrb.gmra.mxu0 %v13027_v26  ;;  %5546 = vmatmul.bf16.vlgmr.msrb.gmra.mxu1 %v13037_v32  ;;  %v11926_v60 = vld [vmem:[%s18861_s2 + $0x8f4] sm:$0xf0]  ;;  %v8686_v31 = vor.u32 %v11878_v15, %v8685_v34  ;;  %v8541_v50 = vld [vmem:[%s18861_s2 + $0x648] sm:$0xf] }
 0x1c3   :  { %5577 = vmatpush.bf16.msra.mxu0 %v8622_v53  ;;  %5590 = vmatpush.bf16.msra.mxu1 %v8750_v7  ;;  %v8701_v53 = vld [vmem:[%s18861_s2 + $0x788] sm:$0xf]  ;;  %v11958_v43 = vld [vmem:[%s18861_s2 + $0x9f4] sm:$0xf0]  ;;  %v8878_v48 = vor.u32 %v11926_v60, %v8877_v21 }
 0x1c4   :  { %5555 = vmatpush.bf16.msrb.mxu2 %v8302_v29  ;;  %5568 = vmatpush.bf16.msrb.mxu3 %v8430_v17  ;;  %v8253_v7 = vld [vmem:[%s18861_s2 + $0x408] sm:$0xf]  ;;  %v5302_v29 = vpop.f32.mrf.mxu2  ;;  %v5315_v17 = vpop.f32.mrf.mxu3  ;;  %v8702_v20 = vor.u32 %v11882_v16, %v8701_v53  ;;  %v11874_v55 = vld [vmem:[%s18861_s2 + $0x754] sm:$0xf0] }
 0x1c5   :  { %v8861_v56 = vld [vmem:[%s18861_s2 + $0x8c8] sm:$0xf]  ;;  %v11922_v57 = vld [vmem:[%s18861_s2 + $0x8d4] sm:$0xf0] }
 0x1c6   :  { %v8989_v61 = vld [vmem:[%s18861_s2 + $0x9c8] sm:$0xf]  ;;  %v11954_v0 = vld [vmem:[%s18861_s2 + $0x9d4] sm:$0xf0]  ;;  %v8862_v53 = vor.u32 %v11922_v57, %v8861_v56 }
 0x1c7   :  { %5578 = vmatpush.bf16.msra.mxu0 %v8606_v23  ;;  %5591 = vmatpush.bf16.msra.mxu1 %v8734_v39  ;;  %v8557_v23 = vld [vmem:[%s18861_s2 + $0x668] sm:$0xf]  ;;  %v8254_v39 = vor.u32 %v11770_v12, %v8253_v7  ;;  %v11918_v13 = vld [vmem:[%s18861_s2 + $0x8b4] sm:$0xf0] }
 0x1c8   :  { %5556 = vmatpush.bf16.msrb.mxu2 %v8286_v51  ;;  %5569 = vmatpush.bf16.msrb.mxu3 %v8414_v52  ;;  %v8558_v47 = vor.u32 %v11846_v25, %v8557_v23  ;;  %v11842_v51 = vld [vmem:[%s18861_s2 + $0x654] sm:$0xf0]  ;;  %v8669_v52 = vld [vmem:[%s18861_s2 + $0x748] sm:$0xf] }
 0x1c9   :  { %v8542_v1 = vor.u32 %v11842_v51, %v8541_v50  ;;  %v8670_v3 = vor.u32 %v11874_v55, %v8669_v52  ;;  %v8525_v16 = vld [vmem:[%s18861_s2 + $0x628] sm:$0xf]  ;;  %v11950_v29 = vld [vmem:[%s18861_s2 + $0x9b4] sm:$0xf0] }
 0x1ca   :  { %v8653_v7 = vld [vmem:[%s18861_s2 + $0x728] sm:$0xf]  ;;  %v11834_v34 = vld [vmem:[%s18861_s2 + $0x614] sm:$0xf0] }
 0x1cb   :  { %5579 = vmatpush.bf16.msra.mxu0 %v8590_v54  ;;  %5592 = vmatpush.bf16.msra.mxu1 %v8718_v58  ;;  %v9006_v54 = vor.u32 %v11958_v43, %v9005_v62  ;;  %v5328_v58 = vpop.f32.mrf.mxu0  ;;  %v8845_v12 = vld [vmem:[%s18861_s2 + $0x8a8] sm:$0xf]  ;;  %v11866_v21 = vld [vmem:[%s18861_s2 + $0x714] sm:$0xf0] }
 0x1cc   :  { %5557 = vmatpush.bf16.msrb.mxu2 %v8270_v4  ;;  %5570 = vmatpush.bf16.msrb.mxu3 %v8398_v8  ;;  %v11838_v4 = vld [vmem:[%s18861_s2 + $0x634] sm:$0xf0]  ;;  %v8990_v8 = vor.u32 %v11954_v0, %v8989_v61  ;;  %v8973_v2 = vld [vmem:[%s18861_s2 + $0x9a8] sm:$0xf]  ;;  %v8846_v25 = vor.u32 %v11918_v13, %v8845_v12 }
 0x1cd   :  { %v8526_v17 = vor.u32 %v11838_v4, %v8525_v16  ;;  %v8637_v15 = vld [vmem:[%s18861_s2 + $0x708] sm:$0xf]  ;;  %v8974_v60 = vor.u32 %v11950_v29, %v8973_v2  ;;  %v11914_v62 = vld [vmem:[%s18861_s2 + $0x894] sm:$0xf0] }
 0x1ce   :  { %v8957_v43 = vld [vmem:[%s18861_s2 + $0x988] sm:$0xf]  ;;  %v8638_v55 = vor.u32 %v11866_v21, %v8637_v15  ;;  %v11910_v61 = vld [vmem:[%s18861_s2 + $0x874] sm:$0xf0] }
 0x1cf   :  { %5580 = vmatpush.bf16.msra.mxu0 %v8574_v9  ;;  %5593 = vmatpush.bf16.msra.mxu1 %v8702_v20  ;;  %v11870_v9 = vld [vmem:[%s18861_s2 + $0x734] sm:$0xf0]  ;;  %v8509_v20 = vld [vmem:[%s18861_s2 + $0x608] sm:$0xf] }
 0x1d0   :  { %5558 = vmatpush.bf16.msrb.mxu2 %v8254_v39  ;;  %5571 = vmatpush.bf16.msrb.mxu3 %v8382_v63  ;;  %v8654_v23 = vor.u32 %v11870_v9, %v8653_v7  ;;  %v8829_v39 = vld [vmem:[%s18861_s2 + $0x888] sm:$0xf]  ;;  %v5339_v63 = vpop.f32.mrf.mxu1  ;;  %v8510_v51 = vor.u32 %v11834_v34, %v8509_v20  ;;  %v11986_v16 = vld [vmem:[%s18861_s2 + $0xad4] sm:$0xf0] }
 0x1d1   :  { %v5340_v50 = vadd.f32 %v5339_v63, %v15579_v6  ;;  %v9261_v52 = vld [vmem:[%s18861_s2 + $0xbe8] sm:$0xf]  ;;  %v8830_v56 = vor.u32 %v11914_v62, %v8829_v39  ;;  %v12018_v7 = vld [vmem:[%s18861_s2 + $0xbd4] sm:$0xf0] }
 0x1d2   :  { %v8813_v6 = vld [vmem:[%s18861_s2 + $0x868] sm:$0xf]  ;;  %v11938_v34 = vld [vmem:[%s18861_s2 + $0x954] sm:$0xf0] }
 0x1d3   :  { %5581 = vmatpush.bf16.msra.mxu0 %v8558_v47  ;;  %5594 = vmatpush.bf16.msra.mxu1 %v8686_v31  ;;  %v11946_v47 = vld [vmem:[%s18861_s2 + $0x994] sm:$0xf0]  ;;  %v9133_v31 = vld [vmem:[%s18861_s2 + $0xae8] sm:$0xf] }
 0x1d4   :  { %5603 = vmatpush.bf16.msra.mxu2 %v8878_v48  ;;  %5616 = vmatpush.bf16.msra.mxu3 %v9006_v54  ;;  %v11990_v48 = vld [vmem:[%s18861_s2 + $0xaf4] sm:$0xf0]  ;;  %v8958_v57 = vor.u32 %v11946_v47, %v8957_v43  ;;  %v8941_v0 = vld [vmem:[%s18861_s2 + $0x968] sm:$0xf] }
 0x1d5   :  { %5559 = vmatmul.bf16.vlgmr.msrb.gmra.mxu2 %v13173_v41  ;;  %5572 = vmatmul.bf16.vlgmr.msrb.gmra.mxu3 %v13177_v44  ;;  %v12022_v54 = vld [vmem:[%s18861_s2 + $0xbf4] sm:$0xf0]  ;;  %v9134_v58 = vor.u32 %v11990_v48, %v9133_v31  ;;  %v9245_v4 = vld [vmem:[%s18861_s2 + $0xbc8] sm:$0xf] }
 0x1d6   :  { %v8797_v29 = vld [vmem:[%s18861_s2 + $0x848] sm:$0xf]  ;;  %v11982_v21 = vld [vmem:[%s18861_s2 + $0xab4] sm:$0xf0] }
 0x1d7   :  { %5582 = vmatpush.bf16.msra.mxu0 %v8542_v1  ;;  %5595 = vmatpush.bf16.msra.mxu1 %v8670_v3  ;;  %v9262_v1 = vor.u32 %v12022_v54, %v9261_v52  ;;  %v11942_v3 = vld [vmem:[%s18861_s2 + $0x974] sm:$0xf0]  ;;  %v8925_v20 = vld [vmem:[%s18861_s2 + $0x948] sm:$0xf] }
 0x1d8   :  { %5604 = vmatpush.bf16.msra.mxu2 %v8862_v53  ;;  %5617 = vmatpush.bf16.msra.mxu3 %v8990_v8  ;;  %v9117_v53 = vld [vmem:[%s18861_s2 + $0xac8] sm:$0xf]  ;;  %v8814_v8 = vor.u32 %v11910_v61, %v8813_v6  ;;  %v8942_v9 = vor.u32 %v11942_v3, %v8941_v0  ;;  %v5352_v12 = vpop.f32.mrf.mxu2  ;;  %v5365_v2 = vpop.f32.mrf.mxu3  ;;  %v12014_v62 = vld [vmem:[%s18861_s2 + $0xbb4] sm:$0xf0]  ;;  %v8926_v47 = vor.u32 %v11938_v34, %v8925_v20 }
 0x1d9   :  { %v9118_v13 = vor.u32 %v11986_v16, %v9117_v53  ;;  %v9101_v15 = vld [vmem:[%s18861_s2 + $0xaa8] sm:$0xf]  ;;  %v11934_v54 = vld [vmem:[%s18861_s2 + $0x934] sm:$0xf0] }
 0x1da   :  { %v9229_v39 = vld [vmem:[%s18861_s2 + $0xba8] sm:$0xf]  ;;  %v9102_v31 = vor.u32 %v11982_v21, %v9101_v15  ;;  %v12010_v6 = vld [vmem:[%s18861_s2 + $0xb94] sm:$0xf0] }
 0x1db   :  { %5583 = vmatpush.bf16.msra.mxu0 %v8526_v17  ;;  %5596 = vmatpush.bf16.msra.mxu1 %v8654_v23  ;;  %v11906_v17 = vld [vmem:[%s18861_s2 + $0x854] sm:$0xf0]  ;;  %v5353_v23 = vadd.f32 %v5352_v12, %v5340_v50  ;;  %v8781_v48 = vld [vmem:[%s18861_s2 + $0x828] sm:$0xf]  ;;  %v9230_v52 = vor.u32 %v12014_v62, %v9229_v39 }
 0x1dc   :  { %5605 = vmatpush.bf16.msra.mxu2 %v8846_v25  ;;  %5618 = vmatpush.bf16.msra.mxu3 %v8974_v60  ;;  %v9246_v25 = vor.u32 %v12018_v7, %v9245_v4  ;;  %v5341_v60 = vpop.f32.mrf.mxu1  ;;  %v8798_v63 = vor.u32 %v11906_v17, %v8797_v29  ;;  %v11902_v50 = vld [vmem:[%s18861_s2 + $0x834] sm:$0xf0]  ;;  %v8893_v4 = vld [vmem:[%s18861_s2 + $0x908] sm:$0xf] }
 0x1dd   :  { %v5366_v43 = vadd.f32 %v5365_v2, %v5353_v23  ;;  %v8782_v0 = vor.u32 %v11902_v50, %v8781_v48  ;;  %v11898_v16 = vld [vmem:[%s18861_s2 + $0x814] sm:$0xf0]  ;;  %v9197_v29 = vld [vmem:[%s18861_s2 + $0xb68] sm:$0xf] }
 0x1de   :  { %v11930_v7 = vld [vmem:[%s18861_s2 + $0x914] sm:$0xf0]  ;;  %v9389_v20 = vld [vmem:[%s18861_s2 + $0xce8] sm:$0xf] }
 0x1df   :  { %5584 = vmatpush.bf16.msra.mxu0 %v8510_v51  ;;  %5597 = vmatpush.bf16.msra.mxu1 %v8638_v55  ;;  %v8909_v51 = vld [vmem:[%s18861_s2 + $0x928] sm:$0xf]  ;;  %v11974_v2 = vld [vmem:[%s18861_s2 + $0xa74] sm:$0xf0]  ;;  %v8894_v21 = vor.u32 %v11930_v7, %v8893_v4 }
 0x1e0   :  { %5606 = vmatpush.bf16.msra.mxu2 %v8830_v56  ;;  %5619 = vmatpush.bf16.msra.mxu3 %v8958_v57  ;;  %v9085_v55 = vld [vmem:[%s18861_s2 + $0xa88] sm:$0xf]  ;;  %v11978_v56 = vld [vmem:[%s18861_s2 + $0xa94] sm:$0xf0]  ;;  %v5378_v57 = vpop.f32.mrf.mxu0  ;;  %v8910_v3 = vor.u32 %v11934_v54, %v8909_v51 }
 0x1e1   :  { %v15778_v61 = vadd.f32 %v5378_v57, %v5366_v43  ;;  %v9086_v53 = vor.u32 %v11978_v56, %v9085_v55  ;;  %v12006_v17 = vld [vmem:[%s18861_s2 + $0xb74] sm:$0xf0]  ;;  %v9517_v34 = vld [vmem:[%s18861_s2 + $0xde8] sm:$0xf] }
 0x1e2   :  { %5585 = vmatmul.bf16.vlgmr.msra.gmra.mxu0 %v13165_v38  ;;  %5598 = vmatmul.bf16.vlgmr.msra.gmra.mxu1 %v13175_v42  ;;  %v12054_v23 = vld [vmem:[%s18861_s2 + $0xcf4] sm:$0xf0]  ;;  %v9198_v39 = vor.u32 %v12006_v17, %v9197_v29  ;;  %v9053_v43 = vld [vmem:[%s18861_s2 + $0xa48] sm:$0xf] }
 0x1e3   :  { %5629 = vmatpush.bf16.msrb.mxu0 %v9134_v58  ;;  %5642 = vmatpush.bf16.msrb.mxu1 %v9262_v1  ;;  %v9213_v58 = vld [vmem:[%s18861_s2 + $0xb88] sm:$0xf]  ;;  %v12086_v15 = vld [vmem:[%s18861_s2 + $0xdf4] sm:$0xf0]  ;;  %v9390_v62 = vor.u32 %v12054_v23, %v9389_v20 }
 0x1e4   :  { %5607 = vmatpush.bf16.msra.mxu2 %v8814_v8  ;;  %5620 = vmatpush.bf16.msra.mxu3 %v8942_v9  ;;  %v8765_v1 = vld [vmem:[%s18861_s2 + $0x808] sm:$0xf]  ;;  %v5354_v8 = vpop.f32.mrf.mxu2  ;;  %v5367_v9 = vpop.f32.mrf.mxu3  ;;  %v9214_v12 = vor.u32 %v12010_v6, %v9213_v58  ;;  %v12002_v48 = vld [vmem:[%s18861_s2 + $0xb54] sm:$0xf0] }
 0x1e5   :  { %v9373_v50 = vld [vmem:[%s18861_s2 + $0xcc8] sm:$0xf]  ;;  %v12050_v51 = vld [vmem:[%s18861_s2 + $0xcd4] sm:$0xf0] }
 0x1e6   :  { %v9501_v54 = vld [vmem:[%s18861_s2 + $0xdc8] sm:$0xf]  ;;  %v12082_v55 = vld [vmem:[%s18861_s2 + $0xdd4] sm:$0xf0]  ;;  %v9374_v58 = vor.u32 %v12050_v51, %v9373_v50 }
 0x1e7   :  { %5630 = vmatpush.bf16.msrb.mxu0 %v9118_v13  ;;  %5643 = vmatpush.bf16.msrb.mxu1 %v9246_v25  ;;  %v9069_v13 = vld [vmem:[%s18861_s2 + $0xa68] sm:$0xf]  ;;  %v8766_v25 = vor.u32 %v11898_v16, %v8765_v1  ;;  %v12046_v4 = vld [vmem:[%s18861_s2 + $0xcb4] sm:$0xf0] }
 0x1e8   :  { %5608 = vmatpush.bf16.msra.mxu2 %v8798_v63  ;;  %5621 = vmatpush.bf16.msra.mxu3 %v8926_v47  ;;  %v9070_v60 = vor.u32 %v11974_v2, %v9069_v13  ;;  %v11970_v63 = vld [vmem:[%s18861_s2 + $0xa54] sm:$0xf0]  ;;  %v9181_v47 = vld [vmem:[%s18861_s2 + $0xb48] sm:$0xf] }
 0x1e9   :  { %v9054_v56 = vor.u32 %v11970_v63, %v9053_v43  ;;  %v9182_v57 = vor.u32 %v12002_v48, %v9181_v47  ;;  %v9037_v6 = vld [vmem:[%s18861_s2 + $0xa28] sm:$0xf]  ;;  %v12078_v8 = vld [vmem:[%s18861_s2 + $0xdb4] sm:$0xf0] }
 0x1ea   :  { %v9165_v1 = vld [vmem:[%s18861_s2 + $0xb28] sm:$0xf]  ;;  %v11962_v29 = vld [vmem:[%s18861_s2 + $0xa14] sm:$0xf0] }
 0x1eb   :  { %5631 = vmatpush.bf16.msrb.mxu0 %v9102_v31  ;;  %5644 = vmatpush.bf16.msrb.mxu1 %v9230_v52  ;;  %v9518_v31 = vor.u32 %v12086_v15, %v9517_v34  ;;  %v5380_v52 = vpop.f32.mrf.mxu0  ;;  %v9357_v16 = vld [vmem:[%s18861_s2 + $0xca8] sm:$0xf]  ;;  %v11994_v20 = vld [vmem:[%s18861_s2 + $0xb14] sm:$0xf0] }
 0x1ec   :  { %5609 = vmatpush.bf16.msra.mxu2 %v8782_v0  ;;  %5622 = vmatpush.bf16.msra.mxu3 %v8910_v3  ;;  %v11966_v0 = vld [vmem:[%s18861_s2 + $0xa34] sm:$0xf0]  ;;  %v9502_v3 = vor.u32 %v12082_v55, %v9501_v54  ;;  %v9485_v7 = vld [vmem:[%s18861_s2 + $0xda8] sm:$0xf]  ;;  %v9358_v2 = vor.u32 %v12046_v4, %v9357_v16 }
 0x1ed   :  { %v9038_v9 = vor.u32 %v11966_v0, %v9037_v6  ;;  %v9149_v17 = vld [vmem:[%s18861_s2 + $0xb08] sm:$0xf]  ;;  %v9486_v23 = vor.u32 %v12078_v8, %v9485_v7  ;;  %v12042_v34 = vld [vmem:[%s18861_s2 + $0xc94] sm:$0xf0] }
 0x1ee   :  { %v9469_v15 = vld [vmem:[%s18861_s2 + $0xd88] sm:$0xf]  ;;  %v9150_v48 = vor.u32 %v11994_v20, %v9149_v17  ;;  %v12038_v54 = vld [vmem:[%s18861_s2 + $0xc74] sm:$0xf0] }
 0x1ef   :  { %5632 = vmatpush.bf16.msrb.mxu0 %v9086_v53  ;;  %5645 = vmatpush.bf16.msrb.mxu1 %v9214_v12  ;;  %v11998_v53 = vld [vmem:[%s18861_s2 + $0xb34] sm:$0xf0]  ;;  %v9021_v12 = vld [vmem:[%s18861_s2 + $0xa08] sm:$0xf] }
 0x1f0   :  { %5610 = vmatpush.bf16.msra.mxu2 %v8766_v25  ;;  %5623 = vmatpush.bf16.msra.mxu3 %v8894_v21  ;;  %v9166_v13 = vor.u32 %v11998_v53, %v9165_v1  ;;  %v9341_v25 = vld [vmem:[%s18861_s2 + $0xc88] sm:$0xf]  ;;  %v5391_v21 = vpop.f32.mrf.mxu1  ;;  %v9022_v63 = vor.u32 %v11962_v29, %v9021_v12  ;;  %v12114_v6 = vld [vmem:[%s18861_s2 + $0xed4] sm:$0xf0] }
 0x1f1   :  { %v5392_v43 = vadd.f32 %v5391_v21, %v15778_v61  ;;  %v9773_v47 = vld [vmem:[%s18861_s2 + $0xfe8] sm:$0xf]  ;;  %v9342_v50 = vor.u32 %v12042_v34, %v9341_v25  ;;  %v12146_v1 = vld [vmem:[%s18861_s2 + $0xfd4] sm:$0xf0] }
 0x1f2   :  { %v9325_v61 = vld [vmem:[%s18861_s2 + $0xc68] sm:$0xf]  ;;  %v12066_v29 = vld [vmem:[%s18861_s2 + $0xd54] sm:$0xf0] }
 0x1f3   :  { %5633 = vmatpush.bf16.msrb.mxu0 %v9070_v60  ;;  %5646 = vmatpush.bf16.msrb.mxu1 %v9198_v39  ;;  %v12074_v60 = vld [vmem:[%s18861_s2 + $0xd94] sm:$0xf0]  ;;  %v9645_v39 = vld [vmem:[%s18861_s2 + $0xee8] sm:$0xf] }
 0x1f4   :  { %5655 = vmatpush.bf16.msrb.mxu2 %v9390_v62  ;;  %5668 = vmatpush.bf16.msrb.mxu3 %v9518_v31  ;;  %v12118_v62 = vld [vmem:[%s18861_s2 + $0xef4] sm:$0xf0]  ;;  %v9470_v51 = vor.u32 %v12074_v60, %v9469_v15  ;;  %v9453_v55 = vld [vmem:[%s18861_s2 + $0xd68] sm:$0xf] }
 0x1f5   :  { %5611 = vmatmul.bf16.vlgmr.msra.gmra.mxu2 %v13373_v24  ;;  %5624 = vmatmul.bf16.vlgmr.msra.gmra.mxu3 %v13390_v18  ;;  %v12150_v31 = vld [vmem:[%s18861_s2 + $0xff4] sm:$0xf0]  ;;  %v9646_v52 = vor.u32 %v12118_v62, %v9645_v39  ;;  %v9757_v0 = vld [vmem:[%s18861_s2 + $0xfc8] sm:$0xf] }
 0x1f6   :  { %v9309_v8 = vld [vmem:[%s18861_s2 + $0xc48] sm:$0xf]  ;;  %v12110_v20 = vld [vmem:[%s18861_s2 + $0xeb4] sm:$0xf0] }
 0x1f7   :  { %5634 = vmatpush.bf16.msrb.mxu0 %v9054_v56  ;;  %5647 = vmatpush.bf16.msrb.mxu1 %v9182_v57  ;;  %v9774_v56 = vor.u32 %v12150_v31, %v9773_v47  ;;  %v12070_v57 = vld [vmem:[%s18861_s2 + $0xd74] sm:$0xf0]  ;;  %v9437_v12 = vld [vmem:[%s18861_s2 + $0xd48] sm:$0xf] }
 0x1f8   :  { %5656 = vmatpush.bf16.msrb.mxu2 %v9374_v58  ;;  %5669 = vmatpush.bf16.msrb.mxu3 %v9502_v3  ;;  %v9629_v58 = vld [vmem:[%s18861_s2 + $0xec8] sm:$0xf]  ;;  %v9326_v3 = vor.u32 %v12038_v54, %v9325_v61  ;;  %v9454_v53 = vor.u32 %v12070_v57, %v9453_v55  ;;  %v5404_v16 = vpop.f32.mrf.mxu2  ;;  %v5417_v7 = vpop.f32.mrf.mxu3  ;;  %v12142_v34 = vld [vmem:[%s18861_s2 + $0xfb4] sm:$0xf0]  ;;  %v9438_v60 = vor.u32 %v12066_v29, %v9437_v12 }
 0x1f9   :  { %v9630_v4 = vor.u32 %v12114_v6, %v9629_v58  ;;  %v9613_v17 = vld [vmem:[%s18861_s2 + $0xea8] sm:$0xf]  ;;  %v12062_v31 = vld [vmem:[%s18861_s2 + $0xd34] sm:$0xf0] }
 0x1fa   :  { %v9741_v25 = vld [vmem:[%s18861_s2 + $0xfa8] sm:$0xf]  ;;  %v9614_v39 = vor.u32 %v12110_v20, %v9613_v17  ;;  %v12138_v61 = vld [vmem:[%s18861_s2 + $0xf94] sm:$0xf0] }
 0x1fb   :  { %5635 = vmatpush.bf16.msrb.mxu0 %v9038_v9  ;;  %5648 = vmatpush.bf16.msrb.mxu1 %v9166_v13  ;;  %v12034_v9 = vld [vmem:[%s18861_s2 + $0xc54] sm:$0xf0]  ;;  %v5405_v13 = vadd.f32 %v5404_v16, %v5392_v43  ;;  %v9293_v62 = vld [vmem:[%s18861_s2 + $0xc28] sm:$0xf]  ;;  %v9742_v47 = vor.u32 %v12142_v34, %v9741_v25 }
 0x1fc   :  { %5657 = vmatpush.bf16.msrb.mxu2 %v9358_v2  ;;  %5670 = vmatpush.bf16.msrb.mxu3 %v9486_v23  ;;  %v9758_v2 = vor.u32 %v12146_v1, %v9757_v0  ;;  %v5393_v23 = vpop.f32.mrf.mxu1  ;;  %v9310_v21 = vor.u32 %v12034_v9, %v9309_v8  ;;  %v12030_v43 = vld [vmem:[%s18861_s2 + $0xc34] sm:$0xf0]  ;;  %v9405_v0 = vld [vmem:[%s18861_s2 + $0xd08] sm:$0xf] }
 0x1fd   :  { %v5418_v15 = vadd.f32 %v5417_v7, %v5405_v13  ;;  %v9294_v55 = vor.u32 %v12030_v43, %v9293_v62  ;;  %v12026_v6 = vld [vmem:[%s18861_s2 + $0xc14] sm:$0xf0]  ;;  %v9709_v8 = vld [vmem:[%s18861_s2 + $0xf68] sm:$0xf] }
 0x1fe   :  { %v12058_v1 = vld [vmem:[%s18861_s2 + $0xd14] sm:$0xf0]  ;;  %v9901_v12 = vld [vmem:[%s18861_s2 + $0x10e8] sm:$0xf] }
 0x1ff   :  { %5636 = vmatpush.bf16.msrb.mxu0 %v9022_v63  ;;  %5649 = vmatpush.bf16.msrb.mxu1 %v9150_v48  ;;  %v9421_v63 = vld [vmem:[%s18861_s2 + $0xd28] sm:$0xf]  ;;  %v12102_v7 = vld [vmem:[%s18861_s2 + $0xe74] sm:$0xf0]  ;;  %v9406_v20 = vor.u32 %v12058_v1, %v9405_v0 }
 0x200   :  { %5658 = vmatpush.bf16.msrb.mxu2 %v9342_v50  ;;  %5671 = vmatpush.bf16.msrb.mxu3 %v9470_v51  ;;  %v9597_v48 = vld [vmem:[%s18861_s2 + $0xe88] sm:$0xf]  ;;  %v12106_v50 = vld [vmem:[%s18861_s2 + $0xe94] sm:$0xf0]  ;;  %v5430_v51 = vpop.f32.mrf.mxu0  ;;  %v9422_v57 = vor.u32 %v12062_v31, %v9421_v63 }
 0x201   :  { %v15977_v54 = vadd.f32 %v5430_v51, %v5418_v15  ;;  %v9598_v58 = vor.u32 %v12106_v50, %v9597_v48  ;;  %v12134_v9 = vld [vmem:[%s18861_s2 + $0xf74] sm:$0xf0]  ;;  %v10029_v29 = vld [vmem:[%s18861_s2 + $0x11e8] sm:$0xf] }
 0x202   :  { %5637 = vmatmul.bf16.vlgmr.msrb.gmra.mxu0 %v13386_v30  ;;  %5650 = vmatmul.bf16.vlgmr.msrb.gmra.mxu1 %v13400_v35  ;;  %v12182_v13 = vld [vmem:[%s18861_s2 + $0x10f4] sm:$0xf0]  ;;  %v9710_v25 = vor.u32 %v12134_v9, %v9709_v8  ;;  %v9565_v15 = vld [vmem:[%s18861_s2 + $0xe48] sm:$0xf] }
 0x203   :  { %5681 = vmatpush.bf16.msra.mxu0 %v9646_v52  ;;  %5694 = vmatpush.bf16.msra.mxu1 %v9774_v56  ;;  %v9725_v52 = vld [vmem:[%s18861_s2 + $0xf88] sm:$0xf]  ;;  %v12214_v17 = vld [vmem:[%s18861_s2 + $0x11f4] sm:$0xf0]  ;;  %v9902_v34 = vor.u32 %v12182_v13, %v9901_v12 }
 0x204   :  { %5659 = vmatpush.bf16.msrb.mxu2 %v9326_v3  ;;  %5672 = vmatpush.bf16.msrb.mxu3 %v9454_v53  ;;  %v9277_v56 = vld [vmem:[%s18861_s2 + $0xc08] sm:$0xf]  ;;  %v5406_v3 = vpop.f32.mrf.mxu2  ;;  %v5419_v53 = vpop.f32.mrf.mxu3  ;;  %v9726_v16 = vor.u32 %v12138_v61, %v9725_v52  ;;  %v12130_v62 = vld [vmem:[%s18861_s2 + $0xf54] sm:$0xf0] }
 0x205   :  { %v9885_v43 = vld [vmem:[%s18861_s2 + $0x10c8] sm:$0xf]  ;;  %v12178_v63 = vld [vmem:[%s18861_s2 + $0x10d4] sm:$0xf0] }
 0x206   :  { %v10013_v31 = vld [vmem:[%s18861_s2 + $0x11c8] sm:$0xf]  ;;  %v12210_v48 = vld [vmem:[%s18861_s2 + $0x11d4] sm:$0xf0]  ;;  %v9886_v52 = vor.u32 %v12178_v63, %v9885_v43 }
 0x207   :  { %5682 = vmatpush.bf16.msra.mxu0 %v9630_v4  ;;  %5695 = vmatpush.bf16.msra.mxu1 %v9758_v2  ;;  %v9581_v4 = vld [vmem:[%s18861_s2 + $0xe68] sm:$0xf]  ;;  %v9278_v2 = vor.u32 %v12026_v6, %v9277_v56  ;;  %v12174_v0 = vld [vmem:[%s18861_s2 + $0x10b4] sm:$0xf0] }
 0x208   :  { %5660 = vmatpush.bf16.msrb.mxu2 %v9310_v21  ;;  %5673 = vmatpush.bf16.msrb.mxu3 %v9438_v60  ;;  %v9582_v23 = vor.u32 %v12102_v7, %v9581_v4  ;;  %v12098_v21 = vld [vmem:[%s18861_s2 + $0xe54] sm:$0xf0]  ;;  %v9693_v60 = vld [vmem:[%s18861_s2 + $0xf48] sm:$0xf] }
 0x209   :  { %v9566_v50 = vor.u32 %v12098_v21, %v9565_v15  ;;  %v9694_v51 = vor.u32 %v12130_v62, %v9693_v60  ;;  %v9549_v61 = vld [vmem:[%s18861_s2 + $0xe28] sm:$0xf]  ;;  %v12206_v3 = vld [vmem:[%s18861_s2 + $0x11b4] sm:$0xf0] }
 0x20a   :  { %v9677_v56 = vld [vmem:[%s18861_s2 + $0xf28] sm:$0xf]  ;;  %v12090_v8 = vld [vmem:[%s18861_s2 + $0xe14] sm:$0xf0] }
 0x20b   :  { %5683 = vmatpush.bf16.msra.mxu0 %v9614_v39  ;;  %5696 = vmatpush.bf16.msra.mxu1 %v9742_v47  ;;  %v10030_v39 = vor.u32 %v12214_v17, %v10029_v29  ;;  %v5432_v47 = vpop.f32.mrf.mxu0  ;;  %v9869_v6 = vld [vmem:[%s18861_s2 + $0x10a8] sm:$0xf]  ;;  %v12122_v12 = vld [vmem:[%s18861_s2 + $0xf14] sm:$0xf0] }
 0x20c   :  { %5661 = vmatpush.bf16.msrb.mxu2 %v9294_v55  ;;  %5674 = vmatpush.bf16.msrb.mxu3 %v9422_v57  ;;  %v12094_v55 = vld [vmem:[%s18861_s2 + $0xe34] sm:$0xf0]  ;;  %v10014_v57 = vor.u32 %v12210_v48, %v10013_v31  ;;  %v9997_v1 = vld [vmem:[%s18861_s2 + $0x11a8] sm:$0xf]  ;;  %v9870_v7 = vor.u32 %v12174_v0, %v9869_v6 }
 0x20d   :  { %v9550_v53 = vor.u32 %v12094_v55, %v9549_v61  ;;  %v9661_v9 = vld [vmem:[%s18861_s2 + $0xf08] sm:$0xf]  ;;  %v9998_v13 = vor.u32 %v12206_v3, %v9997_v1  ;;  %v12170_v29 = vld [vmem:[%s18861_s2 + $0x1094] sm:$0xf0] }
 0x20e   :  { %v9981_v17 = vld [vmem:[%s18861_s2 + $0x1188] sm:$0xf]  ;;  %v9662_v62 = vor.u32 %v12122_v12, %v9661_v9  ;;  %v12166_v31 = vld [vmem:[%s18861_s2 + $0x1074] sm:$0xf0] }
 0x20f   :  { %5684 = vmatpush.bf16.msra.mxu0 %v9598_v58  ;;  %5697 = vmatpush.bf16.msra.mxu1 %v9726_v16  ;;  %v12126_v58 = vld [vmem:[%s18861_s2 + $0xf34] sm:$0xf0]  ;;  %v9533_v16 = vld [vmem:[%s18861_s2 + $0xe08] sm:$0xf] }
 0x210   :  { %5662 = vmatpush.bf16.msrb.mxu2 %v9278_v2  ;;  %5675 = vmatpush.bf16.msrb.mxu3 %v9406_v20  ;;  %v9678_v4 = vor.u32 %v12126_v58, %v9677_v56  ;;  %v9853_v2 = vld [vmem:[%s18861_s2 + $0x1088] sm:$0xf]  ;;  %v5443_v20 = vpop.f32.mrf.mxu1  ;;  %v9534_v21 = vor.u32 %v12090_v8, %v9533_v16  ;;  %v12242_v61 = vld [vmem:[%s18861_s2 + $0x12d4] sm:$0xf0] }
 0x211   :  { %v5444_v15 = vadd.f32 %v5443_v20, %v15977_v54  ;;  %v10285_v60 = vld [vmem:[%s18861_s2 + $0x13e8] sm:$0xf]  ;;  %v9854_v43 = vor.u32 %v12170_v29, %v9853_v2  ;;  %v12274_v56 = vld [vmem:[%s18861_s2 + $0x13d4] sm:$0xf0] }
 0x212   :  { %v9837_v54 = vld [vmem:[%s18861_s2 + $0x1068] sm:$0xf]  ;;  %v12194_v9 = vld [vmem:[%s18861_s2 + $0x1154] sm:$0xf0] }
 0x213   :  { %5685 = vmatpush.bf16.msra.mxu0 %v9582_v23  ;;  %5698 = vmatpush.bf16.msra.mxu1 %v9710_v25  ;;  %v12202_v23 = vld [vmem:[%s18861_s2 + $0x1194] sm:$0xf0]  ;;  %v10157_v25 = vld [vmem:[%s18861_s2 + $0x12e8] sm:$0xf] }
 0x214   :  { %5707 = vmatpush.bf16.msra.mxu2 %v9902_v34  ;;  %5720 = vmatpush.bf16.msra.mxu3 %v10030_v39  ;;  %v12246_v34 = vld [vmem:[%s18861_s2 + $0x12f4] sm:$0xf0]  ;;  %v9982_v63 = vor.u32 %v12202_v23, %v9981_v17  ;;  %v9965_v48 = vld [vmem:[%s18861_s2 + $0x1168] sm:$0xf] }
 0x215   :  { %5663 = vmatmul.bf16.vlgmr.msrb.gmra.mxu2 %v13596_v28  ;;  %5676 = vmatmul.bf16.vlgmr.msrb.gmra.mxu3 %v13613_v59  ;;  %v12278_v39 = vld [vmem:[%s18861_s2 + $0x13f4] sm:$0xf0]  ;;  %v10158_v47 = vor.u32 %v12246_v34, %v10157_v25  ;;  %v10269_v55 = vld [vmem:[%s18861_s2 + $0x13c8] sm:$0xf] }
 0x216   :  { %v9821_v3 = vld [vmem:[%s18861_s2 + $0x1048] sm:$0xf]  ;;  %v12270_v29 = vld [vmem:[%s18861_s2 + $0x13b4] sm:$0xf0] }
 0x217   :  { %5686 = vmatpush.bf16.msra.mxu0 %v9566_v50  ;;  %5699 = vmatpush.bf16.msra.mxu1 %v9694_v51  ;;  %v10286_v50 = vor.u32 %v12278_v39, %v10285_v60  ;;  %v12198_v51 = vld [vmem:[%s18861_s2 + $0x1174] sm:$0xf0]  ;;  %v9949_v16 = vld [vmem:[%s18861_s2 + $0x1148] sm:$0xf] }
 0x218   :  { %5708 = vmatpush.bf16.msra.mxu2 %v9886_v52  ;;  %5721 = vmatpush.bf16.msra.mxu3 %v10014_v57  ;;  %v10141_v52 = vld [vmem:[%s18861_s2 + $0x12c8] sm:$0xf]  ;;  %v9838_v57 = vor.u32 %v12166_v31, %v9837_v54  ;;  %v9966_v58 = vor.u32 %v12198_v51, %v9965_v48  ;;  %v5456_v6 = vpop.f32.mrf.mxu2  ;;  %v5469_v1 = vpop.f32.mrf.mxu3  ;;  %v9950_v23 = vor.u32 %v12194_v9, %v9949_v16  ;;  %v12190_v39 = vld [vmem:[%s18861_s2 + $0x1134] sm:$0xf0] }
 0x219   :  { %v10142_v0 = vor.u32 %v12242_v61, %v10141_v52  ;;  %v5445_v8 = vpop.f32.mrf.mxu1  ;;  %v10125_v12 = vld [vmem:[%s18861_s2 + $0x12a8] sm:$0xf]  ;;  %v12266_v54 = vld [vmem:[%s18861_s2 + $0x1394] sm:$0xf0] }
 0x21a   :  { %v10253_v2 = vld [vmem:[%s18861_s2 + $0x13a8] sm:$0xf]  ;;  %v12154_v61 = vld [vmem:[%s18861_s2 + $0x1014] sm:$0xf0] }
 0x21b   :  { %5687 = vmatpush.bf16.msra.mxu0 %v9550_v53  ;;  %5700 = vmatpush.bf16.msra.mxu1 %v9678_v4  ;;  %v12162_v53 = vld [vmem:[%s18861_s2 + $0x1054] sm:$0xf0]  ;;  %v5457_v4 = vadd.f32 %v5456_v6, %v5444_v15  ;;  %v9805_v34 = vld [vmem:[%s18861_s2 + $0x1028] sm:$0xf]  ;;  %v10254_v60 = vor.u32 %v12270_v29, %v10253_v2 }
 0x21c   :  { %5709 = vmatpush.bf16.msra.mxu2 %v9870_v7  ;;  %5722 = vmatpush.bf16.msra.mxu3 %v9998_v13  ;;  %v10270_v7 = vor.u32 %v12274_v56, %v10269_v55  ;;  %v12238_v13 = vld [vmem:[%s18861_s2 + $0x12b4] sm:$0xf0]  ;;  %v9822_v20 = vor.u32 %v12162_v53, %v9821_v3  ;;  %v9917_v55 = vld [vmem:[%s18861_s2 + $0x1108] sm:$0xf] }
 0x21d   :  { %v5470_v17 = vadd.f32 %v5469_v1, %v5457_v4  ;;  %v10126_v25 = vor.u32 %v12238_v13, %v10125_v12  ;;  %v12158_v15 = vld [vmem:[%s18861_s2 + $0x1034] sm:$0xf0]  ;;  %v10221_v3 = vld [vmem:[%s18861_s2 + $0x1368] sm:$0xf] }
 0x21e   :  { %v9806_v48 = vor.u32 %v12158_v15, %v9805_v34  ;;  %v12186_v56 = vld [vmem:[%s18861_s2 + $0x1114] sm:$0xf0]  ;;  %v10413_v16 = vld [vmem:[%s18861_s2 + $0x14e8] sm:$0xf] }
 0x21f   :  { %5688 = vmatpush.bf16.msra.mxu0 %v9534_v21  ;;  %5701 = vmatpush.bf16.msra.mxu1 %v9662_v62  ;;  %v9933_v21 = vld [vmem:[%s18861_s2 + $0x1128] sm:$0xf]  ;;  %v12230_v1 = vld [vmem:[%s18861_s2 + $0x1274] sm:$0xf0]  ;;  %v9918_v2 = vor.u32 %v12186_v56, %v9917_v55 }
 0x220   :  { %5710 = vmatpush.bf16.msra.mxu2 %v9854_v43  ;;  %5723 = vmatpush.bf16.msra.mxu3 %v9982_v63  ;;  %v10109_v62 = vld [vmem:[%s18861_s2 + $0x1288] sm:$0xf]  ;;  %v12234_v43 = vld [vmem:[%s18861_s2 + $0x1294] sm:$0xf0]  ;;  %v5482_v63 = vpop.f32.mrf.mxu0  ;;  %v9934_v51 = vor.u32 %v12190_v39, %v9933_v21 }
 0x221   :  { %v5483_v31 = vadd.f32 %v5482_v63, %v5470_v17  ;;  %v10110_v52 = vor.u32 %v12234_v43, %v10109_v62  ;;  %v12262_v53 = vld [vmem:[%s18861_s2 + $0x1374] sm:$0xf0]  ;;  %v10541_v9 = vld [vmem:[%s18861_s2 + $0x15e8] sm:$0xf] }
 0x222   :  { %5689 = vmatmul.bf16.vlgmr.msra.gmra.mxu0 %v13609_v19  ;;  %5702 = vmatmul.bf16.vlgmr.msra.gmra.mxu1 %v13623_v37  ;;  %v12310_v4 = vld [vmem:[%s18861_s2 + $0x14f4] sm:$0xf0]  ;;  %v10222_v17 = vor.u32 %v12262_v53, %v10221_v3  ;;  %v10205_v34 = vld [vmem:[%s18861_s2 + $0x1348] sm:$0xf] }
 0x223   :  { %5733 = vmatpush.bf16.msrb.mxu0 %v10158_v47  ;;  %5746 = vmatpush.bf16.msrb.mxu1 %v10286_v50  ;;  %v10237_v47 = vld [vmem:[%s18861_s2 + $0x1388] sm:$0xf]  ;;  %v12342_v12 = vld [vmem:[%s18861_s2 + $0x15f4] sm:$0xf0] }
 0x224   :  { %5711 = vmatpush.bf16.msra.mxu2 %v9838_v57  ;;  %5724 = vmatpush.bf16.msra.mxu3 %v9966_v58  ;;  %v9789_v50 = vld [vmem:[%s18861_s2 + $0x1008] sm:$0xf]  ;;  %v5471_v57 = vpop.f32.mrf.mxu3  ;;  %v5458_v58 = vpop.f32.mrf.mxu2  ;;  %v10238_v6 = vor.u32 %v12266_v54, %v10237_v47  ;;  %v10542_v15 = vor.u32 %v12342_v12, %v10541_v9  ;;  %v12258_v21 = vld [vmem:[%s18861_s2 + $0x1354] sm:$0xf0] }
 0x225   :  { %v9790_v8 = vor.u32 %v12154_v61, %v9789_v50  ;;  %v12306_v39 = vld [vmem:[%s18861_s2 + $0x14d4] sm:$0xf0]  ;;  %v10525_v43 = vld [vmem:[%s18861_s2 + $0x15c8] sm:$0xf]  ;;  %v10206_v54 = vor.u32 %v12258_v21, %v10205_v34 }
 0x226   :  { %v12338_v63 = vld [vmem:[%s18861_s2 + $0x15d4] sm:$0xf0]  ;;  %v10381_v55 = vld [vmem:[%s18861_s2 + $0x14a8] sm:$0xf] }
 0x227   :  { %5734 = vmatpush.bf16.msrb.mxu0 %v10142_v0  ;;  %5747 = vmatpush.bf16.msrb.mxu1 %v10270_v7  ;;  %v10093_v0 = vld [vmem:[%s18861_s2 + $0x1268] sm:$0xf]  ;;  %v5495_v7 = vpop.f32.mrf.mxu1  ;;  %v12222_v50 = vld [vmem:[%s18861_s2 + $0x1234] sm:$0xf0] }
 0x228   :  { %5712 = vmatpush.bf16.msra.mxu2 %v9822_v20  ;;  %5725 = vmatpush.bf16.msra.mxu3 %v9950_v23  ;;  %v16212_v13 = vadd.f32 %v5495_v7, %v5483_v31  ;;  %v10094_v29 = vor.u32 %v12230_v1, %v10093_v0  ;;  %v10414_v20 = vor.u32 %v12310_v4, %v10413_v16  ;;  %v10077_v23 = vld [vmem:[%s18861_s2 + $0x1248] sm:$0xf]  ;;  %v5484_v62 = vpop.f32.mrf.mxu0  ;;  %v12254_v61 = vld [vmem:[%s18861_s2 + $0x1334] sm:$0xf0] }
 0x229   :  { %v12302_v56 = vld [vmem:[%s18861_s2 + $0x14b4] sm:$0xf0]  ;;  %v10509_v57 = vld [vmem:[%s18861_s2 + $0x15a8] sm:$0xf] }
 0x22a   :  { %v12334_v58 = vld [vmem:[%s18861_s2 + $0x15b4] sm:$0xf0]  ;;  %v10045_v1 = vld [vmem:[%s18861_s2 + $0x1208] sm:$0xf]  ;;  %v10382_v53 = vor.u32 %v12302_v56, %v10381_v55  ;;  %12619 = vtanh.f32 %v16212_v13 }
 0x22b   :  { %5735 = vmatpush.bf16.msrb.mxu0 %v10126_v25  ;;  %5748 = vmatpush.bf16.msrb.mxu1 %v10254_v60  ;;  %v12226_v25 = vld [vmem:[%s18861_s2 + $0x1254] sm:$0xf0]  ;;  %v10397_v60 = vld [vmem:[%s18861_s2 + $0x14c8] sm:$0xf] }
 0x22c   :  { %5713 = vmatpush.bf16.msra.mxu2 %v9806_v48  ;;  %5726 = vmatpush.bf16.msra.mxu3 %v9934_v51  ;;  %v10078_v47 = vor.u32 %v12226_v25, %v10077_v23  ;;  %v10398_v31 = vor.u32 %v12306_v39, %v10397_v60  ;;  %v10061_v48 = vld [vmem:[%s18861_s2 + $0x1228] sm:$0xf]  ;;  %v12218_v16 = vld [vmem:[%s18861_s2 + $0x1214] sm:$0xf0] }
 0x22d   :  { %v10189_v51 = vld [vmem:[%s18861_s2 + $0x1328] sm:$0xf]  ;;  %v10062_v0 = vor.u32 %v12222_v50, %v10061_v48  ;;  %v12250_v7 = vld [vmem:[%s18861_s2 + $0x1314] sm:$0xf0]  ;;  %v10046_v23 = vor.u32 %v12218_v16, %v10045_v1 }
 0x22e   :  { %v10190_v3 = vor.u32 %v12254_v61, %v10189_v51  ;;  %v10173_v4 = vld [vmem:[%s18861_s2 + $0x1308] sm:$0xf]  ;;  %v12298_v12 = vld [vmem:[%s18861_s2 + $0x1494] sm:$0xf0] }
 0x22f   :  { %5736 = vmatpush.bf16.msrb.mxu0 %v10110_v52  ;;  %5749 = vmatpush.bf16.msrb.mxu1 %v10238_v6  ;;  %v10526_v52 = vor.u32 %v12338_v63, %v10525_v43  ;;  %v5497_v6 = vpop.f32.mrf.mxu1  ;;  %v10365_v9 = vld [vmem:[%s18861_s2 + $0x1488] sm:$0xf]  ;;  %v12406_v34 = vld [vmem:[%s18861_s2 + $0x17f4] sm:$0xf0] }
 0x230   :  { %5714 = vmatpush.bf16.msra.mxu2 %v9790_v8  ;;  %5727 = vmatpush.bf16.msra.mxu3 %v9918_v2  ;;  %v10510_v8 = vor.u32 %v12334_v58, %v10509_v57  ;;  %v10493_v2 = vld [vmem:[%s18861_s2 + $0x1588] sm:$0xf]  ;;  %v10366_v21 = vor.u32 %v12298_v12, %v10365_v9  ;;  %v12294_v43 = vld [vmem:[%s18861_s2 + $0x1474] sm:$0xf0] }
 0x231   :  { %v10797_v25 = vld [vmem:[%s18861_s2 + $0x17e8] sm:$0xf]  ;;  %v12326_v48 = vld [vmem:[%s18861_s2 + $0x1574] sm:$0xf0] }
 0x232   :  { %v10349_v60 = vld [vmem:[%s18861_s2 + $0x1468] sm:$0xf]  ;;  %v12370_v51 = vld [vmem:[%s18861_s2 + $0x16d4] sm:$0xf0] }
 0x233   :  { %5737 = vmatpush.bf16.msrb.mxu0 %v10094_v29  ;;  %5750 = vmatpush.bf16.msrb.mxu1 %v10222_v17  ;;  %v12330_v29 = vld [vmem:[%s18861_s2 + $0x1594] sm:$0xf0]  ;;  %v10669_v17 = vld [vmem:[%s18861_s2 + $0x16e8] sm:$0xf]  ;;  %v10350_v55 = vor.u32 %v12294_v43, %v10349_v60 }
 0x234   :  { %5759 = vmatpush.bf16.msrb.mxu2 %v10414_v20  ;;  %5772 = vmatpush.bf16.msrb.mxu3 %v10542_v15  ;;  %v12374_v20 = vld [vmem:[%s18861_s2 + $0x16f4] sm:$0xf0]  ;;  %v10174_v15 = vor.u32 %v12250_v7, %v10173_v4  ;;  %v10494_v39 = vor.u32 %v12330_v29, %v10493_v2  ;;  %v10477_v63 = vld [vmem:[%s18861_s2 + $0x1568] sm:$0xf] }
 0x235   :  { %5715 = vmatmul.bf16.vlgmr.msra.gmra.mxu2 %v13806_v36  ;;  %5728 = vmatmul.bf16.vlgmr.msra.gmra.mxu3 %v13819_v22  ;;  %v10670_v62 = vor.u32 %v12374_v20, %v10669_v17  ;;  %v10653_v50 = vld [vmem:[%s18861_s2 + $0x16c8] sm:$0xf]  ;;  %v12402_v61 = vld [vmem:[%s18861_s2 + $0x17d4] sm:$0xf0]  ;;  %v10478_v57 = vor.u32 %v12326_v48, %v10477_v63 }
 0x236   :  { %v10654_v58 = vor.u32 %v12370_v51, %v10653_v50  ;;  %v10333_v6 = vld [vmem:[%s18861_s2 + $0x1448] sm:$0xf]  ;;  %v12322_v4 = vld [vmem:[%s18861_s2 + $0x1554] sm:$0xf0] }
 0x237   :  { %5738 = vmatpush.bf16.msrb.mxu0 %v10078_v47  ;;  %5751 = vmatpush.bf16.msrb.mxu1 %v10206_v54  ;;  %v12636_v47 = vld [vmem:[%s18862_s3] sm:$0xf]  ;;  %v10461_v1 = vld [vmem:[%s18861_s2 + $0x1548] sm:$0xf]  ;;  %v12398_v12 = vld [vmem:[%s18861_s2 + $0x17b4] sm:$0xf0] }
 0x238   :  { %5760 = vmatpush.bf16.msrb.mxu2 %v10398_v31  ;;  %5773 = vmatpush.bf16.msrb.mxu3 %v10526_v52  ;;  %v919_v54 = vperm.slane %v12636_v47, 2  ;;  %v10798_v31 = vor.u32 %v12406_v34, %v10797_v25  ;;  %v10781_v52 = vld [vmem:[%s18861_s2 + $0x17c8] sm:$0xf]  ;;  %v5508_v56 = vpop.f32.mrf.mxu2  ;;  %v10462_v17 = vor.u32 %v12322_v4, %v10461_v1  ;;  %v12286_v25 = vld [vmem:[%s18861_s2 + $0x1434] sm:$0xf0] }
 0x239   :  { %v10782_v16 = vor.u32 %v12402_v61, %v10781_v52  ;;  %v10637_v7 = vld [vmem:[%s18861_s2 + $0x16a8] sm:$0xf]  ;;  %v12394_v43 = vld [vmem:[%s18861_s2 + $0x1794] sm:$0xf0] }
 0x23a   :  { %v10765_v9 = vld [vmem:[%s18861_s2 + $0x17a8] sm:$0xf]  ;;  %v12282_v61 = vld [vmem:[%s18861_s2 + $0x1414] sm:$0xf0] }
 0x23b   :  { %5739 = vmatpush.bf16.msrb.mxu0 %v10062_v0  ;;  %5752 = vmatpush.bf16.msrb.mxu1 %v10190_v3  ;;  %v12290_v0 = vld [vmem:[%s18861_s2 + $0x1454] sm:$0xf0]  ;;  %v5509_v3 = vadd.f32 %v5508_v56, %v919_v54  ;;  %v10445_v34 = vld [vmem:[%s18861_s2 + $0x1528] sm:$0xf] }
 0x23c   :  { %5761 = vmatpush.bf16.msrb.mxu2 %v10382_v53  ;;  %5774 = vmatpush.bf16.msrb.mxu3 %v10510_v8  ;;  %v5521_v53 = vpop.f32.mrf.mxu3  ;;  %v12366_v8 = vld [vmem:[%s18861_s2 + $0x16b4] sm:$0xf0]  ;;  %v10334_v29 = vor.u32 %v12290_v0, %v10333_v6  ;;  %v10621_v60 = vld [vmem:[%s18861_s2 + $0x1688] sm:$0xf] }
 0x23d   :  { %v5522_v2 = vadd.f32 %v5521_v53, %v5509_v3  ;;  %v10638_v20 = vor.u32 %v12366_v8, %v10637_v7  ;;  %v10301_v54 = vld [vmem:[%s18861_s2 + $0x1408] sm:$0xf]  ;;  %v12314_v56 = vld [vmem:[%s18861_s2 + $0x1514] sm:$0xf0]  ;;  %v11668_v8 = vld [vmem:[%s18861_s2 + $0xec] sm:$0xf] }
 0x23e   :  { %v10605_v6 = vld [vmem:[%s18861_s2 + $0x1668] sm:$0xf]  ;;  %v12358_v0 = vld [vmem:[%s18861_s2 + $0x1674] sm:$0xf0]  ;;  %v10302_v7 = vor.u32 %v12282_v61, %v10301_v54 }
 0x23f   :  { %5740 = vmatpush.bf16.msrb.mxu0 %v10046_v23  ;;  %5753 = vmatpush.bf16.msrb.mxu1 %v10174_v15  ;;  %v10317_v23 = vld [vmem:[%s18861_s2 + $0x1428] sm:$0xf]  ;;  %v10766_v15 = vor.u32 %v12398_v12, %v10765_v9  ;;  %v5534_v63 = vpop.f32.mrf.mxu0  ;;  %v5547_v48 = vpop.f32.mrf.mxu1  ;;  %v12390_v53 = vld [vmem:[%s18861_s2 + $0x1774] sm:$0xf0]  ;;  %v7855_v9 = vld [vmem:[%s18861_s2 + $0xf8] sm:$0xf0] }
 0x240   :  { %5762 = vmatpush.bf16.msrb.mxu2 %v10366_v21  ;;  %5775 = vmatpush.bf16.msrb.mxu3 %v10494_v39  ;;  %v12318_v21 = vld [vmem:[%s18861_s2 + $0x1534] sm:$0xf0]  ;;  %v10318_v47 = vor.u32 %v12286_v25, %v10317_v23  ;;  %v5510_v50 = vpop.f32.mrf.mxu2  ;;  %v10733_v1 = vld [vmem:[%s18861_s2 + $0x1768] sm:$0xf] }
 0x241   :  { %v12362_v39 = vld [vmem:[%s18861_s2 + $0x1694] sm:$0xf0]  ;;  %v10446_v51 = vor.u32 %v12318_v21, %v10445_v34  ;;  %v10717_v25 = vld [vmem:[%s18861_s2 + $0x1748] sm:$0xf]  ;;  %v7858_v34 = vor.u32 %v11668_v8, %v7855_v9 }
 0x242   :  { %5741 = vmatmul.bf16.vlgmr.msrb.gmra.mxu0 %v13817_v40  ;;  %5754 = vmatmul.bf16.vlgmr.msrb.gmra.mxu1 %v13827_v45  ;;  %v10622_v52 = vor.u32 %v12362_v39, %v10621_v60  ;;  %v12422_v4 = vld [vmem:[%s18861_s2 + $0x1874] sm:$0xf0]  ;;  %v10845_v21 = vld [vmem:[%s18861_s2 + $0x1848] sm:$0xf] }
 0x243   :  { %5785 = vmatpush.bf16.msra.mxu0 %v10670_v62  ;;  %5798 = vmatpush.bf16.msra.mxu1 %v10798_v31  ;;  %v10749_v62 = vld [vmem:[%s18861_s2 + $0x1788] sm:$0xf]  ;;  %v5535_v31 = vadd.f32 %v5534_v63, %v5522_v2  ;;  %v10606_v2 = vor.u32 %v12358_v0, %v10605_v6  ;;  %v12354_v23 = vld [vmem:[%s18861_s2 + $0x1654] sm:$0xf0] }
 0x244   :  { %5763 = vmatpush.bf16.msrb.mxu2 %v10350_v55  ;;  %5776 = vmatpush.bf16.msrb.mxu3 %v10478_v57  ;;  %v10429_v55 = vld [vmem:[%s18861_s2 + $0x1508] sm:$0xf]  ;;  %v5523_v57 = vpop.f32.mrf.mxu3  ;;  %v12418_v60 = vld [vmem:[%s18861_s2 + $0x1854] sm:$0xf0] }
 0x245   :  { %v16398_v3 = vadd.f32 %v5547_v48, %v5535_v31  ;;  %v10430_v12 = vor.u32 %v12314_v56, %v10429_v55  ;;  %v10846_v31 = vor.u32 %v12418_v60, %v10845_v21  ;;  %v10573_v48 = vld [vmem:[%s18861_s2 + $0x1628] sm:$0xf]  ;;  %v12350_v50 = vld [vmem:[%s18861_s2 + $0x1634] sm:$0xf0]  ;;  %v11660_v57 = vld [vmem:[%s18861_s2 + $0xac] sm:$0xf] }
 0x246   :  { %v12382_v61 = vld [vmem:[%s18861_s2 + $0x1734] sm:$0xf0]  ;;  %v10829_v55 = vld [vmem:[%s18861_s2 + $0x1828] sm:$0xf]  ;;  %v10574_v6 = vor.u32 %v12350_v50, %v10573_v48  ;;  %v8239_v21 = vld [vmem:[%s18861_s2 + $0x3f8] sm:$0xf0] }
 0x247   :  { %5786 = vmatpush.bf16.msra.mxu0 %v10654_v58  ;;  %5799 = vmatpush.bf16.msra.mxu1 %v10782_v16  ;;  %v10750_v58 = vor.u32 %v12394_v43, %v10749_v62  ;;  %v10861_v16 = vld [vmem:[%s18861_s2 + $0x1868] sm:$0xf]  ;;  %v5536_v39 = vpop.f32.mrf.mxu0  ;;  %v11664_v62 = vld [vmem:[%s18861_s2 + $0xcc] sm:$0xf]  ;;  %v7839_v43 = vld [vmem:[%s18861_s2 + $0xd8] sm:$0xf0]  ;;  %v5549_v63 = vpop.f32.mrf.mxu1 }
 0x248   :  { %5764 = vmatpush.bf16.msrb.mxu2 %v10334_v29  ;;  %5777 = vmatpush.bf16.msrb.mxu3 %v10462_v17  ;;  %v10734_v29 = vor.u32 %v12390_v53, %v10733_v1  ;;  %v10862_v17 = vor.u32 %v12422_v4, %v10861_v16  ;;  %v12414_v56 = vld [vmem:[%s18861_s2 + $0x1834] sm:$0xf0]  ;;  %v10557_v0 = vld [vmem:[%s18861_s2 + $0x1608] sm:$0xf]  ;;  %v11652_v63 = vld [vmem:[%s18861_s2 + $0x6c] sm:$0xf] }
 0x249   :  { %v12346_v1 = vld [vmem:[%s18861_s2 + $0x1614] sm:$0xf0]  ;;  %v10830_v16 = vor.u32 %v12414_v56, %v10829_v55  ;;  %v10685_v4 = vld [vmem:[%s18861_s2 + $0x1708] sm:$0xf]  ;;  %v11696_v48 = vld [vmem:[%s18861_s2 + $0x1cc] sm:$0xf] }
 0x24a   :  { %v10813_v8 = vld [vmem:[%s18861_s2 + $0x1808] sm:$0xf]  ;;  %v7967_v50 = vld [vmem:[%s18861_s2 + $0x1d8] sm:$0xf0] }
 0x24b   :  { %5787 = vmatpush.bf16.msra.mxu0 %v10638_v20  ;;  %5800 = vmatpush.bf16.msra.mxu1 %v10766_v15  ;;  %v10589_v20 = vld [vmem:[%s18861_s2 + $0x1648] sm:$0xf]  ;;  %v12386_v15 = vld [vmem:[%s18861_s2 + $0x1754] sm:$0xf0]  ;;  %v8223_v55 = vld [vmem:[%s18861_s2 + $0x3d8] sm:$0xf0] }
 0x24c   :  { %5765 = vmatpush.bf16.msrb.mxu2 %v10318_v47  ;;  %5778 = vmatpush.bf16.msrb.mxu3 %v10446_v51  ;;  %v10590_v47 = vor.u32 %v12354_v23, %v10589_v20  ;;  %v10718_v54 = vor.u32 %v12386_v15, %v10717_v25  ;;  %v10701_v51 = vld [vmem:[%s18861_s2 + $0x1728] sm:$0xf]  ;;  %v7983_v20 = vld [vmem:[%s18861_s2 + $0x1f8] sm:$0xf0]  ;;  %v11732_v23 = vld [vmem:[%s18861_s2 + $0x2ec] sm:$0xf]  ;;  %v10558_v25 = vor.u32 %v12346_v1, %v10557_v0 }
 0x24d   :  { %v10702_v53 = vor.u32 %v12382_v61, %v10701_v51  ;;  %v11764_v15 = vld [vmem:[%s18861_s2 + $0x3ec] sm:$0xf]  ;;  %v7775_v0 = vld [vmem:[%s18861_s2 + $0x58] sm:$0xf0] }
 0x24e   :  { %v11728_v51 = vld [vmem:[%s18861_s2 + $0x2cc] sm:$0xf] }
 0x24f   :  { %5788 = vmatpush.bf16.msra.mxu0 %v10622_v52  ;;  %5801 = vmatpush.bf16.msra.mxu1 %v10750_v58  ;;  %v7842_v52 = vor.u32 %v11664_v62, %v7839_v43  ;;  %v7823_v58 = vld [vmem:[%s18861_s2 + $0xb8] sm:$0xf0]  ;;  %v11760_v61 = vld [vmem:[%s18861_s2 + $0x3cc] sm:$0xf] }
 0x250   :  { %5766 = vmatpush.bf16.msrb.mxu2 %v10302_v7  ;;  %5779 = vmatpush.bf16.msrb.mxu3 %v10430_v12  ;;  %v12378_v7 = vld [vmem:[%s18861_s2 + $0x1714] sm:$0xf0]  ;;  %v7826_v9 = vor.u32 %v11660_v57, %v7823_v58  ;;  %v7970_v58 = vor.u32 %v11696_v48, %v7967_v50 }
 0x251   :  { %v12410_v12 = vld [vmem:[%s18861_s2 + $0x1814] sm:$0xf0]  ;;  %v10686_v60 = vor.u32 %v12378_v7, %v10685_v4  ;;  %v8226_v4 = vor.u32 %v11760_v61, %v8223_v55  ;;  %v11692_v7 = vld [vmem:[%s18861_s2 + $0x1ac] sm:$0xf]  ;;  %v7743_v61 = vld [vmem:[%s18861_s2 + $0x18] sm:$0xf0] }
 0x252   :  { %v10814_v39 = vor.u32 %v12410_v12, %v10813_v8  ;;  %v7951_v8 = vld [vmem:[%s18861_s2 + $0x1b8] sm:$0xf0]  ;;  %v11756_v12 = vld [vmem:[%s18861_s2 + $0x3ac] sm:$0xf] }
 0x253   :  { %5789 = vmatpush.bf16.msra.mxu0 %v10606_v2  ;;  %5802 = vmatpush.bf16.msra.mxu1 %v10734_v29  ;;  %v11656_v2 = vld [vmem:[%s18861_s2 + $0x8c] sm:$0xf]  ;;  %v7807_v29 = vld [vmem:[%s18861_s2 + $0x98] sm:$0xf0] }
 0x254   :  { %5815 = vmatpush.bf16.msra.mxu2 %v10862_v17  ;;  %5824 = vmatpush.bf16.msra.mxu3 %v7858_v34  ;;  %v11700_v17 = vld [vmem:[%s18861_s2 + $0x1ec] sm:$0xf]  ;;  %v8111_v34 = vld [vmem:[%s18861_s2 + $0x2f8] sm:$0xf0]  ;;  %v7810_v62 = vor.u32 %v11656_v2, %v7807_v29 }
 0x255   :  { %5767 = vmatmul.bf16.vlgmr.msrb.gmra.mxu2 %v14018_v5  ;;  %5780 = vmatmul.bf16.vlgmr.msrb.gmra.mxu3 %v14031_v11  ;;  %v7986_v43 = vor.u32 %v11700_v17, %v7983_v20  ;;  %v8207_v2 = vld [vmem:[%s18861_s2 + $0x3b8] sm:$0xf0]  ;;  %v7954_v20 = vor.u32 %v11692_v7, %v7951_v8  ;;  %v11796_v7 = vld [vmem:[%s18861_s2 + $0x4ec] sm:$0xf] }
 0x256   :  { %v8367_v8 = vld [vmem:[%s18861_s2 + $0x4f8] sm:$0xf0] }
 0x257   :  { %5790 = vmatpush.bf16.msra.mxu0 %v10590_v47  ;;  %5803 = vmatpush.bf16.msra.mxu1 %v10718_v54  ;;  %v7791_v47 = vld [vmem:[%s18861_s2 + $0x78] sm:$0xf0]  ;;  %v8114_v54 = vor.u32 %v11732_v23, %v8111_v34  ;;  %v11644_v23 = vld [vmem:[%s18861_s2 + $0x2c] sm:$0xf] }
 0x258   :  { %5816 = vmatpush.bf16.msra.mxu2 %v10846_v31  ;;  %5825 = vmatpush.bf16.msra.mxu3 %v7842_v52  ;;  %v8242_v31 = vor.u32 %v11764_v15, %v8239_v21  ;;  %v8095_v52 = vld [vmem:[%s18861_s2 + $0x2d8] sm:$0xf0]  ;;  %v5560_v56 = vpop.f32.mrf.mxu2  ;;  %v7794_v57 = vor.u32 %v11652_v63, %v7791_v47  ;;  %v8210_v15 = vor.u32 %v11756_v12, %v8207_v2  ;;  %v11688_v21 = vld [vmem:[%s18861_s2 + $0x18c] sm:$0xf] }
 0x259   :  { %v5561_v1 = vadd.f32 %v5560_v56, %v16398_v3  ;;  %v8079_v3 = vld [vmem:[%s18861_s2 + $0x2b8] sm:$0xf0]  ;;  %v11752_v63 = vld [vmem:[%s18861_s2 + $0x38c] sm:$0xf] }
 0x25a   :  { %v8191_v47 = vld [vmem:[%s18861_s2 + $0x398] sm:$0xf0] }
 0x25b   :  { %5791 = vmatpush.bf16.msra.mxu0 %v10574_v6  ;;  %5804 = vmatpush.bf16.msra.mxu1 %v10702_v53  ;;  %v11648_v6 = vld [vmem:[%s18861_s2 + $0x4c] sm:$0xf]  ;;  %v5573_v53 = vpop.f32.mrf.mxu3 }
 0x25c   :  { %5817 = vmatpush.bf16.msra.mxu2 %v10830_v16  ;;  %5826 = vmatpush.bf16.msra.mxu3 %v7826_v9  ;;  %v8098_v16 = vor.u32 %v11728_v51, %v8095_v52  ;;  %v11724_v9 = vld [vmem:[%s18861_s2 + $0x2ac] sm:$0xf]  ;;  %v5574_v29 = vadd.f32 %v5573_v53, %v5561_v1  ;;  %v7778_v17 = vor.u32 %v11648_v6, %v7775_v0  ;;  %v7919_v0 = vld [vmem:[%s18861_s2 + $0x178] sm:$0xf0] }
 0x25d   :  { %v8082_v34 = vor.u32 %v11724_v9, %v8079_v3  ;;  %v11640_v52 = vld [vmem:[%s18861_s2 + $0xc] sm:$0xf]  ;;  %v8047_v53 = vld [vmem:[%s18861_s2 + $0x278] sm:$0xf0] }
 0x25e   :  { %v11684_v6 = vld [vmem:[%s18861_s2 + $0x16c] sm:$0xf]  ;;  %v7746_v9 = vor.u32 %v11640_v52, %v7743_v61  ;;  %v8143_v61 = vld [vmem:[%s18861_s2 + $0x338] sm:$0xf0] }
 0x25f   :  { %5792 = vmatpush.bf16.msra.mxu0 %v10558_v25  ;;  %5805 = vmatpush.bf16.msra.mxu1 %v10686_v60  ;;  %v7759_v25 = vld [vmem:[%s18861_s2 + $0x38] sm:$0xf0]  ;;  %v11716_v1 = vld [vmem:[%s18861_s2 + $0x26c] sm:$0xf]  ;;  %v7922_v3 = vor.u32 %v11684_v6, %v7919_v0 }
 0x260   :  { %5818 = vmatpush.bf16.msra.mxu2 %v10814_v39  ;;  %5827 = vmatpush.bf16.msra.mxu3 %v7810_v62  ;;  %v7935_v60 = vld [vmem:[%s18861_s2 + $0x198] sm:$0xf0]  ;;  %v11720_v39 = vld [vmem:[%s18861_s2 + $0x28c] sm:$0xf]  ;;  %v5586_v62 = vpop.f32.mrf.mxu0  ;;  %v5562_v48 = vpop.f32.mrf.mxu2  ;;  %v7762_v50 = vor.u32 %v11644_v23, %v7759_v25  ;;  %v8050_v12 = vor.u32 %v11716_v1, %v8047_v53  ;;  %v8370_v23 = vor.u32 %v11796_v7, %v8367_v8 }
 0x261   :  { %v7938_v51 = vor.u32 %v11688_v21, %v7935_v60  ;;  %v8031_v25 = vld [vmem:[%s18861_s2 + $0x258] sm:$0xf0]  ;;  %v11792_v60 = vld [vmem:[%s18861_s2 + $0x4cc] sm:$0xf] }
 0x262   :  { %5793 = vmatmul.bf16.vlgmr.msra.gmra.mxu0 %v14029_v10  ;;  %5806 = vmatmul.bf16.vlgmr.msra.gmra.mxu1 %v14039_v14  ;;  %v11708_v48 = vld [vmem:[%s18861_s2 + $0x22c] sm:$0xf]  ;;  %v7871_v0 = vld [vmem:[%s18861_s2 + $0x118] sm:$0xf0] }
 0x263   :  { %5837 = vmatpush.bf16.msrb.mxu0 %v7986_v43  ;;  %5850 = vmatpush.bf16.msrb.mxu1 %v8114_v54  ;;  %v8063_v43 = vld [vmem:[%s18861_s2 + $0x298] sm:$0xf0]  ;;  %v5587_v54 = vadd.f32 %v5586_v62, %v5574_v29  ;;  %v5575_v55 = vpop.f32.mrf.mxu3  ;;  %v11680_v29 = vld [vmem:[%s18861_s2 + $0x14c] sm:$0xf] }
 0x264   :  { %5863 = vmatpush.bf16.msrb.mxu2 %v8242_v31  ;;  %5828 = vmatpush.bf16.msra.mxu3 %v7794_v57  ;;  %v5599_v31 = vpop.f32.mrf.mxu1  ;;  %v8066_v56 = vor.u32 %v11720_v39, %v8063_v43  ;;  %v8194_v57 = vor.u32 %v11752_v63, %v8191_v47  ;;  %v8351_v39 = vld [vmem:[%s18861_s2 + $0x4d8] sm:$0xf0]  ;;  %v11740_v52 = vld [vmem:[%s18861_s2 + $0x32c] sm:$0xf] }
 0x265   :  { %10869 = vmatmul.msk.bf16.vlgmr.msra.gmra.mxu2 %vm4845_vm0, %v14139_v49  ;;  %v11788_v55 = vld [vmem:[%s18861_s2 + $0x4ac] sm:$0xf]  ;;  %v8146_v53 = vor.u32 %v11740_v52, %v8143_v61  ;;  %v8127_v8 = vld [vmem:[%s18861_s2 + $0x318] sm:$0xf0] }
 0x266   :  { %v11672_v6 = vld [vmem:[%s18861_s2 + $0x10c] sm:$0xf] }
 0x267   :  { %5838 = vmatpush.bf16.msrb.mxu0 %v7970_v58  ;;  %5851 = vmatpush.bf16.msrb.mxu1 %v8098_v16  ;;  %v16590_v58 = vadd.f32 %v5599_v31, %v5587_v54  ;;  %v11748_v16 = vld [vmem:[%s18861_s2 + $0x36c] sm:$0xf]  ;;  %v7887_v31 = vld [vmem:[%s18861_s2 + $0x138] sm:$0xf0] }
 0x268   :  { %5864 = vmatpush.bf16.msrb.mxu2 %v8226_v4  ;;  %5829 = vmatpush.bf16.msra.mxu3 %v7778_v17  ;;  %v8175_v4 = vld [vmem:[%s18861_s2 + $0x378] sm:$0xf0]  ;;  %v5588_v21 = vpop.f32.mrf.mxu0  ;;  %v11676_v54 = vld [vmem:[%s18861_s2 + $0x12c] sm:$0xf] }
 0x269   :  { %v8178_v2 = vor.u32 %v11748_v16, %v8175_v4  ;;  %v7903_v17 = vld [vmem:[%s18861_s2 + $0x158] sm:$0xf0]  ;;  %v11704_v16 = vld [vmem:[%s18861_s2 + $0x20c] sm:$0xf] }
 0x26a   :  { %v7906_v43 = vor.u32 %v11680_v29, %v7903_v17  ;;  %v11736_v4 = vld [vmem:[%s18861_s2 + $0x30c] sm:$0xf]  ;;  %v7874_v17 = vor.u32 %v11672_v6, %v7871_v0  ;;  %v8287_v0 = vld [vmem:[%s18861_s2 + $0x458] sm:$0xf0] }
 0x26b   :  { %5839 = vmatpush.bf16.msrb.mxu0 %v7954_v20  ;;  %5852 = vmatpush.bf16.msrb.mxu1 %v8082_v34  ;;  %v11712_v20 = vld [vmem:[%s18861_s2 + $0x24c] sm:$0xf] }
 0x26c   :  { %5865 = vmatpush.bf16.msrb.mxu2 %v8210_v15  ;;  %5830 = vmatpush.bf16.msra.mxu3 %v7762_v50  ;;  %v11744_v34 = vld [vmem:[%s18861_s2 + $0x34c] sm:$0xf]  ;;  %v8159_v15 = vld [vmem:[%s18861_s2 + $0x358] sm:$0xf0]  ;;  %v5601_v62 = vpop.f32.mrf.mxu1  ;;  %v8034_v63 = vor.u32 %v11712_v20, %v8031_v25  ;;  %v8354_v50 = vor.u32 %v11792_v60, %v8351_v39 }
 0x26d   :  { %v8162_v47 = vor.u32 %v11744_v34, %v8159_v15  ;;  %v11860_v29 = vld [vmem:[%s18861_s2 + $0x6ec] sm:$0xf]  ;;  %v8623_v20 = vld [vmem:[%s18861_s2 + $0x6f8] sm:$0xf0]  ;;  %v8130_v15 = vor.u32 %v11736_v4, %v8127_v8 }
 0x26e   :  { %v8751_v25 = vld [vmem:[%s18861_s2 + $0x7f8] sm:$0xf0]  ;;  %v11780_v39 = vld [vmem:[%s18861_s2 + $0x46c] sm:$0xf] }
 0x26f   :  { %5840 = vmatpush.bf16.msrb.mxu0 %v7938_v51  ;;  %5853 = vmatpush.bf16.msrb.mxu1 %v8066_v56  ;;  %v8015_v51 = vld [vmem:[%s18861_s2 + $0x238] sm:$0xf0]  ;;  %v11776_v6 = vld [vmem:[%s18861_s2 + $0x44c] sm:$0xf] }
 0x270   :  { %5866 = vmatpush.bf16.msrb.mxu2 %v8194_v57  ;;  %5831 = vmatpush.bf16.msra.mxu3 %v7746_v9  ;;  %v8335_v56 = vld [vmem:[%s18861_s2 + $0x4b8] sm:$0xf0]  ;;  %v7890_v57 = vor.u32 %v11676_v54, %v7887_v31  ;;  %v8018_v1 = vor.u32 %v11708_v48, %v8015_v51  ;;  %v11784_v9 = vld [vmem:[%s18861_s2 + $0x48c] sm:$0xf] }
 0x271   :  { %v8338_v7 = vor.u32 %v11788_v55, %v8335_v56  ;;  %v8303_v62 = vld [vmem:[%s18861_s2 + $0x478] sm:$0xf0]  ;;  %v11856_v31 = vld [vmem:[%s18861_s2 + $0x6cc] sm:$0xf] }
 0x272   :  { %v8479_v54 = vld [vmem:[%s18861_s2 + $0x5d8] sm:$0xf0]  ;;  %v8306_v61 = vor.u32 %v11780_v39, %v8303_v62  ;;  %v11884_v8 = vld [vmem:[%s18861_s2 + $0x7ac] sm:$0xf] }
 0x273   :  { %5841 = vmatpush.bf16.msrb.mxu0 %v7922_v3  ;;  %5854 = vmatpush.bf16.msrb.mxu1 %v8050_v12  ;;  %v8319_v3 = vld [vmem:[%s18861_s2 + $0x498] sm:$0xf0]  ;;  %v11828_v12 = vld [vmem:[%s18861_s2 + $0x5ec] sm:$0xf] }
 0x274   :  { %5867 = vmatpush.bf16.msrb.mxu2 %v8178_v2  ;;  %5876 = vmatpush.bf16.msrb.mxu3 %v8370_v23  ;;  %v8495_v2 = vld [vmem:[%s18861_s2 + $0x5f8] sm:$0xf0]  ;;  %v11892_v23 = vld [vmem:[%s18861_s2 + $0x7ec] sm:$0xf]  ;;  %v8322_v21 = vor.u32 %v11784_v9, %v8319_v3  ;;  %v8290_v3 = vor.u32 %v11776_v6, %v8287_v0 }
 0x275   :  { %5832 = vmatmul.bf16.vlgmr.msra.gmra.mxu3 %v13029_v27  ;;  %v7999_v27 = vld [vmem:[%s18861_s2 + $0x218] sm:$0xf0]  ;;  %v8498_v60 = vor.u32 %v11828_v12, %v8495_v2  ;;  %v11772_v2 = vld [vmem:[%s18861_s2 + $0x42c] sm:$0xf] }
 0x276   :  { %v8002_v34 = vor.u32 %v11704_v16, %v7999_v27  ;;  %v8607_v48 = vld [vmem:[%s18861_s2 + $0x6d8] sm:$0xf0]  ;;  %v11820_v16 = vld [vmem:[%s18861_s2 + $0x5ac] sm:$0xf] }
 0x277   :  { %5842 = vmatpush.bf16.msrb.mxu0 %v7906_v43  ;;  %5855 = vmatpush.bf16.msrb.mxu1 %v8034_v63  ;;  %v8626_v43 = vor.u32 %v11860_v29, %v8623_v20  ;;  %v8754_v63 = vor.u32 %v11892_v23, %v8751_v25  ;;  %v8735_v51 = vld [vmem:[%s18861_s2 + $0x7d8] sm:$0xf0]  ;;  %v11852_v27 = vld [vmem:[%s18861_s2 + $0x6ac] sm:$0xf] }
 0x278   :  { %5868 = vmatpush.bf16.msrb.mxu2 %v8162_v47  ;;  %5877 = vmatpush.bf16.msrb.mxu3 %v8354_v50  ;;  %v11824_v47 = vld [vmem:[%s18861_s2 + $0x5cc] sm:$0xf]  ;;  %v5612_v52 = vpop.f32.mrf.mxu2  ;;  %v8719_v9 = vld [vmem:[%s18861_s2 + $0x7b8] sm:$0xf0] }
 0x279   :  { %v11888_v50 = vld [vmem:[%s18861_s2 + $0x7cc] sm:$0xf]  ;;  %v5613_v55 = vadd.f32 %v5612_v52, %v16590_v58  ;;  %v8482_v56 = vor.u32 %v11824_v47, %v8479_v54  ;;  %v8463_v58 = vld [vmem:[%s18861_s2 + $0x5b8] sm:$0xf0] }
 0x27a   :  { %v8466_v12 = vor.u32 %v11820_v16, %v8463_v58  ;;  %v8271_v29 = vld [vmem:[%s18861_s2 + $0x438] sm:$0xf0]  ;;  %v11848_v20 = vld [vmem:[%s18861_s2 + $0x68c] sm:$0xf] }
 0x27b   :  { %5843 = vmatpush.bf16.msrb.mxu0 %v7890_v57  ;;  %5856 = vmatpush.bf16.msrb.mxu1 %v8018_v1  ;;  %v5625_v57 = vpop.f32.mrf.mxu3  ;;  %v8610_v1 = vor.u32 %v11856_v31, %v8607_v48  ;;  %v8575_v25 = vld [vmem:[%s18861_s2 + $0x698] sm:$0xf0]  ;;  %v8274_v62 = vor.u32 %v11772_v2, %v8271_v29  ;;  %v11924_v6 = vld [vmem:[%s18861_s2 + $0x8ec] sm:$0xf] }
 0x27c   :  { %5869 = vmatpush.bf16.msrb.mxu2 %v8146_v53  ;;  %5878 = vmatpush.bf16.msrb.mxu3 %v8338_v7  ;;  %v8738_v53 = vor.u32 %v11888_v50, %v8735_v51  ;;  %v5626_v4 = vadd.f32 %v5625_v57, %v5613_v55  ;;  %v8591_v7 = vld [vmem:[%s18861_s2 + $0x6b8] sm:$0xf0]  ;;  %v8578_v31 = vor.u32 %v11848_v20, %v8575_v25  ;;  %v11812_v51 = vld [vmem:[%s18861_s2 + $0x56c] sm:$0xf] }
 0x27d   :  { %v8255_v47 = vld [vmem:[%s18861_s2 + $0x418] sm:$0xf0]  ;;  %v11920_v29 = vld [vmem:[%s18861_s2 + $0x8cc] sm:$0xf] }
 0x27e   :  { %v8431_v52 = vld [vmem:[%s18861_s2 + $0x578] sm:$0xf0] }
 0x27f   :  { %5844 = vmatpush.bf16.msrb.mxu0 %v7874_v17  ;;  %5857 = vmatpush.bf16.msrb.mxu1 %v8002_v34  ;;  %v8594_v17 = vor.u32 %v11852_v27, %v8591_v7  ;;  %v5638_v23 = vpop.f32.mrf.mxu0  ;;  %v11880_v34 = vld [vmem:[%s18861_s2 + $0x78c] sm:$0xf]  ;;  %v8559_v55 = vld [vmem:[%s18861_s2 + $0x678] sm:$0xf0] }
 0x280   :  { %5870 = vmatpush.bf16.msrb.mxu2 %v8130_v15  ;;  %5879 = vmatpush.bf16.msrb.mxu3 %v8322_v21  ;;  %v8703_v15 = vld [vmem:[%s18861_s2 + $0x798] sm:$0xf0]  ;;  %v5639_v21 = vadd.f32 %v5638_v23, %v5626_v4  ;;  %v5614_v39 = vpop.f32.mrf.mxu2  ;;  %v11808_v27 = vld [vmem:[%s18861_s2 + $0x54c] sm:$0xf] }
 0x281   :  { %v8706_v48 = vor.u32 %v11880_v34, %v8703_v15  ;;  %v8687_v57 = vld [vmem:[%s18861_s2 + $0x778] sm:$0xf0]  ;;  %v11840_v7 = vld [vmem:[%s18861_s2 + $0x64c] sm:$0xf] }
 0x282   :  { %5845 = vmatmul.bf16.vlgmr.msrb.gmra.mxu0 %v13039_v33  ;;  %5858 = vmatmul.bf16.vlgmr.msrb.gmra.mxu1 %v13027_v26  ;;  %v11816_v26 = vld [vmem:[%s18861_s2 + $0x58c] sm:$0xf]  ;;  %v8447_v33 = vld [vmem:[%s18861_s2 + $0x598] sm:$0xf0] }
 0x283   :  { %5889 = vmatpush.bf16.msra.mxu0 %v8498_v60  ;;  %5902 = vmatpush.bf16.msra.mxu1 %v8626_v43  ;;  %v5651_v60 = vpop.f32.mrf.mxu1  ;;  %v8450_v43 = vor.u32 %v11816_v26, %v8447_v33  ;;  %v5627_v54 = vpop.f32.mrf.mxu3  ;;  %v8879_v0 = vld [vmem:[%s18861_s2 + $0x8f8] sm:$0xf0]  ;;  %v11804_v23 = vld [vmem:[%s18861_s2 + $0x52c] sm:$0xf] }
 0x284   :  { %5915 = vmatpush.bf16.msra.mxu2 %v8754_v63  ;;  %5880 = vmatpush.bf16.msrb.mxu3 %v8306_v61  ;;  %v11768_v63 = vld [vmem:[%s18861_s2 + $0x40c] sm:$0xf]  ;;  %v16789_v50 = vadd.f32 %v5651_v60, %v5639_v21  ;;  %v8415_v4 = vld [vmem:[%s18861_s2 + $0x558] sm:$0xf0] }
 0x285   :  { %5871 = vmatmul.bf16.vlgmr.msrb.gmra.mxu2 %v13037_v32  ;;  %v8722_v32 = vor.u32 %v11884_v8, %v8719_v9  ;;  %v11844_v61 = vld [vmem:[%s18861_s2 + $0x66c] sm:$0xf]  ;;  %v8882_v8 = vor.u32 %v11924_v6, %v8879_v0  ;;  %v8543_v9 = vld [vmem:[%s18861_s2 + $0x658] sm:$0xf0]  ;;  %v8418_v26 = vor.u32 %v11808_v27, %v8415_v4 }
 0x286   :  { %v8562_v16 = vor.u32 %v11844_v61, %v8559_v55  ;;  %v8546_v33 = vor.u32 %v11840_v7, %v8543_v9  ;;  %v8399_v25 = vld [vmem:[%s18861_s2 + $0x538] sm:$0xf0]  ;;  %v11836_v34 = vld [vmem:[%s18861_s2 + $0x62c] sm:$0xf] }
 0x287   :  { %5890 = vmatpush.bf16.msra.mxu0 %v8482_v56  ;;  %5903 = vmatpush.bf16.msra.mxu1 %v8610_v1  ;;  %v11876_v56 = vld [vmem:[%s18861_s2 + $0x76c] sm:$0xf]  ;;  %v8258_v1 = vor.u32 %v11768_v63, %v8255_v47  ;;  %v5640_v2 = vpop.f32.mrf.mxu0  ;;  %v8527_v21 = vld [vmem:[%s18861_s2 + $0x638] sm:$0xf0]  ;;  %v8402_v63 = vor.u32 %v11804_v23, %v8399_v25 }
 0x288   :  { %5916 = vmatpush.bf16.msra.mxu2 %v8738_v53  ;;  %5881 = vmatpush.bf16.msrb.mxu3 %v8290_v3  ;;  %v8434_v53 = vor.u32 %v11812_v51, %v8431_v52  ;;  %v8690_v58 = vor.u32 %v11876_v56, %v8687_v57  ;;  %v11872_v3 = vld [vmem:[%s18861_s2 + $0x74c] sm:$0xf]  ;;  %v8655_v39 = vld [vmem:[%s18861_s2 + $0x738] sm:$0xf0] }
 0x289   :  { %v11868_v60 = vld [vmem:[%s18861_s2 + $0x72c] sm:$0xf]  ;;  %v8383_v54 = vld [vmem:[%s18861_s2 + $0x518] sm:$0xf0] }
 0x28a   :  { %v11800_v47 = vld [vmem:[%s18861_s2 + $0x50c] sm:$0xf]  ;;  %v8511_v51 = vld [vmem:[%s18861_s2 + $0x618] sm:$0xf0] }
 0x28b   :  { %5891 = vmatpush.bf16.msra.mxu0 %v8466_v12  ;;  %5904 = vmatpush.bf16.msra.mxu1 %v8594_v17  ;;  %v8671_v12 = vld [vmem:[%s18861_s2 + $0x758] sm:$0xf0]  ;;  %v11864_v52 = vld [vmem:[%s18861_s2 + $0x70c] sm:$0xf] }
 0x28c   :  { %5917 = vmatpush.bf16.msra.mxu2 %v8722_v32  ;;  %5882 = vmatpush.bf16.msrb.mxu3 %v8274_v62  ;;  %v8863_v17 = vld [vmem:[%s18861_s2 + $0x8d8] sm:$0xf0]  ;;  %v5653_v32 = vpop.f32.mrf.mxu1  ;;  %v8674_v20 = vor.u32 %v11872_v3, %v8671_v12  ;;  %v11916_v62 = vld [vmem:[%s18861_s2 + $0x8ac] sm:$0xf] }
 0x28d   :  { %v8866_v15 = vor.u32 %v11920_v29, %v8863_v17  ;;  %v8639_v55 = vld [vmem:[%s18861_s2 + $0x718] sm:$0xf0]  ;;  %v11912_v56 = vld [vmem:[%s18861_s2 + $0x88c] sm:$0xf] }
 0x28e   :  { %v8831_v57 = vld [vmem:[%s18861_s2 + $0x898] sm:$0xf0]  ;;  %v11956_v6 = vld [vmem:[%s18861_s2 + $0x9ec] sm:$0xf]  ;;  %v8642_v7 = vor.u32 %v11864_v52, %v8639_v55 }
 0x28f   :  { %5892 = vmatpush.bf16.msra.mxu0 %v8450_v43  ;;  %5905 = vmatpush.bf16.msra.mxu1 %v8578_v31  ;;  %v8847_v43 = vld [vmem:[%s18861_s2 + $0x8b8] sm:$0xf0]  ;;  %v8658_v31 = vor.u32 %v11868_v60, %v8655_v39  ;;  %v11908_v3 = vld [vmem:[%s18861_s2 + $0x86c] sm:$0xf] }
 0x290   :  { %5918 = vmatpush.bf16.msra.mxu2 %v8706_v48  ;;  %5883 = vmatpush.bf16.msrb.mxu3 %v8258_v1  ;;  %v11832_v48 = vld [vmem:[%s18861_s2 + $0x60c] sm:$0xf]  ;;  %v8850_v61 = vor.u32 %v11916_v62, %v8847_v43  ;;  %v9007_v0 = vld [vmem:[%s18861_s2 + $0x9f8] sm:$0xf0] }
 0x291   :  { %v11988_v1 = vld [vmem:[%s18861_s2 + $0xaec] sm:$0xf]  ;;  %v9263_v27 = vld [vmem:[%s18861_s2 + $0xbf8] sm:$0xf0]  ;;  %v8514_v4 = vor.u32 %v11832_v48, %v8511_v51  ;;  %v9010_v9 = vor.u32 %v11956_v6, %v9007_v0 }
 0x292   :  { %v8815_v12 = vld [vmem:[%s18861_s2 + $0x878] sm:$0xf0]  ;;  %v11952_v17 = vld [vmem:[%s18861_s2 + $0x9cc] sm:$0xf] }
 0x293   :  { %5893 = vmatpush.bf16.msra.mxu0 %v8434_v53  ;;  %5906 = vmatpush.bf16.msra.mxu1 %v8562_v16  ;;  %v8386_v53 = vor.u32 %v11800_v47, %v8383_v54  ;;  %v9135_v16 = vld [vmem:[%s18861_s2 + $0xaf8] sm:$0xf0]  ;;  %v11904_v39 = vld [vmem:[%s18861_s2 + $0x84c] sm:$0xf] }
 0x294   :  { %5919 = vmatpush.bf16.msra.mxu2 %v8690_v58  ;;  %5928 = vmatpush.bf16.msra.mxu3 %v8882_v8  ;;  %v12020_v58 = vld [vmem:[%s18861_s2 + $0xbec] sm:$0xf]  ;;  %v8834_v8 = vor.u32 %v11912_v56, %v8831_v57  ;;  %v9138_v2 = vor.u32 %v11988_v1, %v9135_v16  ;;  %v8991_v32 = vld [vmem:[%s18861_s2 + $0x9d8] sm:$0xf0] }
 0x295   :  { %5884 = vmatmul.bf16.vlgmr.msrb.gmra.mxu3 %v13173_v41  ;;  %v8530_v41 = vor.u32 %v11836_v34, %v8527_v21  ;;  %v9266_v29 = vor.u32 %v12020_v58, %v9263_v27  ;;  %v9247_v23 = vld [vmem:[%s18861_s2 + $0xbd8] sm:$0xf0]  ;;  %v8818_v34 = vor.u32 %v11908_v3, %v8815_v12  ;;  %v8994_v21 = vor.u32 %v11952_v17, %v8991_v32  ;;  %v11948_v47 = vld [vmem:[%s18861_s2 + $0x9ac] sm:$0xf] }
 0x296   :  { %v8799_v62 = vld [vmem:[%s18861_s2 + $0x858] sm:$0xf0]  ;;  %v11980_v54 = vld [vmem:[%s18861_s2 + $0xaac] sm:$0xf] }
 0x297   :  { %5894 = vmatpush.bf16.msra.mxu0 %v8418_v26  ;;  %5907 = vmatpush.bf16.msra.mxu1 %v8546_v33  ;;  %v11984_v26 = vld [vmem:[%s18861_s2 + $0xacc] sm:$0xf]  ;;  %v9119_v33 = vld [vmem:[%s18861_s2 + $0xad8] sm:$0xf0] }
 0x298   :  { %5920 = vmatpush.bf16.msra.mxu2 %v8674_v20  ;;  %5929 = vmatpush.bf16.msra.mxu3 %v8866_v15  ;;  %v12016_v20 = vld [vmem:[%s18861_s2 + $0xbcc] sm:$0xf]  ;;  %v5664_v25 = vpop.f32.mrf.mxu2  ;;  %v5677_v60 = vpop.f32.mrf.mxu3  ;;  %v9122_v43 = vor.u32 %v11984_v26, %v9119_v33  ;;  %v9231_v51 = vld [vmem:[%s18861_s2 + $0xbb8] sm:$0xf0] }
 0x299   :  { %v5665_v15 = vadd.f32 %v5664_v25, %v16789_v50  ;;  %v8975_v50 = vld [vmem:[%s18861_s2 + $0x9b8] sm:$0xf0]  ;;  %v12012_v48 = vld [vmem:[%s18861_s2 + $0xbac] sm:$0xf] }
 0x29a   :  { %v8978_v52 = vor.u32 %v11948_v47, %v8975_v50  ;;  %v9234_v56 = vor.u32 %v12012_v48, %v9231_v51  ;;  %v8959_v57 = vld [vmem:[%s18861_s2 + $0x998] sm:$0xf0]  ;;  %v11976_v6 = vld [vmem:[%s18861_s2 + $0xa8c] sm:$0xf] }
 0x29b   :  { %5895 = vmatpush.bf16.msra.mxu0 %v8402_v63  ;;  %5908 = vmatpush.bf16.msra.mxu1 %v8530_v41  ;;  %v9250_v63 = vor.u32 %v12016_v20, %v9247_v23  ;;  %v5678_v41 = vadd.f32 %v5677_v60, %v5665_v15  ;;  %v9087_v1 = vld [vmem:[%s18861_s2 + $0xa98] sm:$0xf0]  ;;  %v11940_v32 = vld [vmem:[%s18861_s2 + $0x96c] sm:$0xf] }
 0x29c   :  { %5921 = vmatpush.bf16.msra.mxu2 %v8658_v31  ;;  %5930 = vmatpush.bf16.msra.mxu3 %v8850_v61  ;;  %v9103_v31 = vld [vmem:[%s18861_s2 + $0xab8] sm:$0xf0]  ;;  %v11972_v33 = vld [vmem:[%s18861_s2 + $0xa6c] sm:$0xf] }
 0x29d   :  { %v8783_v61 = vld [vmem:[%s18861_s2 + $0x838] sm:$0xf0]  ;;  %v9106_v55 = vor.u32 %v11980_v54, %v9103_v31  ;;  %v12004_v23 = vld [vmem:[%s18861_s2 + $0xb6c] sm:$0xf] }
 0x29e   :  { %v9215_v16 = vld [vmem:[%s18861_s2 + $0xb98] sm:$0xf0]  ;;  %v11968_v47 = vld [vmem:[%s18861_s2 + $0xa4c] sm:$0xf] }
 0x29f   :  { %5896 = vmatpush.bf16.msra.mxu0 %v8386_v53  ;;  %5909 = vmatpush.bf16.msra.mxu1 %v8514_v4  ;;  %v5690_v0 = vpop.f32.mrf.mxu0  ;;  %v12008_v53 = vld [vmem:[%s18861_s2 + $0xb8c] sm:$0xf]  ;;  %v5703_v27 = vpop.f32.mrf.mxu1  ;;  %v8767_v3 = vld [vmem:[%s18861_s2 + $0x818] sm:$0xf0] }
 0x2a0   :  { %5922 = vmatpush.bf16.msra.mxu2 %v8642_v7  ;;  %5931 = vmatpush.bf16.msra.mxu3 %v8834_v8  ;;  %v5691_v58 = vadd.f32 %v5690_v0, %v5678_v41  ;;  %v5666_v4 = vpop.f32.mrf.mxu2  ;;  %v5679_v12 = vpop.f32.mrf.mxu3  ;;  %v8943_v26 = vld [vmem:[%s18861_s2 + $0x978] sm:$0xf0]  ;;  %v12000_v41 = vld [vmem:[%s18861_s2 + $0xb4c] sm:$0xf] }
 0x2a1   :  { %v9071_v20 = vld [vmem:[%s18861_s2 + $0xa78] sm:$0xf0]  ;;  %v8946_v60 = vor.u32 %v11940_v32, %v8943_v26  ;;  %v12048_v51 = vld [vmem:[%s18861_s2 + $0xccc] sm:$0xf] }
 0x2a2   :  { %5897 = vmatmul.bf16.vlgmr.msra.gmra.mxu0 %v13177_v44  ;;  %5910 = vmatmul.bf16.vlgmr.msra.gmra.mxu1 %v13165_v38  ;;  %v11900_v44 = vld [vmem:[%s18861_s2 + $0x82c] sm:$0xf]  ;;  %v16988_v17 = vadd.f32 %v5703_v27, %v5691_v58  ;;  %v9199_v25 = vld [vmem:[%s18861_s2 + $0xb78] sm:$0xf0] }
 0x2a3   :  { %5941 = vmatpush.bf16.msrb.mxu0 %v9010_v9  ;;  %5954 = vmatpush.bf16.msrb.mxu1 %v9138_v2  ;;  %v11944_v38 = vld [vmem:[%s18861_s2 + $0x98c] sm:$0xf]  ;;  %v8786_v7 = vor.u32 %v11900_v44, %v8783_v61  ;;  %v9090_v2 = vor.u32 %v11976_v6, %v9087_v1  ;;  %v9391_v15 = vld [vmem:[%s18861_s2 + $0xcf8] sm:$0xf0] }
 0x2a4   :  { %5967 = vmatpush.bf16.msrb.mxu2 %v9266_v29  ;;  %5932 = vmatpush.bf16.msra.mxu3 %v8818_v34  ;;  %v8962_v8 = vor.u32 %v11944_v38, %v8959_v57  ;;  %v11896_v9 = vld [vmem:[%s18861_s2 + $0x80c] sm:$0xf]  ;;  %v9218_v29 = vor.u32 %v12008_v53, %v9215_v16  ;;  %v9055_v54 = vld [vmem:[%s18861_s2 + $0xa58] sm:$0xf0] }
 0x2a5   :  { %5923 = vmatmul.bf16.vlgmr.msra.gmra.mxu2 %v13175_v42  ;;  %v8802_v42 = vor.u32 %v11904_v39, %v8799_v62  ;;  %v12052_v34 = vld [vmem:[%s18861_s2 + $0xcec] sm:$0xf]  ;;  %v9074_v39 = vor.u32 %v11972_v33, %v9071_v20  ;;  %v9202_v62 = vor.u32 %v12004_v23, %v9199_v25  ;;  %v9183_v31 = vld [vmem:[%s18861_s2 + $0xb58] sm:$0xf0]  ;;  %v9058_v61 = vor.u32 %v11968_v47, %v9055_v54 }
 0x2a6   :  { %v9394_v50 = vor.u32 %v12052_v34, %v9391_v15  ;;  %v8911_v38 = vld [vmem:[%s18861_s2 + $0x938] sm:$0xf0]  ;;  %v11964_v57 = vld [vmem:[%s18861_s2 + $0xa2c] sm:$0xf] }
 0x2a7   :  { %5942 = vmatpush.bf16.msrb.mxu0 %v8994_v21  ;;  %5955 = vmatpush.bf16.msrb.mxu1 %v9122_v43  ;;  %v8770_v21 = vor.u32 %v11896_v9, %v8767_v3  ;;  %v11936_v43 = vld [vmem:[%s18861_s2 + $0x94c] sm:$0xf]  ;;  %v5692_v48 = vpop.f32.mrf.mxu0  ;;  %v9039_v0 = vld [vmem:[%s18861_s2 + $0xa38] sm:$0xf0] }
 0x2a8   :  { %5968 = vmatpush.bf16.msrb.mxu2 %v9250_v63  ;;  %5933 = vmatpush.bf16.msra.mxu3 %v8802_v42  ;;  %v8927_v63 = vld [vmem:[%s18861_s2 + $0x958] sm:$0xf0]  ;;  %v11996_v1 = vld [vmem:[%s18861_s2 + $0xb2c] sm:$0xf] }
 0x2a9   :  { %v9375_v42 = vld [vmem:[%s18861_s2 + $0xcd8] sm:$0xf0]  ;;  %v8930_v44 = vor.u32 %v11936_v43, %v8927_v63  ;;  %v12044_v16 = vld [vmem:[%s18861_s2 + $0xcac] sm:$0xf] }
 0x2aa   :  { %v9378_v6 = vor.u32 %v12048_v51, %v9375_v42  ;;  %v9167_v53 = vld [vmem:[%s18861_s2 + $0xb38] sm:$0xf0]  ;;  %v11928_v4 = vld [vmem:[%s18861_s2 + $0x90c] sm:$0xf] }
 0x2ab   :  { %5943 = vmatpush.bf16.msrb.mxu0 %v8978_v52  ;;  %5956 = vmatpush.bf16.msrb.mxu1 %v9106_v55  ;;  %v5705_v52 = vpop.f32.mrf.mxu1  ;;  %v9186_v55 = vor.u32 %v12000_v41, %v9183_v31  ;;  %v9359_v58 = vld [vmem:[%s18861_s2 + $0xcb8] sm:$0xf0]  ;;  %v11960_v9 = vld [vmem:[%s18861_s2 + $0xa0c] sm:$0xf] }
 0x2ac   :  { %5969 = vmatpush.bf16.msrb.mxu2 %v9234_v56  ;;  %5934 = vmatpush.bf16.msra.mxu3 %v8786_v7  ;;  %v11932_v56 = vld [vmem:[%s18861_s2 + $0x92c] sm:$0xf]  ;;  %v8895_v7 = vld [vmem:[%s18861_s2 + $0x918] sm:$0xf0] }
 0x2ad   :  { %v8914_v27 = vor.u32 %v11932_v56, %v8911_v38  ;;  %v9023_v3 = vld [vmem:[%s18861_s2 + $0xa18] sm:$0xf0]  ;;  %v11992_v12 = vld [vmem:[%s18861_s2 + $0xb0c] sm:$0xf]  ;;  %v8898_v25 = vor.u32 %v11928_v4, %v8895_v7 }
 0x2ae   :  { %v12040_v32 = vld [vmem:[%s18861_s2 + $0xc8c] sm:$0xf]  ;;  %v9343_v26 = vld [vmem:[%s18861_s2 + $0xc98] sm:$0xf0] }
 0x2af   :  { %5944 = vmatpush.bf16.msrb.mxu0 %v8962_v8  ;;  %5957 = vmatpush.bf16.msrb.mxu1 %v9090_v2  ;;  %v9170_v8 = vor.u32 %v11996_v1, %v9167_v53  ;;  %v9362_v2 = vor.u32 %v12044_v16, %v9359_v58  ;;  %v12084_v33 = vld [vmem:[%s18861_s2 + $0xdec] sm:$0xf]  ;;  %v9519_v20 = vld [vmem:[%s18861_s2 + $0xdf8] sm:$0xf0] }
 0x2b0   :  { %5970 = vmatpush.bf16.msrb.mxu2 %v9218_v29  ;;  %5935 = vmatpush.bf16.msra.mxu3 %v8770_v21  ;;  %v9151_v29 = vld [vmem:[%s18861_s2 + $0xb18] sm:$0xf0]  ;;  %v12116_v23 = vld [vmem:[%s18861_s2 + $0xeec] sm:$0xf]  ;;  %v9522_v43 = vor.u32 %v12084_v33, %v9519_v20 }
 0x2b1   :  { %v9647_v34 = vld [vmem:[%s18861_s2 + $0xef8] sm:$0xf0]  ;;  %v12148_v15 = vld [vmem:[%s18861_s2 + $0xfec] sm:$0xf] }
 0x2b2   :  { %v9775_v21 = vld [vmem:[%s18861_s2 + $0xff8] sm:$0xf0]  ;;  %v12036_v63 = vld [vmem:[%s18861_s2 + $0xc6c] sm:$0xf] }
 0x2b3   :  { %5945 = vmatpush.bf16.msrb.mxu0 %v8946_v60  ;;  %5958 = vmatpush.bf16.msrb.mxu1 %v9074_v39  ;;  %v9026_v60 = vor.u32 %v11960_v9, %v9023_v3  ;;  %v9154_v39 = vor.u32 %v11992_v12, %v9151_v29  ;;  %v9327_v47 = vld [vmem:[%s18861_s2 + $0xc78] sm:$0xf0]  ;;  %v9778_v54 = vor.u32 %v12148_v15, %v9775_v21  ;;  %v12080_v41 = vld [vmem:[%s18861_s2 + $0xdcc] sm:$0xf] }
 0x2b4   :  { %5971 = vmatpush.bf16.msrb.mxu2 %v9202_v62  ;;  %5980 = vmatpush.bf16.msrb.mxu3 %v9394_v50  ;;  %v9346_v62 = vor.u32 %v12040_v32, %v9343_v26  ;;  %v9650_v50 = vor.u32 %v12116_v23, %v9647_v34  ;;  %v9503_v31 = vld [vmem:[%s18861_s2 + $0xdd8] sm:$0xf0]  ;;  %v12112_v48 = vld [vmem:[%s18861_s2 + $0xecc] sm:$0xf] }
 0x2b5   :  { %5936 = vmatmul.bf16.vlgmr.msra.gmra.mxu3 %v13373_v24  ;;  %v9042_v24 = vor.u32 %v11964_v57, %v9039_v0  ;;  %v9631_v51 = vld [vmem:[%s18861_s2 + $0xed8] sm:$0xf0]  ;;  %v12144_v42 = vld [vmem:[%s18861_s2 + $0xfcc] sm:$0xf]  ;;  %v9506_v56 = vor.u32 %v12080_v41, %v9503_v31 }
 0x2b6   :  { %v9759_v52 = vld [vmem:[%s18861_s2 + $0xfd8] sm:$0xf0]  ;;  %v12032_v57 = vld [vmem:[%s18861_s2 + $0xc4c] sm:$0xf]  ;;  %v9634_v0 = vor.u32 %v12112_v48, %v9631_v51 }
 0x2b7   :  { %5946 = vmatpush.bf16.msrb.mxu0 %v8930_v44  ;;  %5959 = vmatpush.bf16.msrb.mxu1 %v9058_v61  ;;  %v9330_v61 = vor.u32 %v12036_v63, %v9327_v47  ;;  %v9762_v1 = vor.u32 %v12144_v42, %v9759_v52  ;;  %v12076_v53 = vld [vmem:[%s18861_s2 + $0xdac] sm:$0xf]  ;;  %v9743_v7 = vld [vmem:[%s18861_s2 + $0xfb8] sm:$0xf0] }
 0x2b8   :  { %5972 = vmatpush.bf16.msrb.mxu2 %v9186_v55  ;;  %5981 = vmatpush.bf16.msrb.mxu3 %v9378_v6  ;;  %v5716_v44 = vpop.f32.mrf.mxu2  ;;  %v5729_v38 = vpop.f32.mrf.mxu3  ;;  %v9311_v6 = vld [vmem:[%s18861_s2 + $0xc58] sm:$0xf0]  ;;  %v12108_v16 = vld [vmem:[%s18861_s2 + $0xeac] sm:$0xf] }
 0x2b9   :  { %v5717_v55 = vadd.f32 %v5716_v44, %v16988_v17  ;;  %v9487_v17 = vld [vmem:[%s18861_s2 + $0xdb8] sm:$0xf0]  ;;  %v12140_v4 = vld [vmem:[%s18861_s2 + $0xfac] sm:$0xf] }
 0x2ba   :  { %v9746_v3 = vor.u32 %v12140_v4, %v9743_v7  ;;  %v9471_v12 = vld [vmem:[%s18861_s2 + $0xd98] sm:$0xf0]  ;;  %v12136_v26 = vld [vmem:[%s18861_s2 + $0xf8c] sm:$0xf] }
 0x2bb   :  { %5947 = vmatpush.bf16.msrb.mxu0 %v8914_v27  ;;  %5960 = vmatpush.bf16.msrb.mxu1 %v9042_v24  ;;  %v5730_v58 = vadd.f32 %v5729_v38, %v5717_v55  ;;  %v9615_v27 = vld [vmem:[%s18861_s2 + $0xeb8] sm:$0xf0]  ;;  %v9490_v24 = vor.u32 %v12076_v53, %v9487_v17  ;;  %v12024_v21 = vld [vmem:[%s18861_s2 + $0xc0c] sm:$0xf] }
 0x2bc   :  { %5973 = vmatpush.bf16.msrb.mxu2 %v9170_v8  ;;  %5982 = vmatpush.bf16.msrb.mxu3 %v9362_v2  ;;  %v9295_v8 = vld [vmem:[%s18861_s2 + $0xc38] sm:$0xf0]  ;;  %v9618_v9 = vor.u32 %v12108_v16, %v9615_v27  ;;  %v12104_v2 = vld [vmem:[%s18861_s2 + $0xe8c] sm:$0xf] }
 0x2bd   :  { %v9599_v32 = vld [vmem:[%s18861_s2 + $0xe98] sm:$0xf0]  ;;  %v12068_v47 = vld [vmem:[%s18861_s2 + $0xd6c] sm:$0xf] }
 0x2be   :  { %v9727_v33 = vld [vmem:[%s18861_s2 + $0xf98] sm:$0xf0]  ;;  %v12132_v31 = vld [vmem:[%s18861_s2 + $0xf6c] sm:$0xf] }
 0x2bf   :  { %5948 = vmatpush.bf16.msrb.mxu0 %v8898_v25  ;;  %5961 = vmatpush.bf16.msrb.mxu1 %v9026_v60  ;;  %v5742_v29 = vpop.f32.mrf.mxu0  ;;  %v5755_v23 = vpop.f32.mrf.mxu1  ;;  %v9279_v60 = vld [vmem:[%s18861_s2 + $0xc18] sm:$0xf0]  ;;  %v12180_v51 = vld [vmem:[%s18861_s2 + $0x10ec] sm:$0xf] }
 0x2c0   :  { %5974 = vmatpush.bf16.msrb.mxu2 %v9154_v39  ;;  %5983 = vmatpush.bf16.msrb.mxu3 %v9346_v62  ;;  %v5743_v20 = vadd.f32 %v5742_v29, %v5730_v58  ;;  %v5718_v25 = vpop.f32.mrf.mxu2  ;;  %v5731_v39 = vpop.f32.mrf.mxu3  ;;  %v9602_v62 = vor.u32 %v12104_v2, %v9599_v32  ;;  %v9583_v41 = vld [vmem:[%s18861_s2 + $0xe78] sm:$0xf0]  ;;  %v9282_v52 = vor.u32 %v12024_v21, %v9279_v60  ;;  %v12176_v16 = vld [vmem:[%s18861_s2 + $0x10cc] sm:$0xf] }
 0x2c1   :  { %v9711_v48 = vld [vmem:[%s18861_s2 + $0xf78] sm:$0xf0]  ;;  %v12172_v2 = vld [vmem:[%s18861_s2 + $0x10ac] sm:$0xf] }
 0x2c2   :  { %5949 = vmatmul.bf16.vlgmr.msrb.gmra.mxu0 %v13390_v18  ;;  %5962 = vmatmul.bf16.vlgmr.msrb.gmra.mxu1 %v13386_v30  ;;  %v9314_v18 = vor.u32 %v12032_v57, %v9311_v6  ;;  %v12072_v30 = vld [vmem:[%s18861_s2 + $0xd8c] sm:$0xf]  ;;  %v17187_v63 = vadd.f32 %v5755_v23, %v5743_v20  ;;  %v9903_v42 = vld [vmem:[%s18861_s2 + $0x10f8] sm:$0xf0]  ;;  %v9714_v55 = vor.u32 %v12132_v31, %v9711_v48 }
 0x2c3   :  { %5993 = vmatpush.bf16.msra.mxu0 %v9522_v43  ;;  %6006 = vmatpush.bf16.msra.mxu1 %v9650_v50  ;;  %v9474_v15 = vor.u32 %v12072_v30, %v9471_v12  ;;  %v9730_v43 = vor.u32 %v12136_v26, %v9727_v33  ;;  %v9455_v50 = vld [vmem:[%s18861_s2 + $0xd78] sm:$0xf0]  ;;  %v12096_v57 = vld [vmem:[%s18861_s2 + $0xe4c] sm:$0xf]  ;;  %v9906_v6 = vor.u32 %v12180_v51, %v9903_v42 }
 0x2c4   :  { %6019 = vmatpush.bf16.msra.mxu2 %v9778_v54  ;;  %5984 = vmatpush.bf16.msrb.mxu3 %v9330_v61  ;;  %v12100_v54 = vld [vmem:[%s18861_s2 + $0xe6c] sm:$0xf]  ;;  %v9458_v44 = vor.u32 %v12068_v47, %v9455_v50  ;;  %v9439_v38 = vld [vmem:[%s18861_s2 + $0xd58] sm:$0xf0] }
 0x2c5   :  { %5975 = vmatmul.bf16.vlgmr.msrb.gmra.mxu2 %v13400_v35  ;;  %v12028_v35 = vld [vmem:[%s18861_s2 + $0xc2c] sm:$0xf]  ;;  %v9586_v61 = vor.u32 %v12100_v54, %v9583_v41  ;;  %v9695_v53 = vld [vmem:[%s18861_s2 + $0xf58] sm:$0xf0] }
 0x2c6   :  { %v9298_v34 = vor.u32 %v12028_v35, %v9295_v8  ;;  %v9887_v58 = vld [vmem:[%s18861_s2 + $0x10d8] sm:$0xf0]  ;;  %v12092_v8 = vld [vmem:[%s18861_s2 + $0xe2c] sm:$0xf] }
 0x2c7   :  { %5994 = vmatpush.bf16.msra.mxu0 %v9506_v56  ;;  %6007 = vmatpush.bf16.msra.mxu1 %v9634_v0  ;;  %v12064_v56 = vld [vmem:[%s18861_s2 + $0xd4c] sm:$0xf]  ;;  %v9567_v0 = vld [vmem:[%s18861_s2 + $0xe58] sm:$0xf0]  ;;  %v5744_v17 = vpop.f32.mrf.mxu0  ;;  %v5757_v27 = vpop.f32.mrf.mxu1 }
 0x2c8   :  { %6020 = vmatpush.bf16.msra.mxu2 %v9762_v1  ;;  %5985 = vmatpush.bf16.msrb.mxu3 %v9314_v18  ;;  %v12128_v1 = vld [vmem:[%s18861_s2 + $0xf4c] sm:$0xf]  ;;  %v9442_v4 = vor.u32 %v12064_v56, %v9439_v38  ;;  %v9570_v7 = vor.u32 %v12096_v57, %v9567_v0  ;;  %v9423_v35 = vld [vmem:[%s18861_s2 + $0xd38] sm:$0xf0] }
 0x2c9   :  { %v9698_v18 = vor.u32 %v12128_v1, %v9695_v53  ;;  %v12124_v30 = vld [vmem:[%s18861_s2 + $0xf2c] sm:$0xf]  ;;  %v9679_v12 = vld [vmem:[%s18861_s2 + $0xf38] sm:$0xf0] }
 0x2ca   :  { %v9871_v29 = vld [vmem:[%s18861_s2 + $0x10b8] sm:$0xf0]  ;;  %v12056_v26 = vld [vmem:[%s18861_s2 + $0xd0c] sm:$0xf]  ;;  %v9682_v20 = vor.u32 %v12124_v30, %v9679_v12 }
 0x2cb   :  { %5995 = vmatpush.bf16.msra.mxu0 %v9490_v24  ;;  %6008 = vmatpush.bf16.msra.mxu1 %v9618_v9  ;;  %v12060_v24 = vld [vmem:[%s18861_s2 + $0xd2c] sm:$0xf]  ;;  %v9890_v9 = vor.u32 %v12176_v16, %v9887_v58  ;;  %v9407_v33 = vld [vmem:[%s18861_s2 + $0xd18] sm:$0xf0] }
 0x2cc   :  { %6021 = vmatpush.bf16.msra.mxu2 %v9746_v3  ;;  %5986 = vmatpush.bf16.msrb.mxu3 %v9298_v34  ;;  %v9551_v3 = vld [vmem:[%s18861_s2 + $0xe38] sm:$0xf0]  ;;  %v9426_v32 = vor.u32 %v12060_v24, %v9423_v35  ;;  %v12088_v23 = vld [vmem:[%s18861_s2 + $0xe0c] sm:$0xf]  ;;  %v9410_v50 = vor.u32 %v12056_v26, %v9407_v33 }
 0x2cd   :  { %v9535_v25 = vld [vmem:[%s18861_s2 + $0xe18] sm:$0xf0]  ;;  %v12120_v34 = vld [vmem:[%s18861_s2 + $0xf0c] sm:$0xf] }
 0x2ce   :  { %v9663_v21 = vld [vmem:[%s18861_s2 + $0xf18] sm:$0xf0]  ;;  %v12168_v60 = vld [vmem:[%s18861_s2 + $0x108c] sm:$0xf]  ;;  %v9538_v48 = vor.u32 %v12088_v23, %v9535_v25 }
 0x2cf   :  { %5996 = vmatpush.bf16.msra.mxu0 %v9474_v15  ;;  %6009 = vmatpush.bf16.msra.mxu1 %v9602_v62  ;;  %v9874_v15 = vor.u32 %v12172_v2, %v9871_v29  ;;  %v9855_v39 = vld [vmem:[%s18861_s2 + $0x1098] sm:$0xf0]  ;;  %v12212_v62 = vld [vmem:[%s18861_s2 + $0x11ec] sm:$0xf]  ;;  %v9666_v51 = vor.u32 %v12120_v34, %v9663_v21 }
 0x2d0   :  { %6022 = vmatpush.bf16.msra.mxu2 %v9730_v43  ;;  %5987 = vmatpush.bf16.msrb.mxu3 %v9282_v52  ;;  %v10031_v43 = vld [vmem:[%s18861_s2 + $0x11f8] sm:$0xf0]  ;;  %v12244_v47 = vld [vmem:[%s18861_s2 + $0x12ec] sm:$0xf]  ;;  %v9858_v42 = vor.u32 %v12168_v60, %v9855_v39 }
 0x2d1   :  { %v10159_v54 = vld [vmem:[%s18861_s2 + $0x12f8] sm:$0xf0]  ;;  %v12276_v41 = vld [vmem:[%s18861_s2 + $0x13ec] sm:$0xf]  ;;  %v10034_v52 = vor.u32 %v12212_v62, %v10031_v43 }
 0x2d2   :  { %v10287_v31 = vld [vmem:[%s18861_s2 + $0x13f8] sm:$0xf0]  ;;  %v12208_v38 = vld [vmem:[%s18861_s2 + $0x11cc] sm:$0xf] }
 0x2d3   :  { %5997 = vmatpush.bf16.msra.mxu0 %v9458_v44  ;;  %6010 = vmatpush.bf16.msra.mxu1 %v9586_v61  ;;  %v12164_v44 = vld [vmem:[%s18861_s2 + $0x106c] sm:$0xf]  ;;  %v9839_v61 = vld [vmem:[%s18861_s2 + $0x1078] sm:$0xf0]  ;;  %v10290_v56 = vor.u32 %v12276_v41, %v10287_v31 }
 0x2d4   :  { %6023 = vmatpush.bf16.msra.mxu2 %v9714_v55  ;;  %6032 = vmatpush.bf16.msra.mxu3 %v9906_v6  ;;  %v10162_v55 = vor.u32 %v12244_v47, %v10159_v54  ;;  %v10015_v57 = vld [vmem:[%s18861_s2 + $0x11d8] sm:$0xf0]  ;;  %v12240_v6 = vld [vmem:[%s18861_s2 + $0x12cc] sm:$0xf]  ;;  %v9842_v16 = vor.u32 %v12164_v44, %v9839_v61 }
 0x2d5   :  { %5988 = vmatmul.bf16.vlgmr.msrb.gmra.mxu3 %v13596_v28  ;;  %v9554_v28 = vor.u32 %v12092_v8, %v9551_v3  ;;  %v10143_v0 = vld [vmem:[%s18861_s2 + $0x12d8] sm:$0xf0]  ;;  %v12272_v1 = vld [vmem:[%s18861_s2 + $0x13cc] sm:$0xf]  ;;  %v10018_v27 = vor.u32 %v12208_v38, %v10015_v57 }
 0x2d6   :  { %v10271_v53 = vld [vmem:[%s18861_s2 + $0x13d8] sm:$0xf0]  ;;  %v10146_v24 = vor.u32 %v12240_v6, %v10143_v0  ;;  %v12204_v8 = vld [vmem:[%s18861_s2 + $0x11ac] sm:$0xf] }
 0x2d7   :  { %5998 = vmatpush.bf16.msra.mxu0 %v9442_v4  ;;  %6011 = vmatpush.bf16.msra.mxu1 %v9570_v7  ;;  %v12160_v7 = vld [vmem:[%s18861_s2 + $0x104c] sm:$0xf]  ;;  %v10274_v35 = vor.u32 %v12272_v1, %v10271_v53  ;;  %v10127_v30 = vld [vmem:[%s18861_s2 + $0x12b8] sm:$0xf0] }
 0x2d8   :  { %6024 = vmatpush.bf16.msra.mxu2 %v9698_v18  ;;  %6033 = vmatpush.bf16.msra.mxu3 %v9890_v9  ;;  %v5768_v17 = vpop.f32.mrf.mxu2  ;;  %v5781_v4 = vpop.f32.mrf.mxu3  ;;  %v9823_v18 = vld [vmem:[%s18861_s2 + $0x1058] sm:$0xf0]  ;;  %v12236_v9 = vld [vmem:[%s18861_s2 + $0x12ac] sm:$0xf] }
 0x2d9   :  { %v5769_v58 = vadd.f32 %v5768_v17, %v17187_v63  ;;  %v9999_v63 = vld [vmem:[%s18861_s2 + $0x11b8] sm:$0xf0]  ;;  %v12268_v12 = vld [vmem:[%s18861_s2 + $0x13ac] sm:$0xf]  ;;  %v10130_v26 = vor.u32 %v12236_v9, %v10127_v30 }
 0x2da   :  { %v10255_v2 = vld [vmem:[%s18861_s2 + $0x13b8] sm:$0xf0]  ;;  %v10002_v29 = vor.u32 %v12204_v8, %v9999_v63  ;;  %v12264_v25 = vld [vmem:[%s18861_s2 + $0x138c] sm:$0xf] }
 0x2db   :  { %5999 = vmatpush.bf16.msra.mxu0 %v9426_v32  ;;  %6012 = vmatpush.bf16.msra.mxu1 %v9554_v28  ;;  %v5782_v3 = vadd.f32 %v5781_v4, %v5769_v58  ;;  %v9807_v32 = vld [vmem:[%s18861_s2 + $0x1038] sm:$0xf0]  ;;  %v10258_v33 = vor.u32 %v12268_v12, %v10255_v2  ;;  %v12152_v47 = vld [vmem:[%s18861_s2 + $0x100c] sm:$0xf] }
 0x2dc   :  { %6025 = vmatpush.bf16.msra.mxu2 %v9682_v20  ;;  %6034 = vmatpush.bf16.msra.mxu3 %v9874_v15  ;;  %v9983_v28 = vld [vmem:[%s18861_s2 + $0x1198] sm:$0xf0]  ;;  %v12232_v20 = vld [vmem:[%s18861_s2 + $0x128c] sm:$0xf] }
 0x2dd   :  { %v10111_v23 = vld [vmem:[%s18861_s2 + $0x1298] sm:$0xf0]  ;;  %v12260_v61 = vld [vmem:[%s18861_s2 + $0x136c] sm:$0xf] }
 0x2de   :  { %v10239_v34 = vld [vmem:[%s18861_s2 + $0x1398] sm:$0xf0]  ;;  %v10114_v41 = vor.u32 %v12232_v20, %v10111_v23  ;;  %v12192_v53 = vld [vmem:[%s18861_s2 + $0x114c] sm:$0xf] }
 0x2df   :  { %6000 = vmatpush.bf16.msra.mxu0 %v9410_v50  ;;  %6013 = vmatpush.bf16.msra.mxu1 %v9538_v48  ;;  %v5794_v15 = vpop.f32.mrf.mxu0  ;;  %v5807_v43 = vpop.f32.mrf.mxu1  ;;  %v9791_v50 = vld [vmem:[%s18861_s2 + $0x1018] sm:$0xf0]  ;;  %v10242_v31 = vor.u32 %v12264_v25, %v10239_v34  ;;  %v12196_v48 = vld [vmem:[%s18861_s2 + $0x116c] sm:$0xf] }
 0x2e0   :  { %6026 = vmatpush.bf16.msra.mxu2 %v9666_v51  ;;  %6035 = vmatpush.bf16.msra.mxu3 %v9858_v42  ;;  %v5770_v21 = vpop.f32.mrf.mxu2  ;;  %v5795_v60 = vadd.f32 %v5794_v15, %v5782_v3  ;;  %v5783_v54 = vpop.f32.mrf.mxu3  ;;  %v9967_v51 = vld [vmem:[%s18861_s2 + $0x1178] sm:$0xf0]  ;;  %v12228_v42 = vld [vmem:[%s18861_s2 + $0x126c] sm:$0xf]  ;;  %v9794_v57 = vor.u32 %v12152_v47, %v9791_v50 }
 0x2e1   :  { %v10095_v44 = vld [vmem:[%s18861_s2 + $0x1278] sm:$0xf0]  ;;  %v9970_v6 = vor.u32 %v12196_v48, %v9967_v51  ;;  %v12256_v4 = vld [vmem:[%s18861_s2 + $0x134c] sm:$0xf] }
 0x2e2   :  { %6001 = vmatmul.bf16.vlgmr.msra.gmra.mxu0 %v13613_v59  ;;  %6014 = vmatmul.bf16.vlgmr.msra.gmra.mxu1 %v13609_v19  ;;  %v9826_v59 = vor.u32 %v12160_v7, %v9823_v18  ;;  %v12200_v19 = vld [vmem:[%s18861_s2 + $0x118c] sm:$0xf]  ;;  %v10415_v38 = vld [vmem:[%s18861_s2 + $0x14f8] sm:$0xf0]  ;;  %v10098_v0 = vor.u32 %v12228_v42, %v10095_v44 }
 0x2e3   :  { %6045 = vmatpush.bf16.msrb.mxu0 %v10034_v52  ;;  %6058 = vmatpush.bf16.msrb.mxu1 %v10162_v55  ;;  %v9986_v62 = vor.u32 %v12200_v19, %v9983_v28  ;;  %v5808_v52 = vadd.f32 %v5807_v43, %v5795_v60  ;;  %v10223_v55 = vld [vmem:[%s18861_s2 + $0x1378] sm:$0xf0]  ;;  %v12304_v18 = vld [vmem:[%s18861_s2 + $0x14cc] sm:$0xf] }
 0x2e4   :  { %6071 = vmatpush.bf16.msrb.mxu2 %v10290_v56  ;;  %6036 = vmatpush.bf16.msra.mxu3 %v9842_v16  ;;  %v12308_v56 = vld [vmem:[%s18861_s2 + $0x14ec] sm:$0xf]  ;;  %v10226_v1 = vor.u32 %v12260_v61, %v10223_v55  ;;  %v9951_v17 = vld [vmem:[%s18861_s2 + $0x1158] sm:$0xf0] }
 0x2e5   :  { %6027 = vmatmul.bf16.vlgmr.msra.gmra.mxu2 %v13623_v37  ;;  %v12156_v37 = vld [vmem:[%s18861_s2 + $0x102c] sm:$0xf]  ;;  %v10418_v58 = vor.u32 %v12308_v56, %v10415_v38  ;;  %v10207_v7 = vld [vmem:[%s18861_s2 + $0x1358] sm:$0xf0]  ;;  %v9954_v8 = vor.u32 %v12192_v53, %v9951_v17 }
 0x2e6   :  { %v9810_v39 = vor.u32 %v12156_v37, %v9807_v32  ;;  %v12224_v16 = vld [vmem:[%s18861_s2 + $0x124c] sm:$0xf]  ;;  %v10210_v30 = vor.u32 %v12256_v4, %v10207_v7  ;;  %v9935_v2 = vld [vmem:[%s18861_s2 + $0x1138] sm:$0xf0] }
 0x2e7   :  { %6046 = vmatpush.bf16.msrb.mxu0 %v10018_v27  ;;  %6059 = vmatpush.bf16.msrb.mxu1 %v10146_v24  ;;  %v10079_v27 = vld [vmem:[%s18861_s2 + $0x1258] sm:$0xf0]  ;;  %v5809_v63 = vpop.f32.mrf.mxu1  ;;  %v12188_v12 = vld [vmem:[%s18861_s2 + $0x112c] sm:$0xf] }
 0x2e8   :  { %6072 = vmatpush.bf16.msrb.mxu2 %v10274_v35  ;;  %6037 = vmatpush.bf16.msra.mxu3 %v9826_v59  ;;  %v10399_v24 = vld [vmem:[%s18861_s2 + $0x14d8] sm:$0xf0]  ;;  %v5796_v35 = vpop.f32.mrf.mxu0  ;;  %v5820_v9 = vpop.f32.mrf.mxu2  ;;  %v10082_v3 = vor.u32 %v12224_v16, %v10079_v27  ;;  %v12220_v59 = vld [vmem:[%s18861_s2 + $0x122c] sm:$0xf]  ;;  %v9938_v20 = vor.u32 %v12188_v12, %v9935_v2 }
 0x2e9   :  { %v10402_v37 = vor.u32 %v12304_v18, %v10399_v24  ;;  %v10063_v32 = vld [vmem:[%s18861_s2 + $0x1238] sm:$0xf0]  ;;  %v12300_v19 = vld [vmem:[%s18861_s2 + $0x14ac] sm:$0xf]  ;;  %v12637_v35 = vld [vmem:[%s18862_s3] sm:$0xf] }
 0x2ea   :  { %v10383_v28 = vld [vmem:[%s18861_s2 + $0x14b8] sm:$0xf0]  ;;  %v12184_v23 = vld [vmem:[%s18861_s2 + $0x110c] sm:$0xf] }
 0x2eb   :  { %6047 = vmatpush.bf16.msrb.mxu0 %v10002_v29  ;;  %6060 = vmatpush.bf16.msrb.mxu1 %v10130_v26  ;;  %v17443_v29 = vadd.f32 %v5820_v9, %v5808_v52  ;;  %v12252_v26 = vld [vmem:[%s18861_s2 + $0x132c] sm:$0xf]  ;;  %v9919_v25 = vld [vmem:[%s18861_s2 + $0x1118] sm:$0xf0] }
 0x2ec   :  { %6073 = vmatpush.bf16.msrb.mxu2 %v10258_v33  ;;  %6038 = vmatpush.bf16.msra.mxu3 %v9810_v39  ;;  %v10191_v33 = vld [vmem:[%s18861_s2 + $0x1338] sm:$0xf0]  ;;  %v12216_v15 = vld [vmem:[%s18861_s2 + $0x120c] sm:$0xf]  ;;  %v10386_v39 = vor.u32 %v12300_v19, %v10383_v28 }
 0x2ed   :  { %v10194_v34 = vor.u32 %v12252_v26, %v10191_v33  ;;  %v10047_v21 = vld [vmem:[%s18861_s2 + $0x1218] sm:$0xf0]  ;;  %v12248_v60 = vld [vmem:[%s18861_s2 + $0x130c] sm:$0xf]  ;;  %12621 = vtanh.f32 %v17443_v29  ;;  %v12451_v29 = vld [vmem:[%s18863_s4 + $0xe4] sm:$0xf] }
 0x2ee   :  { %v12296_v43 = vld [vmem:[%s18861_s2 + $0x148c] sm:$0xf]  ;;  %v10367_v47 = vld [vmem:[%s18861_s2 + $0x1498] sm:$0xf0]  ;;  %v10050_v52 = vor.u32 %v12216_v15, %v10047_v21 }
 0x2ef   :  { %6048 = vmatpush.bf16.msrb.mxu0 %v9986_v62  ;;  %6061 = vmatpush.bf16.msrb.mxu1 %v10114_v41  ;;  %v10175_v62 = vld [vmem:[%s18861_s2 + $0x1318] sm:$0xf0]  ;;  %v12340_v50 = vld [vmem:[%s18861_s2 + $0x15ec] sm:$0xf]  ;;  %v10370_v55 = vor.u32 %v12296_v43, %v10367_v47 }
 0x2f0   :  { %6074 = vmatpush.bf16.msrb.mxu2 %v10242_v31  ;;  %6039 = vmatpush.bf16.msra.mxu3 %v9794_v57  ;;  %v10543_v54 = vld [vmem:[%s18861_s2 + $0x15f8] sm:$0xf0]  ;;  %v12372_v41 = vld [vmem:[%s18861_s2 + $0x16ec] sm:$0xf]  ;;  %v9922_v31 = vor.u32 %v12184_v23, %v9919_v25  ;;  %v10178_v44 = vor.u32 %v12248_v60, %v10175_v62  ;;  %v5822_v61 = vpop.f32.mrf.mxu2 }
 0x2f1   :  { %v10671_v48 = vld [vmem:[%s18861_s2 + $0x16f8] sm:$0xf0]  ;;  %v12404_v51 = vld [vmem:[%s18861_s2 + $0x17ec] sm:$0xf]  ;;  %v10546_v56 = vor.u32 %v12340_v50, %v10543_v54 }
 0x2f2   :  { %v10799_v42 = vld [vmem:[%s18861_s2 + $0x17f8] sm:$0xf0]  ;;  %v12292_v38 = vld [vmem:[%s18861_s2 + $0x146c] sm:$0xf] }
 0x2f3   :  { %6049 = vmatpush.bf16.msrb.mxu0 %v9970_v6  ;;  %6062 = vmatpush.bf16.msrb.mxu1 %v10098_v0  ;;  %v10351_v57 = vld [vmem:[%s18861_s2 + $0x1478] sm:$0xf0]  ;;  %v10674_v6 = vor.u32 %v12372_v41, %v10671_v48  ;;  %v10802_v0 = vor.u32 %v12404_v51, %v10799_v42  ;;  %v12368_v17 = vld [vmem:[%s18861_s2 + $0x16cc] sm:$0xf] }
 0x2f4   :  { %6075 = vmatpush.bf16.msrb.mxu2 %v10226_v1  ;;  %6084 = vmatpush.bf16.msrb.mxu3 %v10418_v58  ;;  %v12336_v1 = vld [vmem:[%s18861_s2 + $0x15cc] sm:$0xf]  ;;  %v10527_v53 = vld [vmem:[%s18861_s2 + $0x15d8] sm:$0xf0]  ;;  %v10354_v4 = vor.u32 %v12292_v38, %v10351_v57 }
 0x2f5   :  { %6040 = vmatmul.bf16.vlgmr.msra.gmra.mxu3 %v13806_v36  ;;  %v10066_v36 = vor.u32 %v12220_v59, %v10063_v32  ;;  %v10655_v16 = vld [vmem:[%s18861_s2 + $0x16d8] sm:$0xf0]  ;;  %v12400_v58 = vld [vmem:[%s18861_s2 + $0x17cc] sm:$0xf]  ;;  %v10530_v7 = vor.u32 %v12336_v1, %v10527_v53 }
 0x2f6   :  { %v10783_v27 = vld [vmem:[%s18861_s2 + $0x17d8] sm:$0xf0]  ;;  %v12288_v18 = vld [vmem:[%s18861_s2 + $0x144c] sm:$0xf]  ;;  %v10658_v9 = vor.u32 %v12368_v17, %v10655_v16 }
 0x2f7   :  { %6050 = vmatpush.bf16.msrb.mxu0 %v9954_v8  ;;  %6063 = vmatpush.bf16.msrb.mxu1 %v10082_v3  ;;  %v10335_v24 = vld [vmem:[%s18861_s2 + $0x1458] sm:$0xf0]  ;;  %v920_v8 = vperm.slane %v12637_v35, 3  ;;  %v10786_v3 = vor.u32 %v12400_v58, %v10783_v27  ;;  %v12364_v2 = vld [vmem:[%s18861_s2 + $0x16ac] sm:$0xf] }
 0x2f8   :  { %6076 = vmatpush.bf16.msrb.mxu2 %v10210_v30  ;;  %6085 = vmatpush.bf16.msrb.mxu3 %v10402_v37  ;;  %v5833_v63 = vpop.f32.mrf.mxu3  ;;  %v12332_v30 = vld [vmem:[%s18861_s2 + $0x15ac] sm:$0xf]  ;;  %v10511_v12 = vld [vmem:[%s18861_s2 + $0x15b8] sm:$0xf0]  ;;  %v10338_v26 = vor.u32 %v12288_v18, %v10335_v24 }
 0x2f9   :  { %v10639_v59 = vld [vmem:[%s18861_s2 + $0x16b8] sm:$0xf0]  ;;  %v12396_v37 = vld [vmem:[%s18861_s2 + $0x17ac] sm:$0xf]  ;;  %v5834_v19 = vadd.f32 %v5833_v63, %v920_v8 }
 0x2fa   :  { %v10767_v32 = vld [vmem:[%s18861_s2 + $0x17b8] sm:$0xf0]  ;;  %v10642_v28 = vor.u32 %v12364_v2, %v10639_v59  ;;  %v12360_v25 = vld [vmem:[%s18861_s2 + $0x168c] sm:$0xf] }
 0x2fb   :  { %6051 = vmatpush.bf16.msrb.mxu0 %v9938_v20  ;;  %6064 = vmatpush.bf16.msrb.mxu1 %v10066_v36  ;;  %v10319_v33 = vld [vmem:[%s18861_s2 + $0x1438] sm:$0xf0]  ;;  %v10770_v20 = vor.u32 %v12396_v37, %v10767_v32  ;;  %v12280_v62 = vld [vmem:[%s18861_s2 + $0x140c] sm:$0xf] }
 0x2fc   :  { %6077 = vmatpush.bf16.msrb.mxu2 %v10194_v34  ;;  %6086 = vmatpush.bf16.msrb.mxu3 %v10386_v39  ;;  %v10495_v23 = vld [vmem:[%s18861_s2 + $0x1598] sm:$0xf0]  ;;  %v12392_v34 = vld [vmem:[%s18861_s2 + $0x178c] sm:$0xf] }
 0x2fd   :  { %v10623_v36 = vld [vmem:[%s18861_s2 + $0x1698] sm:$0xf0]  ;;  %v12324_v48 = vld [vmem:[%s18861_s2 + $0x156c] sm:$0xf] }
 0x2fe   :  { %v10751_v15 = vld [vmem:[%s18861_s2 + $0x1798] sm:$0xf0]  ;;  %v10626_v41 = vor.u32 %v12360_v25, %v10623_v36  ;;  %v12356_v42 = vld [vmem:[%s18861_s2 + $0x166c] sm:$0xf] }
 0x2ff   :  { %6052 = vmatpush.bf16.msrb.mxu0 %v9922_v31  ;;  %6065 = vmatpush.bf16.msrb.mxu1 %v10050_v52  ;;  %v5846_v21 = vpop.f32.mrf.mxu0  ;;  %v10303_v43 = vld [vmem:[%s18861_s2 + $0x1418] sm:$0xf0]  ;;  %v5859_v50 = vpop.f32.mrf.mxu1  ;;  %v10754_v31 = vor.u32 %v12392_v34, %v10751_v15  ;;  %v12320_v53 = vld [vmem:[%s18861_s2 + $0x154c] sm:$0xf] }
 0x300   :  { %6078 = vmatpush.bf16.msrb.mxu2 %v10178_v44  ;;  %6087 = vmatpush.bf16.msrb.mxu3 %v10370_v55  ;;  %v5847_v47 = vadd.f32 %v5846_v21, %v5834_v19  ;;  %v5835_v54 = vpop.f32.mrf.mxu3  ;;  %v10479_v51 = vld [vmem:[%s18861_s2 + $0x1578] sm:$0xf0]  ;;  %v12388_v44 = vld [vmem:[%s18861_s2 + $0x176c] sm:$0xf]  ;;  %v10306_v57 = vor.u32 %v12280_v62, %v10303_v43  ;;  %v12581_v62 = vld [vmem:[%s18864_s5 + $0xec] sm:$0xf0] }
 0x301   :  { %v10607_v52 = vld [vmem:[%s18861_s2 + $0x1678] sm:$0xf0]  ;;  %v12352_v16 = vld [vmem:[%s18861_s2 + $0x164c] sm:$0xf]  ;;  %v12579_v43 = vld [vmem:[%s18864_s5 + $0xe4] sm:$0xf] }
 0x302   :  { %6053 = vmatmul.bf16.vlgmr.msrb.gmra.mxu0 %v13819_v22  ;;  %6066 = vmatmul.bf16.vlgmr.msrb.gmra.mxu1 %v13817_v40  ;;  %v10514_v22 = vor.u32 %v12332_v30, %v10511_v12  ;;  %v12328_v40 = vld [vmem:[%s18861_s2 + $0x158c] sm:$0xf]  ;;  %v10735_v61 = vld [vmem:[%s18861_s2 + $0x1778] sm:$0xf0]  ;;  %v5860_v55 = vadd.f32 %v5859_v50, %v5847_v47  ;;  %v10987_v47 = vld [vmem:[%s18864_s5 + $0xf0] sm:$0xf0] }
 0x303   :  { %6097 = vmatpush.bf16.msra.mxu0 %v10546_v56  ;;  %6110 = vmatpush.bf16.msra.mxu1 %v10674_v6  ;;  %v10498_v39 = vor.u32 %v12328_v40, %v10495_v23  ;;  %v12420_v56 = vld [vmem:[%s18861_s2 + $0x186c] sm:$0xf]  ;;  %v10863_v38 = vld [vmem:[%s18861_s2 + $0x1878] sm:$0xf0]  ;;  %v10482_v6 = vor.u32 %v12324_v48, %v10479_v51  ;;  %v10738_v1 = vor.u32 %v12388_v44, %v10735_v61  ;;  %v10993_v54 = vld [vmem:[%s18864_s5 + $0xe8] sm:$0xf] }
 0x304   :  { %6123 = vmatpush.bf16.msra.mxu2 %v10802_v0  ;;  %6088 = vmatpush.bf16.msrb.mxu3 %v10354_v4  ;;  %v10610_v0 = vor.u32 %v12356_v42, %v10607_v52  ;;  %v10463_v17 = vld [vmem:[%s18861_s2 + $0x1558] sm:$0xf0]  ;;  %v10866_v27 = vor.u32 %v12420_v56, %v10863_v38  ;;  %v12416_v35 = vld [vmem:[%s18861_s2 + $0x184c] sm:$0xf]  ;;  %v10990_v42 = vor.u32 %v12579_v43, %v10987_v47  ;;  %v10969_v61 = vld [vmem:[%s18864_s5 + $0xc0] sm:$0xf] }
 0x305   :  { %6079 = vmatmul.bf16.vlgmr.msrb.gmra.mxu2 %v13827_v45  ;;  %v12284_v45 = vld [vmem:[%s18861_s2 + $0x142c] sm:$0xf]  ;;  %v10591_v4 = vld [vmem:[%s18861_s2 + $0x1658] sm:$0xf0]  ;;  %v12577_v56 = vld [vmem:[%s18864_s5 + $0xcc] sm:$0xf0] }
 0x306   :  { %v10322_v60 = vor.u32 %v12284_v45, %v10319_v33  ;;  %v10719_v18 = vld [vmem:[%s18861_s2 + $0x1758] sm:$0xf0]  ;;  %v10594_v30 = vor.u32 %v12352_v16, %v10591_v4  ;;  %v12316_v2 = vld [vmem:[%s18861_s2 + $0x152c] sm:$0xf]  ;;  %v12575_v38 = vld [vmem:[%s18864_s5 + $0xc4] sm:$0xf] }
 0x307   :  { %6098 = vmatpush.bf16.msra.mxu0 %v10530_v7  ;;  %6111 = vmatpush.bf16.msra.mxu1 %v10658_v9  ;;  %v12384_v7 = vld [vmem:[%s18861_s2 + $0x174c] sm:$0xf]  ;;  %v10847_v8 = vld [vmem:[%s18861_s2 + $0x1858] sm:$0xf0]  ;;  %v5848_v63 = vpop.f32.mrf.mxu0  ;;  %v10466_v9 = vor.u32 %v12320_v53, %v10463_v17  ;;  %v10970_v53 = vor.u32 %v12577_v56, %v10969_v61  ;;  %v10953_v16 = vld [vmem:[%s18864_s5 + $0xa0] sm:$0xf] }
 0x308   :  { %6124 = vmatpush.bf16.msra.mxu2 %v10786_v3  ;;  %6089 = vmatpush.bf16.msrb.mxu3 %v10338_v26  ;;  %v5872_v58 = vpop.f32.mrf.mxu2  ;;  %v5861_v3 = vpop.f32.mrf.mxu1  ;;  %v10722_v12 = vor.u32 %v12384_v7, %v10719_v18  ;;  %v10447_v59 = vld [vmem:[%s18861_s2 + $0x1538] sm:$0xf0]  ;;  %v12348_v37 = vld [vmem:[%s18861_s2 + $0x162c] sm:$0xf]  ;;  %v10850_v32 = vor.u32 %v12416_v35, %v10847_v8  ;;  %v12573_v4 = vld [vmem:[%s18864_s5 + $0xac] sm:$0xf0] }
 0x309   :  { %v17629_v24 = vadd.f32 %v5872_v58, %v5860_v55  ;;  %v10575_v26 = vld [vmem:[%s18861_s2 + $0x1638] sm:$0xf0]  ;;  %v12412_v33 = vld [vmem:[%s18861_s2 + $0x182c] sm:$0xf]  ;;  %v12571_v7 = vld [vmem:[%s18864_s5 + $0xa4] sm:$0xf]  ;;  %v10954_v63 = vor.u32 %v12573_v4, %v10953_v16 }
 0x30a   :  { %v10703_v45 = vld [vmem:[%s18861_s2 + $0x1738] sm:$0xf0]  ;;  %v10578_v40 = vor.u32 %v12348_v37, %v10575_v26  ;;  %v12344_v25 = vld [vmem:[%s18861_s2 + $0x160c] sm:$0xf]  ;;  %v10955_v18 = vld [vmem:[%s18864_s5 + $0xb0] sm:$0xf0] }
 0x30b   :  { %6099 = vmatpush.bf16.msra.mxu0 %v10514_v22  ;;  %6112 = vmatpush.bf16.msra.mxu1 %v10642_v28  ;;  %v12380_v22 = vld [vmem:[%s18861_s2 + $0x172c] sm:$0xf]  ;;  %v10831_v19 = vld [vmem:[%s18861_s2 + $0x1838] sm:$0xf0]  ;;  %v10450_v28 = vor.u32 %v12316_v2, %v10447_v59  ;;  %v12574_v8 = vld [vmem:[%s18864_s5 + $0xb4] sm:$0xf0] }
 0x30c   :  { %6125 = vmatpush.bf16.msra.mxu2 %v10770_v20  ;;  %6090 = vmatpush.bf16.msrb.mxu3 %v10322_v60  ;;  %v12312_v20 = vld [vmem:[%s18861_s2 + $0x150c] sm:$0xf]  ;;  %v10706_v23 = vor.u32 %v12380_v22, %v10703_v45  ;;  %v10559_v36 = vld [vmem:[%s18861_s2 + $0x1618] sm:$0xf0]  ;;  %v10834_v15 = vor.u32 %v12412_v33, %v10831_v19  ;;  %v12567_v3 = vld [vmem:[%s18864_s5 + $0x84] sm:$0xf] }
 0x30d   :  { %v12376_v21 = vld [vmem:[%s18861_s2 + $0x170c] sm:$0xf]  ;;  %v10687_v60 = vld [vmem:[%s18861_s2 + $0x1718] sm:$0xf0]  ;;  %v12570_v2 = vld [vmem:[%s18864_s5 + $0x94] sm:$0xf0] }
 0x30e   :  { %v10690_v48 = vor.u32 %v12376_v21, %v10687_v60  ;;  %v12408_v52 = vld [vmem:[%s18861_s2 + $0x180c] sm:$0xf]  ;;  %v10815_v44 = vld [vmem:[%s18861_s2 + $0x1818] sm:$0xf0]  ;;  %v10921_v45 = vld [vmem:[%s18864_s5 + $0x60] sm:$0xf] }
 0x30f   :  { %6100 = vmatpush.bf16.msra.mxu0 %v10498_v39  ;;  %6113 = vmatpush.bf16.msra.mxu1 %v10626_v41  ;;  %v10985_v39 = vld [vmem:[%s18864_s5 + $0xe0] sm:$0xf]  ;;  %v12582_v41 = vld [vmem:[%s18864_s5 + $0xf4] sm:$0xf0]  ;;  %v12565_v19 = vld [vmem:[%s18864_s5 + $0x6c] sm:$0xf0] }
 0x310   :  { %6126 = vmatpush.bf16.msra.mxu2 %v10754_v31  ;;  %6091 = vmatpush.bf16.msrb.mxu3 %v10306_v57  ;;  %v5874_v34 = vpop.f32.mrf.mxu2  ;;  %v10562_v31 = vor.u32 %v12344_v25, %v10559_v36  ;;  %v10986_v51 = vor.u32 %v12581_v62, %v10985_v39  ;;  %v10994_v55 = vor.u32 %v12582_v41, %v10993_v54  ;;  %v10971_v57 = vld [vmem:[%s18864_s5 + $0xd0] sm:$0xf0]  ;;  %v12561_v60 = vld [vmem:[%s18864_s5 + $0x4c] sm:$0xf0]  ;;  %v12559_v39 = vld [vmem:[%s18864_s5 + $0x44] sm:$0xf] }
 0x311   :  { %v10974_v17 = vor.u32 %v12575_v38, %v10971_v57  ;;  %v10922_v25 = vor.u32 %v12565_v19, %v10921_v45  ;;  %v10905_v34 = vld [vmem:[%s18864_s5 + $0x40] sm:$0xf]  ;;  %v10907_v62 = vld [vmem:[%s18864_s5 + $0x50] sm:$0xf0]  ;;  %v10913_v47 = vld [vmem:[%s18864_s5 + $0x48] sm:$0xf] }
 0x312   :  { %v10906_v41 = vor.u32 %v12561_v60, %v10905_v34  ;;  %v10891_v61 = vld [vmem:[%s18864_s5 + $0x30] sm:$0xf0]  ;;  %v12558_v56 = vld [vmem:[%s18864_s5 + $0x34] sm:$0xf0]  ;;  %v10881_v16 = vld [vmem:[%s18864_s5 + $0x8] sm:$0xf] }
 0x313   :  { %6101 = vmatpush.bf16.msra.mxu0 %v10482_v6  ;;  %6114 = vmatpush.bf16.msra.mxu1 %v10610_v0  ;;  %v10977_v6 = vld [vmem:[%s18864_s5 + $0xc8] sm:$0xf]  ;;  %v12578_v0 = vld [vmem:[%s18864_s5 + $0xd4] sm:$0xf0]  ;;  %v11113_v4 = vld [vmem:[%s18863_s4 + $0xe0] sm:$0xf] }
 0x314   :  { %6127 = vmatpush.bf16.msra.mxu2 %v10738_v1  ;;  %6140 = vmatpush.bf16.msra.mxu3 %v10866_v27  ;;  %v10818_v1 = vor.u32 %v12408_v52, %v10815_v44  ;;  %v10978_v27 = vor.u32 %v12578_v0, %v10977_v6  ;;  %v12557_v52 = vld [vmem:[%s18864_s5 + $0x2c] sm:$0xf0]  ;;  %v12555_v44 = vld [vmem:[%s18864_s5 + $0x24] sm:$0xf]  ;;  %v10873_v6 = vld [vmem:[%s18864_s5] sm:$0xf] }
 0x315   :  { %6092 = vmatmul.bf16.vlgmr.msrb.gmra.mxu3 %v14018_v5  ;;  %v10431_v5 = vld [vmem:[%s18861_s2 + $0x1518] sm:$0xf0]  ;;  %v10894_v57 = vor.u32 %v12555_v44, %v10891_v61  ;;  %v12553_v0 = vld [vmem:[%s18864_s5 + $0xc] sm:$0xf0]  ;;  %v12580_v45 = vld [vmem:[%s18864_s5 + $0xec] sm:$0xf] }
 0x316   :  { %v10434_v50 = vor.u32 %v12312_v20, %v10431_v5  ;;  %v10923_v20 = vld [vmem:[%s18864_s5 + $0x70] sm:$0xf0]  ;;  %v12566_v5 = vld [vmem:[%s18864_s5 + $0x74] sm:$0xf0]  ;;  %v12477_v34 = vld [vmem:[%s18863_s4 + $0x1ac] sm:$0xf0] }
 0x317   :  { %6102 = vmatpush.bf16.msra.mxu0 %v10466_v9  ;;  %6115 = vmatpush.bf16.msra.mxu1 %v10594_v30  ;;  %v10958_v9 = vor.u32 %v12571_v7, %v10955_v18  ;;  %v10939_v30 = vld [vmem:[%s18864_s5 + $0x90] sm:$0xf0]  ;;  %v12453_v7 = vld [vmem:[%s18863_s4 + $0xec] sm:$0xf0]  ;;  %v11241_v18 = vld [vmem:[%s18863_s4 + $0x1e0] sm:$0xf] }
 0x318   :  { %6128 = vmatpush.bf16.msra.mxu2 %v10722_v12  ;;  %6141 = vmatpush.bf16.msra.mxu3 %v10850_v32  ;;  %v5885_v58 = vpop.f32.mrf.mxu3  ;;  %v10945_v12 = vld [vmem:[%s18864_s5 + $0x88] sm:$0xf]  ;;  %v10942_v26 = vor.u32 %v12567_v3, %v10939_v30  ;;  %v12576_v60 = vld [vmem:[%s18864_s5 + $0xcc] sm:$0xf]  ;;  %v10963_v44 = vld [vmem:[%s18864_s5 + $0xb8] sm:$0xf0] }
 0x319   :  { %v5886_v35 = vadd.f32 %v5885_v58, %v17629_v24  ;;  %v10937_v24 = vld [vmem:[%s18864_s5 + $0x80] sm:$0xf]  ;;  %v10946_v33 = vor.u32 %v12570_v2, %v10945_v12  ;;  %v12554_v58 = vld [vmem:[%s18864_s5 + $0x14] sm:$0xf0]  ;;  %v12449_v2 = vld [vmem:[%s18863_s4 + $0xcc] sm:$0xf0] }
 0x31a   :  { %v11097_v12 = vld [vmem:[%s18863_s4 + $0xc0] sm:$0xf] }
 0x31b   :  { %6103 = vmatpush.bf16.msra.mxu0 %v10450_v28  ;;  %6116 = vmatpush.bf16.msra.mxu1 %v10578_v40  ;;  %v12563_v28 = vld [vmem:[%s18864_s5 + $0x64] sm:$0xf] }
 0x31c   :  { %6129 = vmatpush.bf16.msra.mxu2 %v10706_v23  ;;  %6142 = vmatpush.bf16.msra.mxu3 %v10834_v15  ;;  %v10929_v23 = vld [vmem:[%s18864_s5 + $0x68] sm:$0xf]  ;;  %v10926_v36 = vor.u32 %v12563_v28, %v10923_v20 }
 0x31d   :  { %v10930_v15 = vor.u32 %v12566_v5, %v10929_v23  ;;  %v11081_v23 = vld [vmem:[%s18863_s4 + $0xa0] sm:$0xf]  ;;  %v12445_v5 = vld [vmem:[%s18863_s4 + $0xac] sm:$0xf0] }
 0x31f   :  { %6104 = vmatpush.bf16.msra.mxu0 %v10434_v50  ;;  %6117 = vmatpush.bf16.msra.mxu1 %v10562_v31  ;;  %v5898_v59 = vpop.f32.mrf.mxu0  ;;  %v5911_v22 = vpop.f32.mrf.mxu1  ;;  %v12562_v50 = vld [vmem:[%s18864_s5 + $0x54] sm:$0xf0]  ;;  %v10910_v31 = vor.u32 %v12559_v39, %v10907_v62  ;;  %v10979_v39 = vld [vmem:[%s18864_s5 + $0xd8] sm:$0xf0]  ;;  %v11082_v62 = vor.u32 %v12445_v5, %v11081_v23  ;;  %v12461_v5 = vld [vmem:[%s18863_s4 + $0x12c] sm:$0xf0] }
 0x320   :  { %6130 = vmatpush.bf16.msra.mxu2 %v10690_v48  ;;  %6143 = vmatpush.bf16.msra.mxu3 %v10818_v1  ;;  %v5899_v37 = vadd.f32 %v5898_v59, %v5886_v35  ;;  %v10889_v48 = vld [vmem:[%s18864_s5 + $0x20] sm:$0xf]  ;;  %v12551_v1 = vld [vmem:[%s18864_s5 + $0x4] sm:$0xf]  ;;  %v12485_v35 = vld [vmem:[%s18863_s4 + $0x1ec] sm:$0xf0] }
 0x321   :  { %v10890_v38 = vor.u32 %v12557_v52, %v10889_v48  ;;  %v11242_v3 = vor.u32 %v12485_v35, %v11241_v18  ;;  %v11225_v59 = vld [vmem:[%s18863_s4 + $0x1c0] sm:$0xf]  ;;  %v12473_v48 = vld [vmem:[%s18863_s4 + $0x18c] sm:$0xf0]  ;;  %v12572_v52 = vld [vmem:[%s18864_s5 + $0xac] sm:$0xf] }
 0x322   :  { %6105 = vmatmul.bf16.vlgmr.msra.gmra.mxu0 %v14031_v11  ;;  %6118 = vmatmul.bf16.vlgmr.msra.gmra.mxu1 %v14029_v10  ;;  %v10961_v11 = vld [vmem:[%s18864_s5 + $0xa8] sm:$0xf]  ;;  %v5912_v40 = vadd.f32 %v5911_v22, %v5899_v37  ;;  %v12481_v37 = vld [vmem:[%s18863_s4 + $0x1cc] sm:$0xf0]  ;;  %v12568_v18 = vld [vmem:[%s18864_s5 + $0x8c] sm:$0xf] }
 0x323   :  { %6479 = vmatpush.bf16.msrb.mxu0 %v10986_v51  ;;  %6492 = vmatpush.bf16.msrb.mxu1 %v10990_v42  ;;  %v10962_v10 = vor.u32 %v12574_v8, %v10961_v11  ;;  %v10914_v42 = vor.u32 %v12562_v50, %v10913_v47  ;;  %v11369_v11 = vld [vmem:[%s18863_s4 + $0x2e0] sm:$0xf]  ;;  %v12517_v8 = vld [vmem:[%s18863_s4 + $0x2ec] sm:$0xf0]  ;;  %v11226_v20 = vor.u32 %v12481_v37, %v11225_v59  ;;  %v10947_v35 = vld [vmem:[%s18864_s5 + $0x98] sm:$0xf0] }
 0x324   :  { %6505 = vmatpush.bf16.msrb.mxu2 %v10994_v55  ;;  %v10897_v55 = vld [vmem:[%s18864_s5 + $0x28] sm:$0xf]  ;;  %v11370_v30 = vor.u32 %v12517_v8, %v11369_v11  ;;  %v10950_v8 = vor.u32 %v12568_v18, %v10947_v35  ;;  %v12564_v37 = vld [vmem:[%s18864_s5 + $0x6c] sm:$0xf]  ;;  %v12511_v18 = vld [vmem:[%s18863_s4 + $0x2c4] sm:$0xf] }
 0x325   :  { %6131 = vmatmul.bf16.vlgmr.msra.gmra.mxu2 %v14039_v14  ;;  %v12569_v14 = vld [vmem:[%s18864_s5 + $0x8c] sm:$0xf0]  ;;  %10870 = vmatmul.msk.bf16.vlgmr.msra.gmra.mxu3 %vm4845_vm0, %v14139_v49  ;;  %v5887_v49 = vpop.f32.mrf.mxu3  ;;  %v11355_v35 = vld [vmem:[%s18863_s4 + $0x2d0] sm:$0xf0] }
 0x326   :  { %v10938_v32 = vor.u32 %v12569_v14, %v10937_v24  ;;  %v6285_v24 = vld [vmem:[%s18860_s1] sm:$0x3]  ;;  %v11114_v14 = vor.u32 %v12453_v7, %v11113_v4  ;;  %v10995_v49 = vld [vmem:[%s18864_s5 + $0xf8] sm:$0xf0]  ;;  %v12501_v4 = vld [vmem:[%s18863_s4 + $0x26c] sm:$0xf0] }
 0x327   :  { %6480 = vmatpush.bf16.msrb.mxu0 %v10970_v53  ;;  %6493 = vmatpush.bf16.msrb.mxu1 %v10974_v17  ;;  %v5900_v54 = vpop.f32.mrf.mxu0  ;;  %v5913_v51 = vpop.f32.mrf.mxu1  ;;  %v10898_v53 = vor.u32 %v12558_v56, %v10897_v55  ;;  %v10875_v17 = vld [vmem:[%s18864_s5 + $0x10] sm:$0xf0]  ;;  %v17877_v22 = vpack.c.bf16 %v6285_v24, %v6285_v24  ;;  %v10998_v19 = vor.u32 %v12580_v45, %v10995_v49  ;;  %v11033_v24 = vld [vmem:[%s18863_s4 + $0x40] sm:$0xf] }
 0x328   :  { %6506 = vmatpush.bf16.msrb.mxu2 %v10978_v27  ;;  %v5924_v21 = vpop.f32.mrf.mxu2  ;;  %v11065_v54 = vld [vmem:[%s18863_s4 + $0x80] sm:$0xf]  ;;  %v10966_v56 = vor.u32 %v12572_v52, %v10963_v44  ;;  %v10899_v52 = vld [vmem:[%s18864_s5 + $0x38] sm:$0xf0] }
 0x329   :  { %v17794_v43 = vadd.f32 %v5924_v21, %v5912_v40  ;;  %v12509_v21 = vld [vmem:[%s18863_s4 + $0x2ac] sm:$0xf0]  ;;  %6518 = vmatpush.bf16.msrb.mxu3 %v10998_v19  ;;  %v11321_v51 = vld [vmem:[%s18863_s4 + $0x280] sm:$0xf] }
 0x32b   :  { %6481 = vmatpush.bf16.msrb.mxu0 %v10954_v63  ;;  %6494 = vmatpush.bf16.msrb.mxu1 %v10958_v9  ;;  %v10874_v63 = vor.u32 %v12553_v0, %v10873_v6  ;;  %v10878_v9 = vor.u32 %v12551_v1, %v10875_v17  ;;  %v11049_v1 = vld [vmem:[%s18863_s4 + $0x60] sm:$0xf] }
 0x32c   :  { %6507 = vmatpush.bf16.msrb.mxu2 %v10962_v10  ;;  %v10882_v10 = vor.u32 %v12554_v58, %v10881_v16  ;;  %v11177_v17 = vld [vmem:[%s18863_s4 + $0x160] sm:$0xf]  ;;  %v12469_v58 = vld [vmem:[%s18863_s4 + $0x16c] sm:$0xf0] }
 0x32f   :  { %6482 = vmatpush.bf16.msrb.mxu0 %v10938_v32  ;;  %6495 = vmatpush.bf16.msrb.mxu1 %v10942_v26  ;;  %v11353_v32 = vld [vmem:[%s18863_s4 + $0x2c0] sm:$0xf]  ;;  %v12513_v26 = vld [vmem:[%s18863_s4 + $0x2cc] sm:$0xf0] }
 0x330   :  { %6508 = vmatpush.bf16.msrb.mxu2 %v10946_v33  ;;  %v5926_v27 = vpop.f32.mrf.mxu2  ;;  %v11098_v33 = vor.u32 %v12449_v2, %v11097_v12  ;;  %v11354_v40 = vor.u32 %v12513_v26, %v11353_v32  ;;  %v11289_v12 = vld [vmem:[%s18863_s4 + $0x240] sm:$0xf]  ;;  %v12497_v2 = vld [vmem:[%s18863_s4 + $0x24c] sm:$0xf0]  ;;  %v10931_v32 = vld [vmem:[%s18864_s5 + $0x78] sm:$0xf0] }
 0x331   :  { %v11305_v27 = vld [vmem:[%s18863_s4 + $0x260] sm:$0xf]  ;;  %v10934_v49 = vor.u32 %v12564_v37, %v10931_v32  ;;  %v11290_v19 = vor.u32 %v12497_v2, %v11289_v12  ;;  %v12443_v2 = vld [vmem:[%s18863_s4 + $0xa4] sm:$0xf]  ;;  %v11083_v37 = vld [vmem:[%s18863_s4 + $0xb0] sm:$0xf0] }
 0x333   :  { %6483 = vmatpush.bf16.msrb.mxu0 %v10922_v25  ;;  %6496 = vmatpush.bf16.msrb.mxu1 %v10926_v36  ;;  %v11209_v25 = vld [vmem:[%s18863_s4 + $0x1a0] sm:$0xf] }
 0x334   :  { %6509 = vmatpush.bf16.msrb.mxu2 %v10930_v15  ;;  %v11337_v15 = vld [vmem:[%s18863_s4 + $0x2a0] sm:$0xf]  ;;  %v11210_v47 = vor.u32 %v12477_v34, %v11209_v25  ;;  %v12560_v34 = vld [vmem:[%s18864_s5 + $0x4c] sm:$0xf] }
 0x335   :  { %v11338_v50 = vor.u32 %v12509_v21, %v11337_v15  ;;  %v11273_v25 = vld [vmem:[%s18863_s4 + $0x220] sm:$0xf]  ;;  %v10915_v15 = vld [vmem:[%s18864_s5 + $0x58] sm:$0xf0] }
 0x337   :  { %6484 = vmatpush.bf16.msrb.mxu0 %v10906_v41  ;;  %6497 = vmatpush.bf16.msrb.mxu1 %v10910_v31  ;;  %v12441_v41 = vld [vmem:[%s18863_s4 + $0x8c] sm:$0xf0]  ;;  %v11193_v31 = vld [vmem:[%s18863_s4 + $0x180] sm:$0xf] }
 0x338   :  { %6510 = vmatpush.bf16.msrb.mxu2 %v10914_v42  ;;  %v5937_v28 = vpop.f32.mrf.mxu3  ;;  %v12505_v42 = vld [vmem:[%s18863_s4 + $0x28c] sm:$0xf0]  ;;  %v11066_v55 = vor.u32 %v12441_v41, %v11065_v54  ;;  %v11115_v41 = vld [vmem:[%s18863_s4 + $0xf0] sm:$0xf0] }
 0x339   :  { %v5938_v36 = vadd.f32 %v5937_v28, %v17794_v43  ;;  %v10982_v43 = vor.u32 %v12576_v60, %v10979_v39  ;;  %v11322_v6 = vor.u32 %v12505_v42, %v11321_v51  ;;  %v11017_v28 = vld [vmem:[%s18863_s4 + $0x20] sm:$0xf]  ;;  %v12489_v54 = vld [vmem:[%s18863_s4 + $0x20c] sm:$0xf0]  ;;  %v11243_v51 = vld [vmem:[%s18863_s4 + $0x1f0] sm:$0xf0] }
 0x33a   :  { %v11001_v60 = vld [vmem:[%s18863_s4] sm:$0xf]  ;;  %v12556_v42 = vld [vmem:[%s18864_s5 + $0x2c] sm:$0xf] }
 0x33b   :  { %6485 = vmatpush.bf16.msrb.mxu0 %v10890_v38  ;;  %6498 = vmatpush.bf16.msrb.mxu1 %v10894_v57  ;;  %v11194_v57 = vor.u32 %v12473_v48, %v11193_v31  ;;  %v11129_v39 = vld [vmem:[%s18863_s4 + $0x100] sm:$0xf]  ;;  %v12483_v31 = vld [vmem:[%s18863_s4 + $0x1e4] sm:$0xf]  ;;  %v11002_v44 = vor.u32 %v12425_v46, %v11001_v60 }
 0x33c   :  { %6511 = vmatpush.bf16.msrb.mxu2 %v10898_v53  ;;  %6519 = vmatpush.bf16.msrb.mxu3 %v10982_v43  ;;  %v12437_v53 = vld [vmem:[%s18863_s4 + $0x6c] sm:$0xf0]  ;;  %v12503_v60 = vld [vmem:[%s18863_s4 + $0x284] sm:$0xf] }
 0x33d   :  { %v11050_v11 = vor.u32 %v12437_v53, %v11049_v1  ;;  %v11118_v53 = vor.u32 %v12451_v29, %v11115_v41  ;;  %v11051_v29 = vld [vmem:[%s18863_s4 + $0x70] sm:$0xf0] }
 0x33f   :  { %6486 = vmatpush.bf16.msrb.mxu0 %v10874_v63  ;;  %6499 = vmatpush.bf16.msrb.mxu1 %v10878_v9  ;;  %v5950_v61 = vpop.f32.mrf.mxu0  ;;  %v5963_v0 = vpop.f32.mrf.mxu1  ;;  %v11178_v63 = vor.u32 %v12469_v58, %v11177_v17  ;;  %v11306_v9 = vor.u32 %v12501_v4, %v11305_v27  ;;  %v11246_v17 = vor.u32 %v12483_v31, %v11243_v51  ;;  %v12479_v58 = vld [vmem:[%s18863_s4 + $0x1c4] sm:$0xf]  ;;  %v11227_v27 = vld [vmem:[%s18863_s4 + $0x1d0] sm:$0xf0] }
 0x340   :  { %6512 = vmatpush.bf16.msrb.mxu2 %v10882_v10  ;;  %v5951_v38 = vadd.f32 %v5950_v61, %v5938_v36  ;;  %v5939_v16 = vpop.f32.mrf.mxu3  ;;  %6520 = vmatpush.bf16.msrb.mxu3 %v10966_v56  ;;  %v12433_v10 = vld [vmem:[%s18863_s4 + $0x4c] sm:$0xf0]  ;;  %v12515_v61 = vld [vmem:[%s18863_s4 + $0x2e4] sm:$0xf]  ;;  %v10902_v56 = vor.u32 %v12556_v42, %v10899_v52  ;;  %v11230_v12 = vor.u32 %v12479_v58, %v11227_v27  ;;  %v11291_v27 = vld [vmem:[%s18863_s4 + $0x250] sm:$0xf0] }
 0x341   :  { %v11034_v26 = vor.u32 %v12433_v10, %v11033_v24  ;;  %v12493_v36 = vld [vmem:[%s18863_s4 + $0x22c] sm:$0xf0]  ;;  %v11099_v16 = vld [vmem:[%s18863_s4 + $0xd0] sm:$0xf0]  ;;  %v12499_v51 = vld [vmem:[%s18863_s4 + $0x264] sm:$0xf] }
 0x342   :  { %6487 = vmatmul.bf16.vlgmr.msrb.gmra.mxu0 %v17877_v22  ;;  %6500 = vmatmul.bf16.vlgmr.msrb.gmra.mxu1 %v17877_v22  ;;  %v5964_v7 = vadd.f32 %v5963_v0, %v5951_v38  ;;  %v11274_v43 = vor.u32 %v12493_v36, %v11273_v25  ;;  %v12618_v38 = vpop.eup %12617  ;;  %v12447_v0 = vld [vmem:[%s18863_s4 + $0xc4] sm:$0xf]  ;;  %v11067_v36 = vld [vmem:[%s18863_s4 + $0x90] sm:$0xf0] }
 0x343   :  { %7171 = vmatpush.bf16.msra.mxu0 %v11114_v14  ;;  %7184 = vmatpush.bf16.msra.mxu1 %v11242_v3  ;;  %v11161_v14 = vld [vmem:[%s18863_s4 + $0x140] sm:$0xf]  ;;  %v12620_v1 = vpop.eup %12619  ;;  %v18086_v24 = vpack.c.bf16 %v12618_v38, %v12618_v38  ;;  %v12439_v25 = vld [vmem:[%s18863_s4 + $0x84] sm:$0xf] }
 0x344   :  { %7197 = vmatpush.bf16.msra.mxu2 %v11370_v30  ;;  %v12465_v30 = vld [vmem:[%s18863_s4 + $0x14c] sm:$0xf0]  ;;  %6521 = vmatpush.bf16.msrb.mxu3 %v10950_v8  ;;  %v12622_v4 = vpop.eup %12621  ;;  %v10883_v8 = vld [vmem:[%s18864_s5 + $0x18] sm:$0xf0]  ;;  %v18088_v10 = vpack.c.bf16 %v12620_v1, %v12620_v1  ;;  %v12463_v1 = vld [vmem:[%s18863_s4 + $0x144] sm:$0xf] }
 0x345   :  { %6513 = vmatmul.bf16.vlgmr.msrb.gmra.mxu2 %v17877_v22 }
 0x347   :  { %7172 = vmatpush.bf16.msra.mxu0 %v11098_v33  ;;  %7185 = vmatpush.bf16.msra.mxu1 %v11226_v20  ;;  %v5952_v45 = vpop.f32.mrf.mxu0  ;;  %v11162_v33 = vor.u32 %v12465_v30, %v11161_v14  ;;  %v12429_v20 = vld [vmem:[%s18863_s4 + $0x2c] sm:$0xf0]  ;;  %v5965_v23 = vpop.f32.mrf.mxu1  ;;  %v11102_v30 = vor.u32 %v12447_v0, %v11099_v16 }
 0x348   :  { %7198 = vmatpush.bf16.msra.mxu2 %v11354_v40  ;;  %v5976_v3 = vpop.f32.mrf.mxu2  ;;  %v11145_v40 = vld [vmem:[%s18863_s4 + $0x120] sm:$0xf]  ;;  %6522 = vmatpush.bf16.msrb.mxu3 %v10934_v49  ;;  %v11018_v21 = vor.u32 %v12429_v20, %v11017_v28  ;;  %v12475_v45 = vld [vmem:[%s18863_s4 + $0x1a4] sm:$0xf]  ;;  %v11211_v49 = vld [vmem:[%s18863_s4 + $0x1b0] sm:$0xf0]  ;;  %v11086_v23 = vor.u32 %v12443_v2, %v11083_v37 }
 0x349   :  { %v17979_v59 = vadd.f32 %v5976_v3, %v5964_v7  ;;  %v11146_v13 = vor.u32 %v12461_v5, %v11145_v40  ;;  %v18090_v3 = vpack.c.bf16 %v12622_v4, %v12622_v4  ;;  %v11339_v28 = vld [vmem:[%s18863_s4 + $0x2b0] sm:$0xf0]  ;;  %v11481_v20 = vld [vmem:[%s18863_s4 + $0x3c0] sm:$0xf]  ;;  %v12545_v40 = vld [vmem:[%s18863_s4 + $0x3cc] sm:$0xf0]  ;;  %v11214_v5 = vor.u32 %v12475_v45, %v11211_v49 }
 0x34a   :  { %v11482_v46 = vor.u32 %v12545_v40, %v11481_v20  ;;  %v11433_v4 = vld [vmem:[%s18863_s4 + $0x360] sm:$0xf]  ;;  %v12529_v49 = vld [vmem:[%s18863_s4 + $0x34c] sm:$0xf0]  ;;  %v11003_v20 = vld [vmem:[%s18863_s4 + $0x10] sm:$0xf0] }
 0x34b   :  { %7173 = vmatpush.bf16.msra.mxu0 %v11082_v62  ;;  %7186 = vmatpush.bf16.msra.mxu1 %v11210_v47  ;;  %v10918_v62 = vor.u32 %v12560_v34, %v10915_v15  ;;  %v12457_v47 = vld [vmem:[%s18863_s4 + $0x10c] sm:$0xf0]  ;;  %v12471_v15 = vld [vmem:[%s18863_s4 + $0x184] sm:$0xf]  ;;  %v11417_v45 = vld [vmem:[%s18863_s4 + $0x340] sm:$0xf] }
 0x34c   :  { %7199 = vmatpush.bf16.msra.mxu2 %v11338_v50  ;;  %v11257_v50 = vld [vmem:[%s18863_s4 + $0x200] sm:$0xf]  ;;  %v12455_v40 = vld [vmem:[%s18863_s4 + $0x104] sm:$0xf] }
 0x34d   :  { %6523 = vmatpush.bf16.msrb.mxu3 %v10918_v62  ;;  %v11465_v62 = vld [vmem:[%s18863_s4 + $0x3a0] sm:$0xf] }
 0x34f   :  { %7174 = vmatpush.bf16.msra.mxu0 %v11066_v55  ;;  %7187 = vmatpush.bf16.msra.mxu1 %v11194_v57  ;;  %v11371_v55 = vld [vmem:[%s18863_s4 + $0x2f0] sm:$0xf0]  ;;  %v11130_v57 = vor.u32 %v12457_v47, %v11129_v39  ;;  %v11070_v47 = vor.u32 %v12439_v25, %v11067_v36  ;;  %v12487_v25 = vld [vmem:[%s18863_s4 + $0x204] sm:$0xf] }
 0x350   :  { %7200 = vmatpush.bf16.msra.mxu2 %v11322_v6  ;;  %v5978_v48 = vpop.f32.mrf.mxu2  ;;  %v11258_v6 = vor.u32 %v12489_v54, %v11257_v50  ;;  %v11374_v7 = vor.u32 %v12515_v61, %v11371_v55  ;;  %v11323_v39 = vld [vmem:[%s18863_s4 + $0x290] sm:$0xf0]  ;;  %v12435_v54 = vld [vmem:[%s18863_s4 + $0x64] sm:$0xf]  ;;  %v11449_v61 = vld [vmem:[%s18863_s4 + $0x380] sm:$0xf] }
 0x351   :  { %6524 = vmatpush.bf16.msrb.mxu3 %v10902_v56  ;;  %v11326_v41 = vor.u32 %v12503_v60, %v11323_v39  ;;  %v11179_v48 = vld [vmem:[%s18863_s4 + $0x170] sm:$0xf0]  ;;  %v12537_v55 = vld [vmem:[%s18863_s4 + $0x38c] sm:$0xf0]  ;;  %v11054_v56 = vor.u32 %v12435_v54, %v11051_v29  ;;  %v11249_v60 = vld [vmem:[%s18863_s4 + $0x1e8] sm:$0xf] }
 0x352   :  { %v11450_v16 = vor.u32 %v12537_v55, %v11449_v61  ;;  %v11259_v36 = vld [vmem:[%s18863_s4 + $0x210] sm:$0xf0]  ;;  %v12486_v39 = vld [vmem:[%s18863_s4 + $0x1f4] sm:$0xf0]  ;;  %v11361_v55 = vld [vmem:[%s18863_s4 + $0x2c8] sm:$0xf] }
 0x353   :  { %7175 = vmatpush.bf16.msra.mxu0 %v11050_v11  ;;  %7188 = vmatpush.bf16.msra.mxu1 %v11178_v63  ;;  %v12552_v11 = vld [vmem:[%s18864_s5 + $0xc] sm:$0xf]  ;;  %v11497_v63 = vld [vmem:[%s18863_s4 + $0x3e0] sm:$0xf]  ;;  %v11262_v54 = vor.u32 %v12487_v25, %v11259_v36  ;;  %v12482_v61 = vld [vmem:[%s18863_s4 + $0x1d4] sm:$0xf0] }
 0x354   :  { %7201 = vmatpush.bf16.msra.mxu2 %v11306_v9  ;;  %v12549_v9 = vld [vmem:[%s18863_s4 + $0x3ec] sm:$0xf0]  ;;  %v10886_v14 = vor.u32 %v12552_v11, %v10883_v8  ;;  %v12427_v11 = vld [vmem:[%s18863_s4 + $0x24] sm:$0xf]  ;;  %v11019_v8 = vld [vmem:[%s18863_s4 + $0x30] sm:$0xf0] }
 0x356   :  { %6525 = vmatpush.bf16.msrb.mxu3 %v10886_v14  ;;  %v12459_v14 = vld [vmem:[%s18863_s4 + $0x124] sm:$0xf] }
 0x357   :  { %7176 = vmatpush.bf16.msra.mxu0 %v11034_v26  ;;  %7189 = vmatpush.bf16.msra.mxu1 %v11162_v33  ;;  %v11358_v26 = vor.u32 %v12511_v18, %v11355_v35  ;;  %v12507_v33 = vld [vmem:[%s18863_s4 + $0x2a4] sm:$0xf] }
 0x358   :  { %7202 = vmatpush.bf16.msra.mxu2 %v11290_v19  ;;  %v18099_v32 = vpop.f32.mrf.mxu3  ;;  %v11498_v19 = vor.u32 %v12549_v9, %v11497_v63  ;;  %v11342_v34 = vor.u32 %v12507_v33, %v11339_v28  ;;  %v11022_v33 = vor.u32 %v12427_v11, %v11019_v8  ;;  %v12423_v28 = vld [vmem:[%s18863_s4 + $0x4] sm:$0xf]  ;;  %v11345_v11 = vld [vmem:[%s18863_s4 + $0x2a8] sm:$0xf]  ;;  %v12510_v8 = vld [vmem:[%s18863_s4 + $0x2b4] sm:$0xf0] }
 0x359   :  { %6526 = vmatmul.bf16.vlgmr.msrb.gmra.mxu3 %v17877_v22  ;;  %v12467_v22 = vld [vmem:[%s18863_s4 + $0x164] sm:$0xf] }
 0x35a   :  { %7210 = vmatpush.bf16.msra.mxu3 %v11498_v19  ;;  %v11182_v38 = vor.u32 %v12467_v22, %v11179_v48  ;;  %v12525_v22 = vld [vmem:[%s18863_s4 + $0x32c] sm:$0xf0]  ;;  %v11250_v48 = vor.u32 %v12486_v39, %v11249_v60  ;;  %v11467_v60 = vld [vmem:[%s18863_s4 + $0x3b0] sm:$0xf0]  ;;  %v12470_v39 = vld [vmem:[%s18863_s4 + $0x174] sm:$0xf0] }
 0x35b   :  { %7177 = vmatpush.bf16.msra.mxu0 %v11018_v21  ;;  %7190 = vmatpush.bf16.msra.mxu1 %v11146_v13  ;;  %v11195_v21 = vld [vmem:[%s18863_s4 + $0x190] sm:$0xf0]  ;;  %v12541_v13 = vld [vmem:[%s18863_s4 + $0x3ac] sm:$0xf0] }
 0x35c   :  { %7203 = vmatpush.bf16.msra.mxu2 %v11274_v43  ;;  %v11198_v50 = vor.u32 %v12471_v15, %v11195_v21  ;;  %v11466_v52 = vor.u32 %v12541_v13, %v11465_v62  ;;  %v11121_v15 = vld [vmem:[%s18863_s4 + $0xe8] sm:$0xf]  ;;  %v12454_v21 = vld [vmem:[%s18863_s4 + $0xf4] sm:$0xf0] }
 0x35d   :  { %v11377_v62 = vld [vmem:[%s18863_s4 + $0x2e8] sm:$0xf]  ;;  %v12518_v13 = vld [vmem:[%s18863_s4 + $0x2f4] sm:$0xf0]  ;;  %v11122_v29 = vor.u32 %v12454_v21, %v11121_v15  ;;  %v12539_v21 = vld [vmem:[%s18863_s4 + $0x3a4] sm:$0xf] }
 0x35e   :  { %7211 = vmatpush.bf16.msra.mxu3 %v11482_v46  ;;  %v11185_v15 = vld [vmem:[%s18863_s4 + $0x168] sm:$0xf] }
 0x35f   :  { %7178 = vmatpush.bf16.msra.mxu0 %v11002_v44  ;;  %7191 = vmatpush.bf16.msra.mxu1 %v11130_v57  ;;  %v18146_v43 = vpop.f32.mrf.mxu0  ;;  %v18154_v31 = vpop.f32.mrf.mxu1  ;;  %v11307_v44 = vld [vmem:[%s18863_s4 + $0x270] sm:$0xf0]  ;;  %v12431_v57 = vld [vmem:[%s18863_s4 + $0x44] sm:$0xf] }
 0x360   :  { %7204 = vmatpush.bf16.msra.mxu2 %v11258_v6  ;;  %v5991_v42 = vpop.f32.mrf.mxu3  ;;  %v11035_v6 = vld [vmem:[%s18863_s4 + $0x50] sm:$0xf0]  ;;  %v11310_v0 = vor.u32 %v12499_v51, %v11307_v44  ;;  %v11378_v51 = vor.u32 %v12518_v13, %v11377_v62  ;;  %v11233_v44 = vld [vmem:[%s18863_s4 + $0x1c8] sm:$0xf]  ;;  %v12502_v13 = vld [vmem:[%s18863_s4 + $0x274] sm:$0xf0] }
 0x361   :  { %v11038_v18 = vor.u32 %v12431_v57, %v11035_v6  ;;  %v11105_v42 = vld [vmem:[%s18863_s4 + $0xc8] sm:$0xf] }
 0x362   :  { %7179 = vmatmul.bf16.vlgmr.msra.gmra.mxu0 %v18086_v24  ;;  %7192 = vmatmul.bf16.vlgmr.msra.gmra.mxu1 %v18088_v10  ;;  %v11313_v62 = vld [vmem:[%s18863_s4 + $0x268] sm:$0xf] }
 0x363   :  { %7223 = vmatpush.bf16.msrb.mxu0 %v11118_v53  ;;  %7236 = vmatpush.bf16.msrb.mxu1 %v11246_v17  ;;  %v11163_v53 = vld [vmem:[%s18863_s4 + $0x150] sm:$0xf0]  ;;  %v12495_v17 = vld [vmem:[%s18863_s4 + $0x244] sm:$0xf] }
 0x364   :  { %7249 = vmatpush.bf16.msrb.mxu2 %v11374_v7  ;;  %7212 = vmatpush.bf16.msra.mxu3 %v11466_v52  ;;  %v12533_v7 = vld [vmem:[%s18863_s4 + $0x36c] sm:$0xf0]  ;;  %v11166_v35 = vor.u32 %v12463_v1, %v11163_v53  ;;  %v11294_v9 = vor.u32 %v12495_v17, %v11291_v27  ;;  %v12450_v52 = vld [vmem:[%s18863_s4 + $0xd4] sm:$0xf0]  ;;  %v11385_v1 = vld [vmem:[%s18863_s4 + $0x300] sm:$0xf]  ;;  %v11234_v17 = vor.u32 %v12482_v61, %v11233_v44 }
 0x365   :  { %7205 = vmatmul.bf16.vlgmr.msra.gmra.mxu2 %v18090_v3  ;;  %v11434_v37 = vor.u32 %v12533_v7, %v11433_v4  ;;  %v11106_v6 = vor.u32 %v12450_v52, %v11105_v42  ;;  %v12521_v53 = vld [vmem:[%s18863_s4 + $0x30c] sm:$0xf0]  ;;  %v11217_v27 = vld [vmem:[%s18863_s4 + $0x1a8] sm:$0xf]  ;;  %v12547_v4 = vld [vmem:[%s18863_s4 + $0x3e4] sm:$0xf] }
 0x366   :  { %v11499_v7 = vld [vmem:[%s18863_s4 + $0x3f0] sm:$0xf0]  ;;  %v12535_v42 = vld [vmem:[%s18863_s4 + $0x384] sm:$0xf]  ;;  %v12466_v44 = vld [vmem:[%s18863_s4 + $0x154] sm:$0xf0] }
 0x367   :  { %7224 = vmatpush.bf16.msrb.mxu0 %v11102_v30  ;;  %7237 = vmatpush.bf16.msrb.mxu1 %v11230_v12  ;;  %v6004_v63 = vpop.f32.mrf.mxu0  ;;  %v11147_v30 = vld [vmem:[%s18863_s4 + $0x130] sm:$0xf0]  ;;  %v12491_v12 = vld [vmem:[%s18863_s4 + $0x224] sm:$0xf]  ;;  %v6017_v2 = vpop.f32.mrf.mxu1  ;;  %v11297_v61 = vld [vmem:[%s18863_s4 + $0x248] sm:$0xf] }
 0x368   :  { %7250 = vmatpush.bf16.msrb.mxu2 %v11358_v26  ;;  %v18189_v58 = vpop.f32.mrf.mxu2  ;;  %7213 = vmatpush.bf16.msra.mxu3 %v11450_v16  ;;  %v11275_v26 = vld [vmem:[%s18863_s4 + $0x230] sm:$0xf0]  ;;  %v11150_v19 = vor.u32 %v12459_v14, %v11147_v30  ;;  %v11386_v63 = vor.u32 %v12521_v53, %v11385_v1  ;;  %v11073_v14 = vld [vmem:[%s18863_s4 + $0x88] sm:$0xf]  ;;  %v12442_v30 = vld [vmem:[%s18863_s4 + $0x94] sm:$0xf0] }
 0x369   :  { %v11451_v52 = vld [vmem:[%s18863_s4 + $0x390] sm:$0xf0] }
 0x36b   :  { %7225 = vmatpush.bf16.msrb.mxu0 %v11086_v23  ;;  %7238 = vmatpush.bf16.msrb.mxu1 %v11214_v5  ;;  %v11278_v23 = vor.u32 %v12491_v12, %v11275_v26  ;;  %v11131_v5 = vld [vmem:[%s18863_s4 + $0x110] sm:$0xf0]  ;;  %v11502_v12 = vor.u32 %v12547_v4, %v11499_v7  ;;  %v11201_v26 = vld [vmem:[%s18863_s4 + $0x188] sm:$0xf]  ;;  %v5990_v7 = vadd.f32 %v18099_v32, %v17979_v59  ;;  %v12426_v32 = vld [vmem:[%s18863_s4 + $0x14] sm:$0xf0] }
 0x36c   :  { %7251 = vmatpush.bf16.msrb.mxu2 %v11342_v34  ;;  %7214 = vmatpush.bf16.msra.mxu3 %v11434_v37  ;;  %v11418_v34 = vor.u32 %v12529_v49, %v11417_v45  ;;  %v11346_v37 = vor.u32 %v12510_v8, %v11345_v11  ;;  %v12543_v45 = vld [vmem:[%s18863_s4 + $0x3c4] sm:$0xf]  ;;  %v11483_v49 = vld [vmem:[%s18863_s4 + $0x3d0] sm:$0xf0]  ;;  %v11281_v11 = vld [vmem:[%s18863_s4 + $0x228] sm:$0xf] }
 0x36d   :  { %v11435_v4 = vld [vmem:[%s18863_s4 + $0x370] sm:$0xf0]  ;;  %v12494_v8 = vld [vmem:[%s18863_s4 + $0x234] sm:$0xf0]  ;;  %v11009_v59 = vld [vmem:[%s18863_s4 + $0x8] sm:$0xf] }
 0x36f   :  { %7226 = vmatpush.bf16.msrb.mxu0 %v11070_v47  ;;  %7239 = vmatpush.bf16.msrb.mxu1 %v11198_v50  ;;  %v11006_v47 = vor.u32 %v12423_v28, %v11003_v20  ;;  %v11134_v50 = vor.u32 %v12455_v40, %v11131_v5  ;;  %v12506_v28 = vld [vmem:[%s18863_s4 + $0x294] sm:$0xf0]  ;;  %v11074_v20 = vor.u32 %v12442_v30, %v11073_v14  ;;  %v11057_v40 = vld [vmem:[%s18863_s4 + $0x68] sm:$0xf] }
 0x370   :  { %7252 = vmatpush.bf16.msrb.mxu2 %v11326_v41  ;;  %v6030_v46 = vpop.f32.mrf.mxu2  ;;  %7215 = vmatpush.bf16.msra.mxu3 %v11418_v34  ;;  %v11401_v41 = vld [vmem:[%s18863_s4 + $0x320] sm:$0xf]  ;;  %v11486_v5 = vor.u32 %v12543_v45, %v11483_v49  ;;  %v11137_v30 = vld [vmem:[%s18863_s4 + $0x108] sm:$0xf]  ;;  %v11419_v45 = vld [vmem:[%s18863_s4 + $0x350] sm:$0xf0] }
 0x371   :  { %v11402_v57 = vor.u32 %v12525_v22, %v11401_v41  ;;  %v11470_v41 = vor.u32 %v12539_v21, %v11467_v60  ;;  %v11186_v22 = vor.u32 %v12470_v39, %v11185_v15  ;;  %v11265_v49 = vld [vmem:[%s18863_s4 + $0x208] sm:$0xf]  ;;  %v11379_v15 = vld [vmem:[%s18863_s4 + $0x2f8] sm:$0xf0] }
 0x373   :  { %7227 = vmatpush.bf16.msrb.mxu0 %v11054_v56  ;;  %7240 = vmatpush.bf16.msrb.mxu1 %v11182_v38  ;;  %v12514_v56 = vld [vmem:[%s18863_s4 + $0x2d4] sm:$0xf0]  ;;  %v11089_v38 = vld [vmem:[%s18863_s4 + $0xa8] sm:$0xf] }
 0x374   :  { %7253 = vmatpush.bf16.msrb.mxu2 %v11310_v0  ;;  %v12446_v0 = vld [vmem:[%s18863_s4 + $0xb4] sm:$0xf0]  ;;  %v11362_v16 = vor.u32 %v12514_v56, %v11361_v55  ;;  %7216 = vmatpush.bf16.msra.mxu3 %v11402_v57  ;;  %v11025_v57 = vld [vmem:[%s18863_s4 + $0x28] sm:$0xf] }
 0x375   :  { %v12498_v55 = vld [vmem:[%s18863_s4 + $0x254] sm:$0xf0] }
 0x376   :  { %v11298_v53 = vor.u32 %v12498_v55, %v11297_v61 }
 0x377   :  { %7228 = vmatpush.bf16.msrb.mxu0 %v11038_v18  ;;  %7241 = vmatpush.bf16.msrb.mxu1 %v11166_v35  ;;  %v12478_v35 = vld [vmem:[%s18863_s4 + $0x1b4] sm:$0xf0] }
 0x378   :  { %7254 = vmatpush.bf16.msrb.mxu2 %v11294_v9  ;;  %v18307_v18 = vpop.f32.mrf.mxu3  ;;  %v11090_v9 = vor.u32 %v12446_v0, %v11089_v38  ;;  %v11218_v2 = vor.u32 %v12478_v35, %v11217_v27  ;;  %7217 = vmatpush.bf16.msra.mxu3 %v11386_v63  ;;  %v11454_v0 = vor.u32 %v12535_v42, %v11451_v52  ;;  %v12531_v27 = vld [vmem:[%s18863_s4 + $0x364] sm:$0xf]  ;;  %v12462_v35 = vld [vmem:[%s18863_s4 + $0x134] sm:$0xf0]  ;;  %v11363_v42 = vld [vmem:[%s18863_s4 + $0x2d8] sm:$0xf0] }
 0x37b   :  { %7229 = vmatpush.bf16.msrb.mxu0 %v11022_v33  ;;  %7242 = vmatpush.bf16.msrb.mxu1 %v11150_v19  ;;  %v12474_v33 = vld [vmem:[%s18863_s4 + $0x194] sm:$0xf0]  ;;  %v11329_v19 = vld [vmem:[%s18863_s4 + $0x288] sm:$0xf] }
 0x37c   :  { %7255 = vmatpush.bf16.msrb.mxu2 %v11278_v23  ;;  %v12438_v23 = vld [vmem:[%s18863_s4 + $0x74] sm:$0xf0]  ;;  %7262 = vmatpush.bf16.msrb.mxu3 %v11502_v12  ;;  %v11202_v36 = vor.u32 %v12474_v33, %v11201_v26  ;;  %v11330_v34 = vor.u32 %v12506_v28, %v11329_v19  ;;  %v11438_v12 = vor.u32 %v12531_v27, %v11435_v4  ;;  %v12527_v26 = vld [vmem:[%s18863_s4 + $0x344] sm:$0xf]  ;;  %v12452_v19 = vld [vmem:[%s18863_s4 + $0xec] sm:$0xf] }
 0x37d   :  { %v12490_v33 = vld [vmem:[%s18863_s4 + $0x214] sm:$0xf0]  ;;  %v11123_v28 = vld [vmem:[%s18863_s4 + $0xf8] sm:$0xf0]  ;;  %v11422_v21 = vor.u32 %v12527_v26, %v11419_v45 }
 0x37e   :  { %v11266_v39 = vor.u32 %v12490_v33, %v11265_v49  ;;  %v11059_v45 = vld [vmem:[%s18863_s4 + $0x78] sm:$0xf0]  ;;  %v12468_v49 = vld [vmem:[%s18863_s4 + $0x16c] sm:$0xf] }
 0x37f   :  { %7230 = vmatpush.bf16.msrb.mxu0 %v11006_v47  ;;  %7243 = vmatpush.bf16.msrb.mxu1 %v11134_v50  ;;  %v18349_v25 = vpop.f32.mrf.mxu0  ;;  %v18360_v46 = vpop.f32.mrf.mxu1  ;;  %v11058_v50 = vor.u32 %v12438_v23, %v11057_v40  ;;  %v11251_v40 = vld [vmem:[%s18863_s4 + $0x1f8] sm:$0xf0] }
 0x380   :  { %7256 = vmatpush.bf16.msrb.mxu2 %v11262_v54  ;;  %v6043_v47 = vpop.f32.mrf.mxu3  ;;  %v11041_v54 = vld [vmem:[%s18863_s4 + $0x48] sm:$0xf]  ;;  %7263 = vmatpush.bf16.msrb.mxu3 %v11486_v5  ;;  %v11187_v33 = vld [vmem:[%s18863_s4 + $0x178] sm:$0xf0] }
 0x381   :  { %v12448_v47 = vld [vmem:[%s18863_s4 + $0xcc] sm:$0xf] }
 0x382   :  { %7231 = vmatmul.bf16.vlgmr.msrb.gmra.mxu0 %v18086_v24  ;;  %7244 = vmatmul.bf16.vlgmr.msrb.gmra.mxu1 %v18088_v10 }
 0x383   :  { %7275 = vmatpush.bf16.msra.mxu0 %v11122_v29  ;;  %7288 = vmatpush.bf16.msra.mxu1 %v11250_v48  ;;  %v12434_v29 = vld [vmem:[%s18863_s4 + $0x54] sm:$0xf0]  ;;  %v11314_v48 = vor.u32 %v12502_v13, %v11313_v62  ;;  %v11126_v13 = vor.u32 %v12452_v19, %v11123_v28 }
 0x384   :  { %7301 = vmatpush.bf16.msra.mxu2 %v11378_v51  ;;  %v11169_v51 = vld [vmem:[%s18863_s4 + $0x148] sm:$0xf]  ;;  %v11042_v38 = vor.u32 %v12434_v29, %v11041_v54  ;;  %7264 = vmatpush.bf16.msrb.mxu3 %v11470_v41  ;;  %v11403_v54 = vld [vmem:[%s18863_s4 + $0x330] sm:$0xf0]  ;;  %v11107_v41 = vld [vmem:[%s18863_s4 + $0xd8] sm:$0xf0] }
 0x385   :  { %7257 = vmatmul.bf16.vlgmr.msrb.gmra.mxu2 %v18090_v3  ;;  %v11170_v1 = vor.u32 %v12466_v44, %v11169_v51  ;;  %v12512_v51 = vld [vmem:[%s18863_s4 + $0x2cc] sm:$0xf]  ;;  %v11110_v61 = vor.u32 %v12448_v47, %v11107_v41 }
 0x386   :  { %v12428_v41 = vld [vmem:[%s18863_s4 + $0x2c] sm:$0xf] }
 0x387   :  { %7276 = vmatpush.bf16.msra.mxu0 %v11106_v6  ;;  %7289 = vmatpush.bf16.msra.mxu1 %v11234_v17  ;;  %v12430_v6 = vld [vmem:[%s18863_s4 + $0x34] sm:$0xf0]  ;;  %v11153_v17 = vld [vmem:[%s18863_s4 + $0x128] sm:$0xf]  ;;  %v6069_v63 = vpop.f32.mrf.mxu1 }
 0x388   :  { %7302 = vmatpush.bf16.msra.mxu2 %v11362_v16  ;;  %v18395_v56 = vpop.f32.mrf.mxu2  ;;  %v6056_v16 = vpop.f32.mrf.mxu0  ;;  %v11026_v14 = vor.u32 %v12430_v6, %v11025_v57  ;;  %7265 = vmatpush.bf16.msrb.mxu3 %v11454_v0  ;;  %v11387_v57 = vld [vmem:[%s18863_s4 + $0x310] sm:$0xf0]  ;;  %v11091_v6 = vld [vmem:[%s18863_s4 + $0xb8] sm:$0xf0]  ;;  %v12476_v0 = vld [vmem:[%s18863_s4 + $0x1ac] sm:$0xf] }
 0x389   :  { %v11347_v16 = vld [vmem:[%s18863_s4 + $0x2b8] sm:$0xf0] }
 0x38a   :  { %v11075_v63 = vld [vmem:[%s18863_s4 + $0x98] sm:$0xf0] }
 0x38b   :  { %7277 = vmatpush.bf16.msra.mxu0 %v11090_v9  ;;  %7290 = vmatpush.bf16.msra.mxu1 %v11218_v2  ;;  %v6003_v9 = vadd.f32 %v18146_v43, %v5990_v7  ;;  %v11154_v2 = vor.u32 %v12462_v35, %v11153_v17  ;;  %v11282_v43 = vor.u32 %v12494_v8, %v11281_v11  ;;  %v12508_v17 = vld [vmem:[%s18863_s4 + $0x2ac] sm:$0xf] }
 0x38c   :  { %7303 = vmatpush.bf16.msra.mxu2 %v11346_v37  ;;  %v12458_v37 = vld [vmem:[%s18863_s4 + $0x114] sm:$0xf0]  ;;  %7266 = vmatpush.bf16.msrb.mxu3 %v11438_v12  ;;  %v12440_v11 = vld [vmem:[%s18863_s4 + $0x8c] sm:$0xf]  ;;  %v11350_v8 = vor.u32 %v12508_v17, %v11347_v16  ;;  %v11267_v17 = vld [vmem:[%s18863_s4 + $0x218] sm:$0xf0] }
 0x38d   :  { %v6016_v5 = vadd.f32 %v18154_v31, %v6003_v9  ;;  %v11138_v60 = vor.u32 %v12458_v37, %v11137_v30  ;;  %v12472_v9 = vld [vmem:[%s18863_s4 + $0x18c] sm:$0xf] }
 0x38e   :  { %v12436_v37 = vld [vmem:[%s18863_s4 + $0x6c] sm:$0xf] }
 0x38f   :  { %7278 = vmatpush.bf16.msra.mxu0 %v11074_v20  ;;  %7291 = vmatpush.bf16.msra.mxu1 %v11202_v36  ;;  %v12484_v20 = vld [vmem:[%s18863_s4 + $0x1ec] sm:$0xf]  ;;  %v11010_v36 = vor.u32 %v12426_v32, %v11009_v59  ;;  %v6029_v62 = vadd.f32 %v18189_v58, %v6016_v5  ;;  %v11331_v32 = vld [vmem:[%s18863_s4 + $0x298] sm:$0xf0]  ;;  %v11190_v5 = vor.u32 %v12468_v49, %v11187_v33  ;;  %v11425_v33 = vld [vmem:[%s18863_s4 + $0x348] sm:$0xf] }
 0x390   :  { %7304 = vmatpush.bf16.msra.mxu2 %v11330_v34  ;;  %v6082_v23 = vpop.f32.mrf.mxu2  ;;  %v12516_v34 = vld [vmem:[%s18863_s4 + $0x2ec] sm:$0xf]  ;;  %v11254_v31 = vor.u32 %v12484_v20, %v11251_v40  ;;  %7267 = vmatpush.bf16.msrb.mxu3 %v11422_v21  ;;  %v11315_v40 = vld [vmem:[%s18863_s4 + $0x278] sm:$0xf0] }
 0x391   :  { %v11382_v29 = vor.u32 %v12516_v34, %v11379_v15  ;;  %v12480_v58 = vld [vmem:[%s18863_s4 + $0x1cc] sm:$0xf]  ;;  %v11062_v23 = vor.u32 %v12436_v37, %v11059_v45  ;;  %v11043_v15 = vld [vmem:[%s18863_s4 + $0x58] sm:$0xf0] }
 0x392   :  { %v12504_v59 = vld [vmem:[%s18863_s4 + $0x28c] sm:$0xf] }
 0x393   :  { %7279 = vmatpush.bf16.msra.mxu0 %v11058_v50  ;;  %7292 = vmatpush.bf16.msra.mxu1 %v11186_v22  ;;  %v12523_v50 = vld [vmem:[%s18863_s4 + $0x324] sm:$0xf]  ;;  %v11235_v22 = vld [vmem:[%s18863_s4 + $0x1d8] sm:$0xf0]  ;;  %v11334_v26 = vor.u32 %v12504_v59, %v11331_v32  ;;  %v12500_v20 = vld [vmem:[%s18863_s4 + $0x26c] sm:$0xf] }
 0x394   :  { %7305 = vmatpush.bf16.msra.mxu2 %v11314_v48  ;;  %v6042_v48 = vadd.f32 %v18307_v18, %v6029_v62  ;;  %v11406_v52 = vor.u32 %v12523_v50, %v11403_v54  ;;  %v11238_v55 = vor.u32 %v12480_v58, %v11235_v22  ;;  %v12444_v18 = vld [vmem:[%s18863_s4 + $0xac] sm:$0xf]  ;;  %v11318_v34 = vor.u32 %v12500_v20, %v11315_v40  ;;  %v12546_v59 = vld [vmem:[%s18863_s4 + $0x3d4] sm:$0xf0] }
 0x395   :  { %v11094_v7 = vor.u32 %v12444_v18, %v11091_v6  ;;  %v12464_v21 = vld [vmem:[%s18863_s4 + $0x14c] sm:$0xf]  ;;  %v11011_v6 = vld [vmem:[%s18863_s4 + $0x18] sm:$0xf0] }
 0x396   :  { %v6055_v44 = vadd.f32 %v18349_v25, %v6042_v48  ;;  %v11366_v25 = vor.u32 %v12512_v51, %v11363_v42  ;;  %7268 = vmatpush.bf16.msrb.mxu3 %v11406_v52  ;;  %v12496_v62 = vld [vmem:[%s18863_s4 + $0x24c] sm:$0xf]  ;;  %v11027_v48 = vld [vmem:[%s18863_s4 + $0x38] sm:$0xf0] }
 0x397   :  { %7280 = vmatpush.bf16.msra.mxu0 %v11042_v38  ;;  %7293 = vmatpush.bf16.msra.mxu1 %v11170_v1  ;;  %v12519_v38 = vld [vmem:[%s18863_s4 + $0x304] sm:$0xf]  ;;  %v11219_v1 = vld [vmem:[%s18863_s4 + $0x1b8] sm:$0xf0]  ;;  %v12460_v51 = vld [vmem:[%s18863_s4 + $0x12c] sm:$0xf]  ;;  %v11030_v18 = vor.u32 %v12428_v41, %v11027_v48 }
 0x398   :  { %7306 = vmatpush.bf16.msra.mxu2 %v11298_v53  ;;  %v6093_v53 = vpop.f32.mrf.mxu3  ;;  %v11390_v27 = vor.u32 %v12519_v38, %v11387_v57  ;;  %v6068_v4 = vadd.f32 %v18360_v46, %v6055_v44  ;;  %v11222_v35 = vor.u32 %v12476_v0, %v11219_v1  ;;  %v11203_v46 = vld [vmem:[%s18863_s4 + $0x198] sm:$0xf0]  ;;  %v12492_v52 = vld [vmem:[%s18863_s4 + $0x22c] sm:$0xf] }
 0x399   :  { %v11155_v42 = vld [vmem:[%s18863_s4 + $0x138] sm:$0xf0]  ;;  %v12424_v57 = vld [vmem:[%s18863_s4 + $0xc] sm:$0xf] }
 0x39a   :  { %7269 = vmatpush.bf16.msrb.mxu3 %v11390_v27  ;;  %v11283_v44 = vld [vmem:[%s18863_s4 + $0x238] sm:$0xf0]  ;;  %v11158_v38 = vor.u32 %v12460_v51, %v11155_v42  ;;  %v12456_v0 = vld [vmem:[%s18863_s4 + $0x10c] sm:$0xf]  ;;  %v11014_v27 = vor.u32 %v12424_v57, %v11011_v6 }
 0x39b   :  { %7281 = vmatpush.bf16.msra.mxu0 %v11026_v14  ;;  %7294 = vmatpush.bf16.msra.mxu1 %v11154_v2  ;;  %v6081_v14 = vadd.f32 %v18395_v56, %v6068_v4  ;;  %v11078_v2 = vor.u32 %v12440_v11, %v11075_v63  ;;  %v11139_v1 = vld [vmem:[%s18863_s4 + $0x118] sm:$0xf0]  ;;  %v12550_v11 = vld [vmem:[%s18863_s4 + $0x3f4] sm:$0xf0]  ;;  %v12528_v6 = vld [vmem:[%s18863_s4 + $0x34c] sm:$0xf] }
 0x39c   :  { %7307 = vmatpush.bf16.msra.mxu2 %v11282_v43  ;;  %v11206_v43 = vor.u32 %v12472_v9, %v11203_v46  ;;  %v11142_v4 = vor.u32 %v12456_v0, %v11139_v1  ;;  %v11459_v48 = vld [vmem:[%s18863_s4 + $0x398] sm:$0xf0] }
 0x39d   :  { %v6094_v30 = vadd.f32 %v6093_v53, %v6081_v14  ;;  %v12488_v53 = vld [vmem:[%s18863_s4 + $0x20c] sm:$0xf]  ;;  %v11489_v14 = vld [vmem:[%s18863_s4 + $0x3c8] sm:$0xf]  ;;  %v11427_v0 = vld [vmem:[%s18863_s4 + $0x358] sm:$0xf0] }
 0x39e   :  { %v11490_v32 = vor.u32 %v12546_v59, %v11489_v14 }
 0x39f   :  { %7282 = vmatpush.bf16.msra.mxu0 %v11010_v36  ;;  %7295 = vmatpush.bf16.msra.mxu1 %v11138_v60  ;;  %v6106_v12 = vpop.f32.mrf.mxu0  ;;  %v6119_v56 = vpop.f32.mrf.mxu1  ;;  %v12432_v36 = vld [vmem:[%s18863_s4 + $0x4c] sm:$0xf]  ;;  %v11171_v60 = vld [vmem:[%s18863_s4 + $0x158] sm:$0xf0] }
 0x3a0   :  { %7308 = vmatpush.bf16.msra.mxu2 %v11266_v39  ;;  %v6107_v19 = vadd.f32 %v6106_v12, %v6094_v30  ;;  %v6095_v28 = vpop.f32.mrf.mxu3  ;;  %v11046_v54 = vor.u32 %v12432_v36, %v11043_v15  ;;  %v11473_v30 = vld [vmem:[%s18863_s4 + $0x3a8] sm:$0xf]  ;;  %v12542_v12 = vld [vmem:[%s18863_s4 + $0x3b4] sm:$0xf0] }
 0x3a1   :  { %v11393_v15 = vld [vmem:[%s18863_s4 + $0x308] sm:$0xf] }
 0x3a2   :  { %7283 = vmatmul.bf16.vlgmr.msra.gmra.mxu0 %v18086_v24  ;;  %7296 = vmatmul.bf16.vlgmr.msra.gmra.mxu1 %v18088_v10  ;;  %v6120_v39 = vadd.f32 %v6119_v56, %v6107_v19  ;;  %v11441_v56 = vld [vmem:[%s18863_s4 + $0x368] sm:$0xf]  ;;  %v12530_v19 = vld [vmem:[%s18863_s4 + $0x354] sm:$0xf0] }
 0x3a3   :  { %7327 = vmatpush.bf16.msrb.mxu0 %v11126_v13  ;;  %7340 = vmatpush.bf16.msrb.mxu1 %v11254_v31  ;;  %v11299_v13 = vld [vmem:[%s18863_s4 + $0x258] sm:$0xf0]  ;;  %v11426_v40 = vor.u32 %v12530_v19, %v11425_v33 }
 0x3a4   :  { %7353 = vmatpush.bf16.msrb.mxu2 %v11382_v29  ;;  %v11174_v29 = vor.u32 %v12464_v21, %v11171_v60  ;;  %v11302_v22 = vor.u32 %v12496_v62, %v11299_v13  ;;  %v12522_v21 = vld [vmem:[%s18863_s4 + $0x314] sm:$0xf0]  ;;  %v12548_v60 = vld [vmem:[%s18863_s4 + $0x3ec] sm:$0xf] }
 0x3a5   :  { %7309 = vmatmul.bf16.vlgmr.msra.gmra.mxu2 %v18090_v3  ;;  %v11394_v62 = vor.u32 %v12522_v21, %v11393_v15  ;;  %v12598_v33 = vld [vmem:[%s18866_s7 + $0x78] sm:$0xff]  ;;  %v12583_v15 = vld [vmem:[%s18866_s7] sm:$0xff] }
 0x3a6   :  { %v12595_v21 = vld [vmem:[%s18866_s7 + $0x60] sm:$0xff] }
 0x3a7   :  { %7328 = vmatpush.bf16.msrb.mxu0 %v11110_v61  ;;  %7341 = vmatpush.bf16.msrb.mxu1 %v11238_v55  ;;  %v6108_v50 = vpop.f32.mrf.mxu0  ;;  %v6121_v58 = vpop.f32.mrf.mxu1 }
 0x3a8   :  { %7354 = vmatpush.bf16.msrb.mxu2 %v11366_v25  ;;  %v6132_v31 = vpop.f32.mrf.mxu2  ;;  %v6145_v61 = vpop.f32.mrf.mxu3  ;;  %v11286_v25 = vor.u32 %v12492_v52, %v11283_v44 }
 0x3a9   :  { %v6133_v47 = vadd.f32 %v6132_v31, %v6120_v39  ;;  %v11507_v39 = vld [vmem:[%s18863_s4 + $0x3f8] sm:$0xf0]  ;;  %v12544_v31 = vld [vmem:[%s18863_s4 + $0x3cc] sm:$0xf] }
 0x3aa   :  { %v11510_v13 = vor.u32 %v12548_v60, %v11507_v39  ;;  %v12594_v60 = vld [vmem:[%s18866_s7 + $0x58] sm:$0xff] }
 0x3ab   :  { %7329 = vmatpush.bf16.msrb.mxu0 %v11094_v7  ;;  %7342 = vmatpush.bf16.msrb.mxu1 %v11222_v35  ;;  %v6146_v55 = vadd.f32 %v6145_v61, %v6133_v47  ;;  %v11270_v7 = vor.u32 %v12488_v53, %v11267_v17  ;;  %v11505_v35 = vld [vmem:[%s18863_s4 + $0x3e8] sm:$0xf]  ;;  %v11491_v47 = vld [vmem:[%s18863_s4 + $0x3d8] sm:$0xf0]  ;;  %v12532_v61 = vld [vmem:[%s18863_s4 + $0x36c] sm:$0xf]  ;;  %v11430_v53 = vor.u32 %v12528_v6, %v11427_v0 }
 0x3ac   :  { %7355 = vmatpush.bf16.msrb.mxu2 %v11350_v8  ;;  %v11506_v46 = vor.u32 %v12550_v11, %v11505_v35  ;;  %v11494_v50 = vor.u32 %v12544_v31, %v11491_v47  ;;  %v12524_v17 = vld [vmem:[%s18863_s4 + $0x32c] sm:$0xf]  ;;  %v11395_v11 = vld [vmem:[%s18863_s4 + $0x318] sm:$0xf0] }
 0x3ad   :  { %12623 = vtanh.f32 %v6146_v55  ;;  %v11443_v55 = vld [vmem:[%s18863_s4 + $0x378] sm:$0xf0]  ;;  %v12520_v35 = vld [vmem:[%s18863_s4 + $0x30c] sm:$0xf] }
 0x3ae   :  { %v12606_v39 = vld [vmem:[%s18866_s7 + $0xb8] sm:$0xff]  ;;  %v12592_v31 = vld [vmem:[%s18866_s7 + $0x48] sm:$0xff] }
 0x3af   :  { %7330 = vmatpush.bf16.msrb.mxu0 %v11078_v2  ;;  %7343 = vmatpush.bf16.msrb.mxu1 %v11206_v43  ;;  %v11474_v2 = vor.u32 %v12542_v12, %v11473_v30  ;;  %v12604_v47 = vld [vmem:[%s18866_s7 + $0xa8] sm:$0xff]  ;;  %v12614_v0 = vld [vmem:[%s18866_s7 + $0xf8] sm:$0xff] }
 0x3b0   :  { %7356 = vmatpush.bf16.msrb.mxu2 %v11334_v26  ;;  %v6134_v16 = vpop.f32.mrf.mxu2  ;;  %v6147_v8 = vpop.f32.mrf.mxu3  ;;  %v12534_v26 = vld [vmem:[%s18863_s4 + $0x374] sm:$0xf0] }
 0x3b1   :  { %v11442_v45 = vor.u32 %v12534_v26, %v11441_v56  ;;  %v11411_v16 = vld [vmem:[%s18863_s4 + $0x338] sm:$0xf0]  ;;  %v11398_v8 = vor.u32 %v12520_v35, %v11395_v11 }
 0x3b3   :  { %7331 = vmatpush.bf16.msrb.mxu0 %v11062_v23  ;;  %7344 = vmatpush.bf16.msrb.mxu1 %v11190_v5  ;;  %v12624_v63 = vpop.eup %12623  ;;  %v11409_v23 = vld [vmem:[%s18863_s4 + $0x328] sm:$0xf]  ;;  %v12526_v5 = vld [vmem:[%s18863_s4 + $0x334] sm:$0xf0] }
 0x3b4   :  { %7357 = vmatpush.bf16.msrb.mxu2 %v11318_v34  ;;  %v18619_v9 = vpack.c.bf16 %v12624_v63, %v12624_v63  ;;  %v11410_v36 = vor.u32 %v12526_v5, %v11409_v23  ;;  %v12584_v5 = vld [vmem:[%s18866_s7 + $0x8] sm:$0xff] }
 0x3b6   :  { %7218 = vmatmul.bf16.vlgmr.msra.gmra.mxu3 %v18619_v9 }
 0x3b7   :  { %7332 = vmatpush.bf16.msrb.mxu0 %v11046_v54  ;;  %7345 = vmatpush.bf16.msrb.mxu1 %v11174_v29  ;;  %v12540_v54 = vld [vmem:[%s18863_s4 + $0x3ac] sm:$0xf]  ;;  %v11475_v29 = vld [vmem:[%s18863_s4 + $0x3b8] sm:$0xf0] }
 0x3b8   :  { %7358 = vmatpush.bf16.msrb.mxu2 %v11302_v22  ;;  %7314 = vmatpush.bf16.msra.mxu3 %v11506_v46  ;;  %v11478_v41 = vor.u32 %v12540_v54, %v11475_v29  ;;  %v12536_v22 = vld [vmem:[%s18863_s4 + $0x38c] sm:$0xf]  ;;  %v12591_v29 = vld [vmem:[%s18866_s7 + $0x40] sm:$0xff] }
 0x3b9   :  { %v11462_v44 = vor.u32 %v12536_v22, %v11459_v48  ;;  %v12602_v22 = vld [vmem:[%s18866_s7 + $0x98] sm:$0xff] }
 0x3bb   :  { %7333 = vmatpush.bf16.msrb.mxu0 %v11030_v18  ;;  %7346 = vmatpush.bf16.msrb.mxu1 %v11158_v38  ;;  %v11446_v38 = vor.u32 %v12532_v61, %v11443_v55  ;;  %v12601_v55 = vld [vmem:[%s18866_s7 + $0x90] sm:$0xff] }
 0x3bc   :  { %7359 = vmatpush.bf16.msrb.mxu2 %v11286_v25  ;;  %7315 = vmatpush.bf16.msra.mxu3 %v11490_v32 }
 0x3bf   :  { %7334 = vmatpush.bf16.msrb.mxu0 %v11014_v27  ;;  %7347 = vmatpush.bf16.msrb.mxu1 %v11142_v4  ;;  %v18643_v43 = vpop.f32.mrf.mxu1 }
 0x3c0   :  { %7360 = vmatpush.bf16.msrb.mxu2 %v11270_v7  ;;  %7316 = vmatpush.bf16.msra.mxu3 %v11474_v2  ;;  %v11414_v7 = vor.u32 %v12524_v17, %v11411_v16  ;;  %v12613_v17 = vld [vmem:[%s18866_s7 + $0xf0] sm:$0xff] }
 0x3c2   :  { %7335 = vmatmul.bf16.vlgmr.msrb.gmra.mxu0 %v18086_v24  ;;  %7348 = vmatmul.bf16.vlgmr.msrb.gmra.mxu1 %v18088_v10  ;;  %v11457_v24 = vld [vmem:[%s18863_s4 + $0x388] sm:$0xf]  ;;  %v12538_v10 = vld [vmem:[%s18863_s4 + $0x394] sm:$0xf0] }
 0x3c3   :  { %7361 = vmatmul.bf16.vlgmr.msrb.gmra.mxu2 %v18090_v3  ;;  %v6488_v3 = vpop.f32.mrf.mxu0  ;;  %v11458_v37 = vor.u32 %v12538_v10, %v11457_v24  ;;  %v12590_v10 = vld [vmem:[%s18866_s7 + $0x38] sm:$0xff]  ;;  %7674 = vmatpush.bf16.msra.mxu1 %v12598_v33 }
 0x3c4   :  { %7661 = vmatpush.bf16.msra.mxu0 %v12590_v10  ;;  %7687 = vmatpush.bf16.msra.mxu2 %v12606_v39 }
 0x3c5   :  { %7317 = vmatpush.bf16.msra.mxu3 %v11458_v37  ;;  %v12587_v37 = vld [vmem:[%s18866_s7 + $0x20] sm:$0xff] }
 0x3c6   :  { %7270 = vmatmul.bf16.vlgmr.msrb.gmra.mxu3 %v18619_v9 }
 0x3c7   :  { %v6503_v20 = vpop.f32.mrf.mxu1 }
 0x3c8   :  { %v18651_v49 = vpop.f32.mrf.mxu2  ;;  %v12597_v20 = vld [vmem:[%s18866_s7 + $0x70] sm:$0xff] }
 0x3c9   :  { %7318 = vmatpush.bf16.msra.mxu3 %v11442_v45  ;;  %v12586_v45 = vld [vmem:[%s18866_s7 + $0x18] sm:$0xff]  ;;  %7675 = vmatpush.bf16.msra.mxu1 %v12597_v20 }
 0x3cb   :  { %v6490_v28 = vpop.f32.mrf.mxu0 }
 0x3cc   :  { %v12585_v28 = vld [vmem:[%s18866_s7 + $0x10] sm:$0xff] }
 0x3cd   :  { %7319 = vmatpush.bf16.msra.mxu3 %v11426_v40 }
 0x3d0   :  { %v6516_v34 = vpop.f32.mrf.mxu2 }
 0x3d1   :  { %7320 = vmatpush.bf16.msra.mxu3 %v11410_v36  ;;  %v12596_v36 = vld [vmem:[%s18866_s7 + $0x68] sm:$0xff] }
 0x3d2   :  { %7676 = vmatpush.bf16.msra.mxu1 %v12596_v36 }
 0x3d5   :  { %7321 = vmatpush.bf16.msra.mxu3 %v11394_v62  ;;  %v12593_v62 = vld [vmem:[%s18866_s7 + $0x50] sm:$0xff] }
 0x3d6   :  { %7677 = vmatpush.bf16.msra.mxu1 %v12595_v21 }
 0x3d8   :  { %7322 = vmatmul.bf16.vlgmr.msra.gmra.mxu3 %v18619_v9 }
 0x3d9   :  { %7366 = vmatpush.bf16.msrb.mxu3 %v11510_v13  ;;  %v12605_v13 = vld [vmem:[%s18866_s7 + $0xb0] sm:$0xff] }
 0x3da   :  { %7678 = vmatpush.bf16.msra.mxu1 %v12594_v60  ;;  %7688 = vmatpush.bf16.msra.mxu2 %v12605_v13 }
 0x3dc   :  { %v18717_v27 = vpop.f32.mrf.mxu3 }
 0x3dd   :  { %7367 = vmatpush.bf16.msrb.mxu3 %v11494_v50 }
 0x3de   :  { %7679 = vmatpush.bf16.msra.mxu1 %v12593_v62  ;;  %7689 = vmatpush.bf16.msra.mxu2 %v12604_v47 }
 0x3df   :  { %v7180_v58 = vpop.f32.mrf.mxu0  ;;  %v7193_v42 = vpop.f32.mrf.mxu1 }
 0x3e0   :  { %v7181_v51 = vadd.f32 %v7180_v58, %v6488_v3  ;;  %v12589_v3 = vld [vmem:[%s18866_s7 + $0x30] sm:$0xff]  ;;  %v18802_v58 = vld [vmem:[%s18865_s6] sm:$0xf] }
 0x3e1   :  { %7368 = vmatpush.bf16.msrb.mxu3 %v11478_v41  ;;  %7662 = vmatpush.bf16.msra.mxu0 %v12589_v3  ;;  %v12603_v41 = vld [vmem:[%s18866_s7 + $0xa0] sm:$0xff]  ;;  %v7381_v48 = vperm.slane %v18802_v58, 0  ;;  %v7382_v16 = vperm.slane %v18802_v58, 1 }
 0x3e2   :  { %v7194_v52 = vadd.f32 %v7193_v42, %v7181_v51  ;;  %7680 = vmatpush.bf16.msra.mxu1 %v12592_v31  ;;  %7690 = vmatpush.bf16.msra.mxu2 %v12603_v41 }
 0x3e4   :  { %v6529_v63 = vpop.f32.mrf.mxu3 }
 0x3e5   :  { %7369 = vmatpush.bf16.msrb.mxu3 %v11462_v44 }
 0x3e6   :  { %7681 = vmatpush.bf16.msra.mxu1 %v12591_v29  ;;  %7691 = vmatpush.bf16.msra.mxu2 %v12602_v22 }
 0x3e7   :  { %v7182_v25 = vpop.f32.mrf.mxu0  ;;  %v7195_v1 = vpop.f32.mrf.mxu1 }
 0x3e8   :  { %v7206_v18 = vpop.f32.mrf.mxu2 }
 0x3e9   :  { %v18703_v57 = vadd.f32 %v7206_v18, %v7194_v52  ;;  %7370 = vmatpush.bf16.msrb.mxu3 %v11446_v38  ;;  %v12600_v38 = vld [vmem:[%s18866_s7 + $0x88] sm:$0xff] }
 0x3ea   :  { %7692 = vmatpush.bf16.msra.mxu2 %v12601_v55 }
 0x3ed   :  { %7371 = vmatpush.bf16.msrb.mxu3 %v11430_v53 }
 0x3ee   :  { %7693 = vmatpush.bf16.msra.mxu2 %v12600_v38 }
 0x3f0   :  { %v7208_v4 = vpop.f32.mrf.mxu2 }
 0x3f1   :  { %7372 = vmatpush.bf16.msrb.mxu3 %v11414_v7  ;;  %v12612_v7 = vld [vmem:[%s18866_s7 + $0xe8] sm:$0xff] }
 0x3f5   :  { %7373 = vmatpush.bf16.msrb.mxu3 %v11398_v8  ;;  %v12611_v8 = vld [vmem:[%s18866_s7 + $0xe0] sm:$0xff] }
 0x3f8   :  { %7374 = vmatmul.bf16.vlgmr.msrb.gmra.mxu3 %v18619_v9 }
 0x3f9   :  { %7700 = vmatpush.bf16.msra.mxu3 %v12614_v0 }
 0x3fd   :  { %7701 = vmatpush.bf16.msra.mxu3 %v12613_v17 }
 0x3ff   :  { %v7232_v46 = vpop.f32.mrf.mxu0  ;;  %v7245_v14 = vpop.f32.mrf.mxu1 }
 0x400   :  { %v7233_v59 = vadd.f32 %v7232_v46, %v18643_v43  ;;  %v12588_v43 = vld [vmem:[%s18866_s7 + $0x28] sm:$0xff]  ;;  %v12610_v46 = vld [vmem:[%s18866_s7 + $0xd8] sm:$0xff] }
 0x401   :  { %7663 = vmatpush.bf16.msra.mxu0 %v12588_v43  ;;  %7702 = vmatpush.bf16.msra.mxu3 %v12612_v7  ;;  %v12607_v43 = vld [vmem:[%s18866_s7 + $0xc0] sm:$0xff] }
 0x402   :  { %v7246_v32 = vadd.f32 %v7245_v14, %v7233_v59 }
 0x405   :  { %7664 = vmatpush.bf16.msra.mxu0 %v12587_v37  ;;  %7703 = vmatpush.bf16.msra.mxu3 %v12611_v8 }
 0x407   :  { %v7234_v2 = vpop.f32.mrf.mxu0  ;;  %v7247_v24 = vpop.f32.mrf.mxu1 }
 0x408   :  { %v7258_v30 = vpop.f32.mrf.mxu2  ;;  %v7383_v24 = vperm.slane %v18802_v58, 2 }
 0x409   :  { %v18727_v12 = vadd.f32 %v7258_v30, %v7246_v32  ;;  %7665 = vmatpush.bf16.msra.mxu0 %v12586_v45  ;;  %7704 = vmatpush.bf16.msra.mxu3 %v12610_v46 }
 0x40d   :  { %7666 = vmatpush.bf16.msra.mxu0 %v12585_v28  ;;  %v7384_v28 = vperm.slane %v18802_v58, 3 }
 0x410   :  { %v7260_v9 = vpop.f32.mrf.mxu2 }
 0x411   :  { %7667 = vmatpush.bf16.msra.mxu0 %v12584_v5 }
 0x415   :  { %7668 = vmatpush.bf16.msra.mxu0 %v12583_v15 }
 0x41f   :  { %v18741_v56 = vpop.f32.mrf.mxu0  ;;  %v18743_v26 = vpop.f32.mrf.mxu1 }
 0x420   :  { %v7285_v14 = vadd.f32 %v18741_v56, %v18651_v49  ;;  %v12608_v49 = vld [vmem:[%s18866_s7 + $0xc8] sm:$0xff] }
 0x422   :  { %v7298_v30 = vadd.f32 %v18743_v26, %v7285_v14 }
 0x427   :  { %v7286_v40 = vpop.f32.mrf.mxu0  ;;  %v7299_v23 = vpop.f32.mrf.mxu1 }
 0x428   :  { %v18751_v19 = vpop.f32.mrf.mxu2 }
 0x429   :  { %v7311_v2 = vadd.f32 %v18751_v19, %v7298_v30 }
 0x430   :  { %v7312_v34 = vpop.f32.mrf.mxu2 }
 0x439   :  { %v7219_v42 = vpop.f32.mrf.mxu3 }
 0x43a   :  { %v7220_v52 = vadd.f32 %v7219_v42, %v18703_v57  ;;  %v12599_v57 = vld [vmem:[%s18866_s7 + $0x80] sm:$0xff] }
 0x43b   :  { %7694 = vmatpush.bf16.msra.mxu2 %v12599_v57 }
 0x43c   :  { %v7389_v18 = vadd.f32 %v7381_v48, %v7220_v52 }
 0x43e   :  { %12625 = vtanh.f32 %v7389_v18 }
 0x43f   :  { %v18789_v50 = vpop.f32.mrf.mxu0  ;;  %v18791_v54 = vpop.f32.mrf.mxu1 }
 0x440   :  { %v7337_v45 = vadd.f32 %v18789_v50, %v18717_v27  ;;  %v12616_v27 = vld [vmem:[%s18867_s8] ss:$0 sm:$0xff] }
 0x441   :  { %v7221_v6 = vpop.f32.mrf.mxu3 }
 0x442   :  { %v7350_v33 = vadd.f32 %v18791_v54, %v7337_v45 }
 0x444   :  { %v12626_v1 = vpop.eup %12625 }
 0x445   :  { %v7397_v53 = vpack.c.bf16 %v12626_v1, %v12626_v1 }
 0x446   :  { %v7362_v51 = vpop.f32.mrf.mxu2 }
 0x447   :  { %v7338_v44 = vpop.f32.mrf.mxu0  ;;  %v7351_v61 = vpop.f32.mrf.mxu1  ;;  %7669 = vmatmul.bf16.vlgmr.msra.gmra.mxu0 %v7397_v53  ;;  %v7363_v19 = vadd.f32 %v7362_v51, %v7350_v33 }
 0x449   :  { %v7271_v4 = vpop.f32.mrf.mxu3 }
 0x44a   :  { %v7272_v35 = vadd.f32 %v7271_v4, %v18727_v12  ;;  %v12609_v12 = vld [vmem:[%s18866_s7 + $0xd0] sm:$0xff] }
 0x44b   :  { %7705 = vmatpush.bf16.msra.mxu3 %v12609_v12 }
 0x44c   :  { %v7390_v11 = vadd.f32 %v7382_v16, %v7272_v35 }
 0x44e   :  { %v7364_v25 = vpop.f32.mrf.mxu2  ;;  %12627 = vtanh.f32 %v7390_v11 }
 0x44f   :  { %7706 = vmatpush.bf16.msra.mxu3 %v12608_v49 }
 0x451   :  { %v7273_v63 = vpop.f32.mrf.mxu3 }
 0x453   :  { %7707 = vmatpush.bf16.msra.mxu3 %v12607_v43 }
 0x454   :  { %v12628_v59 = vpop.eup %12627 }
 0x455   :  { %v7398_v32 = vpack.c.bf16 %v12628_v59, %v12628_v59 }
 0x457   :  { %7682 = vmatmul.bf16.vlgmr.msra.gmra.mxu1 %v7398_v32 }
 0x45b   :  { %v7323_v10 = vpop.f32.mrf.mxu3 }
 0x45c   :  { %v7324_v3 = vadd.f32 %v7323_v10, %v7311_v2 }
 0x45e   :  { %v7391_v9 = vadd.f32 %v7383_v24, %v7324_v3 }
 0x460   :  { %12629 = vtanh.f32 %v7391_v9 }
 0x463   :  { %v7325_v37 = vpop.f32.mrf.mxu3 }
 0x466   :  { %v12630_v56 = vpop.eup %12629 }
 0x467   :  { %v7399_v26 = vpack.c.bf16 %v12630_v56, %v12630_v56 }
 0x469   :  { %7695 = vmatmul.bf16.vlgmr.msra.gmra.mxu2 %v7399_v26 }
 0x47b   :  { %v7375_v20 = vpop.f32.mrf.mxu3 }
 0x47c   :  { %v7376_v40 = vadd.f32 %v7375_v20, %v7363_v19 }
 0x47e   :  { %v7392_v23 = vadd.f32 %v7384_v28, %v7376_v40 }
 0x480   :  { %12631 = vtanh.f32 %v7392_v23 }
 0x483   :  { %v7377_v5 = vpop.f32.mrf.mxu3 }
 0x486   :  { %v12632_v36 = vpop.eup %12631 }
 0x487   :  { %v7400_v34 = vpack.c.bf16 %v12632_v36, %v12632_v36 }
 0x489   :  { %7708 = vmatmul.bf16.vlgmr.msra.gmra.mxu3 %v7400_v34 }
 0x4c4   :  { %v7670_v15 = vpop.f32.mrf.mxu0 }
 0x4c5   :  { %v7671_v31 = vadd.f32 %v12616_v27, %v7670_v15 }
 0x4cc   :  { %v7672_v21 = vpop.f32.mrf.mxu0 }
 0x4d4   :  { %v7683_v60 = vpop.f32.mrf.mxu1 }
 0x4d5   :  { %v7684_v47 = vadd.f32 %v7683_v60, %v7671_v31 }
 0x4dc   :  { %v7685_v39 = vpop.f32.mrf.mxu1 }
 0x4ec   :  { %v7696_v62 = vpop.f32.mrf.mxu2 }
 0x4ed   :  { %v7697_v50 = vadd.f32 %v7696_v62, %v7684_v47 }
 0x4f4   :  { %v7698_v13 = vpop.f32.mrf.mxu2 }
 0x50c   :  { %v7709_v54 = vpop.f32.mrf.mxu3 }
 0x50d   :  { %v7710_v29 = vadd.f32 %v7709_v54, %v7697_v50 }
 0x50f   :  { %12633 = vtanh.f32 %v7710_v29 }
 0x514   :  { %v7711_v41 = vpop.f32.mrf.mxu3 }
 0x515   :  { %v12634_v58 = vpop.eup %12633 }
 0x516   :  { %7714 = vst [vmem:[#allocation2] sm:$0x3] %v12634_v58 }
 0x517   :  { %7725 = dma.vmem_to_hbm [thread:$0]  %s7721_s22, 32, %s7723_s25, [#allocation3]  }
 0x518   :  { %12662 = dma.done.wait [#allocation3], 32  }
 0x519   :  { %12663 = vsyncadd [#allocation3], 4294967264 }
 0x51a   :  { %7730 = vsyncpa [#allocation3], 1 }

</bundles_post_ra>
